<compile_context>
chip_gen: v6e
topology: v6e:2x2x1
jax: 0.10.0
libtpu: 0.0.40
codegen_flags: <defaults>
</compile_context>

<pallas_src>
import functools
import itertools

import jax
import jax.numpy as jnp
from jax import lax
from jax.experimental import pallas as pl
from jax.experimental.pallas import tpu as pltpu


def _roll2d(d, oy, ox):
    """shifted[y, x] = d[y - oy, x - ox] with wraparound; the out-of-bounds
    border is handled by pre-masked tap weights, so no padded buffer and no
    offset-1 loads/stores are needed in the hot loop."""
    if oy:
        d = jnp.roll(d, oy, axis=0)
    if ox:
        d = jnp.roll(d, ox, axis=1)
    return d


def _cspn_fused_kernel(x_ref, w_ref, b_ref, o_ref, xpad_ref, wk_ref, d_ref, *,
                       H, W, Cin, Cout, iterations, offsets, unroll):
    """Fused affinity conv + gen_kernel + `iterations` propagation steps.

    x_ref   : (1, Cin, H, W)    f32 VMEM  input image (channel planes, W = lanes)
    w_ref   : (9*Cin*Cout,)     f32 SMEM  3x3 HWIO conv weights, flattened
    b_ref   : (Cout,)           f32 SMEM  conv bias
    o_ref   : (1, H, W)         f32 VMEM  propagated output plane
    xpad_ref: (Cin, H+2, W+2)   f32 VMEM  zero-padded input planes (conv halo)
    wk_ref  : (Cout+1, H, W)    f32 VMEM  normalized tap weights, border-masked
    d_ref   : (H, W)            f32 VMEM  propagation state (offset 0)
    """
    # ---- stage 1: 3x3 "same" conv as shifted-window scalar FMAs (VPU) --------
    xpad_ref[...] = jnp.zeros_like(xpad_ref)
    for ci in range(Cin):
        xpad_ref[ci, 1:1 + H, 1:1 + W] = x_ref[0, ci]

    aff = [jnp.full((H, W), b_ref[co], jnp.float32) for co in range(Cout)]
    for t, (ky, kx) in enumerate(itertools.product(range(3), range(3))):
        for ci in range(Cin):
            win = xpad_ref[ci, ky:ky + H, kx:kx + W]          # (H, W) window
            base = (t * Cin + ci) * Cout
            for co in range(Cout):
                aff[co] = aff[co] + w_ref[base + co] * win

    # ---- stage 2: gen_kernel (normalize; fold border masks into taps) --------
    abs_sum = jnp.abs(aff[0])
    for co in range(1, Cout):
        abs_sum = abs_sum + jnp.abs(aff[co])
    # Reference divides with no guard (NaN on an all-zero affinity pixel); only
    # the degenerate case is guarded so ordinary pixels match the reference.
    inv = 1.0 / jnp.where(abs_sum > 0.0, abs_sum, 1.0)
    an = [a * inv for a in aff]
    center = 1.0 - an[0]
    for m in range(1, Cout):
        center = center - an[m]

    row = lax.broadcasted_iota(jnp.int32, (H, W), 0)
    col = lax.broadcasted_iota(jnp.int32, (H, W), 1)
    wk_ref[0] = center                                        # offset (0, 0)
    for m, (oy, ox) in enumerate(offsets):
        valid = ((row - oy >= 0) & (row - oy < H) &
                 (col - ox >= 0) & (col - ox < W))
        wk_ref[m + 1] = jnp.where(valid, an[m], 0.0)

    # ---- stage 3: propagation; state stays resident in VMEM at offset 0 ------
    d_ref[...] = x_ref[0, 0]

    def step(_, carry):
        d = d_ref[...]
        acc = wk_ref[0] * d
        for m, (oy, ox) in enumerate(offsets):
            acc = acc + wk_ref[m + 1] * _roll2d(d, oy, ox)
        d_ref[...] = acc                                      # unmasked, offset 0
        return carry

    lax.fori_loop(0, iterations, step, 0, unroll=unroll)
    o_ref[0] = d_ref[...]


def cspn_forward(x_nchw, w_hwio, bias, kernel_size, iterations, dim=2):
    """Fused CSPN forward.  x: (N,C,H,W); w: (3,3,C,K); bias: (K,) where
    K = kernel_size**dim - 1.  Returns (N, 1, H, W) float32."""
    assert dim == 2, "only the 2-D variant is implemented"
    N, C, H, W = x_nchw.shape
    K = kernel_size ** dim - 1
    assert w_hwio.shape == (3, 3, C, K) and bias.shape == (K,)

    half = kernel_size // 2
    per_dim = [*range(half + 1), *range(-half, 0)]            # e.g. [0, 1, -1]
    offsets = tuple(itertools.product(per_dim, repeat=dim))   # offsets[0]==(0,0)
    iterations = int(iterations)

    x = x_nchw.astype(jnp.float32)
    w_flat = w_hwio.astype(jnp.float32).reshape(-1)
    b = bias.astype(jnp.float32)

    kernel = functools.partial(
        _cspn_fused_kernel, H=H, W=W, Cin=C, Cout=K,
        iterations=iterations, offsets=offsets[1:],
        unroll=min(4, max(1, iterations)))

    # Explicit VMEM budget (double-buffered I/O blocks + scratch) and cost hint.
    vmem_need = 4 * (2 * C * H * W + 2 * H * W                # in/out blocks x2
                     + C * (H + 2) * (W + 2)                  # padded conv input
                     + (K + 1) * H * W + H * W)               # tap weights+state
    flops = N * (2 * 9 * C * K * H * W                        # conv FMAs
                 + 4 * K * H * W                              # normalization
                 + iterations * (2 * (K + 1) - 1) * H * W)    # propagation
    bytes_accessed = (x.size + w_flat.size + b.size + N * H * W) * 4

    out = pl.pallas_call(
        kernel,
        out_shape=jax.ShapeDtypeStruct((N, H, W), jnp.float32),
        grid=(N,),
        in_specs=[
            pl.BlockSpec((1, C, H, W), lambda n: (n, 0, 0, 0)),
            pl.BlockSpec(memory_space=pltpu.MemorySpace.SMEM),   # conv weights
            pl.BlockSpec(memory_space=pltpu.MemorySpace.SMEM),   # conv bias
        ],
        out_specs=pl.BlockSpec((1, H, W), lambda n: (n, 0, 0)),
        scratch_shapes=[
            pltpu.VMEM((C, H + 2, W + 2), jnp.float32),
            pltpu.VMEM((K + 1, H, W), jnp.float32),
            pltpu.VMEM((H, W), jnp.float32),
        ],
        compiler_params=pltpu.CompilerParams(
            dimension_semantics=("parallel",),
            vmem_limit_bytes=int(min(max(2 * vmem_need, 8 << 20), 64 << 20)),
        ),
        cost_estimate=pl.CostEstimate(flops=int(flops), transcendentals=0,
                                      bytes_accessed=int(bytes_accessed)),
    )(x, w_flat, b)
    return out[:, None, :, :]                                  # (N, 1, H, W)


# ---------------------------------------------------------------------------
# Module-level wrappers (PyTorch-facing NCHW convention)
# ---------------------------------------------------------------------------
class Conv3x3Affinity:
    """Parameter container for the stand-in affinity net: a 3x3 "same" conv +
    bias producing kernel_size**2 - 1 affinity channels.  The conv is fused
    into the CSPN kernel — there is no standalone affinity pass / HBM tensor."""

    def __init__(self, w_hwio, bias):
        self.w = jnp.asarray(w_hwio, jnp.float32)
        self.b = jnp.asarray(bias, jnp.float32)


class CSPNPallas:
    """Pallas port of the reference CSPN module (dim=2), fully fused."""

    def __init__(self, kernel_size, iteration, affinity_net, dim=2):
        assert dim == 2, "only the 2-D variant is implemented"
        assert isinstance(affinity_net, Conv3x3Affinity), (
            "TODO(synk): arbitrary affinity_net modules are not fused")
        self.kernel_size = int(kernel_size)
        self.iteration = int(iteration)
        self.affinity_net = affinity_net
        self.dim = dim

    def __call__(self, x_nchw):
        return cspn_forward(x_nchw, self.affinity_net.w, self.affinity_net.b,
                            self.kernel_size, self.iteration, self.dim)


# ---------------------------------------------------------------------------
# Pure-JAX reference of CSPN.forward given precomputed affinities
# ---------------------------------------------------------------------------
def _cspn_ref(affinity_nchw, x_nchw, kernel_size, iteration, dim=2):
    abs_sum = jnp.sum(jnp.abs(affinity_nchw), axis=1, keepdims=True)
    a = affinity_nchw / abs_sum
    s = jnp.sum(a, axis=1, keepdims=True)
    kernel = jnp.concatenate([1.0 - s, a], axis=1)             # (N, k^2, H, W)
    half = kernel_size // 2
    per_dim = [*range(half + 1), *range(-half, 0)]
    offsets = list(itertools.product(per_dim, repeat=dim))
    N, _, H, W = x_nchw.shape
    x = x_nchw
    for _ in range(iteration):
        d0 = jnp.pad(x[:, 0], ((0, 0), (half, half), (half, half)))
        cols = [d0[:, half - oy:half - oy + H, half - ox:half - ox + W]
                for (oy, ox) in offsets]
        col = jnp.stack(cols, axis=1)                          # (N, k^2, H, W)
        x = jnp.sum(col * kernel, axis=1, keepdims=True)
    return x


if __name__ == "__main__":
    key = jax.random.PRNGKey(0)
    k_w, k_b, k_x = jax.random.split(key, 3)

    N, C, H, W = 2, 4, 16, 16
    kernel_size, iteration, dim = 3, 4, 2
    K = kernel_size ** dim - 1                                 # 8 affinity chans

    x = jax.random.normal(k_x, (N, C, H, W), jnp.float32)
    w = jax.random.normal(k_w, (3, 3, C, K), jnp.float32) * 0.3
    b = jax.random.normal(k_b, (K,), jnp.float32) * 0.1

    affinity_net = Conv3x3Affinity(w, b)
    model = CSPNPallas(kernel_size, iteration, affinity_net, dim=dim)

    out = jax.block_until_ready(model(x))
    assert out.shape == (N, 1, H, W), out.shape
    assert bool(jnp.all(jnp.isfinite(out)))

    # Reference: f32 3x3 conv + bias, then the pure-JAX port of gen_kernel /
    # im2col / iteration loop of the PyTorch module.
    aff = lax.conv_general_dilated(
        x, w, (1, 1), ((1, 1), (1, 1)),
        dimension_numbers=("NCHW", "HWIO", "NCHW"),
        precision=lax.Precision.HIGHEST) + b[None, :, None, None]
    want = _cspn_ref(aff, x, kernel_size, iteration, dim)
    assert jnp.allclose(out, want, atol=1e-3, rtol=1e-3), \
        float(jnp.max(jnp.abs(out - want)))

    print("KERNEL_OK")
</pallas_src>

<mosaic_0001>
module attributes {stable_mosaic.version = 11 : i64} {
  func.func @_cspn_fused_kernel(%arg0: i32, %arg1: memref<1x4x16x16xf32, #tpu.memory_space<vmem>>, %arg2: memref<288xf32, #tpu.memory_space<smem>>, %arg3: memref<8xf32, #tpu.memory_space<smem>>, %arg4: memref<1x16x16xf32, #tpu.memory_space<vmem>>, %arg5: memref<4x18x18xf32, #tpu.memory_space<vmem>>, %arg6: memref<9x16x16xf32, #tpu.memory_space<vmem>>, %arg7: memref<16x16xf32, #tpu.memory_space<vmem>>) attributes {dimension_semantics = [#tpu.dimension_semantics<parallel>], iteration_bounds = array<i64: 2>, scalar_prefetch = 0 : i64, scratch_operands = 3 : i64, tpu.core_type = #tpu.core_type<tc>, window_params = [{transform_indices = @transform_0, window_bounds = array<i64: 1, 4, 16, 16>}, {transform_indices = @transform_1, window_bounds = array<i64: 288>}, {transform_indices = @transform_2, window_bounds = array<i64: 8>}, {transform_indices = @transform_3, window_bounds = array<i64: 1, 16, 16>}]} {
    %cst = arith.constant 0.000000e+00 : f32
    %0 = vector.broadcast %cst : f32 to vector<4x18x18xf32>
    %c0 = arith.constant 0 : index
    %c0_0 = arith.constant 0 : index
    %c0_1 = arith.constant 0 : index
    %1 = vector.load %arg5[%c0, %c0_0, %c0_1] : memref<4x18x18xf32, #tpu.memory_space<vmem>>, vector<4x18x18xf32>
    tpu.vector_store %arg5[%c0, %c0_0, %c0_1], %0 {strides = array<i32>} : memref<4x18x18xf32, #tpu.memory_space<vmem>>, vector<4x18x18xf32>,
    %c0_2 = arith.constant 0 : index
    %c0_3 = arith.constant 0 : index
    %c0_4 = arith.constant 0 : index
    %c0_5 = arith.constant 0 : index
    %2 = vector.load %arg1[%c0_2, %c0_3, %c0_4, %c0_5] : memref<1x4x16x16xf32, #tpu.memory_space<vmem>>, vector<1x1x16x16xf32>
    %3 = vector.shape_cast %2 : vector<1x1x16x16xf32> to vector<16x16xf32>
    %c0_6 = arith.constant 0 : index
    %c1 = arith.constant 1 : index
    %c1_7 = arith.constant 1 : index
    %4 = vector.load %arg5[%c0_6, %c1, %c1_7] : memref<4x18x18xf32, #tpu.memory_space<vmem>>, vector<1x16x16xf32>
    %5 = vector.shape_cast %4 : vector<1x16x16xf32> to vector<16x16xf32>
    %6 = vector.shape_cast %3 : vector<16x16xf32> to vector<1x16x16xf32>
    tpu.vector_store %arg5[%c0_6, %c1, %c1_7], %6 {strides = array<i32>} : memref<4x18x18xf32, #tpu.memory_space<vmem>>, vector<1x16x16xf32>,
    %c0_8 = arith.constant 0 : index
    %c1_9 = arith.constant 1 : index
    %c0_10 = arith.constant 0 : index
    %c0_11 = arith.constant 0 : index
    %7 = vector.load %arg1[%c0_8, %c1_9, %c0_10, %c0_11] : memref<1x4x16x16xf32, #tpu.memory_space<vmem>>, vector<1x1x16x16xf32>
    %8 = vector.shape_cast %7 : vector<1x1x16x16xf32> to vector<16x16xf32>
    %c1_12 = arith.constant 1 : index
    %c1_13 = arith.constant 1 : index
    %c1_14 = arith.constant 1 : index
    %9 = vector.load %arg5[%c1_12, %c1_13, %c1_14] : memref<4x18x18xf32, #tpu.memory_space<vmem>>, vector<1x16x16xf32>
    %10 = vector.shape_cast %9 : vector<1x16x16xf32> to vector<16x16xf32>
    %11 = vector.shape_cast %8 : vector<16x16xf32> to vector<1x16x16xf32>
    tpu.vector_store %arg5[%c1_12, %c1_13, %c1_14], %11 {strides = array<i32>} : memref<4x18x18xf32, #tpu.memory_space<vmem>>, vector<1x16x16xf32>,
    %c0_15 = arith.constant 0 : index
    %c2 = arith.constant 2 : index
    %c0_16 = arith.constant 0 : index
    %c0_17 = arith.constant 0 : index
    %12 = vector.load %arg1[%c0_15, %c2, %c0_16, %c0_17] : memref<1x4x16x16xf32, #tpu.memory_space<vmem>>, vector<1x1x16x16xf32>
    %13 = vector.shape_cast %12 : vector<1x1x16x16xf32> to vector<16x16xf32>
    %c2_18 = arith.constant 2 : index
    %c1_19 = arith.constant 1 : index
    %c1_20 = arith.constant 1 : index
    %14 = vector.load %arg5[%c2_18, %c1_19, %c1_20] : memref<4x18x18xf32, #tpu.memory_space<vmem>>, vector<1x16x16xf32>
    %15 = vector.shape_cast %14 : vector<1x16x16xf32> to vector<16x16xf32>
    %16 = vector.shape_cast %13 : vector<16x16xf32> to vector<1x16x16xf32>
    tpu.vector_store %arg5[%c2_18, %c1_19, %c1_20], %16 {strides = array<i32>} : memref<4x18x18xf32, #tpu.memory_space<vmem>>, vector<1x16x16xf32>,
    %c0_21 = arith.constant 0 : index
    %c3 = arith.constant 3 : index
    %c0_22 = arith.constant 0 : index
    %c0_23 = arith.constant 0 : index
    %17 = vector.load %arg1[%c0_21, %c3, %c0_22, %c0_23] : memref<1x4x16x16xf32, #tpu.memory_space<vmem>>, vector<1x1x16x16xf32>
    %18 = vector.shape_cast %17 : vector<1x1x16x16xf32> to vector<16x16xf32>
    %c3_24 = arith.constant 3 : index
    %c1_25 = arith.constant 1 : index
    %c1_26 = arith.constant 1 : index
    %19 = vector.load %arg5[%c3_24, %c1_25, %c1_26] : memref<4x18x18xf32, #tpu.memory_space<vmem>>, vector<1x16x16xf32>
    %20 = vector.shape_cast %19 : vector<1x16x16xf32> to vector<16x16xf32>
    %21 = vector.shape_cast %18 : vector<16x16xf32> to vector<1x16x16xf32>
    tpu.vector_store %arg5[%c3_24, %c1_25, %c1_26], %21 {strides = array<i32>} : memref<4x18x18xf32, #tpu.memory_space<vmem>>, vector<1x16x16xf32>,
    %c0_27 = arith.constant 0 : index
    %22 = memref.load %arg3[%c0_27] : memref<8xf32, #tpu.memory_space<smem>>
    %23 = vector.broadcast %22 : f32 to vector<16x16xf32>
    %c1_28 = arith.constant 1 : index
    %24 = memref.load %arg3[%c1_28] : memref<8xf32, #tpu.memory_space<smem>>
    %25 = vector.broadcast %24 : f32 to vector<16x16xf32>
    %c2_29 = arith.constant 2 : index
    %26 = memref.load %arg3[%c2_29] : memref<8xf32, #tpu.memory_space<smem>>
    %27 = vector.broadcast %26 : f32 to vector<16x16xf32>
    %c3_30 = arith.constant 3 : index
    %28 = memref.load %arg3[%c3_30] : memref<8xf32, #tpu.memory_space<smem>>
    %29 = vector.broadcast %28 : f32 to vector<16x16xf32>
    %c4 = arith.constant 4 : index
    %30 = memref.load %arg3[%c4] : memref<8xf32, #tpu.memory_space<smem>>
    %31 = vector.broadcast %30 : f32 to vector<16x16xf32>
    %c5 = arith.constant 5 : index
    %32 = memref.load %arg3[%c5] : memref<8xf32, #tpu.memory_space<smem>>
    %33 = vector.broadcast %32 : f32 to vector<16x16xf32>
    %c6 = arith.constant 6 : index
    %34 = memref.load %arg3[%c6] : memref<8xf32, #tpu.memory_space<smem>>
    %35 = vector.broadcast %34 : f32 to vector<16x16xf32>
    %c7 = arith.constant 7 : index
    %36 = memref.load %arg3[%c7] : memref<8xf32, #tpu.memory_space<smem>>
    %37 = vector.broadcast %36 : f32 to vector<16x16xf32>
    %c0_31 = arith.constant 0 : index
    %c0_32 = arith.constant 0 : index
    %c0_33 = arith.constant 0 : index
    %38 = vector.load %arg5[%c0_31, %c0_32, %c0_33] : memref<4x18x18xf32, #tpu.memory_space<vmem>>, vector<1x16x16xf32>
    %39 = vector.shape_cast %38 : vector<1x16x16xf32> to vector<16x16xf32>
    %c0_34 = arith.constant 0 : index
    %40 = memref.load %arg2[%c0_34] : memref<288xf32, #tpu.memory_space<smem>>
    %41 = vector.broadcast %40 : f32 to vector<16x16xf32>
    %42 = arith.mulf %41, %39 : vector<16x16xf32>
    %43 = arith.addf %23, %42 : vector<16x16xf32>
    %c1_35 = arith.constant 1 : index
    %44 = memref.load %arg2[%c1_35] : memref<288xf32, #tpu.memory_space<smem>>
    %45 = vector.broadcast %44 : f32 to vector<16x16xf32>
    %46 = arith.mulf %45, %39 : vector<16x16xf32>
    %47 = arith.addf %25, %46 : vector<16x16xf32>
    %c2_36 = arith.constant 2 : index
    %48 = memref.load %arg2[%c2_36] : memref<288xf32, #tpu.memory_space<smem>>
    %49 = vector.broadcast %48 : f32 to vector<16x16xf32>
    %50 = arith.mulf %49, %39 : vector<16x16xf32>
    %51 = arith.addf %27, %50 : vector<16x16xf32>
    %c3_37 = arith.constant 3 : index
    %52 = memref.load %arg2[%c3_37] : memref<288xf32, #tpu.memory_space<smem>>
    %53 = vector.broadcast %52 : f32 to vector<16x16xf32>
    %54 = arith.mulf %53, %39 : vector<16x16xf32>
    %55 = arith.addf %29, %54 : vector<16x16xf32>
    %c4_38 = arith.constant 4 : index
    %56 = memref.load %arg2[%c4_38] : memref<288xf32, #tpu.memory_space<smem>>
    %57 = vector.broadcast %56 : f32 to vector<16x16xf32>
    %58 = arith.mulf %57, %39 : vector<16x16xf32>
    %59 = arith.addf %31, %58 : vector<16x16xf32>
    %c5_39 = arith.constant 5 : index
    %60 = memref.load %arg2[%c5_39] : memref<288xf32, #tpu.memory_space<smem>>
    %61 = vector.broadcast %60 : f32 to vector<16x16xf32>
    %62 = arith.mulf %61, %39 : vector<16x16xf32>
    %63 = arith.addf %33, %62 : vector<16x16xf32>
    %c6_40 = arith.constant 6 : index
    %64 = memref.load %arg2[%c6_40] : memref<288xf32, #tpu.memory_space<smem>>
    %65 = vector.broadcast %64 : f32 to vector<16x16xf32>
    %66 = arith.mulf %65, %39 : vector<16x16xf32>
    %67 = arith.addf %35, %66 : vector<16x16xf32>
    %c7_41 = arith.constant 7 : index
    %68 = memref.load %arg2[%c7_41] : memref<288xf32, #tpu.memory_space<smem>>
    %69 = vector.broadcast %68 : f32 to vector<16x16xf32>
    %70 = arith.mulf %69, %39 : vector<16x16xf32>
    %71 = arith.addf %37, %70 : vector<16x16xf32>
    %c1_42 = arith.constant 1 : index
    %c0_43 = arith.constant 0 : index
    %c0_44 = arith.constant 0 : index
    %72 = vector.load %arg5[%c1_42, %c0_43, %c0_44] : memref<4x18x18xf32, #tpu.memory_space<vmem>>, vector<1x16x16xf32>
    %73 = vector.shape_cast %72 : vector<1x16x16xf32> to vector<16x16xf32>
    %c8 = arith.constant 8 : index
    %74 = memref.load %arg2[%c8] : memref<288xf32, #tpu.memory_space<smem>>
    %75 = vector.broadcast %74 : f32 to vector<16x16xf32>
    %76 = arith.mulf %75, %73 : vector<16x16xf32>
    %77 = arith.addf %43, %76 : vector<16x16xf32>
    %c9 = arith.constant 9 : index
    %78 = memref.load %arg2[%c9] : memref<288xf32, #tpu.memory_space<smem>>
    %79 = vector.broadcast %78 : f32 to vector<16x16xf32>
    %80 = arith.mulf %79, %73 : vector<16x16xf32>
    %81 = arith.addf %47, %80 : vector<16x16xf32>
    %c10 = arith.constant 10 : index
    %82 = memref.load %arg2[%c10] : memref<288xf32, #tpu.memory_space<smem>>
    %83 = vector.broadcast %82 : f32 to vector<16x16xf32>
    %84 = arith.mulf %83, %73 : vector<16x16xf32>
    %85 = arith.addf %51, %84 : vector<16x16xf32>
    %c11 = arith.constant 11 : index
    %86 = memref.load %arg2[%c11] : memref<288xf32, #tpu.memory_space<smem>>
    %87 = vector.broadcast %86 : f32 to vector<16x16xf32>
    %88 = arith.mulf %87, %73 : vector<16x16xf32>
    %89 = arith.addf %55, %88 : vector<16x16xf32>
    %c12 = arith.constant 12 : index
    %90 = memref.load %arg2[%c12] : memref<288xf32, #tpu.memory_space<smem>>
    %91 = vector.broadcast %90 : f32 to vector<16x16xf32>
    %92 = arith.mulf %91, %73 : vector<16x16xf32>
    %93 = arith.addf %59, %92 : vector<16x16xf32>
    %c13 = arith.constant 13 : index
    %94 = memref.load %arg2[%c13] : memref<288xf32, #tpu.memory_space<smem>>
    %95 = vector.broadcast %94 : f32 to vector<16x16xf32>
    %96 = arith.mulf %95, %73 : vector<16x16xf32>
    %97 = arith.addf %63, %96 : vector<16x16xf32>
    %c14 = arith.constant 14 : index
    %98 = memref.load %arg2[%c14] : memref<288xf32, #tpu.memory_space<smem>>
    %99 = vector.broadcast %98 : f32 to vector<16x16xf32>
    %100 = arith.mulf %99, %73 : vector<16x16xf32>
    %101 = arith.addf %67, %100 : vector<16x16xf32>
    %c15 = arith.constant 15 : index
    %102 = memref.load %arg2[%c15] : memref<288xf32, #tpu.memory_space<smem>>
    %103 = vector.broadcast %102 : f32 to vector<16x16xf32>
    %104 = arith.mulf %103, %73 : vector<16x16xf32>
    %105 = arith.addf %71, %104 : vector<16x16xf32>
    %c2_45 = arith.constant 2 : index
    %c0_46 = arith.constant 0 : index
    %c0_47 = arith.constant 0 : index
    %106 = vector.load %arg5[%c2_45, %c0_46, %c0_47] : memref<4x18x18xf32, #tpu.memory_space<vmem>>, vector<1x16x16xf32>
    %107 = vector.shape_cast %106 : vector<1x16x16xf32> to vector<16x16xf32>
    %c16 = arith.constant 16 : index
    %108 = memref.load %arg2[%c16] : memref<288xf32, #tpu.memory_space<smem>>
    %109 = vector.broadcast %108 : f32 to vector<16x16xf32>
    %110 = arith.mulf %109, %107 : vector<16x16xf32>
    %111 = arith.addf %77, %110 : vector<16x16xf32>
    %c17 = arith.constant 17 : index
    %112 = memref.load %arg2[%c17] : memref<288xf32, #tpu.memory_space<smem>>
    %113 = vector.broadcast %112 : f32 to vector<16x16xf32>
    %114 = arith.mulf %113, %107 : vector<16x16xf32>
    %115 = arith.addf %81, %114 : vector<16x16xf32>
    %c18 = arith.constant 18 : index
    %116 = memref.load %arg2[%c18] : memref<288xf32, #tpu.memory_space<smem>>
    %117 = vector.broadcast %116 : f32 to vector<16x16xf32>
    %118 = arith.mulf %117, %107 : vector<16x16xf32>
    %119 = arith.addf %85, %118 : vector<16x16xf32>
    %c19 = arith.constant 19 : index
    %120 = memref.load %arg2[%c19] : memref<288xf32, #tpu.memory_space<smem>>
    %121 = vector.broadcast %120 : f32 to vector<16x16xf32>
    %122 = arith.mulf %121, %107 : vector<16x16xf32>
    %123 = arith.addf %89, %122 : vector<16x16xf32>
    %c20 = arith.constant 20 : index
    %124 = memref.load %arg2[%c20] : memref<288xf32, #tpu.memory_space<smem>>
    %125 = vector.broadcast %124 : f32 to vector<16x16xf32>
    %126 = arith.mulf %125, %107 : vector<16x16xf32>
    %127 = arith.addf %93, %126 : vector<16x16xf32>
    %c21 = arith.constant 21 : index
    %128 = memref.load %arg2[%c21] : memref<288xf32, #tpu.memory_space<smem>>
    %129 = vector.broadcast %128 : f32 to vector<16x16xf32>
    %130 = arith.mulf %129, %107 : vector<16x16xf32>
    %131 = arith.addf %97, %130 : vector<16x16xf32>
    %c22 = arith.constant 22 : index
    %132 = memref.load %arg2[%c22] : memref<288xf32, #tpu.memory_space<smem>>
    %133 = vector.broadcast %132 : f32 to vector<16x16xf32>
    %134 = arith.mulf %133, %107 : vector<16x16xf32>
    %135 = arith.addf %101, %134 : vector<16x16xf32>
    %c23 = arith.constant 23 : index
    %136 = memref.load %arg2[%c23] : memref<288xf32, #tpu.memory_space<smem>>
    %137 = vector.broadcast %136 : f32 to vector<16x16xf32>
    %138 = arith.mulf %137, %107 : vector<16x16xf32>
    %139 = arith.addf %105, %138 : vector<16x16xf32>
    %c3_48 = arith.constant 3 : index
    %c0_49 = arith.constant 0 : index
    %c0_50 = arith.constant 0 : index
    %140 = vector.load %arg5[%c3_48, %c0_49, %c0_50] : memref<4x18x18xf32, #tpu.memory_space<vmem>>, vector<1x16x16xf32>
    %141 = vector.shape_cast %140 : vector<1x16x16xf32> to vector<16x16xf32>
    %c24 = arith.constant 24 : index
    %142 = memref.load %arg2[%c24] : memref<288xf32, #tpu.memory_space<smem>>
    %143 = vector.broadcast %142 : f32 to vector<16x16xf32>
    %144 = arith.mulf %143, %141 : vector<16x16xf32>
    %145 = arith.addf %111, %144 : vector<16x16xf32>
    %c25 = arith.constant 25 : index
    %146 = memref.load %arg2[%c25] : memref<288xf32, #tpu.memory_space<smem>>
    %147 = vector.broadcast %146 : f32 to vector<16x16xf32>
    %148 = arith.mulf %147, %141 : vector<16x16xf32>
    %149 = arith.addf %115, %148 : vector<16x16xf32>
    %c26 = arith.constant 26 : index
    %150 = memref.load %arg2[%c26] : memref<288xf32, #tpu.memory_space<smem>>
    %151 = vector.broadcast %150 : f32 to vector<16x16xf32>
    %152 = arith.mulf %151, %141 : vector<16x16xf32>
    %153 = arith.addf %119, %152 : vector<16x16xf32>
    %c27 = arith.constant 27 : index
    %154 = memref.load %arg2[%c27] : memref<288xf32, #tpu.memory_space<smem>>
    %155 = vector.broadcast %154 : f32 to vector<16x16xf32>
    %156 = arith.mulf %155, %141 : vector<16x16xf32>
    %157 = arith.addf %123, %156 : vector<16x16xf32>
    %c28 = arith.constant 28 : index
    %158 = memref.load %arg2[%c28] : memref<288xf32, #tpu.memory_space<smem>>
    %159 = vector.broadcast %158 : f32 to vector<16x16xf32>
    %160 = arith.mulf %159, %141 : vector<16x16xf32>
    %161 = arith.addf %127, %160 : vector<16x16xf32>
    %c29 = arith.constant 29 : index
    %162 = memref.load %arg2[%c29] : memref<288xf32, #tpu.memory_space<smem>>
    %163 = vector.broadcast %162 : f32 to vector<16x16xf32>
    %164 = arith.mulf %163, %141 : vector<16x16xf32>
    %165 = arith.addf %131, %164 : vector<16x16xf32>
    %c30 = arith.constant 30 : index
    %166 = memref.load %arg2[%c30] : memref<288xf32, #tpu.memory_space<smem>>
    %167 = vector.broadcast %166 : f32 to vector<16x16xf32>
    %168 = arith.mulf %167, %141 : vector<16x16xf32>
    %169 = arith.addf %135, %168 : vector<16x16xf32>
    %c31 = arith.constant 31 : index
    %170 = memref.load %arg2[%c31] : memref<288xf32, #tpu.memory_space<smem>>
    %171 = vector.broadcast %170 : f32 to vector<16x16xf32>
    %172 = arith.mulf %171, %141 : vector<16x16xf32>
    %173 = arith.addf %139, %172 : vector<16x16xf32>
    %c0_51 = arith.constant 0 : index
    %c0_52 = arith.constant 0 : index
    %c1_53 = arith.constant 1 : index
    %174 = vector.load %arg5[%c0_51, %c0_52, %c1_53] : memref<4x18x18xf32, #tpu.memory_space<vmem>>, vector<1x16x16xf32>
    %175 = vector.shape_cast %174 : vector<1x16x16xf32> to vector<16x16xf32>
    %c32 = arith.constant 32 : index
    %176 = memref.load %arg2[%c32] : memref<288xf32, #tpu.memory_space<smem>>
    %177 = vector.broadcast %176 : f32 to vector<16x16xf32>
    %178 = arith.mulf %177, %175 : vector<16x16xf32>
    %179 = arith.addf %145, %178 : vector<16x16xf32>
    %c33 = arith.constant 33 : index
    %180 = memref.load %arg2[%c33] : memref<288xf32, #tpu.memory_space<smem>>
    %181 = vector.broadcast %180 : f32 to vector<16x16xf32>
    %182 = arith.mulf %181, %175 : vector<16x16xf32>
    %183 = arith.addf %149, %182 : vector<16x16xf32>
    %c34 = arith.constant 34 : index
    %184 = memref.load %arg2[%c34] : memref<288xf32, #tpu.memory_space<smem>>
    %185 = vector.broadcast %184 : f32 to vector<16x16xf32>
    %186 = arith.mulf %185, %175 : vector<16x16xf32>
    %187 = arith.addf %153, %186 : vector<16x16xf32>
    %c35 = arith.constant 35 : index
    %188 = memref.load %arg2[%c35] : memref<288xf32, #tpu.memory_space<smem>>
    %189 = vector.broadcast %188 : f32 to vector<16x16xf32>
    %190 = arith.mulf %189, %175 : vector<16x16xf32>
    %191 = arith.addf %157, %190 : vector<16x16xf32>
    %c36 = arith.constant 36 : index
    %192 = memref.load %arg2[%c36] : memref<288xf32, #tpu.memory_space<smem>>
    %193 = vector.broadcast %192 : f32 to vector<16x16xf32>
    %194 = arith.mulf %193, %175 : vector<16x16xf32>
    %195 = arith.addf %161, %194 : vector<16x16xf32>
    %c37 = arith.constant 37 : index
    %196 = memref.load %arg2[%c37] : memref<288xf32, #tpu.memory_space<smem>>
    %197 = vector.broadcast %196 : f32 to vector<16x16xf32>
    %198 = arith.mulf %197, %175 : vector<16x16xf32>
    %199 = arith.addf %165, %198 : vector<16x16xf32>
    %c38 = arith.constant 38 : index
    %200 = memref.load %arg2[%c38] : memref<288xf32, #tpu.memory_space<smem>>
    %201 = vector.broadcast %200 : f32 to vector<16x16xf32>
    %202 = arith.mulf %201, %175 : vector<16x16xf32>
    %203 = arith.addf %169, %202 : vector<16x16xf32>
    %c39 = arith.constant 39 : index
    %204 = memref.load %arg2[%c39] : memref<288xf32, #tpu.memory_space<smem>>
    %205 = vector.broadcast %204 : f32 to vector<16x16xf32>
    %206 = arith.mulf %205, %175 : vector<16x16xf32>
    %207 = arith.addf %173, %206 : vector<16x16xf32>
    %c1_54 = arith.constant 1 : index
    %c0_55 = arith.constant 0 : index
    %c1_56 = arith.constant 1 : index
    %208 = vector.load %arg5[%c1_54, %c0_55, %c1_56] : memref<4x18x18xf32, #tpu.memory_space<vmem>>, vector<1x16x16xf32>
    %209 = vector.shape_cast %208 : vector<1x16x16xf32> to vector<16x16xf32>
    %c40 = arith.constant 40 : index
    %210 = memref.load %arg2[%c40] : memref<288xf32, #tpu.memory_space<smem>>
    %211 = vector.broadcast %210 : f32 to vector<16x16xf32>
    %212 = arith.mulf %211, %209 : vector<16x16xf32>
    %213 = arith.addf %179, %212 : vector<16x16xf32>
    %c41 = arith.constant 41 : index
    %214 = memref.load %arg2[%c41] : memref<288xf32, #tpu.memory_space<smem>>
    %215 = vector.broadcast %214 : f32 to vector<16x16xf32>
    %216 = arith.mulf %215, %209 : vector<16x16xf32>
    %217 = arith.addf %183, %216 : vector<16x16xf32>
    %c42 = arith.constant 42 : index
    %218 = memref.load %arg2[%c42] : memref<288xf32, #tpu.memory_space<smem>>
    %219 = vector.broadcast %218 : f32 to vector<16x16xf32>
    %220 = arith.mulf %219, %209 : vector<16x16xf32>
    %221 = arith.addf %187, %220 : vector<16x16xf32>
    %c43 = arith.constant 43 : index
    %222 = memref.load %arg2[%c43] : memref<288xf32, #tpu.memory_space<smem>>
    %223 = vector.broadcast %222 : f32 to vector<16x16xf32>
    %224 = arith.mulf %223, %209 : vector<16x16xf32>
    %225 = arith.addf %191, %224 : vector<16x16xf32>
    %c44 = arith.constant 44 : index
    %226 = memref.load %arg2[%c44] : memref<288xf32, #tpu.memory_space<smem>>
    %227 = vector.broadcast %226 : f32 to vector<16x16xf32>
    %228 = arith.mulf %227, %209 : vector<16x16xf32>
    %229 = arith.addf %195, %228 : vector<16x16xf32>
    %c45 = arith.constant 45 : index
    %230 = memref.load %arg2[%c45] : memref<288xf32, #tpu.memory_space<smem>>
    %231 = vector.broadcast %230 : f32 to vector<16x16xf32>
    %232 = arith.mulf %231, %209 : vector<16x16xf32>
    %233 = arith.addf %199, %232 : vector<16x16xf32>
    %c46 = arith.constant 46 : index
    %234 = memref.load %arg2[%c46] : memref<288xf32, #tpu.memory_space<smem>>
    %235 = vector.broadcast %234 : f32 to vector<16x16xf32>
    %236 = arith.mulf %235, %209 : vector<16x16xf32>
    %237 = arith.addf %203, %236 : vector<16x16xf32>
    %c47 = arith.constant 47 : index
    %238 = memref.load %arg2[%c47] : memref<288xf32, #tpu.memory_space<smem>>
    %239 = vector.broadcast %238 : f32 to vector<16x16xf32>
    %240 = arith.mulf %239, %209 : vector<16x16xf32>
    %241 = arith.addf %207, %240 : vector<16x16xf32>
    %c2_57 = arith.constant 2 : index
    %c0_58 = arith.constant 0 : index
    %c1_59 = arith.constant 1 : index
    %242 = vector.load %arg5[%c2_57, %c0_58, %c1_59] : memref<4x18x18xf32, #tpu.memory_space<vmem>>, vector<1x16x16xf32>
    %243 = vector.shape_cast %242 : vector<1x16x16xf32> to vector<16x16xf32>
    %c48 = arith.constant 48 : index
    %244 = memref.load %arg2[%c48] : memref<288xf32, #tpu.memory_space<smem>>
    %245 = vector.broadcast %244 : f32 to vector<16x16xf32>
    %246 = arith.mulf %245, %243 : vector<16x16xf32>
    %247 = arith.addf %213, %246 : vector<16x16xf32>
    %c49 = arith.constant 49 : index
    %248 = memref.load %arg2[%c49] : memref<288xf32, #tpu.memory_space<smem>>
    %249 = vector.broadcast %248 : f32 to vector<16x16xf32>
    %250 = arith.mulf %249, %243 : vector<16x16xf32>
    %251 = arith.addf %217, %250 : vector<16x16xf32>
    %c50 = arith.constant 50 : index
    %252 = memref.load %arg2[%c50] : memref<288xf32, #tpu.memory_space<smem>>
    %253 = vector.broadcast %252 : f32 to vector<16x16xf32>
    %254 = arith.mulf %253, %243 : vector<16x16xf32>
    %255 = arith.addf %221, %254 : vector<16x16xf32>
    %c51 = arith.constant 51 : index
    %256 = memref.load %arg2[%c51] : memref<288xf32, #tpu.memory_space<smem>>
    %257 = vector.broadcast %256 : f32 to vector<16x16xf32>
    %258 = arith.mulf %257, %243 : vector<16x16xf32>
    %259 = arith.addf %225, %258 : vector<16x16xf32>
    %c52 = arith.constant 52 : index
    %260 = memref.load %arg2[%c52] : memref<288xf32, #tpu.memory_space<smem>>
    %261 = vector.broadcast %260 : f32 to vector<16x16xf32>
    %262 = arith.mulf %261, %243 : vector<16x16xf32>
    %263 = arith.addf %229, %262 : vector<16x16xf32>
    %c53 = arith.constant 53 : index
    %264 = memref.load %arg2[%c53] : memref<288xf32, #tpu.memory_space<smem>>
    %265 = vector.broadcast %264 : f32 to vector<16x16xf32>
    %266 = arith.mulf %265, %243 : vector<16x16xf32>
    %267 = arith.addf %233, %266 : vector<16x16xf32>
    %c54 = arith.constant 54 : index
    %268 = memref.load %arg2[%c54] : memref<288xf32, #tpu.memory_space<smem>>
    %269 = vector.broadcast %268 : f32 to vector<16x16xf32>
    %270 = arith.mulf %269, %243 : vector<16x16xf32>
    %271 = arith.addf %237, %270 : vector<16x16xf32>
    %c55 = arith.constant 55 : index
    %272 = memref.load %arg2[%c55] : memref<288xf32, #tpu.memory_space<smem>>
    %273 = vector.broadcast %272 : f32 to vector<16x16xf32>
    %274 = arith.mulf %273, %243 : vector<16x16xf32>
    %275 = arith.addf %241, %274 : vector<16x16xf32>
    %c3_60 = arith.constant 3 : index
    %c0_61 = arith.constant 0 : index
    %c1_62 = arith.constant 1 : index
    %276 = vector.load %arg5[%c3_60, %c0_61, %c1_62] : memref<4x18x18xf32, #tpu.memory_space<vmem>>, vector<1x16x16xf32>
    %277 = vector.shape_cast %276 : vector<1x16x16xf32> to vector<16x16xf32>
    %c56 = arith.constant 56 : index
    %278 = memref.load %arg2[%c56] : memref<288xf32, #tpu.memory_space<smem>>
    %279 = vector.broadcast %278 : f32 to vector<16x16xf32>
    %280 = arith.mulf %279, %277 : vector<16x16xf32>
    %281 = arith.addf %247, %280 : vector<16x16xf32>
    %c57 = arith.constant 57 : index
    %282 = memref.load %arg2[%c57] : memref<288xf32, #tpu.memory_space<smem>>
    %283 = vector.broadcast %282 : f32 to vector<16x16xf32>
    %284 = arith.mulf %283, %277 : vector<16x16xf32>
    %285 = arith.addf %251, %284 : vector<16x16xf32>
    %c58 = arith.constant 58 : index
    %286 = memref.load %arg2[%c58] : memref<288xf32, #tpu.memory_space<smem>>
    %287 = vector.broadcast %286 : f32 to vector<16x16xf32>
    %288 = arith.mulf %287, %277 : vector<16x16xf32>
    %289 = arith.addf %255, %288 : vector<16x16xf32>
    %c59 = arith.constant 59 : index
    %290 = memref.load %arg2[%c59] : memref<288xf32, #tpu.memory_space<smem>>
    %291 = vector.broadcast %290 : f32 to vector<16x16xf32>
    %292 = arith.mulf %291, %277 : vector<16x16xf32>
    %293 = arith.addf %259, %292 : vector<16x16xf32>
    %c60 = arith.constant 60 : index
    %294 = memref.load %arg2[%c60] : memref<288xf32, #tpu.memory_space<smem>>
    %295 = vector.broadcast %294 : f32 to vector<16x16xf32>
    %296 = arith.mulf %295, %277 : vector<16x16xf32>
    %297 = arith.addf %263, %296 : vector<16x16xf32>
    %c61 = arith.constant 61 : index
    %298 = memref.load %arg2[%c61] : memref<288xf32, #tpu.memory_space<smem>>
    %299 = vector.broadcast %298 : f32 to vector<16x16xf32>
    %300 = arith.mulf %299, %277 : vector<16x16xf32>
    %301 = arith.addf %267, %300 : vector<16x16xf32>
    %c62 = arith.constant 62 : index
    %302 = memref.load %arg2[%c62] : memref<288xf32, #tpu.memory_space<smem>>
    %303 = vector.broadcast %302 : f32 to vector<16x16xf32>
    %304 = arith.mulf %303, %277 : vector<16x16xf32>
    %305 = arith.addf %271, %304 : vector<16x16xf32>
    %c63 = arith.constant 63 : index
    %306 = memref.load %arg2[%c63] : memref<288xf32, #tpu.memory_space<smem>>
    %307 = vector.broadcast %306 : f32 to vector<16x16xf32>
    %308 = arith.mulf %307, %277 : vector<16x16xf32>
    %309 = arith.addf %275, %308 : vector<16x16xf32>
    %c0_63 = arith.constant 0 : index
    %c0_64 = arith.constant 0 : index
    %c2_65 = arith.constant 2 : index
    %310 = vector.load %arg5[%c0_63, %c0_64, %c2_65] : memref<4x18x18xf32, #tpu.memory_space<vmem>>, vector<1x16x16xf32>
    %311 = vector.shape_cast %310 : vector<1x16x16xf32> to vector<16x16xf32>
    %c64 = arith.constant 64 : index
    %312 = memref.load %arg2[%c64] : memref<288xf32, #tpu.memory_space<smem>>
    %313 = vector.broadcast %312 : f32 to vector<16x16xf32>
    %314 = arith.mulf %313, %311 : vector<16x16xf32>
    %315 = arith.addf %281, %314 : vector<16x16xf32>
    %c65 = arith.constant 65 : index
    %316 = memref.load %arg2[%c65] : memref<288xf32, #tpu.memory_space<smem>>
    %317 = vector.broadcast %316 : f32 to vector<16x16xf32>
    %318 = arith.mulf %317, %311 : vector<16x16xf32>
    %319 = arith.addf %285, %318 : vector<16x16xf32>
    %c66 = arith.constant 66 : index
    %320 = memref.load %arg2[%c66] : memref<288xf32, #tpu.memory_space<smem>>
    %321 = vector.broadcast %320 : f32 to vector<16x16xf32>
    %322 = arith.mulf %321, %311 : vector<16x16xf32>
    %323 = arith.addf %289, %322 : vector<16x16xf32>
    %c67 = arith.constant 67 : index
    %324 = memref.load %arg2[%c67] : memref<288xf32, #tpu.memory_space<smem>>
    %325 = vector.broadcast %324 : f32 to vector<16x16xf32>
    %326 = arith.mulf %325, %311 : vector<16x16xf32>
    %327 = arith.addf %293, %326 : vector<16x16xf32>
    %c68 = arith.constant 68 : index
    %328 = memref.load %arg2[%c68] : memref<288xf32, #tpu.memory_space<smem>>
    %329 = vector.broadcast %328 : f32 to vector<16x16xf32>
    %330 = arith.mulf %329, %311 : vector<16x16xf32>
    %331 = arith.addf %297, %330 : vector<16x16xf32>
    %c69 = arith.constant 69 : index
    %332 = memref.load %arg2[%c69] : memref<288xf32, #tpu.memory_space<smem>>
    %333 = vector.broadcast %332 : f32 to vector<16x16xf32>
    %334 = arith.mulf %333, %311 : vector<16x16xf32>
    %335 = arith.addf %301, %334 : vector<16x16xf32>
    %c70 = arith.constant 70 : index
    %336 = memref.load %arg2[%c70] : memref<288xf32, #tpu.memory_space<smem>>
    %337 = vector.broadcast %336 : f32 to vector<16x16xf32>
    %338 = arith.mulf %337, %311 : vector<16x16xf32>
    %339 = arith.addf %305, %338 : vector<16x16xf32>
    %c71 = arith.constant 71 : index
    %340 = memref.load %arg2[%c71] : memref<288xf32, #tpu.memory_space<smem>>
    %341 = vector.broadcast %340 : f32 to vector<16x16xf32>
    %342 = arith.mulf %341, %311 : vector<16x16xf32>
    %343 = arith.addf %309, %342 : vector<16x16xf32>
    %c1_66 = arith.constant 1 : index
    %c0_67 = arith.constant 0 : index
    %c2_68 = arith.constant 2 : index
    %344 = vector.load %arg5[%c1_66, %c0_67, %c2_68] : memref<4x18x18xf32, #tpu.memory_space<vmem>>, vector<1x16x16xf32>
    %345 = vector.shape_cast %344 : vector<1x16x16xf32> to vector<16x16xf32>
    %c72 = arith.constant 72 : index
    %346 = memref.load %arg2[%c72] : memref<288xf32, #tpu.memory_space<smem>>
    %347 = vector.broadcast %346 : f32 to vector<16x16xf32>
    %348 = arith.mulf %347, %345 : vector<16x16xf32>
    %349 = arith.addf %315, %348 : vector<16x16xf32>
    %c73 = arith.constant 73 : index
    %350 = memref.load %arg2[%c73] : memref<288xf32, #tpu.memory_space<smem>>
    %351 = vector.broadcast %350 : f32 to vector<16x16xf32>
    %352 = arith.mulf %351, %345 : vector<16x16xf32>
    %353 = arith.addf %319, %352 : vector<16x16xf32>
    %c74 = arith.constant 74 : index
    %354 = memref.load %arg2[%c74] : memref<288xf32, #tpu.memory_space<smem>>
    %355 = vector.broadcast %354 : f32 to vector<16x16xf32>
    %356 = arith.mulf %355, %345 : vector<16x16xf32>
    %357 = arith.addf %323, %356 : vector<16x16xf32>
    %c75 = arith.constant 75 : index
    %358 = memref.load %arg2[%c75] : memref<288xf32, #tpu.memory_space<smem>>
    %359 = vector.broadcast %358 : f32 to vector<16x16xf32>
    %360 = arith.mulf %359, %345 : vector<16x16xf32>
    %361 = arith.addf %327, %360 : vector<16x16xf32>
    %c76 = arith.constant 76 : index
    %362 = memref.load %arg2[%c76] : memref<288xf32, #tpu.memory_space<smem>>
    %363 = vector.broadcast %362 : f32 to vector<16x16xf32>
    %364 = arith.mulf %363, %345 : vector<16x16xf32>
    %365 = arith.addf %331, %364 : vector<16x16xf32>
    %c77 = arith.constant 77 : index
    %366 = memref.load %arg2[%c77] : memref<288xf32, #tpu.memory_space<smem>>
    %367 = vector.broadcast %366 : f32 to vector<16x16xf32>
    %368 = arith.mulf %367, %345 : vector<16x16xf32>
    %369 = arith.addf %335, %368 : vector<16x16xf32>
    %c78 = arith.constant 78 : index
    %370 = memref.load %arg2[%c78] : memref<288xf32, #tpu.memory_space<smem>>
    %371 = vector.broadcast %370 : f32 to vector<16x16xf32>
    %372 = arith.mulf %371, %345 : vector<16x16xf32>
    %373 = arith.addf %339, %372 : vector<16x16xf32>
    %c79 = arith.constant 79 : index
    %374 = memref.load %arg2[%c79] : memref<288xf32, #tpu.memory_space<smem>>
    %375 = vector.broadcast %374 : f32 to vector<16x16xf32>
    %376 = arith.mulf %375, %345 : vector<16x16xf32>
    %377 = arith.addf %343, %376 : vector<16x16xf32>
    %c2_69 = arith.constant 2 : index
    %c0_70 = arith.constant 0 : index
    %c2_71 = arith.constant 2 : index
    %378 = vector.load %arg5[%c2_69, %c0_70, %c2_71] : memref<4x18x18xf32, #tpu.memory_space<vmem>>, vector<1x16x16xf32>
    %379 = vector.shape_cast %378 : vector<1x16x16xf32> to vector<16x16xf32>
    %c80 = arith.constant 80 : index
    %380 = memref.load %arg2[%c80] : memref<288xf32, #tpu.memory_space<smem>>
    %381 = vector.broadcast %380 : f32 to vector<16x16xf32>
    %382 = arith.mulf %381, %379 : vector<16x16xf32>
    %383 = arith.addf %349, %382 : vector<16x16xf32>
    %c81 = arith.constant 81 : index
    %384 = memref.load %arg2[%c81] : memref<288xf32, #tpu.memory_space<smem>>
    %385 = vector.broadcast %384 : f32 to vector<16x16xf32>
    %386 = arith.mulf %385, %379 : vector<16x16xf32>
    %387 = arith.addf %353, %386 : vector<16x16xf32>
    %c82 = arith.constant 82 : index
    %388 = memref.load %arg2[%c82] : memref<288xf32, #tpu.memory_space<smem>>
    %389 = vector.broadcast %388 : f32 to vector<16x16xf32>
    %390 = arith.mulf %389, %379 : vector<16x16xf32>
    %391 = arith.addf %357, %390 : vector<16x16xf32>
    %c83 = arith.constant 83 : index
    %392 = memref.load %arg2[%c83] : memref<288xf32, #tpu.memory_space<smem>>
    %393 = vector.broadcast %392 : f32 to vector<16x16xf32>
    %394 = arith.mulf %393, %379 : vector<16x16xf32>
    %395 = arith.addf %361, %394 : vector<16x16xf32>
    %c84 = arith.constant 84 : index
    %396 = memref.load %arg2[%c84] : memref<288xf32, #tpu.memory_space<smem>>
    %397 = vector.broadcast %396 : f32 to vector<16x16xf32>
    %398 = arith.mulf %397, %379 : vector<16x16xf32>
    %399 = arith.addf %365, %398 : vector<16x16xf32>
    %c85 = arith.constant 85 : index
    %400 = memref.load %arg2[%c85] : memref<288xf32, #tpu.memory_space<smem>>
    %401 = vector.broadcast %400 : f32 to vector<16x16xf32>
    %402 = arith.mulf %401, %379 : vector<16x16xf32>
    %403 = arith.addf %369, %402 : vector<16x16xf32>
    %c86 = arith.constant 86 : index
    %404 = memref.load %arg2[%c86] : memref<288xf32, #tpu.memory_space<smem>>
    %405 = vector.broadcast %404 : f32 to vector<16x16xf32>
    %406 = arith.mulf %405, %379 : vector<16x16xf32>
    %407 = arith.addf %373, %406 : vector<16x16xf32>
    %c87 = arith.constant 87 : index
    %408 = memref.load %arg2[%c87] : memref<288xf32, #tpu.memory_space<smem>>
    %409 = vector.broadcast %408 : f32 to vector<16x16xf32>
    %410 = arith.mulf %409, %379 : vector<16x16xf32>
    %411 = arith.addf %377, %410 : vector<16x16xf32>
    %c3_72 = arith.constant 3 : index
    %c0_73 = arith.constant 0 : index
    %c2_74 = arith.constant 2 : index
    %412 = vector.load %arg5[%c3_72, %c0_73, %c2_74] : memref<4x18x18xf32, #tpu.memory_space<vmem>>, vector<1x16x16xf32>
    %413 = vector.shape_cast %412 : vector<1x16x16xf32> to vector<16x16xf32>
    %c88 = arith.constant 88 : index
    %414 = memref.load %arg2[%c88] : memref<288xf32, #tpu.memory_space<smem>>
    %415 = vector.broadcast %414 : f32 to vector<16x16xf32>
    %416 = arith.mulf %415, %413 : vector<16x16xf32>
    %417 = arith.addf %383, %416 : vector<16x16xf32>
    %c89 = arith.constant 89 : index
    %418 = memref.load %arg2[%c89] : memref<288xf32, #tpu.memory_space<smem>>
    %419 = vector.broadcast %418 : f32 to vector<16x16xf32>
    %420 = arith.mulf %419, %413 : vector<16x16xf32>
    %421 = arith.addf %387, %420 : vector<16x16xf32>
    %c90 = arith.constant 90 : index
    %422 = memref.load %arg2[%c90] : memref<288xf32, #tpu.memory_space<smem>>
    %423 = vector.broadcast %422 : f32 to vector<16x16xf32>
    %424 = arith.mulf %423, %413 : vector<16x16xf32>
    %425 = arith.addf %391, %424 : vector<16x16xf32>
    %c91 = arith.constant 91 : index
    %426 = memref.load %arg2[%c91] : memref<288xf32, #tpu.memory_space<smem>>
    %427 = vector.broadcast %426 : f32 to vector<16x16xf32>
    %428 = arith.mulf %427, %413 : vector<16x16xf32>
    %429 = arith.addf %395, %428 : vector<16x16xf32>
    %c92 = arith.constant 92 : index
    %430 = memref.load %arg2[%c92] : memref<288xf32, #tpu.memory_space<smem>>
    %431 = vector.broadcast %430 : f32 to vector<16x16xf32>
    %432 = arith.mulf %431, %413 : vector<16x16xf32>
    %433 = arith.addf %399, %432 : vector<16x16xf32>
    %c93 = arith.constant 93 : index
    %434 = memref.load %arg2[%c93] : memref<288xf32, #tpu.memory_space<smem>>
    %435 = vector.broadcast %434 : f32 to vector<16x16xf32>
    %436 = arith.mulf %435, %413 : vector<16x16xf32>
    %437 = arith.addf %403, %436 : vector<16x16xf32>
    %c94 = arith.constant 94 : index
    %438 = memref.load %arg2[%c94] : memref<288xf32, #tpu.memory_space<smem>>
    %439 = vector.broadcast %438 : f32 to vector<16x16xf32>
    %440 = arith.mulf %439, %413 : vector<16x16xf32>
    %441 = arith.addf %407, %440 : vector<16x16xf32>
    %c95 = arith.constant 95 : index
    %442 = memref.load %arg2[%c95] : memref<288xf32, #tpu.memory_space<smem>>
    %443 = vector.broadcast %442 : f32 to vector<16x16xf32>
    %444 = arith.mulf %443, %413 : vector<16x16xf32>
    %445 = arith.addf %411, %444 : vector<16x16xf32>
    %c0_75 = arith.constant 0 : index
    %c1_76 = arith.constant 1 : index
    %c0_77 = arith.constant 0 : index
    %446 = vector.load %arg5[%c0_75, %c1_76, %c0_77] : memref<4x18x18xf32, #tpu.memory_space<vmem>>, vector<1x16x16xf32>
    %447 = vector.shape_cast %446 : vector<1x16x16xf32> to vector<16x16xf32>
    %c96 = arith.constant 96 : index
    %448 = memref.load %arg2[%c96] : memref<288xf32, #tpu.memory_space<smem>>
    %449 = vector.broadcast %448 : f32 to vector<16x16xf32>
    %450 = arith.mulf %449, %447 : vector<16x16xf32>
    %451 = arith.addf %417, %450 : vector<16x16xf32>
    %c97 = arith.constant 97 : index
    %452 = memref.load %arg2[%c97] : memref<288xf32, #tpu.memory_space<smem>>
    %453 = vector.broadcast %452 : f32 to vector<16x16xf32>
    %454 = arith.mulf %453, %447 : vector<16x16xf32>
    %455 = arith.addf %421, %454 : vector<16x16xf32>
    %c98 = arith.constant 98 : index
    %456 = memref.load %arg2[%c98] : memref<288xf32, #tpu.memory_space<smem>>
    %457 = vector.broadcast %456 : f32 to vector<16x16xf32>
    %458 = arith.mulf %457, %447 : vector<16x16xf32>
    %459 = arith.addf %425, %458 : vector<16x16xf32>
    %c99 = arith.constant 99 : index
    %460 = memref.load %arg2[%c99] : memref<288xf32, #tpu.memory_space<smem>>
    %461 = vector.broadcast %460 : f32 to vector<16x16xf32>
    %462 = arith.mulf %461, %447 : vector<16x16xf32>
    %463 = arith.addf %429, %462 : vector<16x16xf32>
    %c100 = arith.constant 100 : index
    %464 = memref.load %arg2[%c100] : memref<288xf32, #tpu.memory_space<smem>>
    %465 = vector.broadcast %464 : f32 to vector<16x16xf32>
    %466 = arith.mulf %465, %447 : vector<16x16xf32>
    %467 = arith.addf %433, %466 : vector<16x16xf32>
    %c101 = arith.constant 101 : index
    %468 = memref.load %arg2[%c101] : memref<288xf32, #tpu.memory_space<smem>>
    %469 = vector.broadcast %468 : f32 to vector<16x16xf32>
    %470 = arith.mulf %469, %447 : vector<16x16xf32>
    %471 = arith.addf %437, %470 : vector<16x16xf32>
    %c102 = arith.constant 102 : index
    %472 = memref.load %arg2[%c102] : memref<288xf32, #tpu.memory_space<smem>>
    %473 = vector.broadcast %472 : f32 to vector<16x16xf32>
    %474 = arith.mulf %473, %447 : vector<16x16xf32>
    %475 = arith.addf %441, %474 : vector<16x16xf32>
    %c103 = arith.constant 103 : index
    %476 = memref.load %arg2[%c103] : memref<288xf32, #tpu.memory_space<smem>>
    %477 = vector.broadcast %476 : f32 to vector<16x16xf32>
    %478 = arith.mulf %477, %447 : vector<16x16xf32>
    %479 = arith.addf %445, %478 : vector<16x16xf32>
    %c1_78 = arith.constant 1 : index
    %c1_79 = arith.constant 1 : index
    %c0_80 = arith.constant 0 : index
    %480 = vector.load %arg5[%c1_78, %c1_79, %c0_80] : memref<4x18x18xf32, #tpu.memory_space<vmem>>, vector<1x16x16xf32>
    %481 = vector.shape_cast %480 : vector<1x16x16xf32> to vector<16x16xf32>
    %c104 = arith.constant 104 : index
    %482 = memref.load %arg2[%c104] : memref<288xf32, #tpu.memory_space<smem>>
    %483 = vector.broadcast %482 : f32 to vector<16x16xf32>
    %484 = arith.mulf %483, %481 : vector<16x16xf32>
    %485 = arith.addf %451, %484 : vector<16x16xf32>
    %c105 = arith.constant 105 : index
    %486 = memref.load %arg2[%c105] : memref<288xf32, #tpu.memory_space<smem>>
    %487 = vector.broadcast %486 : f32 to vector<16x16xf32>
    %488 = arith.mulf %487, %481 : vector<16x16xf32>
    %489 = arith.addf %455, %488 : vector<16x16xf32>
    %c106 = arith.constant 106 : index
    %490 = memref.load %arg2[%c106] : memref<288xf32, #tpu.memory_space<smem>>
    %491 = vector.broadcast %490 : f32 to vector<16x16xf32>
    %492 = arith.mulf %491, %481 : vector<16x16xf32>
    %493 = arith.addf %459, %492 : vector<16x16xf32>
    %c107 = arith.constant 107 : index
    %494 = memref.load %arg2[%c107] : memref<288xf32, #tpu.memory_space<smem>>
    %495 = vector.broadcast %494 : f32 to vector<16x16xf32>
    %496 = arith.mulf %495, %481 : vector<16x16xf32>
    %497 = arith.addf %463, %496 : vector<16x16xf32>
    %c108 = arith.constant 108 : index
    %498 = memref.load %arg2[%c108] : memref<288xf32, #tpu.memory_space<smem>>
    %499 = vector.broadcast %498 : f32 to vector<16x16xf32>
    %500 = arith.mulf %499, %481 : vector<16x16xf32>
    %501 = arith.addf %467, %500 : vector<16x16xf32>
    %c109 = arith.constant 109 : index
    %502 = memref.load %arg2[%c109] : memref<288xf32, #tpu.memory_space<smem>>
    %503 = vector.broadcast %502 : f32 to vector<16x16xf32>
    %504 = arith.mulf %503, %481 : vector<16x16xf32>
    %505 = arith.addf %471, %504 : vector<16x16xf32>
    %c110 = arith.constant 110 : index
    %506 = memref.load %arg2[%c110] : memref<288xf32, #tpu.memory_space<smem>>
    %507 = vector.broadcast %506 : f32 to vector<16x16xf32>
    %508 = arith.mulf %507, %481 : vector<16x16xf32>
    %509 = arith.addf %475, %508 : vector<16x16xf32>
    %c111 = arith.constant 111 : index
    %510 = memref.load %arg2[%c111] : memref<288xf32, #tpu.memory_space<smem>>
    %511 = vector.broadcast %510 : f32 to vector<16x16xf32>
    %512 = arith.mulf %511, %481 : vector<16x16xf32>
    %513 = arith.addf %479, %512 : vector<16x16xf32>
    %c2_81 = arith.constant 2 : index
    %c1_82 = arith.constant 1 : index
    %c0_83 = arith.constant 0 : index
    %514 = vector.load %arg5[%c2_81, %c1_82, %c0_83] : memref<4x18x18xf32, #tpu.memory_space<vmem>>, vector<1x16x16xf32>
    %515 = vector.shape_cast %514 : vector<1x16x16xf32> to vector<16x16xf32>
    %c112 = arith.constant 112 : index
    %516 = memref.load %arg2[%c112] : memref<288xf32, #tpu.memory_space<smem>>
    %517 = vector.broadcast %516 : f32 to vector<16x16xf32>
    %518 = arith.mulf %517, %515 : vector<16x16xf32>
    %519 = arith.addf %485, %518 : vector<16x16xf32>
    %c113 = arith.constant 113 : index
    %520 = memref.load %arg2[%c113] : memref<288xf32, #tpu.memory_space<smem>>
    %521 = vector.broadcast %520 : f32 to vector<16x16xf32>
    %522 = arith.mulf %521, %515 : vector<16x16xf32>
    %523 = arith.addf %489, %522 : vector<16x16xf32>
    %c114 = arith.constant 114 : index
    %524 = memref.load %arg2[%c114] : memref<288xf32, #tpu.memory_space<smem>>
    %525 = vector.broadcast %524 : f32 to vector<16x16xf32>
    %526 = arith.mulf %525, %515 : vector<16x16xf32>
    %527 = arith.addf %493, %526 : vector<16x16xf32>
    %c115 = arith.constant 115 : index
    %528 = memref.load %arg2[%c115] : memref<288xf32, #tpu.memory_space<smem>>
    %529 = vector.broadcast %528 : f32 to vector<16x16xf32>
    %530 = arith.mulf %529, %515 : vector<16x16xf32>
    %531 = arith.addf %497, %530 : vector<16x16xf32>
    %c116 = arith.constant 116 : index
    %532 = memref.load %arg2[%c116] : memref<288xf32, #tpu.memory_space<smem>>
    %533 = vector.broadcast %532 : f32 to vector<16x16xf32>
    %534 = arith.mulf %533, %515 : vector<16x16xf32>
    %535 = arith.addf %501, %534 : vector<16x16xf32>
    %c117 = arith.constant 117 : index
    %536 = memref.load %arg2[%c117] : memref<288xf32, #tpu.memory_space<smem>>
    %537 = vector.broadcast %536 : f32 to vector<16x16xf32>
    %538 = arith.mulf %537, %515 : vector<16x16xf32>
    %539 = arith.addf %505, %538 : vector<16x16xf32>
    %c118 = arith.constant 118 : index
    %540 = memref.load %arg2[%c118] : memref<288xf32, #tpu.memory_space<smem>>
    %541 = vector.broadcast %540 : f32 to vector<16x16xf32>
    %542 = arith.mulf %541, %515 : vector<16x16xf32>
    %543 = arith.addf %509, %542 : vector<16x16xf32>
    %c119 = arith.constant 119 : index
    %544 = memref.load %arg2[%c119] : memref<288xf32, #tpu.memory_space<smem>>
    %545 = vector.broadcast %544 : f32 to vector<16x16xf32>
    %546 = arith.mulf %545, %515 : vector<16x16xf32>
    %547 = arith.addf %513, %546 : vector<16x16xf32>
    %c3_84 = arith.constant 3 : index
    %c1_85 = arith.constant 1 : index
    %c0_86 = arith.constant 0 : index
    %548 = vector.load %arg5[%c3_84, %c1_85, %c0_86] : memref<4x18x18xf32, #tpu.memory_space<vmem>>, vector<1x16x16xf32>
    %549 = vector.shape_cast %548 : vector<1x16x16xf32> to vector<16x16xf32>
    %c120 = arith.constant 120 : index
    %550 = memref.load %arg2[%c120] : memref<288xf32, #tpu.memory_space<smem>>
    %551 = vector.broadcast %550 : f32 to vector<16x16xf32>
    %552 = arith.mulf %551, %549 : vector<16x16xf32>
    %553 = arith.addf %519, %552 : vector<16x16xf32>
    %c121 = arith.constant 121 : index
    %554 = memref.load %arg2[%c121] : memref<288xf32, #tpu.memory_space<smem>>
    %555 = vector.broadcast %554 : f32 to vector<16x16xf32>
    %556 = arith.mulf %555, %549 : vector<16x16xf32>
    %557 = arith.addf %523, %556 : vector<16x16xf32>
    %c122 = arith.constant 122 : index
    %558 = memref.load %arg2[%c122] : memref<288xf32, #tpu.memory_space<smem>>
    %559 = vector.broadcast %558 : f32 to vector<16x16xf32>
    %560 = arith.mulf %559, %549 : vector<16x16xf32>
    %561 = arith.addf %527, %560 : vector<16x16xf32>
    %c123 = arith.constant 123 : index
    %562 = memref.load %arg2[%c123] : memref<288xf32, #tpu.memory_space<smem>>
    %563 = vector.broadcast %562 : f32 to vector<16x16xf32>
    %564 = arith.mulf %563, %549 : vector<16x16xf32>
    %565 = arith.addf %531, %564 : vector<16x16xf32>
    %c124 = arith.constant 124 : index
    %566 = memref.load %arg2[%c124] : memref<288xf32, #tpu.memory_space<smem>>
    %567 = vector.broadcast %566 : f32 to vector<16x16xf32>
    %568 = arith.mulf %567, %549 : vector<16x16xf32>
    %569 = arith.addf %535, %568 : vector<16x16xf32>
    %c125 = arith.constant 125 : index
    %570 = memref.load %arg2[%c125] : memref<288xf32, #tpu.memory_space<smem>>
    %571 = vector.broadcast %570 : f32 to vector<16x16xf32>
    %572 = arith.mulf %571, %549 : vector<16x16xf32>
    %573 = arith.addf %539, %572 : vector<16x16xf32>
    %c126 = arith.constant 126 : index
    %574 = memref.load %arg2[%c126] : memref<288xf32, #tpu.memory_space<smem>>
    %575 = vector.broadcast %574 : f32 to vector<16x16xf32>
    %576 = arith.mulf %575, %549 : vector<16x16xf32>
    %577 = arith.addf %543, %576 : vector<16x16xf32>
    %c127 = arith.constant 127 : index
    %578 = memref.load %arg2[%c127] : memref<288xf32, #tpu.memory_space<smem>>
    %579 = vector.broadcast %578 : f32 to vector<16x16xf32>
    %580 = arith.mulf %579, %549 : vector<16x16xf32>
    %581 = arith.addf %547, %580 : vector<16x16xf32>
    %c0_87 = arith.constant 0 : index
    %c1_88 = arith.constant 1 : index
    %c1_89 = arith.constant 1 : index
    %582 = vector.load %arg5[%c0_87, %c1_88, %c1_89] : memref<4x18x18xf32, #tpu.memory_space<vmem>>, vector<1x16x16xf32>
    %583 = vector.shape_cast %582 : vector<1x16x16xf32> to vector<16x16xf32>
    %c128 = arith.constant 128 : index
    %584 = memref.load %arg2[%c128] : memref<288xf32, #tpu.memory_space<smem>>
    %585 = vector.broadcast %584 : f32 to vector<16x16xf32>
    %586 = arith.mulf %585, %583 : vector<16x16xf32>
    %587 = arith.addf %553, %586 : vector<16x16xf32>
    %c129 = arith.constant 129 : index
    %588 = memref.load %arg2[%c129] : memref<288xf32, #tpu.memory_space<smem>>
    %589 = vector.broadcast %588 : f32 to vector<16x16xf32>
    %590 = arith.mulf %589, %583 : vector<16x16xf32>
    %591 = arith.addf %557, %590 : vector<16x16xf32>
    %c130 = arith.constant 130 : index
    %592 = memref.load %arg2[%c130] : memref<288xf32, #tpu.memory_space<smem>>
    %593 = vector.broadcast %592 : f32 to vector<16x16xf32>
    %594 = arith.mulf %593, %583 : vector<16x16xf32>
    %595 = arith.addf %561, %594 : vector<16x16xf32>
    %c131 = arith.constant 131 : index
    %596 = memref.load %arg2[%c131] : memref<288xf32, #tpu.memory_space<smem>>
    %597 = vector.broadcast %596 : f32 to vector<16x16xf32>
    %598 = arith.mulf %597, %583 : vector<16x16xf32>
    %599 = arith.addf %565, %598 : vector<16x16xf32>
    %c132 = arith.constant 132 : index
    %600 = memref.load %arg2[%c132] : memref<288xf32, #tpu.memory_space<smem>>
    %601 = vector.broadcast %600 : f32 to vector<16x16xf32>
    %602 = arith.mulf %601, %583 : vector<16x16xf32>
    %603 = arith.addf %569, %602 : vector<16x16xf32>
    %c133 = arith.constant 133 : index
    %604 = memref.load %arg2[%c133] : memref<288xf32, #tpu.memory_space<smem>>
    %605 = vector.broadcast %604 : f32 to vector<16x16xf32>
    %606 = arith.mulf %605, %583 : vector<16x16xf32>
    %607 = arith.addf %573, %606 : vector<16x16xf32>
    %c134 = arith.constant 134 : index
    %608 = memref.load %arg2[%c134] : memref<288xf32, #tpu.memory_space<smem>>
    %609 = vector.broadcast %608 : f32 to vector<16x16xf32>
    %610 = arith.mulf %609, %583 : vector<16x16xf32>
    %611 = arith.addf %577, %610 : vector<16x16xf32>
    %c135 = arith.constant 135 : index
    %612 = memref.load %arg2[%c135] : memref<288xf32, #tpu.memory_space<smem>>
    %613 = vector.broadcast %612 : f32 to vector<16x16xf32>
    %614 = arith.mulf %613, %583 : vector<16x16xf32>
    %615 = arith.addf %581, %614 : vector<16x16xf32>
    %c1_90 = arith.constant 1 : index
    %c1_91 = arith.constant 1 : index
    %c1_92 = arith.constant 1 : index
    %616 = vector.load %arg5[%c1_90, %c1_91, %c1_92] : memref<4x18x18xf32, #tpu.memory_space<vmem>>, vector<1x16x16xf32>
    %617 = vector.shape_cast %616 : vector<1x16x16xf32> to vector<16x16xf32>
    %c136 = arith.constant 136 : index
    %618 = memref.load %arg2[%c136] : memref<288xf32, #tpu.memory_space<smem>>
    %619 = vector.broadcast %618 : f32 to vector<16x16xf32>
    %620 = arith.mulf %619, %617 : vector<16x16xf32>
    %621 = arith.addf %587, %620 : vector<16x16xf32>
    %c137 = arith.constant 137 : index
    %622 = memref.load %arg2[%c137] : memref<288xf32, #tpu.memory_space<smem>>
    %623 = vector.broadcast %622 : f32 to vector<16x16xf32>
    %624 = arith.mulf %623, %617 : vector<16x16xf32>
    %625 = arith.addf %591, %624 : vector<16x16xf32>
    %c138 = arith.constant 138 : index
    %626 = memref.load %arg2[%c138] : memref<288xf32, #tpu.memory_space<smem>>
    %627 = vector.broadcast %626 : f32 to vector<16x16xf32>
    %628 = arith.mulf %627, %617 : vector<16x16xf32>
    %629 = arith.addf %595, %628 : vector<16x16xf32>
    %c139 = arith.constant 139 : index
    %630 = memref.load %arg2[%c139] : memref<288xf32, #tpu.memory_space<smem>>
    %631 = vector.broadcast %630 : f32 to vector<16x16xf32>
    %632 = arith.mulf %631, %617 : vector<16x16xf32>
    %633 = arith.addf %599, %632 : vector<16x16xf32>
    %c140 = arith.constant 140 : index
    %634 = memref.load %arg2[%c140] : memref<288xf32, #tpu.memory_space<smem>>
    %635 = vector.broadcast %634 : f32 to vector<16x16xf32>
    %636 = arith.mulf %635, %617 : vector<16x16xf32>
    %637 = arith.addf %603, %636 : vector<16x16xf32>
    %c141 = arith.constant 141 : index
    %638 = memref.load %arg2[%c141] : memref<288xf32, #tpu.memory_space<smem>>
    %639 = vector.broadcast %638 : f32 to vector<16x16xf32>
    %640 = arith.mulf %639, %617 : vector<16x16xf32>
    %641 = arith.addf %607, %640 : vector<16x16xf32>
    %c142 = arith.constant 142 : index
    %642 = memref.load %arg2[%c142] : memref<288xf32, #tpu.memory_space<smem>>
    %643 = vector.broadcast %642 : f32 to vector<16x16xf32>
    %644 = arith.mulf %643, %617 : vector<16x16xf32>
    %645 = arith.addf %611, %644 : vector<16x16xf32>
    %c143 = arith.constant 143 : index
    %646 = memref.load %arg2[%c143] : memref<288xf32, #tpu.memory_space<smem>>
    %647 = vector.broadcast %646 : f32 to vector<16x16xf32>
    %648 = arith.mulf %647, %617 : vector<16x16xf32>
    %649 = arith.addf %615, %648 : vector<16x16xf32>
    %c2_93 = arith.constant 2 : index
    %c1_94 = arith.constant 1 : index
    %c1_95 = arith.constant 1 : index
    %650 = vector.load %arg5[%c2_93, %c1_94, %c1_95] : memref<4x18x18xf32, #tpu.memory_space<vmem>>, vector<1x16x16xf32>
    %651 = vector.shape_cast %650 : vector<1x16x16xf32> to vector<16x16xf32>
    %c144 = arith.constant 144 : index
    %652 = memref.load %arg2[%c144] : memref<288xf32, #tpu.memory_space<smem>>
    %653 = vector.broadcast %652 : f32 to vector<16x16xf32>
    %654 = arith.mulf %653, %651 : vector<16x16xf32>
    %655 = arith.addf %621, %654 : vector<16x16xf32>
    %c145 = arith.constant 145 : index
    %656 = memref.load %arg2[%c145] : memref<288xf32, #tpu.memory_space<smem>>
    %657 = vector.broadcast %656 : f32 to vector<16x16xf32>
    %658 = arith.mulf %657, %651 : vector<16x16xf32>
    %659 = arith.addf %625, %658 : vector<16x16xf32>
    %c146 = arith.constant 146 : index
    %660 = memref.load %arg2[%c146] : memref<288xf32, #tpu.memory_space<smem>>
    %661 = vector.broadcast %660 : f32 to vector<16x16xf32>
    %662 = arith.mulf %661, %651 : vector<16x16xf32>
    %663 = arith.addf %629, %662 : vector<16x16xf32>
    %c147 = arith.constant 147 : index
    %664 = memref.load %arg2[%c147] : memref<288xf32, #tpu.memory_space<smem>>
    %665 = vector.broadcast %664 : f32 to vector<16x16xf32>
    %666 = arith.mulf %665, %651 : vector<16x16xf32>
    %667 = arith.addf %633, %666 : vector<16x16xf32>
    %c148 = arith.constant 148 : index
    %668 = memref.load %arg2[%c148] : memref<288xf32, #tpu.memory_space<smem>>
    %669 = vector.broadcast %668 : f32 to vector<16x16xf32>
    %670 = arith.mulf %669, %651 : vector<16x16xf32>
    %671 = arith.addf %637, %670 : vector<16x16xf32>
    %c149 = arith.constant 149 : index
    %672 = memref.load %arg2[%c149] : memref<288xf32, #tpu.memory_space<smem>>
    %673 = vector.broadcast %672 : f32 to vector<16x16xf32>
    %674 = arith.mulf %673, %651 : vector<16x16xf32>
    %675 = arith.addf %641, %674 : vector<16x16xf32>
    %c150 = arith.constant 150 : index
    %676 = memref.load %arg2[%c150] : memref<288xf32, #tpu.memory_space<smem>>
    %677 = vector.broadcast %676 : f32 to vector<16x16xf32>
    %678 = arith.mulf %677, %651 : vector<16x16xf32>
    %679 = arith.addf %645, %678 : vector<16x16xf32>
    %c151 = arith.constant 151 : index
    %680 = memref.load %arg2[%c151] : memref<288xf32, #tpu.memory_space<smem>>
    %681 = vector.broadcast %680 : f32 to vector<16x16xf32>
    %682 = arith.mulf %681, %651 : vector<16x16xf32>
    %683 = arith.addf %649, %682 : vector<16x16xf32>
    %c3_96 = arith.constant 3 : index
    %c1_97 = arith.constant 1 : index
    %c1_98 = arith.constant 1 : index
    %684 = vector.load %arg5[%c3_96, %c1_97, %c1_98] : memref<4x18x18xf32, #tpu.memory_space<vmem>>, vector<1x16x16xf32>
    %685 = vector.shape_cast %684 : vector<1x16x16xf32> to vector<16x16xf32>
    %c152 = arith.constant 152 : index
    %686 = memref.load %arg2[%c152] : memref<288xf32, #tpu.memory_space<smem>>
    %687 = vector.broadcast %686 : f32 to vector<16x16xf32>
    %688 = arith.mulf %687, %685 : vector<16x16xf32>
    %689 = arith.addf %655, %688 : vector<16x16xf32>
    %c153 = arith.constant 153 : index
    %690 = memref.load %arg2[%c153] : memref<288xf32, #tpu.memory_space<smem>>
    %691 = vector.broadcast %690 : f32 to vector<16x16xf32>
    %692 = arith.mulf %691, %685 : vector<16x16xf32>
    %693 = arith.addf %659, %692 : vector<16x16xf32>
    %c154 = arith.constant 154 : index
    %694 = memref.load %arg2[%c154] : memref<288xf32, #tpu.memory_space<smem>>
    %695 = vector.broadcast %694 : f32 to vector<16x16xf32>
    %696 = arith.mulf %695, %685 : vector<16x16xf32>
    %697 = arith.addf %663, %696 : vector<16x16xf32>
    %c155 = arith.constant 155 : index
    %698 = memref.load %arg2[%c155] : memref<288xf32, #tpu.memory_space<smem>>
    %699 = vector.broadcast %698 : f32 to vector<16x16xf32>
    %700 = arith.mulf %699, %685 : vector<16x16xf32>
    %701 = arith.addf %667, %700 : vector<16x16xf32>
    %c156 = arith.constant 156 : index
    %702 = memref.load %arg2[%c156] : memref<288xf32, #tpu.memory_space<smem>>
    %703 = vector.broadcast %702 : f32 to vector<16x16xf32>
    %704 = arith.mulf %703, %685 : vector<16x16xf32>
    %705 = arith.addf %671, %704 : vector<16x16xf32>
    %c157 = arith.constant 157 : index
    %706 = memref.load %arg2[%c157] : memref<288xf32, #tpu.memory_space<smem>>
    %707 = vector.broadcast %706 : f32 to vector<16x16xf32>
    %708 = arith.mulf %707, %685 : vector<16x16xf32>
    %709 = arith.addf %675, %708 : vector<16x16xf32>
    %c158 = arith.constant 158 : index
    %710 = memref.load %arg2[%c158] : memref<288xf32, #tpu.memory_space<smem>>
    %711 = vector.broadcast %710 : f32 to vector<16x16xf32>
    %712 = arith.mulf %711, %685 : vector<16x16xf32>
    %713 = arith.addf %679, %712 : vector<16x16xf32>
    %c159 = arith.constant 159 : index
    %714 = memref.load %arg2[%c159] : memref<288xf32, #tpu.memory_space<smem>>
    %715 = vector.broadcast %714 : f32 to vector<16x16xf32>
    %716 = arith.mulf %715, %685 : vector<16x16xf32>
    %717 = arith.addf %683, %716 : vector<16x16xf32>
    %c0_99 = arith.constant 0 : index
    %c1_100 = arith.constant 1 : index
    %c2_101 = arith.constant 2 : index
    %718 = vector.load %arg5[%c0_99, %c1_100, %c2_101] : memref<4x18x18xf32, #tpu.memory_space<vmem>>, vector<1x16x16xf32>
    %719 = vector.shape_cast %718 : vector<1x16x16xf32> to vector<16x16xf32>
    %c160 = arith.constant 160 : index
    %720 = memref.load %arg2[%c160] : memref<288xf32, #tpu.memory_space<smem>>
    %721 = vector.broadcast %720 : f32 to vector<16x16xf32>
    %722 = arith.mulf %721, %719 : vector<16x16xf32>
    %723 = arith.addf %689, %722 : vector<16x16xf32>
    %c161 = arith.constant 161 : index
    %724 = memref.load %arg2[%c161] : memref<288xf32, #tpu.memory_space<smem>>
    %725 = vector.broadcast %724 : f32 to vector<16x16xf32>
    %726 = arith.mulf %725, %719 : vector<16x16xf32>
    %727 = arith.addf %693, %726 : vector<16x16xf32>
    %c162 = arith.constant 162 : index
    %728 = memref.load %arg2[%c162] : memref<288xf32, #tpu.memory_space<smem>>
    %729 = vector.broadcast %728 : f32 to vector<16x16xf32>
    %730 = arith.mulf %729, %719 : vector<16x16xf32>
    %731 = arith.addf %697, %730 : vector<16x16xf32>
    %c163 = arith.constant 163 : index
    %732 = memref.load %arg2[%c163] : memref<288xf32, #tpu.memory_space<smem>>
    %733 = vector.broadcast %732 : f32 to vector<16x16xf32>
    %734 = arith.mulf %733, %719 : vector<16x16xf32>
    %735 = arith.addf %701, %734 : vector<16x16xf32>
    %c164 = arith.constant 164 : index
    %736 = memref.load %arg2[%c164] : memref<288xf32, #tpu.memory_space<smem>>
    %737 = vector.broadcast %736 : f32 to vector<16x16xf32>
    %738 = arith.mulf %737, %719 : vector<16x16xf32>
    %739 = arith.addf %705, %738 : vector<16x16xf32>
    %c165 = arith.constant 165 : index
    %740 = memref.load %arg2[%c165] : memref<288xf32, #tpu.memory_space<smem>>
    %741 = vector.broadcast %740 : f32 to vector<16x16xf32>
    %742 = arith.mulf %741, %719 : vector<16x16xf32>
    %743 = arith.addf %709, %742 : vector<16x16xf32>
    %c166 = arith.constant 166 : index
    %744 = memref.load %arg2[%c166] : memref<288xf32, #tpu.memory_space<smem>>
    %745 = vector.broadcast %744 : f32 to vector<16x16xf32>
    %746 = arith.mulf %745, %719 : vector<16x16xf32>
    %747 = arith.addf %713, %746 : vector<16x16xf32>
    %c167 = arith.constant 167 : index
    %748 = memref.load %arg2[%c167] : memref<288xf32, #tpu.memory_space<smem>>
    %749 = vector.broadcast %748 : f32 to vector<16x16xf32>
    %750 = arith.mulf %749, %719 : vector<16x16xf32>
    %751 = arith.addf %717, %750 : vector<16x16xf32>
    %c1_102 = arith.constant 1 : index
    %c1_103 = arith.constant 1 : index
    %c2_104 = arith.constant 2 : index
    %752 = vector.load %arg5[%c1_102, %c1_103, %c2_104] : memref<4x18x18xf32, #tpu.memory_space<vmem>>, vector<1x16x16xf32>
    %753 = vector.shape_cast %752 : vector<1x16x16xf32> to vector<16x16xf32>
    %c168 = arith.constant 168 : index
    %754 = memref.load %arg2[%c168] : memref<288xf32, #tpu.memory_space<smem>>
    %755 = vector.broadcast %754 : f32 to vector<16x16xf32>
    %756 = arith.mulf %755, %753 : vector<16x16xf32>
    %757 = arith.addf %723, %756 : vector<16x16xf32>
    %c169 = arith.constant 169 : index
    %758 = memref.load %arg2[%c169] : memref<288xf32, #tpu.memory_space<smem>>
    %759 = vector.broadcast %758 : f32 to vector<16x16xf32>
    %760 = arith.mulf %759, %753 : vector<16x16xf32>
    %761 = arith.addf %727, %760 : vector<16x16xf32>
    %c170 = arith.constant 170 : index
    %762 = memref.load %arg2[%c170] : memref<288xf32, #tpu.memory_space<smem>>
    %763 = vector.broadcast %762 : f32 to vector<16x16xf32>
    %764 = arith.mulf %763, %753 : vector<16x16xf32>
    %765 = arith.addf %731, %764 : vector<16x16xf32>
    %c171 = arith.constant 171 : index
    %766 = memref.load %arg2[%c171] : memref<288xf32, #tpu.memory_space<smem>>
    %767 = vector.broadcast %766 : f32 to vector<16x16xf32>
    %768 = arith.mulf %767, %753 : vector<16x16xf32>
    %769 = arith.addf %735, %768 : vector<16x16xf32>
    %c172 = arith.constant 172 : index
    %770 = memref.load %arg2[%c172] : memref<288xf32, #tpu.memory_space<smem>>
    %771 = vector.broadcast %770 : f32 to vector<16x16xf32>
    %772 = arith.mulf %771, %753 : vector<16x16xf32>
    %773 = arith.addf %739, %772 : vector<16x16xf32>
    %c173 = arith.constant 173 : index
    %774 = memref.load %arg2[%c173] : memref<288xf32, #tpu.memory_space<smem>>
    %775 = vector.broadcast %774 : f32 to vector<16x16xf32>
    %776 = arith.mulf %775, %753 : vector<16x16xf32>
    %777 = arith.addf %743, %776 : vector<16x16xf32>
    %c174 = arith.constant 174 : index
    %778 = memref.load %arg2[%c174] : memref<288xf32, #tpu.memory_space<smem>>
    %779 = vector.broadcast %778 : f32 to vector<16x16xf32>
    %780 = arith.mulf %779, %753 : vector<16x16xf32>
    %781 = arith.addf %747, %780 : vector<16x16xf32>
    %c175 = arith.constant 175 : index
    %782 = memref.load %arg2[%c175] : memref<288xf32, #tpu.memory_space<smem>>
    %783 = vector.broadcast %782 : f32 to vector<16x16xf32>
    %784 = arith.mulf %783, %753 : vector<16x16xf32>
    %785 = arith.addf %751, %784 : vector<16x16xf32>
    %c2_105 = arith.constant 2 : index
    %c1_106 = arith.constant 1 : index
    %c2_107 = arith.constant 2 : index
    %786 = vector.load %arg5[%c2_105, %c1_106, %c2_107] : memref<4x18x18xf32, #tpu.memory_space<vmem>>, vector<1x16x16xf32>
    %787 = vector.shape_cast %786 : vector<1x16x16xf32> to vector<16x16xf32>
    %c176 = arith.constant 176 : index
    %788 = memref.load %arg2[%c176] : memref<288xf32, #tpu.memory_space<smem>>
    %789 = vector.broadcast %788 : f32 to vector<16x16xf32>
    %790 = arith.mulf %789, %787 : vector<16x16xf32>
    %791 = arith.addf %757, %790 : vector<16x16xf32>
    %c177 = arith.constant 177 : index
    %792 = memref.load %arg2[%c177] : memref<288xf32, #tpu.memory_space<smem>>
    %793 = vector.broadcast %792 : f32 to vector<16x16xf32>
    %794 = arith.mulf %793, %787 : vector<16x16xf32>
    %795 = arith.addf %761, %794 : vector<16x16xf32>
    %c178 = arith.constant 178 : index
    %796 = memref.load %arg2[%c178] : memref<288xf32, #tpu.memory_space<smem>>
    %797 = vector.broadcast %796 : f32 to vector<16x16xf32>
    %798 = arith.mulf %797, %787 : vector<16x16xf32>
    %799 = arith.addf %765, %798 : vector<16x16xf32>
    %c179 = arith.constant 179 : index
    %800 = memref.load %arg2[%c179] : memref<288xf32, #tpu.memory_space<smem>>
    %801 = vector.broadcast %800 : f32 to vector<16x16xf32>
    %802 = arith.mulf %801, %787 : vector<16x16xf32>
    %803 = arith.addf %769, %802 : vector<16x16xf32>
    %c180 = arith.constant 180 : index
    %804 = memref.load %arg2[%c180] : memref<288xf32, #tpu.memory_space<smem>>
    %805 = vector.broadcast %804 : f32 to vector<16x16xf32>
    %806 = arith.mulf %805, %787 : vector<16x16xf32>
    %807 = arith.addf %773, %806 : vector<16x16xf32>
    %c181 = arith.constant 181 : index
    %808 = memref.load %arg2[%c181] : memref<288xf32, #tpu.memory_space<smem>>
    %809 = vector.broadcast %808 : f32 to vector<16x16xf32>
    %810 = arith.mulf %809, %787 : vector<16x16xf32>
    %811 = arith.addf %777, %810 : vector<16x16xf32>
    %c182 = arith.constant 182 : index
    %812 = memref.load %arg2[%c182] : memref<288xf32, #tpu.memory_space<smem>>
    %813 = vector.broadcast %812 : f32 to vector<16x16xf32>
    %814 = arith.mulf %813, %787 : vector<16x16xf32>
    %815 = arith.addf %781, %814 : vector<16x16xf32>
    %c183 = arith.constant 183 : index
    %816 = memref.load %arg2[%c183] : memref<288xf32, #tpu.memory_space<smem>>
    %817 = vector.broadcast %816 : f32 to vector<16x16xf32>
    %818 = arith.mulf %817, %787 : vector<16x16xf32>
    %819 = arith.addf %785, %818 : vector<16x16xf32>
    %c3_108 = arith.constant 3 : index
    %c1_109 = arith.constant 1 : index
    %c2_110 = arith.constant 2 : index
    %820 = vector.load %arg5[%c3_108, %c1_109, %c2_110] : memref<4x18x18xf32, #tpu.memory_space<vmem>>, vector<1x16x16xf32>
    %821 = vector.shape_cast %820 : vector<1x16x16xf32> to vector<16x16xf32>
    %c184 = arith.constant 184 : index
    %822 = memref.load %arg2[%c184] : memref<288xf32, #tpu.memory_space<smem>>
    %823 = vector.broadcast %822 : f32 to vector<16x16xf32>
    %824 = arith.mulf %823, %821 : vector<16x16xf32>
    %825 = arith.addf %791, %824 : vector<16x16xf32>
    %c185 = arith.constant 185 : index
    %826 = memref.load %arg2[%c185] : memref<288xf32, #tpu.memory_space<smem>>
    %827 = vector.broadcast %826 : f32 to vector<16x16xf32>
    %828 = arith.mulf %827, %821 : vector<16x16xf32>
    %829 = arith.addf %795, %828 : vector<16x16xf32>
    %c186 = arith.constant 186 : index
    %830 = memref.load %arg2[%c186] : memref<288xf32, #tpu.memory_space<smem>>
    %831 = vector.broadcast %830 : f32 to vector<16x16xf32>
    %832 = arith.mulf %831, %821 : vector<16x16xf32>
    %833 = arith.addf %799, %832 : vector<16x16xf32>
    %c187 = arith.constant 187 : index
    %834 = memref.load %arg2[%c187] : memref<288xf32, #tpu.memory_space<smem>>
    %835 = vector.broadcast %834 : f32 to vector<16x16xf32>
    %836 = arith.mulf %835, %821 : vector<16x16xf32>
    %837 = arith.addf %803, %836 : vector<16x16xf32>
    %c188 = arith.constant 188 : index
    %838 = memref.load %arg2[%c188] : memref<288xf32, #tpu.memory_space<smem>>
    %839 = vector.broadcast %838 : f32 to vector<16x16xf32>
    %840 = arith.mulf %839, %821 : vector<16x16xf32>
    %841 = arith.addf %807, %840 : vector<16x16xf32>
    %c189 = arith.constant 189 : index
    %842 = memref.load %arg2[%c189] : memref<288xf32, #tpu.memory_space<smem>>
    %843 = vector.broadcast %842 : f32 to vector<16x16xf32>
    %844 = arith.mulf %843, %821 : vector<16x16xf32>
    %845 = arith.addf %811, %844 : vector<16x16xf32>
    %c190 = arith.constant 190 : index
    %846 = memref.load %arg2[%c190] : memref<288xf32, #tpu.memory_space<smem>>
    %847 = vector.broadcast %846 : f32 to vector<16x16xf32>
    %848 = arith.mulf %847, %821 : vector<16x16xf32>
    %849 = arith.addf %815, %848 : vector<16x16xf32>
    %c191 = arith.constant 191 : index
    %850 = memref.load %arg2[%c191] : memref<288xf32, #tpu.memory_space<smem>>
    %851 = vector.broadcast %850 : f32 to vector<16x16xf32>
    %852 = arith.mulf %851, %821 : vector<16x16xf32>
    %853 = arith.addf %819, %852 : vector<16x16xf32>
    %c0_111 = arith.constant 0 : index
    %c2_112 = arith.constant 2 : index
    %c0_113 = arith.constant 0 : index
    %854 = vector.load %arg5[%c0_111, %c2_112, %c0_113] : memref<4x18x18xf32, #tpu.memory_space<vmem>>, vector<1x16x16xf32>
    %855 = vector.shape_cast %854 : vector<1x16x16xf32> to vector<16x16xf32>
    %c192 = arith.constant 192 : index
    %856 = memref.load %arg2[%c192] : memref<288xf32, #tpu.memory_space<smem>>
    %857 = vector.broadcast %856 : f32 to vector<16x16xf32>
    %858 = arith.mulf %857, %855 : vector<16x16xf32>
    %859 = arith.addf %825, %858 : vector<16x16xf32>
    %c193 = arith.constant 193 : index
    %860 = memref.load %arg2[%c193] : memref<288xf32, #tpu.memory_space<smem>>
    %861 = vector.broadcast %860 : f32 to vector<16x16xf32>
    %862 = arith.mulf %861, %855 : vector<16x16xf32>
    %863 = arith.addf %829, %862 : vector<16x16xf32>
    %c194 = arith.constant 194 : index
    %864 = memref.load %arg2[%c194] : memref<288xf32, #tpu.memory_space<smem>>
    %865 = vector.broadcast %864 : f32 to vector<16x16xf32>
    %866 = arith.mulf %865, %855 : vector<16x16xf32>
    %867 = arith.addf %833, %866 : vector<16x16xf32>
    %c195 = arith.constant 195 : index
    %868 = memref.load %arg2[%c195] : memref<288xf32, #tpu.memory_space<smem>>
    %869 = vector.broadcast %868 : f32 to vector<16x16xf32>
    %870 = arith.mulf %869, %855 : vector<16x16xf32>
    %871 = arith.addf %837, %870 : vector<16x16xf32>
    %c196 = arith.constant 196 : index
    %872 = memref.load %arg2[%c196] : memref<288xf32, #tpu.memory_space<smem>>
    %873 = vector.broadcast %872 : f32 to vector<16x16xf32>
    %874 = arith.mulf %873, %855 : vector<16x16xf32>
    %875 = arith.addf %841, %874 : vector<16x16xf32>
    %c197 = arith.constant 197 : index
    %876 = memref.load %arg2[%c197] : memref<288xf32, #tpu.memory_space<smem>>
    %877 = vector.broadcast %876 : f32 to vector<16x16xf32>
    %878 = arith.mulf %877, %855 : vector<16x16xf32>
    %879 = arith.addf %845, %878 : vector<16x16xf32>
    %c198 = arith.constant 198 : index
    %880 = memref.load %arg2[%c198] : memref<288xf32, #tpu.memory_space<smem>>
    %881 = vector.broadcast %880 : f32 to vector<16x16xf32>
    %882 = arith.mulf %881, %855 : vector<16x16xf32>
    %883 = arith.addf %849, %882 : vector<16x16xf32>
    %c199 = arith.constant 199 : index
    %884 = memref.load %arg2[%c199] : memref<288xf32, #tpu.memory_space<smem>>
    %885 = vector.broadcast %884 : f32 to vector<16x16xf32>
    %886 = arith.mulf %885, %855 : vector<16x16xf32>
    %887 = arith.addf %853, %886 : vector<16x16xf32>
    %c1_114 = arith.constant 1 : index
    %c2_115 = arith.constant 2 : index
    %c0_116 = arith.constant 0 : index
    %888 = vector.load %arg5[%c1_114, %c2_115, %c0_116] : memref<4x18x18xf32, #tpu.memory_space<vmem>>, vector<1x16x16xf32>
    %889 = vector.shape_cast %888 : vector<1x16x16xf32> to vector<16x16xf32>
    %c200 = arith.constant 200 : index
    %890 = memref.load %arg2[%c200] : memref<288xf32, #tpu.memory_space<smem>>
    %891 = vector.broadcast %890 : f32 to vector<16x16xf32>
    %892 = arith.mulf %891, %889 : vector<16x16xf32>
    %893 = arith.addf %859, %892 : vector<16x16xf32>
    %c201 = arith.constant 201 : index
    %894 = memref.load %arg2[%c201] : memref<288xf32, #tpu.memory_space<smem>>
    %895 = vector.broadcast %894 : f32 to vector<16x16xf32>
    %896 = arith.mulf %895, %889 : vector<16x16xf32>
    %897 = arith.addf %863, %896 : vector<16x16xf32>
    %c202 = arith.constant 202 : index
    %898 = memref.load %arg2[%c202] : memref<288xf32, #tpu.memory_space<smem>>
    %899 = vector.broadcast %898 : f32 to vector<16x16xf32>
    %900 = arith.mulf %899, %889 : vector<16x16xf32>
    %901 = arith.addf %867, %900 : vector<16x16xf32>
    %c203 = arith.constant 203 : index
    %902 = memref.load %arg2[%c203] : memref<288xf32, #tpu.memory_space<smem>>
    %903 = vector.broadcast %902 : f32 to vector<16x16xf32>
    %904 = arith.mulf %903, %889 : vector<16x16xf32>
    %905 = arith.addf %871, %904 : vector<16x16xf32>
    %c204 = arith.constant 204 : index
    %906 = memref.load %arg2[%c204] : memref<288xf32, #tpu.memory_space<smem>>
    %907 = vector.broadcast %906 : f32 to vector<16x16xf32>
    %908 = arith.mulf %907, %889 : vector<16x16xf32>
    %909 = arith.addf %875, %908 : vector<16x16xf32>
    %c205 = arith.constant 205 : index
    %910 = memref.load %arg2[%c205] : memref<288xf32, #tpu.memory_space<smem>>
    %911 = vector.broadcast %910 : f32 to vector<16x16xf32>
    %912 = arith.mulf %911, %889 : vector<16x16xf32>
    %913 = arith.addf %879, %912 : vector<16x16xf32>
    %c206 = arith.constant 206 : index
    %914 = memref.load %arg2[%c206] : memref<288xf32, #tpu.memory_space<smem>>
    %915 = vector.broadcast %914 : f32 to vector<16x16xf32>
    %916 = arith.mulf %915, %889 : vector<16x16xf32>
    %917 = arith.addf %883, %916 : vector<16x16xf32>
    %c207 = arith.constant 207 : index
    %918 = memref.load %arg2[%c207] : memref<288xf32, #tpu.memory_space<smem>>
    %919 = vector.broadcast %918 : f32 to vector<16x16xf32>
    %920 = arith.mulf %919, %889 : vector<16x16xf32>
    %921 = arith.addf %887, %920 : vector<16x16xf32>
    %c2_117 = arith.constant 2 : index
    %c2_118 = arith.constant 2 : index
    %c0_119 = arith.constant 0 : index
    %922 = vector.load %arg5[%c2_117, %c2_118, %c0_119] : memref<4x18x18xf32, #tpu.memory_space<vmem>>, vector<1x16x16xf32>
    %923 = vector.shape_cast %922 : vector<1x16x16xf32> to vector<16x16xf32>
    %c208 = arith.constant 208 : index
    %924 = memref.load %arg2[%c208] : memref<288xf32, #tpu.memory_space<smem>>
    %925 = vector.broadcast %924 : f32 to vector<16x16xf32>
    %926 = arith.mulf %925, %923 : vector<16x16xf32>
    %927 = arith.addf %893, %926 : vector<16x16xf32>
    %c209 = arith.constant 209 : index
    %928 = memref.load %arg2[%c209] : memref<288xf32, #tpu.memory_space<smem>>
    %929 = vector.broadcast %928 : f32 to vector<16x16xf32>
    %930 = arith.mulf %929, %923 : vector<16x16xf32>
    %931 = arith.addf %897, %930 : vector<16x16xf32>
    %c210 = arith.constant 210 : index
    %932 = memref.load %arg2[%c210] : memref<288xf32, #tpu.memory_space<smem>>
    %933 = vector.broadcast %932 : f32 to vector<16x16xf32>
    %934 = arith.mulf %933, %923 : vector<16x16xf32>
    %935 = arith.addf %901, %934 : vector<16x16xf32>
    %c211 = arith.constant 211 : index
    %936 = memref.load %arg2[%c211] : memref<288xf32, #tpu.memory_space<smem>>
    %937 = vector.broadcast %936 : f32 to vector<16x16xf32>
    %938 = arith.mulf %937, %923 : vector<16x16xf32>
    %939 = arith.addf %905, %938 : vector<16x16xf32>
    %c212 = arith.constant 212 : index
    %940 = memref.load %arg2[%c212] : memref<288xf32, #tpu.memory_space<smem>>
    %941 = vector.broadcast %940 : f32 to vector<16x16xf32>
    %942 = arith.mulf %941, %923 : vector<16x16xf32>
    %943 = arith.addf %909, %942 : vector<16x16xf32>
    %c213 = arith.constant 213 : index
    %944 = memref.load %arg2[%c213] : memref<288xf32, #tpu.memory_space<smem>>
    %945 = vector.broadcast %944 : f32 to vector<16x16xf32>
    %946 = arith.mulf %945, %923 : vector<16x16xf32>
    %947 = arith.addf %913, %946 : vector<16x16xf32>
    %c214 = arith.constant 214 : index
    %948 = memref.load %arg2[%c214] : memref<288xf32, #tpu.memory_space<smem>>
    %949 = vector.broadcast %948 : f32 to vector<16x16xf32>
    %950 = arith.mulf %949, %923 : vector<16x16xf32>
    %951 = arith.addf %917, %950 : vector<16x16xf32>
    %c215 = arith.constant 215 : index
    %952 = memref.load %arg2[%c215] : memref<288xf32, #tpu.memory_space<smem>>
    %953 = vector.broadcast %952 : f32 to vector<16x16xf32>
    %954 = arith.mulf %953, %923 : vector<16x16xf32>
    %955 = arith.addf %921, %954 : vector<16x16xf32>
    %c3_120 = arith.constant 3 : index
    %c2_121 = arith.constant 2 : index
    %c0_122 = arith.constant 0 : index
    %956 = vector.load %arg5[%c3_120, %c2_121, %c0_122] : memref<4x18x18xf32, #tpu.memory_space<vmem>>, vector<1x16x16xf32>
    %957 = vector.shape_cast %956 : vector<1x16x16xf32> to vector<16x16xf32>
    %c216 = arith.constant 216 : index
    %958 = memref.load %arg2[%c216] : memref<288xf32, #tpu.memory_space<smem>>
    %959 = vector.broadcast %958 : f32 to vector<16x16xf32>
    %960 = arith.mulf %959, %957 : vector<16x16xf32>
    %961 = arith.addf %927, %960 : vector<16x16xf32>
    %c217 = arith.constant 217 : index
    %962 = memref.load %arg2[%c217] : memref<288xf32, #tpu.memory_space<smem>>
    %963 = vector.broadcast %962 : f32 to vector<16x16xf32>
    %964 = arith.mulf %963, %957 : vector<16x16xf32>
    %965 = arith.addf %931, %964 : vector<16x16xf32>
    %c218 = arith.constant 218 : index
    %966 = memref.load %arg2[%c218] : memref<288xf32, #tpu.memory_space<smem>>
    %967 = vector.broadcast %966 : f32 to vector<16x16xf32>
    %968 = arith.mulf %967, %957 : vector<16x16xf32>
    %969 = arith.addf %935, %968 : vector<16x16xf32>
    %c219 = arith.constant 219 : index
    %970 = memref.load %arg2[%c219] : memref<288xf32, #tpu.memory_space<smem>>
    %971 = vector.broadcast %970 : f32 to vector<16x16xf32>
    %972 = arith.mulf %971, %957 : vector<16x16xf32>
    %973 = arith.addf %939, %972 : vector<16x16xf32>
    %c220 = arith.constant 220 : index
    %974 = memref.load %arg2[%c220] : memref<288xf32, #tpu.memory_space<smem>>
    %975 = vector.broadcast %974 : f32 to vector<16x16xf32>
    %976 = arith.mulf %975, %957 : vector<16x16xf32>
    %977 = arith.addf %943, %976 : vector<16x16xf32>
    %c221 = arith.constant 221 : index
    %978 = memref.load %arg2[%c221] : memref<288xf32, #tpu.memory_space<smem>>
    %979 = vector.broadcast %978 : f32 to vector<16x16xf32>
    %980 = arith.mulf %979, %957 : vector<16x16xf32>
    %981 = arith.addf %947, %980 : vector<16x16xf32>
    %c222 = arith.constant 222 : index
    %982 = memref.load %arg2[%c222] : memref<288xf32, #tpu.memory_space<smem>>
    %983 = vector.broadcast %982 : f32 to vector<16x16xf32>
    %984 = arith.mulf %983, %957 : vector<16x16xf32>
    %985 = arith.addf %951, %984 : vector<16x16xf32>
    %c223 = arith.constant 223 : index
    %986 = memref.load %arg2[%c223] : memref<288xf32, #tpu.memory_space<smem>>
    %987 = vector.broadcast %986 : f32 to vector<16x16xf32>
    %988 = arith.mulf %987, %957 : vector<16x16xf32>
    %989 = arith.addf %955, %988 : vector<16x16xf32>
    %c0_123 = arith.constant 0 : index
    %c2_124 = arith.constant 2 : index
    %c1_125 = arith.constant 1 : index
    %990 = vector.load %arg5[%c0_123, %c2_124, %c1_125] : memref<4x18x18xf32, #tpu.memory_space<vmem>>, vector<1x16x16xf32>
    %991 = vector.shape_cast %990 : vector<1x16x16xf32> to vector<16x16xf32>
    %c224 = arith.constant 224 : index
    %992 = memref.load %arg2[%c224] : memref<288xf32, #tpu.memory_space<smem>>
    %993 = vector.broadcast %992 : f32 to vector<16x16xf32>
    %994 = arith.mulf %993, %991 : vector<16x16xf32>
    %995 = arith.addf %961, %994 : vector<16x16xf32>
    %c225 = arith.constant 225 : index
    %996 = memref.load %arg2[%c225] : memref<288xf32, #tpu.memory_space<smem>>
    %997 = vector.broadcast %996 : f32 to vector<16x16xf32>
    %998 = arith.mulf %997, %991 : vector<16x16xf32>
    %999 = arith.addf %965, %998 : vector<16x16xf32>
    %c226 = arith.constant 226 : index
    %1000 = memref.load %arg2[%c226] : memref<288xf32, #tpu.memory_space<smem>>
    %1001 = vector.broadcast %1000 : f32 to vector<16x16xf32>
    %1002 = arith.mulf %1001, %991 : vector<16x16xf32>
    %1003 = arith.addf %969, %1002 : vector<16x16xf32>
    %c227 = arith.constant 227 : index
    %1004 = memref.load %arg2[%c227] : memref<288xf32, #tpu.memory_space<smem>>
    %1005 = vector.broadcast %1004 : f32 to vector<16x16xf32>
    %1006 = arith.mulf %1005, %991 : vector<16x16xf32>
    %1007 = arith.addf %973, %1006 : vector<16x16xf32>
    %c228 = arith.constant 228 : index
    %1008 = memref.load %arg2[%c228] : memref<288xf32, #tpu.memory_space<smem>>
    %1009 = vector.broadcast %1008 : f32 to vector<16x16xf32>
    %1010 = arith.mulf %1009, %991 : vector<16x16xf32>
    %1011 = arith.addf %977, %1010 : vector<16x16xf32>
    %c229 = arith.constant 229 : index
    %1012 = memref.load %arg2[%c229] : memref<288xf32, #tpu.memory_space<smem>>
    %1013 = vector.broadcast %1012 : f32 to vector<16x16xf32>
    %1014 = arith.mulf %1013, %991 : vector<16x16xf32>
    %1015 = arith.addf %981, %1014 : vector<16x16xf32>
    %c230 = arith.constant 230 : index
    %1016 = memref.load %arg2[%c230] : memref<288xf32, #tpu.memory_space<smem>>
    %1017 = vector.broadcast %1016 : f32 to vector<16x16xf32>
    %1018 = arith.mulf %1017, %991 : vector<16x16xf32>
    %1019 = arith.addf %985, %1018 : vector<16x16xf32>
    %c231 = arith.constant 231 : index
    %1020 = memref.load %arg2[%c231] : memref<288xf32, #tpu.memory_space<smem>>
    %1021 = vector.broadcast %1020 : f32 to vector<16x16xf32>
    %1022 = arith.mulf %1021, %991 : vector<16x16xf32>
    %1023 = arith.addf %989, %1022 : vector<16x16xf32>
    %c1_126 = arith.constant 1 : index
    %c2_127 = arith.constant 2 : index
    %c1_128 = arith.constant 1 : index
    %1024 = vector.load %arg5[%c1_126, %c2_127, %c1_128] : memref<4x18x18xf32, #tpu.memory_space<vmem>>, vector<1x16x16xf32>
    %1025 = vector.shape_cast %1024 : vector<1x16x16xf32> to vector<16x16xf32>
    %c232 = arith.constant 232 : index
    %1026 = memref.load %arg2[%c232] : memref<288xf32, #tpu.memory_space<smem>>
    %1027 = vector.broadcast %1026 : f32 to vector<16x16xf32>
    %1028 = arith.mulf %1027, %1025 : vector<16x16xf32>
    %1029 = arith.addf %995, %1028 : vector<16x16xf32>
    %c233 = arith.constant 233 : index
    %1030 = memref.load %arg2[%c233] : memref<288xf32, #tpu.memory_space<smem>>
    %1031 = vector.broadcast %1030 : f32 to vector<16x16xf32>
    %1032 = arith.mulf %1031, %1025 : vector<16x16xf32>
    %1033 = arith.addf %999, %1032 : vector<16x16xf32>
    %c234 = arith.constant 234 : index
    %1034 = memref.load %arg2[%c234] : memref<288xf32, #tpu.memory_space<smem>>
    %1035 = vector.broadcast %1034 : f32 to vector<16x16xf32>
    %1036 = arith.mulf %1035, %1025 : vector<16x16xf32>
    %1037 = arith.addf %1003, %1036 : vector<16x16xf32>
    %c235 = arith.constant 235 : index
    %1038 = memref.load %arg2[%c235] : memref<288xf32, #tpu.memory_space<smem>>
    %1039 = vector.broadcast %1038 : f32 to vector<16x16xf32>
    %1040 = arith.mulf %1039, %1025 : vector<16x16xf32>
    %1041 = arith.addf %1007, %1040 : vector<16x16xf32>
    %c236 = arith.constant 236 : index
    %1042 = memref.load %arg2[%c236] : memref<288xf32, #tpu.memory_space<smem>>
    %1043 = vector.broadcast %1042 : f32 to vector<16x16xf32>
    %1044 = arith.mulf %1043, %1025 : vector<16x16xf32>
    %1045 = arith.addf %1011, %1044 : vector<16x16xf32>
    %c237 = arith.constant 237 : index
    %1046 = memref.load %arg2[%c237] : memref<288xf32, #tpu.memory_space<smem>>
    %1047 = vector.broadcast %1046 : f32 to vector<16x16xf32>
    %1048 = arith.mulf %1047, %1025 : vector<16x16xf32>
    %1049 = arith.addf %1015, %1048 : vector<16x16xf32>
    %c238 = arith.constant 238 : index
    %1050 = memref.load %arg2[%c238] : memref<288xf32, #tpu.memory_space<smem>>
    %1051 = vector.broadcast %1050 : f32 to vector<16x16xf32>
    %1052 = arith.mulf %1051, %1025 : vector<16x16xf32>
    %1053 = arith.addf %1019, %1052 : vector<16x16xf32>
    %c239 = arith.constant 239 : index
    %1054 = memref.load %arg2[%c239] : memref<288xf32, #tpu.memory_space<smem>>
    %1055 = vector.broadcast %1054 : f32 to vector<16x16xf32>
    %1056 = arith.mulf %1055, %1025 : vector<16x16xf32>
    %1057 = arith.addf %1023, %1056 : vector<16x16xf32>
    %c2_129 = arith.constant 2 : index
    %c2_130 = arith.constant 2 : index
    %c1_131 = arith.constant 1 : index
    %1058 = vector.load %arg5[%c2_129, %c2_130, %c1_131] : memref<4x18x18xf32, #tpu.memory_space<vmem>>, vector<1x16x16xf32>
    %1059 = vector.shape_cast %1058 : vector<1x16x16xf32> to vector<16x16xf32>
    %c240 = arith.constant 240 : index
    %1060 = memref.load %arg2[%c240] : memref<288xf32, #tpu.memory_space<smem>>
    %1061 = vector.broadcast %1060 : f32 to vector<16x16xf32>
    %1062 = arith.mulf %1061, %1059 : vector<16x16xf32>
    %1063 = arith.addf %1029, %1062 : vector<16x16xf32>
    %c241 = arith.constant 241 : index
    %1064 = memref.load %arg2[%c241] : memref<288xf32, #tpu.memory_space<smem>>
    %1065 = vector.broadcast %1064 : f32 to vector<16x16xf32>
    %1066 = arith.mulf %1065, %1059 : vector<16x16xf32>
    %1067 = arith.addf %1033, %1066 : vector<16x16xf32>
    %c242 = arith.constant 242 : index
    %1068 = memref.load %arg2[%c242] : memref<288xf32, #tpu.memory_space<smem>>
    %1069 = vector.broadcast %1068 : f32 to vector<16x16xf32>
    %1070 = arith.mulf %1069, %1059 : vector<16x16xf32>
    %1071 = arith.addf %1037, %1070 : vector<16x16xf32>
    %c243 = arith.constant 243 : index
    %1072 = memref.load %arg2[%c243] : memref<288xf32, #tpu.memory_space<smem>>
    %1073 = vector.broadcast %1072 : f32 to vector<16x16xf32>
    %1074 = arith.mulf %1073, %1059 : vector<16x16xf32>
    %1075 = arith.addf %1041, %1074 : vector<16x16xf32>
    %c244 = arith.constant 244 : index
    %1076 = memref.load %arg2[%c244] : memref<288xf32, #tpu.memory_space<smem>>
    %1077 = vector.broadcast %1076 : f32 to vector<16x16xf32>
    %1078 = arith.mulf %1077, %1059 : vector<16x16xf32>
    %1079 = arith.addf %1045, %1078 : vector<16x16xf32>
    %c245 = arith.constant 245 : index
    %1080 = memref.load %arg2[%c245] : memref<288xf32, #tpu.memory_space<smem>>
    %1081 = vector.broadcast %1080 : f32 to vector<16x16xf32>
    %1082 = arith.mulf %1081, %1059 : vector<16x16xf32>
    %1083 = arith.addf %1049, %1082 : vector<16x16xf32>
    %c246 = arith.constant 246 : index
    %1084 = memref.load %arg2[%c246] : memref<288xf32, #tpu.memory_space<smem>>
    %1085 = vector.broadcast %1084 : f32 to vector<16x16xf32>
    %1086 = arith.mulf %1085, %1059 : vector<16x16xf32>
    %1087 = arith.addf %1053, %1086 : vector<16x16xf32>
    %c247 = arith.constant 247 : index
    %1088 = memref.load %arg2[%c247] : memref<288xf32, #tpu.memory_space<smem>>
    %1089 = vector.broadcast %1088 : f32 to vector<16x16xf32>
    %1090 = arith.mulf %1089, %1059 : vector<16x16xf32>
    %1091 = arith.addf %1057, %1090 : vector<16x16xf32>
    %c3_132 = arith.constant 3 : index
    %c2_133 = arith.constant 2 : index
    %c1_134 = arith.constant 1 : index
    %1092 = vector.load %arg5[%c3_132, %c2_133, %c1_134] : memref<4x18x18xf32, #tpu.memory_space<vmem>>, vector<1x16x16xf32>
    %1093 = vector.shape_cast %1092 : vector<1x16x16xf32> to vector<16x16xf32>
    %c248 = arith.constant 248 : index
    %1094 = memref.load %arg2[%c248] : memref<288xf32, #tpu.memory_space<smem>>
    %1095 = vector.broadcast %1094 : f32 to vector<16x16xf32>
    %1096 = arith.mulf %1095, %1093 : vector<16x16xf32>
    %1097 = arith.addf %1063, %1096 : vector<16x16xf32>
    %c249 = arith.constant 249 : index
    %1098 = memref.load %arg2[%c249] : memref<288xf32, #tpu.memory_space<smem>>
    %1099 = vector.broadcast %1098 : f32 to vector<16x16xf32>
    %1100 = arith.mulf %1099, %1093 : vector<16x16xf32>
    %1101 = arith.addf %1067, %1100 : vector<16x16xf32>
    %c250 = arith.constant 250 : index
    %1102 = memref.load %arg2[%c250] : memref<288xf32, #tpu.memory_space<smem>>
    %1103 = vector.broadcast %1102 : f32 to vector<16x16xf32>
    %1104 = arith.mulf %1103, %1093 : vector<16x16xf32>
    %1105 = arith.addf %1071, %1104 : vector<16x16xf32>
    %c251 = arith.constant 251 : index
    %1106 = memref.load %arg2[%c251] : memref<288xf32, #tpu.memory_space<smem>>
    %1107 = vector.broadcast %1106 : f32 to vector<16x16xf32>
    %1108 = arith.mulf %1107, %1093 : vector<16x16xf32>
    %1109 = arith.addf %1075, %1108 : vector<16x16xf32>
    %c252 = arith.constant 252 : index
    %1110 = memref.load %arg2[%c252] : memref<288xf32, #tpu.memory_space<smem>>
    %1111 = vector.broadcast %1110 : f32 to vector<16x16xf32>
    %1112 = arith.mulf %1111, %1093 : vector<16x16xf32>
    %1113 = arith.addf %1079, %1112 : vector<16x16xf32>
    %c253 = arith.constant 253 : index
    %1114 = memref.load %arg2[%c253] : memref<288xf32, #tpu.memory_space<smem>>
    %1115 = vector.broadcast %1114 : f32 to vector<16x16xf32>
    %1116 = arith.mulf %1115, %1093 : vector<16x16xf32>
    %1117 = arith.addf %1083, %1116 : vector<16x16xf32>
    %c254 = arith.constant 254 : index
    %1118 = memref.load %arg2[%c254] : memref<288xf32, #tpu.memory_space<smem>>
    %1119 = vector.broadcast %1118 : f32 to vector<16x16xf32>
    %1120 = arith.mulf %1119, %1093 : vector<16x16xf32>
    %1121 = arith.addf %1087, %1120 : vector<16x16xf32>
    %c255 = arith.constant 255 : index
    %1122 = memref.load %arg2[%c255] : memref<288xf32, #tpu.memory_space<smem>>
    %1123 = vector.broadcast %1122 : f32 to vector<16x16xf32>
    %1124 = arith.mulf %1123, %1093 : vector<16x16xf32>
    %1125 = arith.addf %1091, %1124 : vector<16x16xf32>
    %c0_135 = arith.constant 0 : index
    %c2_136 = arith.constant 2 : index
    %c2_137 = arith.constant 2 : index
    %1126 = vector.load %arg5[%c0_135, %c2_136, %c2_137] : memref<4x18x18xf32, #tpu.memory_space<vmem>>, vector<1x16x16xf32>
    %1127 = vector.shape_cast %1126 : vector<1x16x16xf32> to vector<16x16xf32>
    %c256 = arith.constant 256 : index
    %1128 = memref.load %arg2[%c256] : memref<288xf32, #tpu.memory_space<smem>>
    %1129 = vector.broadcast %1128 : f32 to vector<16x16xf32>
    %1130 = arith.mulf %1129, %1127 : vector<16x16xf32>
    %1131 = arith.addf %1097, %1130 : vector<16x16xf32>
    %c257 = arith.constant 257 : index
    %1132 = memref.load %arg2[%c257] : memref<288xf32, #tpu.memory_space<smem>>
    %1133 = vector.broadcast %1132 : f32 to vector<16x16xf32>
    %1134 = arith.mulf %1133, %1127 : vector<16x16xf32>
    %1135 = arith.addf %1101, %1134 : vector<16x16xf32>
    %c258 = arith.constant 258 : index
    %1136 = memref.load %arg2[%c258] : memref<288xf32, #tpu.memory_space<smem>>
    %1137 = vector.broadcast %1136 : f32 to vector<16x16xf32>
    %1138 = arith.mulf %1137, %1127 : vector<16x16xf32>
    %1139 = arith.addf %1105, %1138 : vector<16x16xf32>
    %c259 = arith.constant 259 : index
    %1140 = memref.load %arg2[%c259] : memref<288xf32, #tpu.memory_space<smem>>
    %1141 = vector.broadcast %1140 : f32 to vector<16x16xf32>
    %1142 = arith.mulf %1141, %1127 : vector<16x16xf32>
    %1143 = arith.addf %1109, %1142 : vector<16x16xf32>
    %c260 = arith.constant 260 : index
    %1144 = memref.load %arg2[%c260] : memref<288xf32, #tpu.memory_space<smem>>
    %1145 = vector.broadcast %1144 : f32 to vector<16x16xf32>
    %1146 = arith.mulf %1145, %1127 : vector<16x16xf32>
    %1147 = arith.addf %1113, %1146 : vector<16x16xf32>
    %c261 = arith.constant 261 : index
    %1148 = memref.load %arg2[%c261] : memref<288xf32, #tpu.memory_space<smem>>
    %1149 = vector.broadcast %1148 : f32 to vector<16x16xf32>
    %1150 = arith.mulf %1149, %1127 : vector<16x16xf32>
    %1151 = arith.addf %1117, %1150 : vector<16x16xf32>
    %c262 = arith.constant 262 : index
    %1152 = memref.load %arg2[%c262] : memref<288xf32, #tpu.memory_space<smem>>
    %1153 = vector.broadcast %1152 : f32 to vector<16x16xf32>
    %1154 = arith.mulf %1153, %1127 : vector<16x16xf32>
    %1155 = arith.addf %1121, %1154 : vector<16x16xf32>
    %c263 = arith.constant 263 : index
    %1156 = memref.load %arg2[%c263] : memref<288xf32, #tpu.memory_space<smem>>
    %1157 = vector.broadcast %1156 : f32 to vector<16x16xf32>
    %1158 = arith.mulf %1157, %1127 : vector<16x16xf32>
    %1159 = arith.addf %1125, %1158 : vector<16x16xf32>
    %c1_138 = arith.constant 1 : index
    %c2_139 = arith.constant 2 : index
    %c2_140 = arith.constant 2 : index
    %1160 = vector.load %arg5[%c1_138, %c2_139, %c2_140] : memref<4x18x18xf32, #tpu.memory_space<vmem>>, vector<1x16x16xf32>
    %1161 = vector.shape_cast %1160 : vector<1x16x16xf32> to vector<16x16xf32>
    %c264 = arith.constant 264 : index
    %1162 = memref.load %arg2[%c264] : memref<288xf32, #tpu.memory_space<smem>>
    %1163 = vector.broadcast %1162 : f32 to vector<16x16xf32>
    %1164 = arith.mulf %1163, %1161 : vector<16x16xf32>
    %1165 = arith.addf %1131, %1164 : vector<16x16xf32>
    %c265 = arith.constant 265 : index
    %1166 = memref.load %arg2[%c265] : memref<288xf32, #tpu.memory_space<smem>>
    %1167 = vector.broadcast %1166 : f32 to vector<16x16xf32>
    %1168 = arith.mulf %1167, %1161 : vector<16x16xf32>
    %1169 = arith.addf %1135, %1168 : vector<16x16xf32>
    %c266 = arith.constant 266 : index
    %1170 = memref.load %arg2[%c266] : memref<288xf32, #tpu.memory_space<smem>>
    %1171 = vector.broadcast %1170 : f32 to vector<16x16xf32>
    %1172 = arith.mulf %1171, %1161 : vector<16x16xf32>
    %1173 = arith.addf %1139, %1172 : vector<16x16xf32>
    %c267 = arith.constant 267 : index
    %1174 = memref.load %arg2[%c267] : memref<288xf32, #tpu.memory_space<smem>>
    %1175 = vector.broadcast %1174 : f32 to vector<16x16xf32>
    %1176 = arith.mulf %1175, %1161 : vector<16x16xf32>
    %1177 = arith.addf %1143, %1176 : vector<16x16xf32>
    %c268 = arith.constant 268 : index
    %1178 = memref.load %arg2[%c268] : memref<288xf32, #tpu.memory_space<smem>>
    %1179 = vector.broadcast %1178 : f32 to vector<16x16xf32>
    %1180 = arith.mulf %1179, %1161 : vector<16x16xf32>
    %1181 = arith.addf %1147, %1180 : vector<16x16xf32>
    %c269 = arith.constant 269 : index
    %1182 = memref.load %arg2[%c269] : memref<288xf32, #tpu.memory_space<smem>>
    %1183 = vector.broadcast %1182 : f32 to vector<16x16xf32>
    %1184 = arith.mulf %1183, %1161 : vector<16x16xf32>
    %1185 = arith.addf %1151, %1184 : vector<16x16xf32>
    %c270 = arith.constant 270 : index
    %1186 = memref.load %arg2[%c270] : memref<288xf32, #tpu.memory_space<smem>>
    %1187 = vector.broadcast %1186 : f32 to vector<16x16xf32>
    %1188 = arith.mulf %1187, %1161 : vector<16x16xf32>
    %1189 = arith.addf %1155, %1188 : vector<16x16xf32>
    %c271 = arith.constant 271 : index
    %1190 = memref.load %arg2[%c271] : memref<288xf32, #tpu.memory_space<smem>>
    %1191 = vector.broadcast %1190 : f32 to vector<16x16xf32>
    %1192 = arith.mulf %1191, %1161 : vector<16x16xf32>
    %1193 = arith.addf %1159, %1192 : vector<16x16xf32>
    %c2_141 = arith.constant 2 : index
    %c2_142 = arith.constant 2 : index
    %c2_143 = arith.constant 2 : index
    %1194 = vector.load %arg5[%c2_141, %c2_142, %c2_143] : memref<4x18x18xf32, #tpu.memory_space<vmem>>, vector<1x16x16xf32>
    %1195 = vector.shape_cast %1194 : vector<1x16x16xf32> to vector<16x16xf32>
    %c272 = arith.constant 272 : index
    %1196 = memref.load %arg2[%c272] : memref<288xf32, #tpu.memory_space<smem>>
    %1197 = vector.broadcast %1196 : f32 to vector<16x16xf32>
    %1198 = arith.mulf %1197, %1195 : vector<16x16xf32>
    %1199 = arith.addf %1165, %1198 : vector<16x16xf32>
    %c273 = arith.constant 273 : index
    %1200 = memref.load %arg2[%c273] : memref<288xf32, #tpu.memory_space<smem>>
    %1201 = vector.broadcast %1200 : f32 to vector<16x16xf32>
    %1202 = arith.mulf %1201, %1195 : vector<16x16xf32>
    %1203 = arith.addf %1169, %1202 : vector<16x16xf32>
    %c274 = arith.constant 274 : index
    %1204 = memref.load %arg2[%c274] : memref<288xf32, #tpu.memory_space<smem>>
    %1205 = vector.broadcast %1204 : f32 to vector<16x16xf32>
    %1206 = arith.mulf %1205, %1195 : vector<16x16xf32>
    %1207 = arith.addf %1173, %1206 : vector<16x16xf32>
    %c275 = arith.constant 275 : index
    %1208 = memref.load %arg2[%c275] : memref<288xf32, #tpu.memory_space<smem>>
    %1209 = vector.broadcast %1208 : f32 to vector<16x16xf32>
    %1210 = arith.mulf %1209, %1195 : vector<16x16xf32>
    %1211 = arith.addf %1177, %1210 : vector<16x16xf32>
    %c276 = arith.constant 276 : index
    %1212 = memref.load %arg2[%c276] : memref<288xf32, #tpu.memory_space<smem>>
    %1213 = vector.broadcast %1212 : f32 to vector<16x16xf32>
    %1214 = arith.mulf %1213, %1195 : vector<16x16xf32>
    %1215 = arith.addf %1181, %1214 : vector<16x16xf32>
    %c277 = arith.constant 277 : index
    %1216 = memref.load %arg2[%c277] : memref<288xf32, #tpu.memory_space<smem>>
    %1217 = vector.broadcast %1216 : f32 to vector<16x16xf32>
    %1218 = arith.mulf %1217, %1195 : vector<16x16xf32>
    %1219 = arith.addf %1185, %1218 : vector<16x16xf32>
    %c278 = arith.constant 278 : index
    %1220 = memref.load %arg2[%c278] : memref<288xf32, #tpu.memory_space<smem>>
    %1221 = vector.broadcast %1220 : f32 to vector<16x16xf32>
    %1222 = arith.mulf %1221, %1195 : vector<16x16xf32>
    %1223 = arith.addf %1189, %1222 : vector<16x16xf32>
    %c279 = arith.constant 279 : index
    %1224 = memref.load %arg2[%c279] : memref<288xf32, #tpu.memory_space<smem>>
    %1225 = vector.broadcast %1224 : f32 to vector<16x16xf32>
    %1226 = arith.mulf %1225, %1195 : vector<16x16xf32>
    %1227 = arith.addf %1193, %1226 : vector<16x16xf32>
    %c3_144 = arith.constant 3 : index
    %c2_145 = arith.constant 2 : index
    %c2_146 = arith.constant 2 : index
    %1228 = vector.load %arg5[%c3_144, %c2_145, %c2_146] : memref<4x18x18xf32, #tpu.memory_space<vmem>>, vector<1x16x16xf32>
    %1229 = vector.shape_cast %1228 : vector<1x16x16xf32> to vector<16x16xf32>
    %c280 = arith.constant 280 : index
    %1230 = memref.load %arg2[%c280] : memref<288xf32, #tpu.memory_space<smem>>
    %1231 = vector.broadcast %1230 : f32 to vector<16x16xf32>
    %1232 = arith.mulf %1231, %1229 : vector<16x16xf32>
    %1233 = arith.addf %1199, %1232 : vector<16x16xf32>
    %c281 = arith.constant 281 : index
    %1234 = memref.load %arg2[%c281] : memref<288xf32, #tpu.memory_space<smem>>
    %1235 = vector.broadcast %1234 : f32 to vector<16x16xf32>
    %1236 = arith.mulf %1235, %1229 : vector<16x16xf32>
    %1237 = arith.addf %1203, %1236 : vector<16x16xf32>
    %c282 = arith.constant 282 : index
    %1238 = memref.load %arg2[%c282] : memref<288xf32, #tpu.memory_space<smem>>
    %1239 = vector.broadcast %1238 : f32 to vector<16x16xf32>
    %1240 = arith.mulf %1239, %1229 : vector<16x16xf32>
    %1241 = arith.addf %1207, %1240 : vector<16x16xf32>
    %c283 = arith.constant 283 : index
    %1242 = memref.load %arg2[%c283] : memref<288xf32, #tpu.memory_space<smem>>
    %1243 = vector.broadcast %1242 : f32 to vector<16x16xf32>
    %1244 = arith.mulf %1243, %1229 : vector<16x16xf32>
    %1245 = arith.addf %1211, %1244 : vector<16x16xf32>
    %c284 = arith.constant 284 : index
    %1246 = memref.load %arg2[%c284] : memref<288xf32, #tpu.memory_space<smem>>
    %1247 = vector.broadcast %1246 : f32 to vector<16x16xf32>
    %1248 = arith.mulf %1247, %1229 : vector<16x16xf32>
    %1249 = arith.addf %1215, %1248 : vector<16x16xf32>
    %c285 = arith.constant 285 : index
    %1250 = memref.load %arg2[%c285] : memref<288xf32, #tpu.memory_space<smem>>
    %1251 = vector.broadcast %1250 : f32 to vector<16x16xf32>
    %1252 = arith.mulf %1251, %1229 : vector<16x16xf32>
    %1253 = arith.addf %1219, %1252 : vector<16x16xf32>
    %c286 = arith.constant 286 : index
    %1254 = memref.load %arg2[%c286] : memref<288xf32, #tpu.memory_space<smem>>
    %1255 = vector.broadcast %1254 : f32 to vector<16x16xf32>
    %1256 = arith.mulf %1255, %1229 : vector<16x16xf32>
    %1257 = arith.addf %1223, %1256 : vector<16x16xf32>
    %c287 = arith.constant 287 : index
    %1258 = memref.load %arg2[%c287] : memref<288xf32, #tpu.memory_space<smem>>
    %1259 = vector.broadcast %1258 : f32 to vector<16x16xf32>
    %1260 = arith.mulf %1259, %1229 : vector<16x16xf32>
    %1261 = arith.addf %1227, %1260 : vector<16x16xf32>
    %1262 = math.absf %1233 : vector<16x16xf32>
    %1263 = math.absf %1237 : vector<16x16xf32>
    %1264 = arith.addf %1262, %1263 : vector<16x16xf32>
    %1265 = math.absf %1241 : vector<16x16xf32>
    %1266 = arith.addf %1264, %1265 : vector<16x16xf32>
    %1267 = math.absf %1245 : vector<16x16xf32>
    %1268 = arith.addf %1266, %1267 : vector<16x16xf32>
    %1269 = math.absf %1249 : vector<16x16xf32>
    %1270 = arith.addf %1268, %1269 : vector<16x16xf32>
    %1271 = math.absf %1253 : vector<16x16xf32>
    %1272 = arith.addf %1270, %1271 : vector<16x16xf32>
    %1273 = math.absf %1257 : vector<16x16xf32>
    %1274 = arith.addf %1272, %1273 : vector<16x16xf32>
    %1275 = math.absf %1261 : vector<16x16xf32>
    %1276 = arith.addf %1274, %1275 : vector<16x16xf32>
    %cst_147 = arith.constant 0.000000e+00 : f32
    %1277 = vector.broadcast %cst_147 : f32 to vector<16x16xf32>
    %1278 = arith.cmpf ogt, %1276, %1277 : vector<16x16xf32>
    %cst_148 = arith.constant 1.000000e+00 : f32
    %1279 = vector.broadcast %cst_148 : f32 to vector<16x16xf32>
    %1280 = arith.select %1278, %1276, %1279 : vector<16x16xi1>, vector<16x16xf32>
    %cst_149 = arith.constant 1.000000e+00 : f32
    %1281 = vector.broadcast %cst_149 : f32 to vector<16x16xf32>
    %1282 = arith.divf %1281, %1280 : vector<16x16xf32>
    %1283 = arith.mulf %1233, %1282 : vector<16x16xf32>
    %1284 = arith.mulf %1237, %1282 : vector<16x16xf32>
    %1285 = arith.mulf %1241, %1282 : vector<16x16xf32>
    %1286 = arith.mulf %1245, %1282 : vector<16x16xf32>
    %1287 = arith.mulf %1249, %1282 : vector<16x16xf32>
    %1288 = arith.mulf %1253, %1282 : vector<16x16xf32>
    %1289 = arith.mulf %1257, %1282 : vector<16x16xf32>
    %1290 = arith.mulf %1261, %1282 : vector<16x16xf32>
    %cst_150 = arith.constant 1.000000e+00 : f32
    %1291 = vector.broadcast %cst_150 : f32 to vector<16x16xf32>
    %1292 = arith.subf %1291, %1283 : vector<16x16xf32>
    %1293 = arith.subf %1292, %1284 : vector<16x16xf32>
    %1294 = arith.subf %1293, %1285 : vector<16x16xf32>
    %1295 = arith.subf %1294, %1286 : vector<16x16xf32>
    %1296 = arith.subf %1295, %1287 : vector<16x16xf32>
    %1297 = arith.subf %1296, %1288 : vector<16x16xf32>
    %1298 = arith.subf %1297, %1289 : vector<16x16xf32>
    %1299 = arith.subf %1298, %1290 : vector<16x16xf32>
    %1300 = tpu.iota {dimensions = array<i32: 0>} : vector<16x16xi32>
    %1301 = tpu.iota {dimensions = array<i32: 1>} : vector<16x16xi32>
    %c0_151 = arith.constant 0 : index
    %c0_152 = arith.constant 0 : index
    %c0_153 = arith.constant 0 : index
    %1302 = vector.load %arg6[%c0_151, %c0_152, %c0_153] : memref<9x16x16xf32, #tpu.memory_space<vmem>>, vector<1x16x16xf32>
    %1303 = vector.shape_cast %1302 : vector<1x16x16xf32> to vector<16x16xf32>
    %1304 = vector.shape_cast %1299 : vector<16x16xf32> to vector<1x16x16xf32>
    tpu.vector_store %arg6[%c0_151, %c0_152, %c0_153], %1304 {strides = array<i32>} : memref<9x16x16xf32, #tpu.memory_space<vmem>>, vector<1x16x16xf32>,
    %c0_i32 = arith.constant 0 : i32
    %1305 = vector.broadcast %c0_i32 : i32 to vector<16x16xi32>
    %1306 = arith.subi %1300, %1305 : vector<16x16xi32>
    %c0_i32_154 = arith.constant 0 : i32
    %1307 = vector.broadcast %c0_i32_154 : i32 to vector<16x16xi32>
    %1308 = arith.cmpi sge, %1306, %1307 : vector<16x16xi32>
    %c0_i32_155 = arith.constant 0 : i32
    %1309 = vector.broadcast %c0_i32_155 : i32 to vector<16x16xi32>
    %1310 = arith.subi %1300, %1309 : vector<16x16xi32>
    %c16_i32 = arith.constant 16 : i32
    %1311 = vector.broadcast %c16_i32 : i32 to vector<16x16xi32>
    %1312 = arith.cmpi slt, %1310, %1311 : vector<16x16xi32>
    %1313 = arith.andi %1308, %1312 : vector<16x16xi1>
    %c1_i32 = arith.constant 1 : i32
    %1314 = vector.broadcast %c1_i32 : i32 to vector<16x16xi32>
    %1315 = arith.subi %1301, %1314 : vector<16x16xi32>
    %c0_i32_156 = arith.constant 0 : i32
    %1316 = vector.broadcast %c0_i32_156 : i32 to vector<16x16xi32>
    %1317 = arith.cmpi sge, %1315, %1316 : vector<16x16xi32>
    %1318 = arith.andi %1313, %1317 : vector<16x16xi1>
    %c1_i32_157 = arith.constant 1 : i32
    %1319 = vector.broadcast %c1_i32_157 : i32 to vector<16x16xi32>
    %1320 = arith.subi %1301, %1319 : vector<16x16xi32>
    %c16_i32_158 = arith.constant 16 : i32
    %1321 = vector.broadcast %c16_i32_158 : i32 to vector<16x16xi32>
    %1322 = arith.cmpi slt, %1320, %1321 : vector<16x16xi32>
    %1323 = arith.andi %1318, %1322 : vector<16x16xi1>
    %cst_159 = arith.constant 0.000000e+00 : f32
    %1324 = vector.broadcast %cst_159 : f32 to vector<16x16xf32>
    %1325 = arith.select %1323, %1283, %1324 : vector<16x16xi1>, vector<16x16xf32>
    %c1_160 = arith.constant 1 : index
    %c0_161 = arith.constant 0 : index
    %c0_162 = arith.constant 0 : index
    %1326 = vector.load %arg6[%c1_160, %c0_161, %c0_162] : memref<9x16x16xf32, #tpu.memory_space<vmem>>, vector<1x16x16xf32>
    %1327 = vector.shape_cast %1326 : vector<1x16x16xf32> to vector<16x16xf32>
    %1328 = vector.shape_cast %1325 : vector<16x16xf32> to vector<1x16x16xf32>
    tpu.vector_store %arg6[%c1_160, %c0_161, %c0_162], %1328 {strides = array<i32>} : memref<9x16x16xf32, #tpu.memory_space<vmem>>, vector<1x16x16xf32>,
    %c0_i32_163 = arith.constant 0 : i32
    %1329 = vector.broadcast %c0_i32_163 : i32 to vector<16x16xi32>
    %1330 = arith.subi %1300, %1329 : vector<16x16xi32>
    %c0_i32_164 = arith.constant 0 : i32
    %1331 = vector.broadcast %c0_i32_164 : i32 to vector<16x16xi32>
    %1332 = arith.cmpi sge, %1330, %1331 : vector<16x16xi32>
    %c0_i32_165 = arith.constant 0 : i32
    %1333 = vector.broadcast %c0_i32_165 : i32 to vector<16x16xi32>
    %1334 = arith.subi %1300, %1333 : vector<16x16xi32>
    %c16_i32_166 = arith.constant 16 : i32
    %1335 = vector.broadcast %c16_i32_166 : i32 to vector<16x16xi32>
    %1336 = arith.cmpi slt, %1334, %1335 : vector<16x16xi32>
    %1337 = arith.andi %1332, %1336 : vector<16x16xi1>
    %c-1_i32 = arith.constant -1 : i32
    %1338 = vector.broadcast %c-1_i32 : i32 to vector<16x16xi32>
    %1339 = arith.subi %1301, %1338 : vector<16x16xi32>
    %c0_i32_167 = arith.constant 0 : i32
    %1340 = vector.broadcast %c0_i32_167 : i32 to vector<16x16xi32>
    %1341 = arith.cmpi sge, %1339, %1340 : vector<16x16xi32>
    %1342 = arith.andi %1337, %1341 : vector<16x16xi1>
    %c-1_i32_168 = arith.constant -1 : i32
    %1343 = vector.broadcast %c-1_i32_168 : i32 to vector<16x16xi32>
    %1344 = arith.subi %1301, %1343 : vector<16x16xi32>
    %c16_i32_169 = arith.constant 16 : i32
    %1345 = vector.broadcast %c16_i32_169 : i32 to vector<16x16xi32>
    %1346 = arith.cmpi slt, %1344, %1345 : vector<16x16xi32>
    %1347 = arith.andi %1342, %1346 : vector<16x16xi1>
    %cst_170 = arith.constant 0.000000e+00 : f32
    %1348 = vector.broadcast %cst_170 : f32 to vector<16x16xf32>
    %1349 = arith.select %1347, %1284, %1348 : vector<16x16xi1>, vector<16x16xf32>
    %c2_171 = arith.constant 2 : index
    %c0_172 = arith.constant 0 : index
    %c0_173 = arith.constant 0 : index
    %1350 = vector.load %arg6[%c2_171, %c0_172, %c0_173] : memref<9x16x16xf32, #tpu.memory_space<vmem>>, vector<1x16x16xf32>
    %1351 = vector.shape_cast %1350 : vector<1x16x16xf32> to vector<16x16xf32>
    %1352 = vector.shape_cast %1349 : vector<16x16xf32> to vector<1x16x16xf32>
    tpu.vector_store %arg6[%c2_171, %c0_172, %c0_173], %1352 {strides = array<i32>} : memref<9x16x16xf32, #tpu.memory_space<vmem>>, vector<1x16x16xf32>,
    %c1_i32_174 = arith.constant 1 : i32
    %1353 = vector.broadcast %c1_i32_174 : i32 to vector<16x16xi32>
    %1354 = arith.subi %1300, %1353 : vector<16x16xi32>
    %c0_i32_175 = arith.constant 0 : i32
    %1355 = vector.broadcast %c0_i32_175 : i32 to vector<16x16xi32>
    %1356 = arith.cmpi sge, %1354, %1355 : vector<16x16xi32>
    %c1_i32_176 = arith.constant 1 : i32
    %1357 = vector.broadcast %c1_i32_176 : i32 to vector<16x16xi32>
    %1358 = arith.subi %1300, %1357 : vector<16x16xi32>
    %c16_i32_177 = arith.constant 16 : i32
    %1359 = vector.broadcast %c16_i32_177 : i32 to vector<16x16xi32>
    %1360 = arith.cmpi slt, %1358, %1359 : vector<16x16xi32>
    %1361 = arith.andi %1356, %1360 : vector<16x16xi1>
    %c0_i32_178 = arith.constant 0 : i32
    %1362 = vector.broadcast %c0_i32_178 : i32 to vector<16x16xi32>
    %1363 = arith.subi %1301, %1362 : vector<16x16xi32>
    %c0_i32_179 = arith.constant 0 : i32
    %1364 = vector.broadcast %c0_i32_179 : i32 to vector<16x16xi32>
    %1365 = arith.cmpi sge, %1363, %1364 : vector<16x16xi32>
    %1366 = arith.andi %1361, %1365 : vector<16x16xi1>
    %c0_i32_180 = arith.constant 0 : i32
    %1367 = vector.broadcast %c0_i32_180 : i32 to vector<16x16xi32>
    %1368 = arith.subi %1301, %1367 : vector<16x16xi32>
    %c16_i32_181 = arith.constant 16 : i32
    %1369 = vector.broadcast %c16_i32_181 : i32 to vector<16x16xi32>
    %1370 = arith.cmpi slt, %1368, %1369 : vector<16x16xi32>
    %1371 = arith.andi %1366, %1370 : vector<16x16xi1>
    %cst_182 = arith.constant 0.000000e+00 : f32
    %1372 = vector.broadcast %cst_182 : f32 to vector<16x16xf32>
    %1373 = arith.select %1371, %1285, %1372 : vector<16x16xi1>, vector<16x16xf32>
    %c3_183 = arith.constant 3 : index
    %c0_184 = arith.constant 0 : index
    %c0_185 = arith.constant 0 : index
    %1374 = vector.load %arg6[%c3_183, %c0_184, %c0_185] : memref<9x16x16xf32, #tpu.memory_space<vmem>>, vector<1x16x16xf32>
    %1375 = vector.shape_cast %1374 : vector<1x16x16xf32> to vector<16x16xf32>
    %1376 = vector.shape_cast %1373 : vector<16x16xf32> to vector<1x16x16xf32>
    tpu.vector_store %arg6[%c3_183, %c0_184, %c0_185], %1376 {strides = array<i32>} : memref<9x16x16xf32, #tpu.memory_space<vmem>>, vector<1x16x16xf32>,
    %c1_i32_186 = arith.constant 1 : i32
    %1377 = vector.broadcast %c1_i32_186 : i32 to vector<16x16xi32>
    %1378 = arith.subi %1300, %1377 : vector<16x16xi32>
    %c0_i32_187 = arith.constant 0 : i32
    %1379 = vector.broadcast %c0_i32_187 : i32 to vector<16x16xi32>
    %1380 = arith.cmpi sge, %1378, %1379 : vector<16x16xi32>
    %c1_i32_188 = arith.constant 1 : i32
    %1381 = vector.broadcast %c1_i32_188 : i32 to vector<16x16xi32>
    %1382 = arith.subi %1300, %1381 : vector<16x16xi32>
    %c16_i32_189 = arith.constant 16 : i32
    %1383 = vector.broadcast %c16_i32_189 : i32 to vector<16x16xi32>
    %1384 = arith.cmpi slt, %1382, %1383 : vector<16x16xi32>
    %1385 = arith.andi %1380, %1384 : vector<16x16xi1>
    %c1_i32_190 = arith.constant 1 : i32
    %1386 = vector.broadcast %c1_i32_190 : i32 to vector<16x16xi32>
    %1387 = arith.subi %1301, %1386 : vector<16x16xi32>
    %c0_i32_191 = arith.constant 0 : i32
    %1388 = vector.broadcast %c0_i32_191 : i32 to vector<16x16xi32>
    %1389 = arith.cmpi sge, %1387, %1388 : vector<16x16xi32>
    %1390 = arith.andi %1385, %1389 : vector<16x16xi1>
    %c1_i32_192 = arith.constant 1 : i32
    %1391 = vector.broadcast %c1_i32_192 : i32 to vector<16x16xi32>
    %1392 = arith.subi %1301, %1391 : vector<16x16xi32>
    %c16_i32_193 = arith.constant 16 : i32
    %1393 = vector.broadcast %c16_i32_193 : i32 to vector<16x16xi32>
    %1394 = arith.cmpi slt, %1392, %1393 : vector<16x16xi32>
    %1395 = arith.andi %1390, %1394 : vector<16x16xi1>
    %cst_194 = arith.constant 0.000000e+00 : f32
    %1396 = vector.broadcast %cst_194 : f32 to vector<16x16xf32>
    %1397 = arith.select %1395, %1286, %1396 : vector<16x16xi1>, vector<16x16xf32>
    %c4_195 = arith.constant 4 : index
    %c0_196 = arith.constant 0 : index
    %c0_197 = arith.constant 0 : index
    %1398 = vector.load %arg6[%c4_195, %c0_196, %c0_197] : memref<9x16x16xf32, #tpu.memory_space<vmem>>, vector<1x16x16xf32>
    %1399 = vector.shape_cast %1398 : vector<1x16x16xf32> to vector<16x16xf32>
    %1400 = vector.shape_cast %1397 : vector<16x16xf32> to vector<1x16x16xf32>
    tpu.vector_store %arg6[%c4_195, %c0_196, %c0_197], %1400 {strides = array<i32>} : memref<9x16x16xf32, #tpu.memory_space<vmem>>, vector<1x16x16xf32>,
    %c1_i32_198 = arith.constant 1 : i32
    %1401 = vector.broadcast %c1_i32_198 : i32 to vector<16x16xi32>
    %1402 = arith.subi %1300, %1401 : vector<16x16xi32>
    %c0_i32_199 = arith.constant 0 : i32
    %1403 = vector.broadcast %c0_i32_199 : i32 to vector<16x16xi32>
    %1404 = arith.cmpi sge, %1402, %1403 : vector<16x16xi32>
    %c1_i32_200 = arith.constant 1 : i32
    %1405 = vector.broadcast %c1_i32_200 : i32 to vector<16x16xi32>
    %1406 = arith.subi %1300, %1405 : vector<16x16xi32>
    %c16_i32_201 = arith.constant 16 : i32
    %1407 = vector.broadcast %c16_i32_201 : i32 to vector<16x16xi32>
    %1408 = arith.cmpi slt, %1406, %1407 : vector<16x16xi32>
    %1409 = arith.andi %1404, %1408 : vector<16x16xi1>
    %c-1_i32_202 = arith.constant -1 : i32
    %1410 = vector.broadcast %c-1_i32_202 : i32 to vector<16x16xi32>
    %1411 = arith.subi %1301, %1410 : vector<16x16xi32>
    %c0_i32_203 = arith.constant 0 : i32
    %1412 = vector.broadcast %c0_i32_203 : i32 to vector<16x16xi32>
    %1413 = arith.cmpi sge, %1411, %1412 : vector<16x16xi32>
    %1414 = arith.andi %1409, %1413 : vector<16x16xi1>
    %c-1_i32_204 = arith.constant -1 : i32
    %1415 = vector.broadcast %c-1_i32_204 : i32 to vector<16x16xi32>
    %1416 = arith.subi %1301, %1415 : vector<16x16xi32>
    %c16_i32_205 = arith.constant 16 : i32
    %1417 = vector.broadcast %c16_i32_205 : i32 to vector<16x16xi32>
    %1418 = arith.cmpi slt, %1416, %1417 : vector<16x16xi32>
    %1419 = arith.andi %1414, %1418 : vector<16x16xi1>
    %cst_206 = arith.constant 0.000000e+00 : f32
    %1420 = vector.broadcast %cst_206 : f32 to vector<16x16xf32>
    %1421 = arith.select %1419, %1287, %1420 : vector<16x16xi1>, vector<16x16xf32>
    %c5_207 = arith.constant 5 : index
    %c0_208 = arith.constant 0 : index
    %c0_209 = arith.constant 0 : index
    %1422 = vector.load %arg6[%c5_207, %c0_208, %c0_209] : memref<9x16x16xf32, #tpu.memory_space<vmem>>, vector<1x16x16xf32>
    %1423 = vector.shape_cast %1422 : vector<1x16x16xf32> to vector<16x16xf32>
    %1424 = vector.shape_cast %1421 : vector<16x16xf32> to vector<1x16x16xf32>
    tpu.vector_store %arg6[%c5_207, %c0_208, %c0_209], %1424 {strides = array<i32>} : memref<9x16x16xf32, #tpu.memory_space<vmem>>, vector<1x16x16xf32>,
    %c-1_i32_210 = arith.constant -1 : i32
    %1425 = vector.broadcast %c-1_i32_210 : i32 to vector<16x16xi32>
    %1426 = arith.subi %1300, %1425 : vector<16x16xi32>
    %c0_i32_211 = arith.constant 0 : i32
    %1427 = vector.broadcast %c0_i32_211 : i32 to vector<16x16xi32>
    %1428 = arith.cmpi sge, %1426, %1427 : vector<16x16xi32>
    %c-1_i32_212 = arith.constant -1 : i32
    %1429 = vector.broadcast %c-1_i32_212 : i32 to vector<16x16xi32>
    %1430 = arith.subi %1300, %1429 : vector<16x16xi32>
    %c16_i32_213 = arith.constant 16 : i32
    %1431 = vector.broadcast %c16_i32_213 : i32 to vector<16x16xi32>
    %1432 = arith.cmpi slt, %1430, %1431 : vector<16x16xi32>
    %1433 = arith.andi %1428, %1432 : vector<16x16xi1>
    %c0_i32_214 = arith.constant 0 : i32
    %1434 = vector.broadcast %c0_i32_214 : i32 to vector<16x16xi32>
    %1435 = arith.subi %1301, %1434 : vector<16x16xi32>
    %c0_i32_215 = arith.constant 0 : i32
    %1436 = vector.broadcast %c0_i32_215 : i32 to vector<16x16xi32>
    %1437 = arith.cmpi sge, %1435, %1436 : vector<16x16xi32>
    %1438 = arith.andi %1433, %1437 : vector<16x16xi1>
    %c0_i32_216 = arith.constant 0 : i32
    %1439 = vector.broadcast %c0_i32_216 : i32 to vector<16x16xi32>
    %1440 = arith.subi %1301, %1439 : vector<16x16xi32>
    %c16_i32_217 = arith.constant 16 : i32
    %1441 = vector.broadcast %c16_i32_217 : i32 to vector<16x16xi32>
    %1442 = arith.cmpi slt, %1440, %1441 : vector<16x16xi32>
    %1443 = arith.andi %1438, %1442 : vector<16x16xi1>
    %cst_218 = arith.constant 0.000000e+00 : f32
    %1444 = vector.broadcast %cst_218 : f32 to vector<16x16xf32>
    %1445 = arith.select %1443, %1288, %1444 : vector<16x16xi1>, vector<16x16xf32>
    %c6_219 = arith.constant 6 : index
    %c0_220 = arith.constant 0 : index
    %c0_221 = arith.constant 0 : index
    %1446 = vector.load %arg6[%c6_219, %c0_220, %c0_221] : memref<9x16x16xf32, #tpu.memory_space<vmem>>, vector<1x16x16xf32>
    %1447 = vector.shape_cast %1446 : vector<1x16x16xf32> to vector<16x16xf32>
    %1448 = vector.shape_cast %1445 : vector<16x16xf32> to vector<1x16x16xf32>
    tpu.vector_store %arg6[%c6_219, %c0_220, %c0_221], %1448 {strides = array<i32>} : memref<9x16x16xf32, #tpu.memory_space<vmem>>, vector<1x16x16xf32>,
    %c-1_i32_222 = arith.constant -1 : i32
    %1449 = vector.broadcast %c-1_i32_222 : i32 to vector<16x16xi32>
    %1450 = arith.subi %1300, %1449 : vector<16x16xi32>
    %c0_i32_223 = arith.constant 0 : i32
    %1451 = vector.broadcast %c0_i32_223 : i32 to vector<16x16xi32>
    %1452 = arith.cmpi sge, %1450, %1451 : vector<16x16xi32>
    %c-1_i32_224 = arith.constant -1 : i32
    %1453 = vector.broadcast %c-1_i32_224 : i32 to vector<16x16xi32>
    %1454 = arith.subi %1300, %1453 : vector<16x16xi32>
    %c16_i32_225 = arith.constant 16 : i32
    %1455 = vector.broadcast %c16_i32_225 : i32 to vector<16x16xi32>
    %1456 = arith.cmpi slt, %1454, %1455 : vector<16x16xi32>
    %1457 = arith.andi %1452, %1456 : vector<16x16xi1>
    %c1_i32_226 = arith.constant 1 : i32
    %1458 = vector.broadcast %c1_i32_226 : i32 to vector<16x16xi32>
    %1459 = arith.subi %1301, %1458 : vector<16x16xi32>
    %c0_i32_227 = arith.constant 0 : i32
    %1460 = vector.broadcast %c0_i32_227 : i32 to vector<16x16xi32>
    %1461 = arith.cmpi sge, %1459, %1460 : vector<16x16xi32>
    %1462 = arith.andi %1457, %1461 : vector<16x16xi1>
    %c1_i32_228 = arith.constant 1 : i32
    %1463 = vector.broadcast %c1_i32_228 : i32 to vector<16x16xi32>
    %1464 = arith.subi %1301, %1463 : vector<16x16xi32>
    %c16_i32_229 = arith.constant 16 : i32
    %1465 = vector.broadcast %c16_i32_229 : i32 to vector<16x16xi32>
    %1466 = arith.cmpi slt, %1464, %1465 : vector<16x16xi32>
    %1467 = arith.andi %1462, %1466 : vector<16x16xi1>
    %cst_230 = arith.constant 0.000000e+00 : f32
    %1468 = vector.broadcast %cst_230 : f32 to vector<16x16xf32>
    %1469 = arith.select %1467, %1289, %1468 : vector<16x16xi1>, vector<16x16xf32>
    %c7_231 = arith.constant 7 : index
    %c0_232 = arith.constant 0 : index
    %c0_233 = arith.constant 0 : index
    %1470 = vector.load %arg6[%c7_231, %c0_232, %c0_233] : memref<9x16x16xf32, #tpu.memory_space<vmem>>, vector<1x16x16xf32>
    %1471 = vector.shape_cast %1470 : vector<1x16x16xf32> to vector<16x16xf32>
    %1472 = vector.shape_cast %1469 : vector<16x16xf32> to vector<1x16x16xf32>
    tpu.vector_store %arg6[%c7_231, %c0_232, %c0_233], %1472 {strides = array<i32>} : memref<9x16x16xf32, #tpu.memory_space<vmem>>, vector<1x16x16xf32>,
    %c-1_i32_234 = arith.constant -1 : i32
    %1473 = vector.broadcast %c-1_i32_234 : i32 to vector<16x16xi32>
    %1474 = arith.subi %1300, %1473 : vector<16x16xi32>
    %c0_i32_235 = arith.constant 0 : i32
    %1475 = vector.broadcast %c0_i32_235 : i32 to vector<16x16xi32>
    %1476 = arith.cmpi sge, %1474, %1475 : vector<16x16xi32>
    %c-1_i32_236 = arith.constant -1 : i32
    %1477 = vector.broadcast %c-1_i32_236 : i32 to vector<16x16xi32>
    %1478 = arith.subi %1300, %1477 : vector<16x16xi32>
    %c16_i32_237 = arith.constant 16 : i32
    %1479 = vector.broadcast %c16_i32_237 : i32 to vector<16x16xi32>
    %1480 = arith.cmpi slt, %1478, %1479 : vector<16x16xi32>
    %1481 = arith.andi %1476, %1480 : vector<16x16xi1>
    %c-1_i32_238 = arith.constant -1 : i32
    %1482 = vector.broadcast %c-1_i32_238 : i32 to vector<16x16xi32>
    %1483 = arith.subi %1301, %1482 : vector<16x16xi32>
    %c0_i32_239 = arith.constant 0 : i32
    %1484 = vector.broadcast %c0_i32_239 : i32 to vector<16x16xi32>
    %1485 = arith.cmpi sge, %1483, %1484 : vector<16x16xi32>
    %1486 = arith.andi %1481, %1485 : vector<16x16xi1>
    %c-1_i32_240 = arith.constant -1 : i32
    %1487 = vector.broadcast %c-1_i32_240 : i32 to vector<16x16xi32>
    %1488 = arith.subi %1301, %1487 : vector<16x16xi32>
    %c16_i32_241 = arith.constant 16 : i32
    %1489 = vector.broadcast %c16_i32_241 : i32 to vector<16x16xi32>
    %1490 = arith.cmpi slt, %1488, %1489 : vector<16x16xi32>
    %1491 = arith.andi %1486, %1490 : vector<16x16xi1>
    %cst_242 = arith.constant 0.000000e+00 : f32
    %1492 = vector.broadcast %cst_242 : f32 to vector<16x16xf32>
    %1493 = arith.select %1491, %1290, %1492 : vector<16x16xi1>, vector<16x16xf32>
    %c8_243 = arith.constant 8 : index
    %c0_244 = arith.constant 0 : index
    %c0_245 = arith.constant 0 : index
    %1494 = vector.load %arg6[%c8_243, %c0_244, %c0_245] : memref<9x16x16xf32, #tpu.memory_space<vmem>>, vector<1x16x16xf32>
    %1495 = vector.shape_cast %1494 : vector<1x16x16xf32> to vector<16x16xf32>
    %1496 = vector.shape_cast %1493 : vector<16x16xf32> to vector<1x16x16xf32>
    tpu.vector_store %arg6[%c8_243, %c0_244, %c0_245], %1496 {strides = array<i32>} : memref<9x16x16xf32, #tpu.memory_space<vmem>>, vector<1x16x16xf32>,
    %c0_246 = arith.constant 0 : index
    %c0_247 = arith.constant 0 : index
    %c0_248 = arith.constant 0 : index
    %c0_249 = arith.constant 0 : index
    %1497 = vector.load %arg1[%c0_246, %c0_247, %c0_248, %c0_249] : memref<1x4x16x16xf32, #tpu.memory_space<vmem>>, vector<1x1x16x16xf32>
    %1498 = vector.shape_cast %1497 : vector<1x1x16x16xf32> to vector<16x16xf32>
    %c0_250 = arith.constant 0 : index
    %c0_251 = arith.constant 0 : index
    %1499 = vector.load %arg7[%c0_250, %c0_251] : memref<16x16xf32, #tpu.memory_space<vmem>>, vector<16x16xf32>
    tpu.vector_store %arg7[%c0_250, %c0_251], %1498 {strides = array<i32>} : memref<16x16xf32, #tpu.memory_space<vmem>>, vector<16x16xf32>,
    %c0_i32_252 = arith.constant 0 : i32
    %c0_253 = arith.constant 0 : index
    %c0_254 = arith.constant 0 : index
    %1500 = vector.load %arg7[%c0_253, %c0_254] : memref<16x16xf32, #tpu.memory_space<vmem>>, vector<16x16xf32>
    %c0_255 = arith.constant 0 : index
    %c0_256 = arith.constant 0 : index
    %c0_257 = arith.constant 0 : index
    %1501 = vector.load %arg6[%c0_255, %c0_256, %c0_257] : memref<9x16x16xf32, #tpu.memory_space<vmem>>, vector<1x16x16xf32>
    %1502 = vector.shape_cast %1501 : vector<1x16x16xf32> to vector<16x16xf32>
    %1503 = arith.mulf %1502, %1500 : vector<16x16xf32>
    %c1_258 = arith.constant 1 : index
    %c0_259 = arith.constant 0 : index
    %c0_260 = arith.constant 0 : index
    %1504 = vector.load %arg6[%c1_258, %c0_259, %c0_260] : memref<9x16x16xf32, #tpu.memory_space<vmem>>, vector<1x16x16xf32>
    %1505 = vector.shape_cast %1504 : vector<1x16x16xf32> to vector<16x16xf32>
    %1506 = vector.extract_strided_slice %1500 {offsets = [0, 15], sizes = [16, 1], strides = [1, 1]} : vector<16x16xf32> to vector<16x1xf32>
    %1507 = vector.extract_strided_slice %1500 {offsets = [0, 0], sizes = [16, 15], strides = [1, 1]} : vector<16x16xf32> to vector<16x15xf32>
    %1508 = tpu.concatenate %1506, %1507 in 1 : vector<16x1xf32>, vector<16x15xf32> -> vector<16x16xf32>
    %1509 = arith.mulf %1505, %1508 : vector<16x16xf32>
    %1510 = arith.addf %1503, %1509 : vector<16x16xf32>
    %c2_261 = arith.constant 2 : index
    %c0_262 = arith.constant 0 : index
    %c0_263 = arith.constant 0 : index
    %1511 = vector.load %arg6[%c2_261, %c0_262, %c0_263] : memref<9x16x16xf32, #tpu.memory_space<vmem>>, vector<1x16x16xf32>
    %1512 = vector.shape_cast %1511 : vector<1x16x16xf32> to vector<16x16xf32>
    %1513 = vector.extract_strided_slice %1500 {offsets = [0, 1], sizes = [16, 15], strides = [1, 1]} : vector<16x16xf32> to vector<16x15xf32>
    %1514 = vector.extract_strided_slice %1500 {offsets = [0, 0], sizes = [16, 1], strides = [1, 1]} : vector<16x16xf32> to vector<16x1xf32>
    %1515 = tpu.concatenate %1513, %1514 in 1 : vector<16x15xf32>, vector<16x1xf32> -> vector<16x16xf32>
    %1516 = arith.mulf %1512, %1515 : vector<16x16xf32>
    %1517 = arith.addf %1510, %1516 : vector<16x16xf32>
    %c3_264 = arith.constant 3 : index
    %c0_265 = arith.constant 0 : index
    %c0_266 = arith.constant 0 : index
    %1518 = vector.load %arg6[%c3_264, %c0_265, %c0_266] : memref<9x16x16xf32, #tpu.memory_space<vmem>>, vector<1x16x16xf32>
    %1519 = vector.shape_cast %1518 : vector<1x16x16xf32> to vector<16x16xf32>
    %1520 = vector.extract_strided_slice %1500 {offsets = [15, 0], sizes = [1, 16], strides = [1, 1]} : vector<16x16xf32> to vector<1x16xf32>
    %1521 = vector.extract_strided_slice %1500 {offsets = [0, 0], sizes = [15, 16], strides = [1, 1]} : vector<16x16xf32> to vector<15x16xf32>
    %1522 = tpu.concatenate %1520, %1521 in 0 : vector<1x16xf32>, vector<15x16xf32> -> vector<16x16xf32>
    %1523 = arith.mulf %1519, %1522 : vector<16x16xf32>
    %1524 = arith.addf %1517, %1523 : vector<16x16xf32>
    %c4_267 = arith.constant 4 : index
    %c0_268 = arith.constant 0 : index
    %c0_269 = arith.constant 0 : index
    %1525 = vector.load %arg6[%c4_267, %c0_268, %c0_269] : memref<9x16x16xf32, #tpu.memory_space<vmem>>, vector<1x16x16xf32>
    %1526 = vector.shape_cast %1525 : vector<1x16x16xf32> to vector<16x16xf32>
    %1527 = vector.extract_strided_slice %1500 {offsets = [15, 0], sizes = [1, 16], strides = [1, 1]} : vector<16x16xf32> to vector<1x16xf32>
    %1528 = vector.extract_strided_slice %1500 {offsets = [0, 0], sizes = [15, 16], strides = [1, 1]} : vector<16x16xf32> to vector<15x16xf32>
    %1529 = tpu.concatenate %1527, %1528 in 0 : vector<1x16xf32>, vector<15x16xf32> -> vector<16x16xf32>
    %1530 = vector.extract_strided_slice %1529 {offsets = [0, 15], sizes = [16, 1], strides = [1, 1]} : vector<16x16xf32> to vector<16x1xf32>
    %1531 = vector.extract_strided_slice %1529 {offsets = [0, 0], sizes = [16, 15], strides = [1, 1]} : vector<16x16xf32> to vector<16x15xf32>
    %1532 = tpu.concatenate %1530, %1531 in 1 : vector<16x1xf32>, vector<16x15xf32> -> vector<16x16xf32>
    %1533 = arith.mulf %1526, %1532 : vector<16x16xf32>
    %1534 = arith.addf %1524, %1533 : vector<16x16xf32>
    %c5_270 = arith.constant 5 : index
    %c0_271 = arith.constant 0 : index
    %c0_272 = arith.constant 0 : index
    %1535 = vector.load %arg6[%c5_270, %c0_271, %c0_272] : memref<9x16x16xf32, #tpu.memory_space<vmem>>, vector<1x16x16xf32>
    %1536 = vector.shape_cast %1535 : vector<1x16x16xf32> to vector<16x16xf32>
    %1537 = vector.extract_strided_slice %1500 {offsets = [15, 0], sizes = [1, 16], strides = [1, 1]} : vector<16x16xf32> to vector<1x16xf32>
    %1538 = vector.extract_strided_slice %1500 {offsets = [0, 0], sizes = [15, 16], strides = [1, 1]} : vector<16x16xf32> to vector<15x16xf32>
    %1539 = tpu.concatenate %1537, %1538 in 0 : vector<1x16xf32>, vector<15x16xf32> -> vector<16x16xf32>
    %1540 = vector.extract_strided_slice %1539 {offsets = [0, 1], sizes = [16, 15], strides = [1, 1]} : vector<16x16xf32> to vector<16x15xf32>
    %1541 = vector.extract_strided_slice %1539 {offsets = [0, 0], sizes = [16, 1], strides = [1, 1]} : vector<16x16xf32> to vector<16x1xf32>
    %1542 = tpu.concatenate %1540, %1541 in 1 : vector<16x15xf32>, vector<16x1xf32> -> vector<16x16xf32>
    %1543 = arith.mulf %1536, %1542 : vector<16x16xf32>
    %1544 = arith.addf %1534, %1543 : vector<16x16xf32>
    %c6_273 = arith.constant 6 : index
    %c0_274 = arith.constant 0 : index
    %c0_275 = arith.constant 0 : index
    %1545 = vector.load %arg6[%c6_273, %c0_274, %c0_275] : memref<9x16x16xf32, #tpu.memory_space<vmem>>, vector<1x16x16xf32>
    %1546 = vector.shape_cast %1545 : vector<1x16x16xf32> to vector<16x16xf32>
    %1547 = vector.extract_strided_slice %1500 {offsets = [1, 0], sizes = [15, 16], strides = [1, 1]} : vector<16x16xf32> to vector<15x16xf32>
    %1548 = vector.extract_strided_slice %1500 {offsets = [0, 0], sizes = [1, 16], strides = [1, 1]} : vector<16x16xf32> to vector<1x16xf32>
    %1549 = tpu.concatenate %1547, %1548 in 0 : vector<15x16xf32>, vector<1x16xf32> -> vector<16x16xf32>
    %1550 = arith.mulf %1546, %1549 : vector<16x16xf32>
    %1551 = arith.addf %1544, %1550 : vector<16x16xf32>
    %c7_276 = arith.constant 7 : index
    %c0_277 = arith.constant 0 : index
    %c0_278 = arith.constant 0 : index
    %1552 = vector.load %arg6[%c7_276, %c0_277, %c0_278] : memref<9x16x16xf32, #tpu.memory_space<vmem>>, vector<1x16x16xf32>
    %1553 = vector.shape_cast %1552 : vector<1x16x16xf32> to vector<16x16xf32>
    %1554 = vector.extract_strided_slice %1500 {offsets = [1, 0], sizes = [15, 16], strides = [1, 1]} : vector<16x16xf32> to vector<15x16xf32>
    %1555 = vector.extract_strided_slice %1500 {offsets = [0, 0], sizes = [1, 16], strides = [1, 1]} : vector<16x16xf32> to vector<1x16xf32>
    %1556 = tpu.concatenate %1554, %1555 in 0 : vector<15x16xf32>, vector<1x16xf32> -> vector<16x16xf32>
    %1557 = vector.extract_strided_slice %1556 {offsets = [0, 15], sizes = [16, 1], strides = [1, 1]} : vector<16x16xf32> to vector<16x1xf32>
    %1558 = vector.extract_strided_slice %1556 {offsets = [0, 0], sizes = [16, 15], strides = [1, 1]} : vector<16x16xf32> to vector<16x15xf32>
    %1559 = tpu.concatenate %1557, %1558 in 1 : vector<16x1xf32>, vector<16x15xf32> -> vector<16x16xf32>
    %1560 = arith.mulf %1553, %1559 : vector<16x16xf32>
    %1561 = arith.addf %1551, %1560 : vector<16x16xf32>
    %c8_279 = arith.constant 8 : index
    %c0_280 = arith.constant 0 : index
    %c0_281 = arith.constant 0 : index
    %1562 = vector.load %arg6[%c8_279, %c0_280, %c0_281] : memref<9x16x16xf32, #tpu.memory_space<vmem>>, vector<1x16x16xf32>
    %1563 = vector.shape_cast %1562 : vector<1x16x16xf32> to vector<16x16xf32>
    %1564 = vector.extract_strided_slice %1500 {offsets = [1, 0], sizes = [15, 16], strides = [1, 1]} : vector<16x16xf32> to vector<15x16xf32>
    %1565 = vector.extract_strided_slice %1500 {offsets = [0, 0], sizes = [1, 16], strides = [1, 1]} : vector<16x16xf32> to vector<1x16xf32>
    %1566 = tpu.concatenate %1564, %1565 in 0 : vector<15x16xf32>, vector<1x16xf32> -> vector<16x16xf32>
    %1567 = vector.extract_strided_slice %1566 {offsets = [0, 1], sizes = [16, 15], strides = [1, 1]} : vector<16x16xf32> to vector<16x15xf32>
    %1568 = vector.extract_strided_slice %1566 {offsets = [0, 0], sizes = [16, 1], strides = [1, 1]} : vector<16x16xf32> to vector<16x1xf32>
    %1569 = tpu.concatenate %1567, %1568 in 1 : vector<16x15xf32>, vector<16x1xf32> -> vector<16x16xf32>
    %1570 = arith.mulf %1563, %1569 : vector<16x16xf32>
    %1571 = arith.addf %1561, %1570 : vector<16x16xf32>
    %c0_282 = arith.constant 0 : index
    %c0_283 = arith.constant 0 : index
    %1572 = vector.load %arg7[%c0_282, %c0_283] : memref<16x16xf32, #tpu.memory_space<vmem>>, vector<16x16xf32>
    tpu.vector_store %arg7[%c0_282, %c0_283], %1571 {strides = array<i32>} : memref<16x16xf32, #tpu.memory_space<vmem>>, vector<16x16xf32>,
    %c1_i32_284 = arith.constant 1 : i32
    %c0_285 = arith.constant 0 : index
    %c0_286 = arith.constant 0 : index
    %1573 = vector.load %arg7[%c0_285, %c0_286] : memref<16x16xf32, #tpu.memory_space<vmem>>, vector<16x16xf32>
    %c0_287 = arith.constant 0 : index
    %c0_288 = arith.constant 0 : index
    %c0_289 = arith.constant 0 : index
    %1574 = vector.load %arg6[%c0_287, %c0_288, %c0_289] : memref<9x16x16xf32, #tpu.memory_space<vmem>>, vector<1x16x16xf32>
    %1575 = vector.shape_cast %1574 : vector<1x16x16xf32> to vector<16x16xf32>
    %1576 = arith.mulf %1575, %1573 : vector<16x16xf32>
    %c1_290 = arith.constant 1 : index
    %c0_291 = arith.constant 0 : index
    %c0_292 = arith.constant 0 : index
    %1577 = vector.load %arg6[%c1_290, %c0_291, %c0_292] : memref<9x16x16xf32, #tpu.memory_space<vmem>>, vector<1x16x16xf32>
    %1578 = vector.shape_cast %1577 : vector<1x16x16xf32> to vector<16x16xf32>
    %1579 = vector.extract_strided_slice %1573 {offsets = [0, 15], sizes = [16, 1], strides = [1, 1]} : vector<16x16xf32> to vector<16x1xf32>
    %1580 = vector.extract_strided_slice %1573 {offsets = [0, 0], sizes = [16, 15], strides = [1, 1]} : vector<16x16xf32> to vector<16x15xf32>
    %1581 = tpu.concatenate %1579, %1580 in 1 : vector<16x1xf32>, vector<16x15xf32> -> vector<16x16xf32>
    %1582 = arith.mulf %1578, %1581 : vector<16x16xf32>
    %1583 = arith.addf %1576, %1582 : vector<16x16xf32>
    %c2_293 = arith.constant 2 : index
    %c0_294 = arith.constant 0 : index
    %c0_295 = arith.constant 0 : index
    %1584 = vector.load %arg6[%c2_293, %c0_294, %c0_295] : memref<9x16x16xf32, #tpu.memory_space<vmem>>, vector<1x16x16xf32>
    %1585 = vector.shape_cast %1584 : vector<1x16x16xf32> to vector<16x16xf32>
    %1586 = vector.extract_strided_slice %1573 {offsets = [0, 1], sizes = [16, 15], strides = [1, 1]} : vector<16x16xf32> to vector<16x15xf32>
    %1587 = vector.extract_strided_slice %1573 {offsets = [0, 0], sizes = [16, 1], strides = [1, 1]} : vector<16x16xf32> to vector<16x1xf32>
    %1588 = tpu.concatenate %1586, %1587 in 1 : vector<16x15xf32>, vector<16x1xf32> -> vector<16x16xf32>
    %1589 = arith.mulf %1585, %1588 : vector<16x16xf32>
    %1590 = arith.addf %1583, %1589 : vector<16x16xf32>
    %c3_296 = arith.constant 3 : index
    %c0_297 = arith.constant 0 : index
    %c0_298 = arith.constant 0 : index
    %1591 = vector.load %arg6[%c3_296, %c0_297, %c0_298] : memref<9x16x16xf32, #tpu.memory_space<vmem>>, vector<1x16x16xf32>
    %1592 = vector.shape_cast %1591 : vector<1x16x16xf32> to vector<16x16xf32>
    %1593 = vector.extract_strided_slice %1573 {offsets = [15, 0], sizes = [1, 16], strides = [1, 1]} : vector<16x16xf32> to vector<1x16xf32>
    %1594 = vector.extract_strided_slice %1573 {offsets = [0, 0], sizes = [15, 16], strides = [1, 1]} : vector<16x16xf32> to vector<15x16xf32>
    %1595 = tpu.concatenate %1593, %1594 in 0 : vector<1x16xf32>, vector<15x16xf32> -> vector<16x16xf32>
    %1596 = arith.mulf %1592, %1595 : vector<16x16xf32>
    %1597 = arith.addf %1590, %1596 : vector<16x16xf32>
    %c4_299 = arith.constant 4 : index
    %c0_300 = arith.constant 0 : index
    %c0_301 = arith.constant 0 : index
    %1598 = vector.load %arg6[%c4_299, %c0_300, %c0_301] : memref<9x16x16xf32, #tpu.memory_space<vmem>>, vector<1x16x16xf32>
    %1599 = vector.shape_cast %1598 : vector<1x16x16xf32> to vector<16x16xf32>
    %1600 = vector.extract_strided_slice %1573 {offsets = [15, 0], sizes = [1, 16], strides = [1, 1]} : vector<16x16xf32> to vector<1x16xf32>
    %1601 = vector.extract_strided_slice %1573 {offsets = [0, 0], sizes = [15, 16], strides = [1, 1]} : vector<16x16xf32> to vector<15x16xf32>
    %1602 = tpu.concatenate %1600, %1601 in 0 : vector<1x16xf32>, vector<15x16xf32> -> vector<16x16xf32>
    %1603 = vector.extract_strided_slice %1602 {offsets = [0, 15], sizes = [16, 1], strides = [1, 1]} : vector<16x16xf32> to vector<16x1xf32>
    %1604 = vector.extract_strided_slice %1602 {offsets = [0, 0], sizes = [16, 15], strides = [1, 1]} : vector<16x16xf32> to vector<16x15xf32>
    %1605 = tpu.concatenate %1603, %1604 in 1 : vector<16x1xf32>, vector<16x15xf32> -> vector<16x16xf32>
    %1606 = arith.mulf %1599, %1605 : vector<16x16xf32>
    %1607 = arith.addf %1597, %1606 : vector<16x16xf32>
    %c5_302 = arith.constant 5 : index
    %c0_303 = arith.constant 0 : index
    %c0_304 = arith.constant 0 : index
    %1608 = vector.load %arg6[%c5_302, %c0_303, %c0_304] : memref<9x16x16xf32, #tpu.memory_space<vmem>>, vector<1x16x16xf32>
    %1609 = vector.shape_cast %1608 : vector<1x16x16xf32> to vector<16x16xf32>
    %1610 = vector.extract_strided_slice %1573 {offsets = [15, 0], sizes = [1, 16], strides = [1, 1]} : vector<16x16xf32> to vector<1x16xf32>
    %1611 = vector.extract_strided_slice %1573 {offsets = [0, 0], sizes = [15, 16], strides = [1, 1]} : vector<16x16xf32> to vector<15x16xf32>
    %1612 = tpu.concatenate %1610, %1611 in 0 : vector<1x16xf32>, vector<15x16xf32> -> vector<16x16xf32>
    %1613 = vector.extract_strided_slice %1612 {offsets = [0, 1], sizes = [16, 15], strides = [1, 1]} : vector<16x16xf32> to vector<16x15xf32>
    %1614 = vector.extract_strided_slice %1612 {offsets = [0, 0], sizes = [16, 1], strides = [1, 1]} : vector<16x16xf32> to vector<16x1xf32>
    %1615 = tpu.concatenate %1613, %1614 in 1 : vector<16x15xf32>, vector<16x1xf32> -> vector<16x16xf32>
    %1616 = arith.mulf %1609, %1615 : vector<16x16xf32>
    %1617 = arith.addf %1607, %1616 : vector<16x16xf32>
    %c6_305 = arith.constant 6 : index
    %c0_306 = arith.constant 0 : index
    %c0_307 = arith.constant 0 : index
    %1618 = vector.load %arg6[%c6_305, %c0_306, %c0_307] : memref<9x16x16xf32, #tpu.memory_space<vmem>>, vector<1x16x16xf32>
    %1619 = vector.shape_cast %1618 : vector<1x16x16xf32> to vector<16x16xf32>
    %1620 = vector.extract_strided_slice %1573 {offsets = [1, 0], sizes = [15, 16], strides = [1, 1]} : vector<16x16xf32> to vector<15x16xf32>
    %1621 = vector.extract_strided_slice %1573 {offsets = [0, 0], sizes = [1, 16], strides = [1, 1]} : vector<16x16xf32> to vector<1x16xf32>
    %1622 = tpu.concatenate %1620, %1621 in 0 : vector<15x16xf32>, vector<1x16xf32> -> vector<16x16xf32>
    %1623 = arith.mulf %1619, %1622 : vector<16x16xf32>
    %1624 = arith.addf %1617, %1623 : vector<16x16xf32>
    %c7_308 = arith.constant 7 : index
    %c0_309 = arith.constant 0 : index
    %c0_310 = arith.constant 0 : index
    %1625 = vector.load %arg6[%c7_308, %c0_309, %c0_310] : memref<9x16x16xf32, #tpu.memory_space<vmem>>, vector<1x16x16xf32>
    %1626 = vector.shape_cast %1625 : vector<1x16x16xf32> to vector<16x16xf32>
    %1627 = vector.extract_strided_slice %1573 {offsets = [1, 0], sizes = [15, 16], strides = [1, 1]} : vector<16x16xf32> to vector<15x16xf32>
    %1628 = vector.extract_strided_slice %1573 {offsets = [0, 0], sizes = [1, 16], strides = [1, 1]} : vector<16x16xf32> to vector<1x16xf32>
    %1629 = tpu.concatenate %1627, %1628 in 0 : vector<15x16xf32>, vector<1x16xf32> -> vector<16x16xf32>
    %1630 = vector.extract_strided_slice %1629 {offsets = [0, 15], sizes = [16, 1], strides = [1, 1]} : vector<16x16xf32> to vector<16x1xf32>
    %1631 = vector.extract_strided_slice %1629 {offsets = [0, 0], sizes = [16, 15], strides = [1, 1]} : vector<16x16xf32> to vector<16x15xf32>
    %1632 = tpu.concatenate %1630, %1631 in 1 : vector<16x1xf32>, vector<16x15xf32> -> vector<16x16xf32>
    %1633 = arith.mulf %1626, %1632 : vector<16x16xf32>
    %1634 = arith.addf %1624, %1633 : vector<16x16xf32>
    %c8_311 = arith.constant 8 : index
    %c0_312 = arith.constant 0 : index
    %c0_313 = arith.constant 0 : index
    %1635 = vector.load %arg6[%c8_311, %c0_312, %c0_313] : memref<9x16x16xf32, #tpu.memory_space<vmem>>, vector<1x16x16xf32>
    %1636 = vector.shape_cast %1635 : vector<1x16x16xf32> to vector<16x16xf32>
    %1637 = vector.extract_strided_slice %1573 {offsets = [1, 0], sizes = [15, 16], strides = [1, 1]} : vector<16x16xf32> to vector<15x16xf32>
    %1638 = vector.extract_strided_slice %1573 {offsets = [0, 0], sizes = [1, 16], strides = [1, 1]} : vector<16x16xf32> to vector<1x16xf32>
    %1639 = tpu.concatenate %1637, %1638 in 0 : vector<15x16xf32>, vector<1x16xf32> -> vector<16x16xf32>
    %1640 = vector.extract_strided_slice %1639 {offsets = [0, 1], sizes = [16, 15], strides = [1, 1]} : vector<16x16xf32> to vector<16x15xf32>
    %1641 = vector.extract_strided_slice %1639 {offsets = [0, 0], sizes = [16, 1], strides = [1, 1]} : vector<16x16xf32> to vector<16x1xf32>
    %1642 = tpu.concatenate %1640, %1641 in 1 : vector<16x15xf32>, vector<16x1xf32> -> vector<16x16xf32>
    %1643 = arith.mulf %1636, %1642 : vector<16x16xf32>
    %1644 = arith.addf %1634, %1643 : vector<16x16xf32>
    %c0_314 = arith.constant 0 : index
    %c0_315 = arith.constant 0 : index
    %1645 = vector.load %arg7[%c0_314, %c0_315] : memref<16x16xf32, #tpu.memory_space<vmem>>, vector<16x16xf32>
    tpu.vector_store %arg7[%c0_314, %c0_315], %1644 {strides = array<i32>} : memref<16x16xf32, #tpu.memory_space<vmem>>, vector<16x16xf32>,
    %c2_i32 = arith.constant 2 : i32
    %c0_316 = arith.constant 0 : index
    %c0_317 = arith.constant 0 : index
    %1646 = vector.load %arg7[%c0_316, %c0_317] : memref<16x16xf32, #tpu.memory_space<vmem>>, vector<16x16xf32>
    %c0_318 = arith.constant 0 : index
    %c0_319 = arith.constant 0 : index
    %c0_320 = arith.constant 0 : index
    %1647 = vector.load %arg6[%c0_318, %c0_319, %c0_320] : memref<9x16x16xf32, #tpu.memory_space<vmem>>, vector<1x16x16xf32>
    %1648 = vector.shape_cast %1647 : vector<1x16x16xf32> to vector<16x16xf32>
    %1649 = arith.mulf %1648, %1646 : vector<16x16xf32>
    %c1_321 = arith.constant 1 : index
    %c0_322 = arith.constant 0 : index
    %c0_323 = arith.constant 0 : index
    %1650 = vector.load %arg6[%c1_321, %c0_322, %c0_323] : memref<9x16x16xf32, #tpu.memory_space<vmem>>, vector<1x16x16xf32>
    %1651 = vector.shape_cast %1650 : vector<1x16x16xf32> to vector<16x16xf32>
    %1652 = vector.extract_strided_slice %1646 {offsets = [0, 15], sizes = [16, 1], strides = [1, 1]} : vector<16x16xf32> to vector<16x1xf32>
    %1653 = vector.extract_strided_slice %1646 {offsets = [0, 0], sizes = [16, 15], strides = [1, 1]} : vector<16x16xf32> to vector<16x15xf32>
    %1654 = tpu.concatenate %1652, %1653 in 1 : vector<16x1xf32>, vector<16x15xf32> -> vector<16x16xf32>
    %1655 = arith.mulf %1651, %1654 : vector<16x16xf32>
    %1656 = arith.addf %1649, %1655 : vector<16x16xf32>
    %c2_324 = arith.constant 2 : index
    %c0_325 = arith.constant 0 : index
    %c0_326 = arith.constant 0 : index
    %1657 = vector.load %arg6[%c2_324, %c0_325, %c0_326] : memref<9x16x16xf32, #tpu.memory_space<vmem>>, vector<1x16x16xf32>
    %1658 = vector.shape_cast %1657 : vector<1x16x16xf32> to vector<16x16xf32>
    %1659 = vector.extract_strided_slice %1646 {offsets = [0, 1], sizes = [16, 15], strides = [1, 1]} : vector<16x16xf32> to vector<16x15xf32>
    %1660 = vector.extract_strided_slice %1646 {offsets = [0, 0], sizes = [16, 1], strides = [1, 1]} : vector<16x16xf32> to vector<16x1xf32>
    %1661 = tpu.concatenate %1659, %1660 in 1 : vector<16x15xf32>, vector<16x1xf32> -> vector<16x16xf32>
    %1662 = arith.mulf %1658, %1661 : vector<16x16xf32>
    %1663 = arith.addf %1656, %1662 : vector<16x16xf32>
    %c3_327 = arith.constant 3 : index
    %c0_328 = arith.constant 0 : index
    %c0_329 = arith.constant 0 : index
    %1664 = vector.load %arg6[%c3_327, %c0_328, %c0_329] : memref<9x16x16xf32, #tpu.memory_space<vmem>>, vector<1x16x16xf32>
    %1665 = vector.shape_cast %1664 : vector<1x16x16xf32> to vector<16x16xf32>
    %1666 = vector.extract_strided_slice %1646 {offsets = [15, 0], sizes = [1, 16], strides = [1, 1]} : vector<16x16xf32> to vector<1x16xf32>
    %1667 = vector.extract_strided_slice %1646 {offsets = [0, 0], sizes = [15, 16], strides = [1, 1]} : vector<16x16xf32> to vector<15x16xf32>
    %1668 = tpu.concatenate %1666, %1667 in 0 : vector<1x16xf32>, vector<15x16xf32> -> vector<16x16xf32>
    %1669 = arith.mulf %1665, %1668 : vector<16x16xf32>
    %1670 = arith.addf %1663, %1669 : vector<16x16xf32>
    %c4_330 = arith.constant 4 : index
    %c0_331 = arith.constant 0 : index
    %c0_332 = arith.constant 0 : index
    %1671 = vector.load %arg6[%c4_330, %c0_331, %c0_332] : memref<9x16x16xf32, #tpu.memory_space<vmem>>, vector<1x16x16xf32>
    %1672 = vector.shape_cast %1671 : vector<1x16x16xf32> to vector<16x16xf32>
    %1673 = vector.extract_strided_slice %1646 {offsets = [15, 0], sizes = [1, 16], strides = [1, 1]} : vector<16x16xf32> to vector<1x16xf32>
    %1674 = vector.extract_strided_slice %1646 {offsets = [0, 0], sizes = [15, 16], strides = [1, 1]} : vector<16x16xf32> to vector<15x16xf32>
    %1675 = tpu.concatenate %1673, %1674 in 0 : vector<1x16xf32>, vector<15x16xf32> -> vector<16x16xf32>
    %1676 = vector.extract_strided_slice %1675 {offsets = [0, 15], sizes = [16, 1], strides = [1, 1]} : vector<16x16xf32> to vector<16x1xf32>
    %1677 = vector.extract_strided_slice %1675 {offsets = [0, 0], sizes = [16, 15], strides = [1, 1]} : vector<16x16xf32> to vector<16x15xf32>
    %1678 = tpu.concatenate %1676, %1677 in 1 : vector<16x1xf32>, vector<16x15xf32> -> vector<16x16xf32>
    %1679 = arith.mulf %1672, %1678 : vector<16x16xf32>
    %1680 = arith.addf %1670, %1679 : vector<16x16xf32>
    %c5_333 = arith.constant 5 : index
    %c0_334 = arith.constant 0 : index
    %c0_335 = arith.constant 0 : index
    %1681 = vector.load %arg6[%c5_333, %c0_334, %c0_335] : memref<9x16x16xf32, #tpu.memory_space<vmem>>, vector<1x16x16xf32>
    %1682 = vector.shape_cast %1681 : vector<1x16x16xf32> to vector<16x16xf32>
    %1683 = vector.extract_strided_slice %1646 {offsets = [15, 0], sizes = [1, 16], strides = [1, 1]} : vector<16x16xf32> to vector<1x16xf32>
    %1684 = vector.extract_strided_slice %1646 {offsets = [0, 0], sizes = [15, 16], strides = [1, 1]} : vector<16x16xf32> to vector<15x16xf32>
    %1685 = tpu.concatenate %1683, %1684 in 0 : vector<1x16xf32>, vector<15x16xf32> -> vector<16x16xf32>
    %1686 = vector.extract_strided_slice %1685 {offsets = [0, 1], sizes = [16, 15], strides = [1, 1]} : vector<16x16xf32> to vector<16x15xf32>
    %1687 = vector.extract_strided_slice %1685 {offsets = [0, 0], sizes = [16, 1], strides = [1, 1]} : vector<16x16xf32> to vector<16x1xf32>
    %1688 = tpu.concatenate %1686, %1687 in 1 : vector<16x15xf32>, vector<16x1xf32> -> vector<16x16xf32>
    %1689 = arith.mulf %1682, %1688 : vector<16x16xf32>
    %1690 = arith.addf %1680, %1689 : vector<16x16xf32>
    %c6_336 = arith.constant 6 : index
    %c0_337 = arith.constant 0 : index
    %c0_338 = arith.constant 0 : index
    %1691 = vector.load %arg6[%c6_336, %c0_337, %c0_338] : memref<9x16x16xf32, #tpu.memory_space<vmem>>, vector<1x16x16xf32>
    %1692 = vector.shape_cast %1691 : vector<1x16x16xf32> to vector<16x16xf32>
    %1693 = vector.extract_strided_slice %1646 {offsets = [1, 0], sizes = [15, 16], strides = [1, 1]} : vector<16x16xf32> to vector<15x16xf32>
    %1694 = vector.extract_strided_slice %1646 {offsets = [0, 0], sizes = [1, 16], strides = [1, 1]} : vector<16x16xf32> to vector<1x16xf32>
    %1695 = tpu.concatenate %1693, %1694 in 0 : vector<15x16xf32>, vector<1x16xf32> -> vector<16x16xf32>
    %1696 = arith.mulf %1692, %1695 : vector<16x16xf32>
    %1697 = arith.addf %1690, %1696 : vector<16x16xf32>
    %c7_339 = arith.constant 7 : index
    %c0_340 = arith.constant 0 : index
    %c0_341 = arith.constant 0 : index
    %1698 = vector.load %arg6[%c7_339, %c0_340, %c0_341] : memref<9x16x16xf32, #tpu.memory_space<vmem>>, vector<1x16x16xf32>
    %1699 = vector.shape_cast %1698 : vector<1x16x16xf32> to vector<16x16xf32>
    %1700 = vector.extract_strided_slice %1646 {offsets = [1, 0], sizes = [15, 16], strides = [1, 1]} : vector<16x16xf32> to vector<15x16xf32>
    %1701 = vector.extract_strided_slice %1646 {offsets = [0, 0], sizes = [1, 16], strides = [1, 1]} : vector<16x16xf32> to vector<1x16xf32>
    %1702 = tpu.concatenate %1700, %1701 in 0 : vector<15x16xf32>, vector<1x16xf32> -> vector<16x16xf32>
    %1703 = vector.extract_strided_slice %1702 {offsets = [0, 15], sizes = [16, 1], strides = [1, 1]} : vector<16x16xf32> to vector<16x1xf32>
    %1704 = vector.extract_strided_slice %1702 {offsets = [0, 0], sizes = [16, 15], strides = [1, 1]} : vector<16x16xf32> to vector<16x15xf32>
    %1705 = tpu.concatenate %1703, %1704 in 1 : vector<16x1xf32>, vector<16x15xf32> -> vector<16x16xf32>
    %1706 = arith.mulf %1699, %1705 : vector<16x16xf32>
    %1707 = arith.addf %1697, %1706 : vector<16x16xf32>
    %c8_342 = arith.constant 8 : index
    %c0_343 = arith.constant 0 : index
    %c0_344 = arith.constant 0 : index
    %1708 = vector.load %arg6[%c8_342, %c0_343, %c0_344] : memref<9x16x16xf32, #tpu.memory_space<vmem>>, vector<1x16x16xf32>
    %1709 = vector.shape_cast %1708 : vector<1x16x16xf32> to vector<16x16xf32>
    %1710 = vector.extract_strided_slice %1646 {offsets = [1, 0], sizes = [15, 16], strides = [1, 1]} : vector<16x16xf32> to vector<15x16xf32>
    %1711 = vector.extract_strided_slice %1646 {offsets = [0, 0], sizes = [1, 16], strides = [1, 1]} : vector<16x16xf32> to vector<1x16xf32>
    %1712 = tpu.concatenate %1710, %1711 in 0 : vector<15x16xf32>, vector<1x16xf32> -> vector<16x16xf32>
    %1713 = vector.extract_strided_slice %1712 {offsets = [0, 1], sizes = [16, 15], strides = [1, 1]} : vector<16x16xf32> to vector<16x15xf32>
    %1714 = vector.extract_strided_slice %1712 {offsets = [0, 0], sizes = [16, 1], strides = [1, 1]} : vector<16x16xf32> to vector<16x1xf32>
    %1715 = tpu.concatenate %1713, %1714 in 1 : vector<16x15xf32>, vector<16x1xf32> -> vector<16x16xf32>
    %1716 = arith.mulf %1709, %1715 : vector<16x16xf32>
    %1717 = arith.addf %1707, %1716 : vector<16x16xf32>
    %c0_345 = arith.constant 0 : index
    %c0_346 = arith.constant 0 : index
    %1718 = vector.load %arg7[%c0_345, %c0_346] : memref<16x16xf32, #tpu.memory_space<vmem>>, vector<16x16xf32>
    tpu.vector_store %arg7[%c0_345, %c0_346], %1717 {strides = array<i32>} : memref<16x16xf32, #tpu.memory_space<vmem>>, vector<16x16xf32>,
    %c3_i32 = arith.constant 3 : i32
    %c0_347 = arith.constant 0 : index
    %c0_348 = arith.constant 0 : index
    %1719 = vector.load %arg7[%c0_347, %c0_348] : memref<16x16xf32, #tpu.memory_space<vmem>>, vector<16x16xf32>
    %c0_349 = arith.constant 0 : index
    %c0_350 = arith.constant 0 : index
    %c0_351 = arith.constant 0 : index
    %1720 = vector.load %arg6[%c0_349, %c0_350, %c0_351] : memref<9x16x16xf32, #tpu.memory_space<vmem>>, vector<1x16x16xf32>
    %1721 = vector.shape_cast %1720 : vector<1x16x16xf32> to vector<16x16xf32>
    %1722 = arith.mulf %1721, %1719 : vector<16x16xf32>
    %c1_352 = arith.constant 1 : index
    %c0_353 = arith.constant 0 : index
    %c0_354 = arith.constant 0 : index
    %1723 = vector.load %arg6[%c1_352, %c0_353, %c0_354] : memref<9x16x16xf32, #tpu.memory_space<vmem>>, vector<1x16x16xf32>
    %1724 = vector.shape_cast %1723 : vector<1x16x16xf32> to vector<16x16xf32>
    %1725 = vector.extract_strided_slice %1719 {offsets = [0, 15], sizes = [16, 1], strides = [1, 1]} : vector<16x16xf32> to vector<16x1xf32>
    %1726 = vector.extract_strided_slice %1719 {offsets = [0, 0], sizes = [16, 15], strides = [1, 1]} : vector<16x16xf32> to vector<16x15xf32>
    %1727 = tpu.concatenate %1725, %1726 in 1 : vector<16x1xf32>, vector<16x15xf32> -> vector<16x16xf32>
    %1728 = arith.mulf %1724, %1727 : vector<16x16xf32>
    %1729 = arith.addf %1722, %1728 : vector<16x16xf32>
    %c2_355 = arith.constant 2 : index
    %c0_356 = arith.constant 0 : index
    %c0_357 = arith.constant 0 : index
    %1730 = vector.load %arg6[%c2_355, %c0_356, %c0_357] : memref<9x16x16xf32, #tpu.memory_space<vmem>>, vector<1x16x16xf32>
    %1731 = vector.shape_cast %1730 : vector<1x16x16xf32> to vector<16x16xf32>
    %1732 = vector.extract_strided_slice %1719 {offsets = [0, 1], sizes = [16, 15], strides = [1, 1]} : vector<16x16xf32> to vector<16x15xf32>
    %1733 = vector.extract_strided_slice %1719 {offsets = [0, 0], sizes = [16, 1], strides = [1, 1]} : vector<16x16xf32> to vector<16x1xf32>
    %1734 = tpu.concatenate %1732, %1733 in 1 : vector<16x15xf32>, vector<16x1xf32> -> vector<16x16xf32>
    %1735 = arith.mulf %1731, %1734 : vector<16x16xf32>
    %1736 = arith.addf %1729, %1735 : vector<16x16xf32>
    %c3_358 = arith.constant 3 : index
    %c0_359 = arith.constant 0 : index
    %c0_360 = arith.constant 0 : index
    %1737 = vector.load %arg6[%c3_358, %c0_359, %c0_360] : memref<9x16x16xf32, #tpu.memory_space<vmem>>, vector<1x16x16xf32>
    %1738 = vector.shape_cast %1737 : vector<1x16x16xf32> to vector<16x16xf32>
    %1739 = vector.extract_strided_slice %1719 {offsets = [15, 0], sizes = [1, 16], strides = [1, 1]} : vector<16x16xf32> to vector<1x16xf32>
    %1740 = vector.extract_strided_slice %1719 {offsets = [0, 0], sizes = [15, 16], strides = [1, 1]} : vector<16x16xf32> to vector<15x16xf32>
    %1741 = tpu.concatenate %1739, %1740 in 0 : vector<1x16xf32>, vector<15x16xf32> -> vector<16x16xf32>
    %1742 = arith.mulf %1738, %1741 : vector<16x16xf32>
    %1743 = arith.addf %1736, %1742 : vector<16x16xf32>
    %c4_361 = arith.constant 4 : index
    %c0_362 = arith.constant 0 : index
    %c0_363 = arith.constant 0 : index
    %1744 = vector.load %arg6[%c4_361, %c0_362, %c0_363] : memref<9x16x16xf32, #tpu.memory_space<vmem>>, vector<1x16x16xf32>
    %1745 = vector.shape_cast %1744 : vector<1x16x16xf32> to vector<16x16xf32>
    %1746 = vector.extract_strided_slice %1719 {offsets = [15, 0], sizes = [1, 16], strides = [1, 1]} : vector<16x16xf32> to vector<1x16xf32>
    %1747 = vector.extract_strided_slice %1719 {offsets = [0, 0], sizes = [15, 16], strides = [1, 1]} : vector<16x16xf32> to vector<15x16xf32>
    %1748 = tpu.concatenate %1746, %1747 in 0 : vector<1x16xf32>, vector<15x16xf32> -> vector<16x16xf32>
    %1749 = vector.extract_strided_slice %1748 {offsets = [0, 15], sizes = [16, 1], strides = [1, 1]} : vector<16x16xf32> to vector<16x1xf32>
    %1750 = vector.extract_strided_slice %1748 {offsets = [0, 0], sizes = [16, 15], strides = [1, 1]} : vector<16x16xf32> to vector<16x15xf32>
    %1751 = tpu.concatenate %1749, %1750 in 1 : vector<16x1xf32>, vector<16x15xf32> -> vector<16x16xf32>
    %1752 = arith.mulf %1745, %1751 : vector<16x16xf32>
    %1753 = arith.addf %1743, %1752 : vector<16x16xf32>
    %c5_364 = arith.constant 5 : index
    %c0_365 = arith.constant 0 : index
    %c0_366 = arith.constant 0 : index
    %1754 = vector.load %arg6[%c5_364, %c0_365, %c0_366] : memref<9x16x16xf32, #tpu.memory_space<vmem>>, vector<1x16x16xf32>
    %1755 = vector.shape_cast %1754 : vector<1x16x16xf32> to vector<16x16xf32>
    %1756 = vector.extract_strided_slice %1719 {offsets = [15, 0], sizes = [1, 16], strides = [1, 1]} : vector<16x16xf32> to vector<1x16xf32>
    %1757 = vector.extract_strided_slice %1719 {offsets = [0, 0], sizes = [15, 16], strides = [1, 1]} : vector<16x16xf32> to vector<15x16xf32>
    %1758 = tpu.concatenate %1756, %1757 in 0 : vector<1x16xf32>, vector<15x16xf32> -> vector<16x16xf32>
    %1759 = vector.extract_strided_slice %1758 {offsets = [0, 1], sizes = [16, 15], strides = [1, 1]} : vector<16x16xf32> to vector<16x15xf32>
    %1760 = vector.extract_strided_slice %1758 {offsets = [0, 0], sizes = [16, 1], strides = [1, 1]} : vector<16x16xf32> to vector<16x1xf32>
    %1761 = tpu.concatenate %1759, %1760 in 1 : vector<16x15xf32>, vector<16x1xf32> -> vector<16x16xf32>
    %1762 = arith.mulf %1755, %1761 : vector<16x16xf32>
    %1763 = arith.addf %1753, %1762 : vector<16x16xf32>
    %c6_367 = arith.constant 6 : index
    %c0_368 = arith.constant 0 : index
    %c0_369 = arith.constant 0 : index
    %1764 = vector.load %arg6[%c6_367, %c0_368, %c0_369] : memref<9x16x16xf32, #tpu.memory_space<vmem>>, vector<1x16x16xf32>
    %1765 = vector.shape_cast %1764 : vector<1x16x16xf32> to vector<16x16xf32>
    %1766 = vector.extract_strided_slice %1719 {offsets = [1, 0], sizes = [15, 16], strides = [1, 1]} : vector<16x16xf32> to vector<15x16xf32>
    %1767 = vector.extract_strided_slice %1719 {offsets = [0, 0], sizes = [1, 16], strides = [1, 1]} : vector<16x16xf32> to vector<1x16xf32>
    %1768 = tpu.concatenate %1766, %1767 in 0 : vector<15x16xf32>, vector<1x16xf32> -> vector<16x16xf32>
    %1769 = arith.mulf %1765, %1768 : vector<16x16xf32>
    %1770 = arith.addf %1763, %1769 : vector<16x16xf32>
    %c7_370 = arith.constant 7 : index
    %c0_371 = arith.constant 0 : index
    %c0_372 = arith.constant 0 : index
    %1771 = vector.load %arg6[%c7_370, %c0_371, %c0_372] : memref<9x16x16xf32, #tpu.memory_space<vmem>>, vector<1x16x16xf32>
    %1772 = vector.shape_cast %1771 : vector<1x16x16xf32> to vector<16x16xf32>
    %1773 = vector.extract_strided_slice %1719 {offsets = [1, 0], sizes = [15, 16], strides = [1, 1]} : vector<16x16xf32> to vector<15x16xf32>
    %1774 = vector.extract_strided_slice %1719 {offsets = [0, 0], sizes = [1, 16], strides = [1, 1]} : vector<16x16xf32> to vector<1x16xf32>
    %1775 = tpu.concatenate %1773, %1774 in 0 : vector<15x16xf32>, vector<1x16xf32> -> vector<16x16xf32>
    %1776 = vector.extract_strided_slice %1775 {offsets = [0, 15], sizes = [16, 1], strides = [1, 1]} : vector<16x16xf32> to vector<16x1xf32>
    %1777 = vector.extract_strided_slice %1775 {offsets = [0, 0], sizes = [16, 15], strides = [1, 1]} : vector<16x16xf32> to vector<16x15xf32>
    %1778 = tpu.concatenate %1776, %1777 in 1 : vector<16x1xf32>, vector<16x15xf32> -> vector<16x16xf32>
    %1779 = arith.mulf %1772, %1778 : vector<16x16xf32>
    %1780 = arith.addf %1770, %1779 : vector<16x16xf32>
    %c8_373 = arith.constant 8 : index
    %c0_374 = arith.constant 0 : index
    %c0_375 = arith.constant 0 : index
    %1781 = vector.load %arg6[%c8_373, %c0_374, %c0_375] : memref<9x16x16xf32, #tpu.memory_space<vmem>>, vector<1x16x16xf32>
    %1782 = vector.shape_cast %1781 : vector<1x16x16xf32> to vector<16x16xf32>
    %1783 = vector.extract_strided_slice %1719 {offsets = [1, 0], sizes = [15, 16], strides = [1, 1]} : vector<16x16xf32> to vector<15x16xf32>
    %1784 = vector.extract_strided_slice %1719 {offsets = [0, 0], sizes = [1, 16], strides = [1, 1]} : vector<16x16xf32> to vector<1x16xf32>
    %1785 = tpu.concatenate %1783, %1784 in 0 : vector<15x16xf32>, vector<1x16xf32> -> vector<16x16xf32>
    %1786 = vector.extract_strided_slice %1785 {offsets = [0, 1], sizes = [16, 15], strides = [1, 1]} : vector<16x16xf32> to vector<16x15xf32>
    %1787 = vector.extract_strided_slice %1785 {offsets = [0, 0], sizes = [16, 1], strides = [1, 1]} : vector<16x16xf32> to vector<16x1xf32>
    %1788 = tpu.concatenate %1786, %1787 in 1 : vector<16x15xf32>, vector<16x1xf32> -> vector<16x16xf32>
    %1789 = arith.mulf %1782, %1788 : vector<16x16xf32>
    %1790 = arith.addf %1780, %1789 : vector<16x16xf32>
    %c0_376 = arith.constant 0 : index
    %c0_377 = arith.constant 0 : index
    %1791 = vector.load %arg7[%c0_376, %c0_377] : memref<16x16xf32, #tpu.memory_space<vmem>>, vector<16x16xf32>
    tpu.vector_store %arg7[%c0_376, %c0_377], %1790 {strides = array<i32>} : memref<16x16xf32, #tpu.memory_space<vmem>>, vector<16x16xf32>,
    %c0_378 = arith.constant 0 : index
    %c0_379 = arith.constant 0 : index
    %1792 = vector.load %arg7[%c0_378, %c0_379] : memref<16x16xf32, #tpu.memory_space<vmem>>, vector<16x16xf32>
    %c0_380 = arith.constant 0 : index
    %c0_381 = arith.constant 0 : index
    %c0_382 = arith.constant 0 : index
    %1793 = vector.load %arg4[%c0_380, %c0_381, %c0_382] : memref<1x16x16xf32, #tpu.memory_space<vmem>>, vector<1x16x16xf32>
    %1794 = vector.shape_cast %1793 : vector<1x16x16xf32> to vector<16x16xf32>
    %1795 = vector.shape_cast %1792 : vector<16x16xf32> to vector<1x16x16xf32>
    tpu.vector_store %arg4[%c0_380, %c0_381, %c0_382], %1795 {strides = array<i32>} : memref<1x16x16xf32, #tpu.memory_space<vmem>>, vector<1x16x16xf32>,
    return
  }
  func.func @transform_0(%arg0: i32) -> (i32, i32, i32, i32) {
    %c0_i32 = arith.constant 0 : i32
    %c0_i32_0 = arith.constant 0 : i32
    %c0_i32_1 = arith.constant 0 : i32
    %c0_i32_2 = arith.constant 0 : i32
    return %arg0, %c0_i32, %c0_i32_0, %c0_i32_1 : i32, i32, i32, i32
  }
  func.func @transform_1(%arg0: i32) -> i32 {
    %c0_i32 = arith.constant 0 : i32
    %c0_i32_0 = arith.constant 0 : i32
    return %c0_i32 : i32
  }
  func.func @transform_2(%arg0: i32) -> i32 {
    %c0_i32 = arith.constant 0 : i32
    %c0_i32_0 = arith.constant 0 : i32
    return %c0_i32 : i32
  }
  func.func @transform_3(%arg0: i32) -> (i32, i32, i32) {
    %c0_i32 = arith.constant 0 : i32
    %c0_i32_0 = arith.constant 0 : i32
    %c0_i32_1 = arith.constant 0 : i32
    return %arg0, %c0_i32, %c0_i32_0 : i32, i32, i32
  }
}

</mosaic_0001>

<bundles_post_ra>
// kernel: tpu_custom_call.1
= control target key start
LH: loop header
LB: loop body
LE: loop exit
PB: predicated region body
PF: predicated region fallthrough
CT: control target
= control target key end

     0   :  { %s9200_s0 = inlined_call_operand.hbm [shape: f32[2,4,16,16], index: 0, kind: input, shape index: {}]   ;;  %s9201_s1 = inlined_call_operand.hbm [shape: f32[288], index: 1, kind: input, shape index: {}]   ;;  %s9202_s2 = inlined_call_operand.vmem [shape: f32[8], index: 2, kind: input, shape index: {}]   ;;  %s9203_s3 = inlined_call_operand.hbm [shape: f32[2,16,16], index: 3, kind: output, shape index: {}]  }
   0x1   :  { %9310 = sst [smem:[#allocation228_spill]] %s9200_s0 }
   0x2   :  { %9311 = sst [smem:[#allocation229_spill]] %s9201_s1 }
   0x3   :  { %9312 = sst [smem:[#allocation230_spill]] %s9202_s2 }
   0x4   :  { %9313 = sst [smem:[#allocation231_spill]] %s9203_s3 }
   0x5   :  { %8 = vsyncpa [#allocation6], 0 }
   0x6   :  { %10 = vsyncpa [#allocation6 + $0x1], 0 }
   0x7   :  { %11 = vsyncpa [#allocation8], 0 }
   0x8   :  { %12 = vsyncpa [#allocation9], 0 }
   0x9   :  { %13 = vsyncpa [#allocation7], 0 }
   0xa   :  { %15 = vsyncpa [#allocation7 + $0x1], 0  ;;  %s5111_s12 = smov 0   ;;  %s5113_s13 = smov 0  }
   0xb   :  { %s5115_s14 = smov 0   ;;  %s5117_s15 = smov 0  }
   0xc LB: > { %9314 = sst [smem:[#allocation17_spill]] %s5063_s12  ;;  %s5132_s16 = sadd.s32 4294967295, %s5075_s15   ;;  %s5075_s15 = sphi %s5117_s15, %s10164_s15   ;;  %s5071_s14 = sphi %s5115_s14, %s10167_s14   ;;  %s5067_s13 = sphi %s5113_s13, %s10166_s13   ;;  %s5063_s12 = sphi %s5111_s12, %s10165_s12  }
   0xd   : > { %9315 = sst [smem:[#allocation18_spill]] %s5067_s13  ;;  %s4522_s17 = sadd.s32 4294967294, %s5075_s15  }
   0xe   : > { %9316 = sst [smem:[#allocation19_spill]] %s5071_s14  ;;  %s5136_s18 = sadd.s32 1, %s5075_s15  }
   0xf   : > { %9317 = sst [smem:[#allocation20_spill]] %s5075_s15  ;;  %s28_s19 = sadd.s32 1, %s5071_s14 }
  0x10   : > { %9318 = sst [smem:[#allocation21_spill]] %s5132_s16  ;;  %s25_s20 = ssub.s32 %s5075_s15, %s5136_s18 }
  0x11   : > { %9319 = sst [smem:[#allocation22_spill]] %s5136_s18  ;;  %p35_p0 = scmp.ne.s32.totalorder %s5071_s14, %s5067_s13 }
  0x12   : > { %p26_p1 = scmp.eq.s32.totalorder %s25_s20, 0  ;;  %p36_p2 = scmp.eq.s32.totalorder %s5075_s15, 0 }
  0x13   : > { %p41_p3 = scmp.ne.s32.totalorder %s5067_s13, %s5063_s12  ;;  %p9204_p4 = scmp.eq.s32.totalorder %s5132_s16, 0 }
  0x14   : > { %s5148_s21 = scalar_select %p26_p1, %s5071_s14, %s28_s19  }
  0x15   : > { %p5150_p5 = por %p36_p2, %p35_p0  ;;  %p5156_p6 = por %p9204_p4, %p41_p3 }
  0x16   : > { %9320 = sst [smem:[#allocation23_spill]] %s5148_s21  ;;  %p107_p7 = scmp.eq.s32.totalorder %s5132_s16, 1 }
  0x17   : > { %s9322_s23 = scalar_select %p5156_p6, 1, 0 }
  0x18   : > { %p113_p8 = scmp.eq.s32.totalorder %s4522_s17, 1  ;;  %p4523_p9 = scmp.ge.s32.totalorder %s5075_s15, 1 }
  0x19   : > { %p120_p10 = scmp.lt.s32.totalorder %s5075_s15, 3  ;;  %p5163_p11 = por %p107_p7, %p35_p0 }
  0x1a   : > { %p5167_p12 = por %p113_p8, %p41_p3  ;;  %p4877_p4 = scmp.lt.s32.totalorder %s5075_s15, 2 }
  0x1b   : > { %s9323_s24 = scalar_select %p5163_p11, 1, 0 }
  0x1c   : > { %s9325_s25 = scalar_select %p5167_p12, 1, 0 }
  0x1d   : > { %9324 = sst [smem:[#allocation24_spill]] %s9323_s24  ;;  %p5171_p13 = pnand %p4523_p9, %p120_p10 }
  0x1e   : > { %9326 = sst [smem:[#allocation25_spill]] %s9325_s25  ;;  %p9329_p0 = scmp.eq.s32.totalorder %s5132_s16, 0 }
  0x1f   : > { %s9327_s26 = scalar_select %p5171_p13, 1, 0 }
  0x20   : > { %p4860_p2 = pneg %p5171_p13  ;;  %s9328_s2 = sld [smem:[#allocation230_spill]] }
  0x21   : > { %p5190_p3 = pnand %p4877_p4, %p5150_p5  ;;  %s153_s5 = sand.u32 1, %s5071_s14  }
  0x22   : > { %p5184_p7 = pnand %p4860_p2, %p9329_p0  ;;  %s5077_s6 = smov [#allocation10]  }
  0x23   : > { %s9332_s1 = sld [smem:[#allocation229_spill]] }
  0x24   : > { %p4962_p9 = pneg %p5184_p7 }
  0x26   : > { %s142_s29 = sshll.u32 %s9328_s2, 4  ;;  %s143_s29 = int_to_ptr.vmem [resolvable:$true] %s142_s29 }
  0x27   : > { %s4960_s9 = scalar_lea.vmem %s143_s29, 16  ;;  %p4968_p0 = scmp.lt.s32.totalorder %s143_s29, %s143_s29 }
  0x28   : > { %p4961_p8 = scmp.ne.s32.totalorder %s143_s29, %s4960_s9  ;;  %p4969_p1 = scmp.lt.s32.totalorder %s4960_s9, %s4960_s9 }
  0x29   : > { %4863 = dma.hbm_to_smem (!%p5184_p7), %s9332_s1, 48, %s5077_s6, [#allocation8]  }
  0x2a   : > { %p4963_p10 = pnand %p4962_p9, %p4961_p8  ;;  %p4970_p4 = por %p4969_p1, %p4968_p0 }
  0x2c   : > { %p4964_p2 = pneg %p4963_p10 }
  0x2e   : > { %p4971_p5 = pnand %p4970_p4, %p4964_p2 }
  0x30   : > { %4974 = shalt.err (!%p4971_p5)
}
  0x31   : > { %s5078_s10 = smov [#allocation11]   ;;  %s4527_s11 = sshll.u32 %s153_s5, 6 }
  0x32   : > { %4866 = dma.vmem_to_smem (!%p5184_p7), %s143_s29, 16, %s5078_s10, [#allocation9]  }
  0x33   : > { %s4846_s17 = sshll.u32 %s5075_s15, 10  ;;  %s9333_s0 = sld [smem:[#allocation228_spill]] }
  0x34   : > { %s157_s27 = scalar_lea.vmem [#allocation5], %s4527_s11  ;;  %s5212_s6 = scalar_lea.sflag [#allocation6], %s153_s5 }
  0x35   : > { %s164_s28 = sshll.u32 %s157_s27, 4  ;;  %p4977_p7 = pneg %p5190_p3  ;;  %s5210_s28 = int_to_ptr.vmem [resolvable:$true] %s164_s28 }
  0x39   : > { %s5208_s22 = scalar_lea.hbm %s9333_s0, %s4846_s17  ;;  %s4980_s8 = scalar_lea.hbm %s9333_s0, 2048 }
  0x3a   : > { %s4975_s30 = scalar_lea.hbm %s5208_s22, 1024  ;;  %p4981_p10 = scmp.lt.s32.totalorder %s5208_s22, %s9333_s0 }
  0x3b   : > { %p4976_p1 = scmp.ne.s32.totalorder %s5208_s22, %s4975_s30  ;;  %p4982_p2 = scmp.lt.s32.totalorder %s4980_s8, %s4975_s30 }
  0x3d   : > { %p4978_p8 = pnand %p4977_p7, %p4976_p1  ;;  %p4983_p0 = por %p4982_p2, %p4981_p10 }
  0x3f   : > { %p4979_p9 = pneg %p4978_p8 }
  0x41   : > { %p4984_p4 = pnand %p4983_p0, %p4979_p9 }
  0x43   : > { %4987 = shalt.err (!%p4984_p4)
}
  0x44   : > { %s4988_s5 = scalar_lea.vmem %s5210_s28, 1024  ;;  %s5079_s11 = smov [#allocation5]  }
  0x45   : > { %p4989_p5 = scmp.ne.s32.totalorder %s5210_s28, %s4988_s5  ;;  %s4993_s17 = sshll.u32 %s5079_s11, 4  ;;  %s4994_s17 = int_to_ptr.vmem [resolvable:$false] %s4993_s17 }
  0x46   : > { %s4995_s19 = scalar_lea.vmem %s4994_s17, 2048  ;;  %p4996_p8 = scmp.lt.s32.totalorder %s5210_s28, %s4994_s17 }
  0x47   : > { %p4991_p12 = pnand %p4989_p5, %p4977_p7  ;;  %p4997_p11 = scmp.lt.s32.totalorder %s4995_s19, %s4988_s5 }
  0x49   : > { %p4992_p1 = pneg %p4991_p12  ;;  %p4998_p6 = por %p4997_p11, %p4996_p8 }
  0x4b   : > { %p4999_p13 = pnand %p4998_p6, %p4992_p1 }
  0x4d   : > { %5002 = shalt.err (!%p4999_p13)
}
  0x4e   : > { %s5080_s20 = smov 128   ;;  %s5081_s27 = smov 8  }
  0x4f   : > { %4870 = dma.hbm_to_vmem [thread:$0]  (!%p5190_p3), %s5208_s22, 1024, %s5210_s28, %s5212_s6, %s5080_s20, %s5080_s20, %s5081_s27  }
  0x50   : > { %p9334_p7 = scmp.ne.s32.totalorder %s9327_s26, 0 }
  0x52   : > { %176 = sbr.rel (%p9334_p7) target bundleno = 1727 (0x6bf), region = 32 }
  0x57   : > { %s5236_s30 = sand.u32 1, %s5067_s13   ;;  %p9337_p6 = scmp.ne.s32.totalorder %s9322_s23, 0 }
  0x58   : > { %9335 = sst [smem:[#allocation26_spill]] %s5236_s30  ;;  %s4531_s29 = sshll.u32 %s5236_s30, 6 }
  0x59   : > { %s179_s7 = scalar_lea.sflag [#allocation6], %s5236_s30  ;;  %s5240_s8 = scalar_lea.vmem [#allocation5], %s4531_s29 }
  0x5a   : > { %9336 = sst [smem:[#allocation27_spill]] %s5240_s8 }
  0x5b   : > { %5046 = dma.done.wait (%p9337_p6), %s179_s7, 1024  }
  0x5c   : > { %5048 = vsyncadd (%p9337_p6), %s179_s7, 4294966272  ;;  %p9338_p11 = scmp.eq.s32.totalorder %s5132_s16, 0 }
  0x5e   : > { %5050 = dma.done.wait (%p9338_p11), [#allocation8], 48   ;;  %p9339_p12 = pmov %p9338_p11 }
  0x5f   : > { %p9340_p13 = pmov %p9338_p11 }
  0x60   : > { %5052 = vsyncadd (%p9339_p12), [#allocation8], 4294967248 }
  0x61   : > { %5054 = dma.done.wait (%p9340_p13), [#allocation9], 16   ;;  %p9341_p3 = pmov %p9338_p11 }
  0x63   : > { %5056 = vsyncadd (%p9341_p3), [#allocation9], 4294967280 }
  0x64   : > { %195 = sfence }
  0x65   : > { %v4535_v0 = vld [vmem:[%s5240_s8 + $0x10] sm:$0xff]  ;;  %v228_v1 = vld [vmem:[%s5240_s8] sm:$0xff]  ;;  %vm214_vm0 = vcmask 146432   ;;  %s9208_s23 = smov 1   ;;  %vm217_vm1 = vcmask 140288   ;;  %v4536_v2 = vld [vmem:[%s5240_s8 + $0x18] sm:$0xff] }
  0x66   : > { %246 = vrot.lane.b32.xlu1 %v4535_v0, %s9208_s23  ;;  %232 = vrot.lane.b32.xlu0 %v228_v1, %s9208_s23  ;;  %v229_v3 = vld [vmem:[%s5240_s8 + $0x8] sm:$0xff]  ;;  %v5083_v4 = vmov 0.0   ;;  %v4537_v6 = vld [vmem:[%s5240_s8 + $0x20] sm:$0xff]  ;;  %s5270_s26 = sld [smem:[#allocation10 + $0x20]]  ;;  %vm238_vm2 = vcmask 138248   ;;  %vm3662_vm3 = vcmask 130048  }
  0x67   : > { %219 = vst.msk [vmem:[#allocation2 + $0x18] sm:$0xff] %vm214_vm0, %v5083_v4  ;;  %220 = vst.msk [vmem:[#allocation2 + $0x20] sm:$0xff] %vm214_vm0, %v5083_v4  ;;  %v4538_v5 = vld [vmem:[%s5240_s8 + $0x28] sm:$0xff]  ;;  %v4540_v7 = vld [vmem:[%s5240_s8 + $0x38] sm:$0xff]  ;;  %s5272_s4 = sld [smem:[#allocation10 + $0x21]]  ;;  %vm3825_vm4 = vcmask 1040384  }
  0x68   : > { %215 = vst.msk [vmem:[#allocation2] sm:$0xff] %vm214_vm0, %v5083_v4  ;;  %216 = vst.msk [vmem:[#allocation2 + $0x8] sm:$0xff] %vm214_vm0, %v5083_v4  ;;  %v4539_v8 = vld [vmem:[%s5240_s8 + $0x30] sm:$0xff]  ;;  %s5274_s22 = sld [smem:[#allocation10 + $0x22]]  ;;  %vm3878_vm5 = vcmask 1046528  }
  0x69   : > { %222 = vst.msk [vmem:[#allocation2 + $0x30] sm:$0xff] %vm214_vm0, %v5083_v4  ;;  %223 = vst.msk [vmem:[#allocation2 + $0x38] sm:$0xff] %vm214_vm0, %v5083_v4  ;;  %s5276_s28 = sld [smem:[#allocation10 + $0x23]] }
  0x6a   : > { %225 = vst.msk [vmem:[#allocation2 + $0x48] sm:$0xff] %vm214_vm0, %v5083_v4  ;;  %226 = vst.msk [vmem:[#allocation2 + $0x50] sm:$0xff] %vm214_vm0, %v5083_v4  ;;  %248 = vrot.lane.b32.xlu1 %v4536_v2, %s9208_s23  ;;  %234 = vrot.lane.b32.xlu0 %v229_v3, %s9208_s23  ;;  %s5278_s6 = sld [smem:[#allocation10 + $0x24]] }
  0x6b   : > { %221 = vst.msk [vmem:[#allocation2 + $0x28] sm:$0x3] %vm217_vm1, %v5083_v4  ;;  %218 = vst.msk [vmem:[#allocation2 + $0x10] sm:$0x3] %vm217_vm1, %v5083_v4  ;;  %s5280_s9 = sld [smem:[#allocation10 + $0x25]] }
  0x6c   : > { %224 = vst.msk [vmem:[#allocation2 + $0x40] sm:$0x3] %vm217_vm1, %v5083_v4  ;;  %227 = vst.msk [vmem:[#allocation2 + $0x58] sm:$0x3] %vm217_vm1, %v5083_v4  ;;  %s5282_s10 = sld [smem:[#allocation10 + $0x26]]  ;;  %v500_v13 = vstv %s5270_s26 }
  0x6d   : > { %s5284_s5 = sld [smem:[#allocation10 + $0x27]]  ;;  %v514_v14 = vstv %s5272_s4 }
  0x6e   : > { %262 = vrot.lane.b32.xlu1 %v4538_v5, %s9208_s23  ;;  %260 = vrot.lane.b32.xlu0 %v4537_v6, %s9208_s23  ;;  %s5286_s11 = sld [smem:[#allocation11]]  ;;  %v528_v18 = vstv %s5274_s22 }
  0x6f   : > { %s5288_s17 = sld [smem:[#allocation10]]  ;;  %v542_v19 = vstv %s5276_s28 }
  0x70   : > { %9342 = sst [smem:[#allocation28_spill]] %s5278_s6  ;;  %v556_v20 = vstv %s5278_s6  ;;  %s9257_s6 = smov 127  }
  0x71   : > { %9343 = sst [smem:[#allocation29_spill]] %s5280_s9  ;;  %v570_v21 = vstv %s5280_s9 }
  0x72   : > { %276 = vrot.lane.b32.xlu1 %v4540_v7, %s9208_s23  ;;  %274 = vrot.lane.b32.xlu0 %v4539_v8, %s9208_s23  ;;  %9344 = sst [smem:[#allocation30_spill]] %s5282_s10  ;;  %v584_v23 = vstv %s5282_s10 }
  0x73   : > { %9345 = sst [smem:[#allocation31_spill]] %s5284_s5  ;;  %v598_v24 = vstv %s5284_s5 }
  0x74   : > { %9346 = sst [smem:[#allocation32_spill]] %s5286_s11  ;;  %v284_v25 = vstv %s5286_s11 }
  0x75   : > { %9347 = sst [smem:[#allocation33_spill]] %s5288_s17  ;;  %v302_v26 = vstv %s5288_s17 }
  0x76   : > { %s5290_s19 = sld [smem:[#allocation10 + $0x8]] }
  0x77   : > { %s5292_s20 = sld [smem:[#allocation10 + $0x10]] }
  0x78   : > { %s5294_s27 = sld [smem:[#allocation10 + $0x18]] }
  0x79   : > { %s5296_s29 = sld [smem:[#allocation11 + $0x1]] }
  0x7a   : > { %s5298_s7 = sld [smem:[#allocation10 + $0x1]] }
  0x7b   : > { %s5300_s23 = sld [smem:[#allocation10 + $0x9]] }
  0x7c   : > { %9348 = sst [smem:[#allocation34_spill]] %s5290_s19  ;;  %v352_v27 = vstv %s5290_s19 }
  0x7d   : > { %9349 = sst [smem:[#allocation35_spill]] %s5292_s20  ;;  %v402_v28 = vstv %s5292_s20 }
  0x7e   : > { %9350 = sst [smem:[#allocation36_spill]] %s5294_s27  ;;  %v452_v29 = vstv %s5294_s27 }
  0x7f   : > { %9351 = sst [smem:[#allocation37_spill]] %s5296_s29  ;;  %v286_v30 = vstv %s5296_s29 }
  0x80   : > { %9352 = sst [smem:[#allocation38_spill]] %s5298_s7  ;;  %v308_v31 = vstv %s5298_s7  ;;  %s9392_s7 = smov 127  }
  0x81   : > { %9353 = sst [smem:[#allocation39_spill]] %s5300_s23  ;;  %v358_v32 = vstv %s5300_s23 }
  0x82   : > { %s5302_s0 = sld [smem:[#allocation10 + $0x11]] }
  0x83   : > { %s5304_s1 = sld [smem:[#allocation10 + $0x19]] }
  0x84   : > { %s5306_s2 = sld [smem:[#allocation11 + $0x2]] }
  0x85   : > { %s5308_s21 = sld [smem:[#allocation10 + $0x2]] }
  0x86   : > { %s5310_s14 = sld [smem:[#allocation10 + $0xa]] }
  0x87   : > { %s5312_s13 = sld [smem:[#allocation10 + $0x12]] }
  0x88   : > { %9354 = sst [smem:[#allocation40_spill]] %s5302_s0  ;;  %v408_v35 = vstv %s5302_s0 }
  0x89   : > { %9355 = sst [smem:[#allocation41_spill]] %s5304_s1  ;;  %v458_v36 = vstv %s5304_s1 }
  0x8a   : > { %9356 = sst [smem:[#allocation42_spill]] %s5306_s2  ;;  %v288_v37 = vstv %s5306_s2 }
  0x8b   : > { %9357 = sst [smem:[#allocation43_spill]] %s5308_s21  ;;  %v314_v38 = vstv %s5308_s21 }
  0x8c   : > { %9358 = sst [smem:[#allocation44_spill]] %s5310_s14 }
  0x8d   : > { %9359 = sst [smem:[#allocation45_spill]] %s5312_s13 }
  0x8e   : > { %s5314_s18 = sld [smem:[#allocation10 + $0x28]] }
  0x8f   : > { %s5316_s15 = sld [smem:[#allocation10 + $0x29]] }
  0x90   : > { %s5318_s25 = sld [smem:[#allocation10 + $0x2a]] }
  0x91   : > { %s5320_s12 = sld [smem:[#allocation10 + $0x2b]] }
  0x92   : > { %s5322_s3 = sld [smem:[#allocation10 + $0x2c]] }
  0x93   : > { %s5324_s24 = sld [smem:[#allocation10 + $0x2d]] }
  0x94   : > { %9360 = sst [smem:[#allocation46_spill]] %s5314_s18 }
  0x95   : > { %9361 = sst [smem:[#allocation47_spill]] %s5316_s15 }
  0x96   : > { %9362 = sst [smem:[#allocation48_spill]] %s5318_s25  ;;  %v640_v46 = vstv %s5318_s25  ;;  %s5085_s25 = smov 126  }
  0x97   : > { %9363 = sst [smem:[#allocation49_spill]] %s5320_s12 }
  0x98   : > { %9364 = sst [smem:[#allocation50_spill]] %s5322_s3 }
  0x99   : > { %9365 = sst [smem:[#allocation51_spill]] %s5324_s24 }
  0x9a   : > { %s5326_s16 = sld [smem:[#allocation10 + $0x1a]] }
  0x9b   : > { %s5328_s30 = sld [smem:[#allocation11 + $0x3]] }
  0x9c   : > { %s5330_s8 = sld [smem:[#allocation10 + $0x3]] }
  0x9d   : > { %s5332_s14 = sld [smem:[#allocation10 + $0xb]] }
  0x9e   : > { %s5334_s13 = sld [smem:[#allocation10 + $0x13]] }
  0x9f   : > { %s5336_s18 = sld [smem:[#allocation10 + $0x1b]] }
  0xa0   : > { %s5338_s15 = sld [smem:[#allocation11 + $0x4]]  ;;  %v464_v50 = vstv %s5326_s16 }
  0xa1   : > { %9366 = sst [smem:[#allocation52_spill]] %s5328_s30 }
  0xa2   : > { %s5340_s12 = sld [smem:[#allocation10 + $0x4]]  ;;  %v320_v52 = vstv %s5330_s8 }
  0xa3   : > { %s5342_s3 = sld [smem:[#allocation10 + $0xc]]  ;;  %v370_v53 = vstv %s5332_s14 }
  0xa4   : > { %9367 = sst [smem:[#allocation53_spill]] %s5334_s13 }
  0xa5   : > { %9368 = sst [smem:[#allocation54_spill]] %s5336_s18 }
  0xa6   : > { %9369 = sst [smem:[#allocation55_spill]] %s5338_s15 }
  0xa7   : > { %s5344_s30 = sld [smem:[#allocation10 + $0x14]] }
  0xa8   : > { %s5348_s13 = sld [smem:[#allocation10 + $0x1c]]  ;;  %v326_v59 = vstv %s5340_s12 }
  0xa9   : > { %9370 = sst [smem:[#allocation56_spill]] %s5342_s3 }
  0xaa   : > { %s5350_s18 = sld [smem:[#allocation11 + $0x5]] }
  0xab   : > { %s5352_s15 = sld [smem:[#allocation10 + $0x5]] }
  0xac   : > { %s5354_s3 = sld [smem:[#allocation10 + $0xd]] }
  0xad   : > { %9371 = sst [smem:[#allocation57_spill]] %s5344_s30 }
  0xae   : > { %9372 = sst [smem:[#allocation58_spill]] %s5348_s13 }
  0xaf   : > { %s5358_s30 = sld [smem:[#allocation10 + $0x15]] }
  0xb0   : > { %9373 = sst [smem:[#allocation59_spill]] %s5350_s18  ;;  %v294_v63 = vstv %s5350_s18 }
  0xb1   : > { %9374 = sst [smem:[#allocation60_spill]] %s5352_s15 }
  0xb2   : > { %s5361_s13 = sld [smem:[#allocation10 + $0x1d]]  ;;  %v382_v1 = vstv %s5354_s3 }
  0xb3   : > { %s5364_s15 = sld [smem:[#allocation11 + $0x6]] }
  0xb4   : > { %s5372_s26 = sld [smem:[#allocation10 + $0x6]] }
  0xb5   : > { %s5380_s4 = sld [smem:[#allocation10 + $0xe]]  ;;  %v432_v2 = vstv %s5358_s30 }
  0xb6   : > { %s5386_s9 = sld [smem:[#allocation10 + $0x16]] }
  0xb7   : > { %s9380_s10 = sld [smem:[#allocation44_spill]] }
  0xb8   : > { %9375 = sst [smem:[#allocation61_spill]] %s5361_s13  ;;  %v482_v3 = vstv %s5361_s13 }
  0xb9   : > { %9376 = sst [smem:[#allocation62_spill]] %s5364_s15 }
  0xba   : > { %9377 = sst [smem:[#allocation63_spill]] %s5372_s26 }
  0xbb   : > { %9378 = sst [smem:[#allocation64_spill]] %s5380_s4 }
  0xbc   : > { %s9379_s26 = sld [smem:[#allocation46_spill]] }
  0xbd   : > { %s9381_s5 = sld [smem:[#allocation45_spill]]  ;;  %v364_v42 = vstv %s9380_s10 }
  0xbe   : > { %s5392_s11 = sld [smem:[#allocation10 + $0x1e]] }
  0xbf   : > { %s9382_s4 = sld [smem:[#allocation47_spill]] }
  0xc0   : > { %s9383_s20 = sld [smem:[#allocation49_spill]] }
  0xc1   : > { %s5398_s17 = sld [smem:[#allocation11 + $0x7]] }
  0xc2   : > { %v612_v41 = vstv %s9379_s26  ;;  %s5408_s2 = sld [smem:[#allocation10 + $0x7]] }
  0xc3   : > { %v414_v43 = vstv %s9381_s5  ;;  %s9388_s21 = sld [smem:[#allocation53_spill]] }
  0xc4   : > { %s9389_s1 = sld [smem:[#allocation54_spill]] }
  0xc5   : > { %v626_v45 = vstv %s9382_s4  ;;  %s9390_s29 = sld [smem:[#allocation55_spill]] }
  0xc6   : > { %v654_v47 = vstv %s9383_s20  ;;  %s5414_s0 = sld [smem:[#allocation10 + $0xf]] }
  0xc7   : > { %9385 = sst [smem:[#allocation47_spill]] %s5398_s17 }
  0xc8   : > { %s9393_s26 = sld [smem:[#allocation56_spill]] }
  0xc9   : > { %s9394_s10 = sld [smem:[#allocation57_spill]]  ;;  %v420_v55 = vstv %s9388_s21 }
  0xca   : > { %s9395_s5 = sld [smem:[#allocation58_spill]]  ;;  %v470_v56 = vstv %s9389_s1 }
  0xcb   : > { %s5420_s23 = sld [smem:[#allocation10 + $0x17]]  ;;  %v292_v57 = vstv %s9390_s29 }
  0xcc   : > { %9391 = sst [smem:[#allocation53_spill]] %s5414_s0 }
  0xcd   : > { %s9397_s19 = sld [smem:[#allocation60_spill]] }
  0xce   : > { %s9398_s24 = sld [smem:[#allocation63_spill]]  ;;  %v376_v60 = vstv %s9393_s26 }
  0xcf   : > { %s9399_s27 = sld [smem:[#allocation64_spill]]  ;;  %v426_v61 = vstv %s9394_s10 }
  0xd0   : > { %v476_v62 = vstv %s9395_s5  ;;  %s5686_s21 = sld [smem:[#allocation10 + $0x1f]] }
  0xd1   : > { %9396 = sst [smem:[#allocation54_spill]] %s5420_s23 }
  0xd2   : > { %s9426_s8 = sld [smem:[#allocation62_spill]] }
  0xd3   : > { %v332_v0 = vstv %s9397_s19  ;;  %s9427_s3 = sld [smem:[#allocation53_spill]] }
  0xd4   : > { %v338_v7 = vstv %s9398_s24  ;;  %s9432_s23 = sld [smem:[#allocation54_spill]] }
  0xd5   : > { %v388_v8 = vstv %s9399_s27  ;;  %s9436_s10 = sld [smem:[#allocation50_spill]] }
  0xd6   : > { %s5753_s5 = sld [smem:[#allocation10 + $0x2e]] }
  0xd7   : > { %s5797_s19 = sld [smem:[#allocation10 + $0x30]] }
  0xd8   : > { %v247_v9 = vpop.permute.xlu1 %246  ;;  %v233_v10 = vpop.permute.xlu0 %232  ;;  %s4596_s20 = sld [smem:[#allocation10 + $0x31]] }
  0xd9   : > { %253 = vst.msk [vmem:[#allocation2 + $0x19] sm:$0xff] %vm238_vm2, %v247_v9  ;;  %239 = vst.msk [vmem:[#allocation2 + $0x1] sm:$0xff] %vm238_vm2, %v233_v10  ;;  %s4597_s27 = sld [smem:[#allocation10 + $0x32]] }
  0xda   : > { %s4598_s29 = sld [smem:[#allocation10 + $0x33]] }
  0xdb   : > { %s4599_s26 = sld [smem:[#allocation10 + $0x34]] }
  0xdc   : > { %v249_v11 = vpop.permute.xlu1 %248  ;;  %v235_v12 = vpop.permute.xlu0 %234  ;;  %s4600_s4 = sld [smem:[#allocation10 + $0x35]] }
  0xdd   : > { %254 = vst.msk [vmem:[#allocation2 + $0x21] sm:$0xff] %vm238_vm2, %v249_v11  ;;  %240 = vst.msk [vmem:[#allocation2 + $0x9] sm:$0xff] %vm238_vm2, %v235_v12  ;;  %s4601_s22 = sld [smem:[#allocation10 + $0x36]] }
  0xde   : > { %s4602_s18 = sld [smem:[#allocation10 + $0x37]] }
  0xdf   : > { %s4603_s28 = sld [smem:[#allocation10 + $0x38]] }
  0xe0   : > { %v5366_v15 = vld [vmem:[#allocation2] sm:$0xff]  ;;  %v263_v16 = vpop.permute.xlu1 %262  ;;  %v261_v17 = vpop.permute.xlu0 %260  ;;  %v5444_v4 = vld [vmem:[#allocation2 + $0x18] sm:$0xff]  ;;  %s4604_s15 = sld [smem:[#allocation10 + $0x39]] }
  0xe1   : > { %268 = vst.msk [vmem:[#allocation2 + $0x39] sm:$0xff] %vm238_vm2, %v263_v16  ;;  %267 = vst.msk [vmem:[#allocation2 + $0x31] sm:$0xff] %vm238_vm2, %v261_v17  ;;  %v501_v22 = vmul.f32 %v500_v13, %v5366_v15  ;;  %v515_v40 = vmul.f32 %v514_v14, %v5366_v15  ;;  %v529_v54 = vmul.f32 %v528_v18, %v5366_v15  ;;  %s4605_s24 = sld [smem:[#allocation10 + $0x3a]] }
  0xe2   : > { %v543_v5 = vmul.f32 %v542_v19, %v5366_v15  ;;  %v309_v16 = vmul.f32 %v308_v31, %v5366_v15  ;;  %s4606_s17 = sld [smem:[#allocation10 + $0x3b]] }
  0xe3   : > { %505 = vrot.lane.b32.xlu0 %v501_v22, %s9257_s6  ;;  %s9386_s6 = sld [smem:[#allocation52_spill]] }
  0xe4   : > { %v277_v33 = vpop.permute.xlu1 %276  ;;  %v275_v34 = vpop.permute.xlu0 %274  ;;  %v5400_v39 = vld [vmem:[#allocation2 + $0x8] sm:$0xff]  ;;  %9387 = sst [smem:[#allocation52_spill]] %s5408_s2  ;;  %v5452_v9 = vld [vmem:[#allocation2 + $0x20] sm:$0xff]  ;;  %v311_v6 = vadd.f32 %v309_v16, %v286_v30 }
  0xe5   : > { %282 = vst.msk [vmem:[#allocation2 + $0x51] sm:$0xff] %vm238_vm2, %v277_v33  ;;  %281 = vst.msk [vmem:[#allocation2 + $0x49] sm:$0xff] %vm238_vm2, %v275_v34  ;;  %v502_v44 = vmul.f32 %v500_v13, %v5400_v39  ;;  %v516_v58 = vmul.f32 %v514_v14, %v5400_v39  ;;  %v530_v10 = vmul.f32 %v528_v18, %v5400_v39  ;;  %s9428_s30 = sld [smem:[#allocation52_spill]] }
  0xe6   : > { %v557_v34 = vmul.f32 %v556_v20, %v5366_v15  ;;  %v354_v49 = vmul.f32 %v352_v27, %v5452_v9  ;;  %v304_v48 = vmul.f32 %v302_v26, %v5400_v39  ;;  %v572_v16 = vmul.f32 %v570_v21, %v5400_v39  ;;  %s4607_s0 = sld [smem:[#allocation10 + $0x3c]] }
  0xe7   : > { %519 = vrot.lane.b32.xlu0 %v515_v40, %s9392_s7  ;;  %507 = vrot.lane.b32.xlu1 %v502_v44, %s9392_s7  ;;  %v571_v40 = vmul.f32 %v570_v21, %v5366_v15  ;;  %v353_v44 = vmul.f32 %v352_v27, %v5444_v4  ;;  %s4608_s2 = sld [smem:[#allocation10 + $0x3d]] }
  0xe8   : > { %v5460_v14 = vld [vmem:[#allocation2 + $0x30] sm:$0xff]  ;;  %v5466_v33 = vld [vmem:[#allocation2 + $0x38] sm:$0xff]  ;;  %v306_v17 = vadd.f32 %v304_v48, %v284_v25  ;;  %v310_v48 = vmul.f32 %v308_v31, %v5400_v39  ;;  %s4609_s13 = sld [smem:[#allocation10 + $0x3e]] }
  0xe9   : > { %v290_v51 = vstv %s9386_s6  ;;  %v403_v13 = vmul.f32 %v402_v28, %v5460_v14  ;;  %v410_v31 = vmul.f32 %v408_v35, %v5466_v33  ;;  %s9433_s6 = sld [smem:[#allocation47_spill]] }
  0xea   : > { %v356_v11 = vadd.f32 %v354_v49, %v306_v17  ;;  %v315_v49 = vmul.f32 %v314_v38, %v5366_v15  ;;  %v415_v17 = vmul.f32 %v414_v43, %v5460_v14  ;;  %s4610_s1 = sld [smem:[#allocation10 + $0x3f]] }
  0xeb   : > { %533 = vrot.lane.b32.xlu0 %v529_v54, %s9392_s7  ;;  %521 = vrot.lane.b32.xlu1 %v516_v58, %s9392_s7  ;;  %v303_v54 = vmul.f32 %v302_v26, %v5366_v15  ;;  %v558_v26 = vmul.f32 %v556_v20, %v5400_v39  ;;  %v409_v20 = vmul.f32 %v408_v35, %v5460_v14  ;;  %s5883_s12 = sld [smem:[#allocation10 + $0x40]] }
  0xec   : > { %v5468_v18 = vld [vmem:[#allocation2 + $0x48] sm:$0xff]  ;;  %v5483_v58 = vld [vmem:[#allocation2 + $0x50] sm:$0xff]  ;;  %v317_v21 = vadd.f32 %v315_v49, %v288_v37  ;;  %s5893_s14 = sld [smem:[#allocation10 + $0x41]] }
  0xed   : > { %v305_v22 = vadd.f32 %v303_v54, %v284_v25  ;;  %v453_v27 = vmul.f32 %v452_v29, %v5468_v18  ;;  %v404_v54 = vmul.f32 %v402_v28, %v5466_v33  ;;  %v459_v28 = vmul.f32 %v458_v36, %v5468_v18  ;;  %s5904_s16 = sld [smem:[#allocation10 + $0x42]] }
  0xee   : > { %v360_v25 = vmul.f32 %v358_v32, %v5452_v9  ;;  %v460_v35 = vmul.f32 %v458_v36, %v5483_v58  ;;  %v599_v36 = vmul.f32 %v598_v24, %v5366_v15  ;;  %v471_v49 = vmul.f32 %v470_v56, %v5468_v18 }
  0xef   : > { %547 = vrot.lane.b32.xlu0 %v543_v5, %s9392_s7  ;;  %535 = vrot.lane.b32.xlu1 %v530_v10, %s9392_s7  ;;  %v544_v5 = vmul.f32 %v542_v19, %v5400_v39  ;;  %v585_v10 = vmul.f32 %v584_v23, %v5366_v15  ;;  %v359_v19 = vmul.f32 %v358_v32, %v5444_v4 }
  0xf0   : > { %v355_v12 = vadd.f32 %v353_v44, %v305_v22  ;;  %v365_v44 = vmul.f32 %v364_v42, %v5444_v4  ;;  %v406_v32 = vadd.f32 %v404_v54, %v356_v11 }
  0xf2   : > { %v405_v22 = vadd.f32 %v403_v13, %v355_v12 }
  0xf3   : > { %561 = vrot.lane.b32.xlu0 %v557_v34, %s9392_s7  ;;  %549 = vrot.lane.b32.xlu1 %v544_v5, %s9392_s7  ;;  %v454_v34 = vmul.f32 %v452_v29, %v5483_v58  ;;  %v361_v29 = vadd.f32 %v359_v19, %v311_v6  ;;  %v312_v6 = vadd.f32 %v310_v48, %v286_v30 }
  0xf4   : > { %v5554_v12 = vadd.f32 %v453_v27, %v405_v22  ;;  %v367_v19 = vadd.f32 %v365_v44, %v317_v21  ;;  %v316_v27 = vmul.f32 %v314_v38, %v5400_v39  ;;  %v586_v38 = vmul.f32 %v584_v23, %v5400_v39 }
  0xf5   : > { %v411_v13 = vadd.f32 %v409_v20, %v361_v29  ;;  %v5561_v11 = vadd.f32 %v454_v34, %v406_v32  ;;  %v362_v30 = vadd.f32 %v360_v25, %v312_v6  ;;  %v371_v34 = vmul.f32 %v370_v53, %v5444_v4 }
  0xf6   : > { %v321_v20 = vmul.f32 %v320_v52, %v5366_v15  ;;  %v466_v48 = vmul.f32 %v464_v50, %v5483_v58  ;;  %v421_v22 = vmul.f32 %v420_v55, %v5460_v14  ;;  %v322_v44 = vmul.f32 %v320_v52, %v5400_v39 }
  0xf7   : > { %575 = vrot.lane.b32.xlu0 %v571_v40, %s9392_s7  ;;  %563 = vrot.lane.b32.xlu1 %v558_v26, %s9392_s7  ;;  %v465_v40 = vmul.f32 %v464_v50, %v5468_v18  ;;  %v5569_v5 = vadd.f32 %v459_v28, %v411_v13  ;;  %v366_v26 = vmul.f32 %v364_v42, %v5452_v9 }
  0xf8   : > { %v412_v54 = vadd.f32 %v410_v31, %v362_v30  ;;  %v417_v42 = vadd.f32 %v415_v17, %v367_v19  ;;  %v318_v28 = vadd.f32 %v316_v27, %v288_v37  ;;  %v323_v23 = vadd.f32 %v321_v20, %v290_v51 }
  0xf9   : > { %v372_v37 = vmul.f32 %v370_v53, %v5452_v9  ;;  %v613_v50 = vmul.f32 %v612_v41, %v5444_v4  ;;  %v422_v32 = vmul.f32 %v420_v55, %v5466_v33  ;;  %v324_v52 = vadd.f32 %v322_v44, %v290_v51 }
  0xfa   : > { %v5596_v25 = vadd.f32 %v460_v35, %v412_v54  ;;  %v5606_v29 = vadd.f32 %v465_v40, %v417_v42  ;;  %v377_v31 = vmul.f32 %v376_v60, %v5444_v4  ;;  %v327_v6 = vmul.f32 %v326_v59, %v5366_v15 }
  0xfb   : > { %589 = vrot.lane.b32.xlu0 %v585_v10, %s9392_s7  ;;  %577 = vrot.lane.b32.xlu1 %v572_v16, %s9392_s7  ;;  %v416_v10 = vmul.f32 %v414_v43, %v5466_v33  ;;  %v368_v43 = vadd.f32 %v366_v26, %v318_v28  ;;  %v373_v16 = vadd.f32 %v371_v34, %v323_v23 }
  0xfc   : > { %v600_v13 = vmul.f32 %v598_v24, %v5400_v39  ;;  %v627_v55 = vmul.f32 %v626_v45, %v5444_v4  ;;  %v472_v21 = vmul.f32 %v470_v56, %v5483_v58  ;;  %v374_v35 = vadd.f32 %v372_v37, %v324_v52 }
  0xfd   : > { %v418_v53 = vadd.f32 %v416_v10, %v368_v43  ;;  %v423_v17 = vadd.f32 %v421_v22, %v373_v16  ;;  %v427_v30 = vmul.f32 %v426_v61, %v5460_v14  ;;  %v329_v24 = vadd.f32 %v327_v6, %v292_v57 }
  0xfe   : > { %v477_v56 = vmul.f32 %v476_v62, %v5468_v18  ;;  %v378_v19 = vmul.f32 %v376_v60, %v5452_v9  ;;  %v328_v26 = vmul.f32 %v326_v59, %v5400_v39  ;;  %v424_v27 = vadd.f32 %v422_v32, %v374_v35 }
  0xff   : > { %603 = vrot.lane.b32.xlu0 %v599_v36, %s9392_s7  ;;  %591 = vrot.lane.b32.xlu1 %v586_v38, %s9392_s7  ;;  %v5642_v51 = vadd.f32 %v466_v48, %v418_v53  ;;  %v5650_v40 = vadd.f32 %v471_v49, %v423_v17  ;;  %v379_v36 = vadd.f32 %v377_v31, %v329_v24  ;;  %v9429_v52 = vstv %s5386_s9  ;;  %s9445_s9 = sld [smem:[#allocation51_spill]] }
 0x100   : > { %v383_v54 = vmul.f32 %v382_v1, %v5444_v4  ;;  %v333_v34 = vmul.f32 %v332_v0, %v5366_v15  ;;  %v614_v20 = vmul.f32 %v612_v41, %v5452_v9  ;;  %v641_v59 = vmul.f32 %v640_v46, %v5444_v4 }
 0x101   : > { %v428_v60 = vmul.f32 %v426_v61, %v5466_v33  ;;  %v330_v38 = vadd.f32 %v328_v26, %v292_v57  ;;  %v5679_v42 = vadd.f32 %v472_v21, %v424_v27  ;;  %v429_v10 = vadd.f32 %v427_v30, %v379_v36 }
 0x102   : > { %v433_v28 = vmul.f32 %v432_v2, %v5460_v14  ;;  %v335_v41 = vadd.f32 %v333_v34, %v294_v63  ;;  %v478_v57 = vmul.f32 %v476_v62, %v5483_v58  ;;  %v384_v48 = vmul.f32 %v382_v1, %v5452_v9 }
 0x103   : > { %617 = vrot.lane.b32.xlu0 %v613_v50, %s9392_s7  ;;  %605 = vrot.lane.b32.xlu1 %v600_v13, %s9392_s7  ;;  %v380_v61 = vadd.f32 %v378_v19, %v330_v38  ;;  %v334_v22 = vmul.f32 %v332_v0, %v5400_v39  ;;  %v5699_v23 = vadd.f32 %v477_v56, %v429_v10  ;;  %v9430_v31 = vstv %s9426_s8  ;;  %s4615_s8 = sld [smem:[#allocation10 + $0x44]] }
 0x104   : > { %v483_v43 = vmul.f32 %v482_v3, %v5468_v18  ;;  %v385_v37 = vadd.f32 %v383_v54, %v335_v41  ;;  %v434_v62 = vmul.f32 %v432_v2, %v5466_v33  ;;  %v389_v0 = vmul.f32 %v388_v8, %v5444_v4 }
 0x105   : > { %v430_v44 = vadd.f32 %v428_v60, %v380_v61  ;;  %v336_v1 = vadd.f32 %v334_v22, %v294_v63  ;;  %v339_v50 = vmul.f32 %v338_v7, %v5366_v15  ;;  %v628_v49 = vmul.f32 %v626_v45, %v5452_v9 }
 0x106   : > { %v655_v16 = vmul.f32 %v654_v47, %v5444_v4  ;;  %v435_v2 = vadd.f32 %v433_v28, %v385_v37  ;;  %v484_v63 = vmul.f32 %v482_v3, %v5483_v58  ;;  %v439_v45 = vmul.f32 %v9429_v52, %v5460_v14 }
 0x107   : > { %631 = vrot.lane.b32.xlu0 %v627_v55, %s9392_s7  ;;  %619 = vrot.lane.b32.xlu1 %v614_v20, %s9392_s7  ;;  %v5725_v32 = vadd.f32 %v478_v57, %v430_v44  ;;  %v386_v53 = vadd.f32 %v384_v48, %v336_v1  ;;  %v341_v6 = vadd.f32 %v339_v50, %v9430_v31  ;;  %v9431_v55 = vstv %s5392_s11  ;;  %s5788_s11 = sld [smem:[#allocation10 + $0x2f]] }
 0x108   : > { %v5733_v13 = vadd.f32 %v483_v43, %v435_v2  ;;  %v489_v3 = vmul.f32 %v9431_v55, %v5468_v18  ;;  %v390_v17 = vmul.f32 %v388_v8, %v5452_v9  ;;  %v340_v21 = vmul.f32 %v338_v7, %v5400_v39 }
 0x109   : > { %v436_v35 = vadd.f32 %v434_v62, %v386_v53  ;;  %v391_v30 = vadd.f32 %v389_v0, %v341_v6  ;;  %v9434_v24 = vstv %s9427_s3  ;;  %v9435_v19 = vstv %s9428_s30  ;;  %s4616_s3 = sld [smem:[#allocation10 + $0x45]] }
 0x10a   : > { %v395_v56 = vmul.f32 %v9434_v24, %v5444_v4  ;;  %v345_v26 = vmul.f32 %v9435_v19, %v5366_v15  ;;  %v642_v27 = vmul.f32 %v640_v46, %v5452_v9  ;;  %v9437_v8 = vmov %v9429_v52  ;;  %s4617_s30 = sld [smem:[#allocation10 + $0x46]] }
 0x10b   : > { %645 = vrot.lane.b32.xlu0 %v641_v59, %s9392_s7  ;;  %633 = vrot.lane.b32.xlu1 %v628_v49, %s9392_s7  ;;  %v440_v7 = vmul.f32 %v9437_v8, %v5466_v33  ;;  %v9438_v36 = vmov %v9430_v31  ;;  %v494_v34 = vstv %s5686_s21  ;;  %v5762_v20 = vadd.f32 %v484_v63, %v436_v35  ;;  %s5915_s21 = sld [smem:[#allocation10 + $0x43]] }
 0x10c   : > { %v342_v54 = vadd.f32 %v340_v21, %v9438_v36  ;;  %v441_v59 = vadd.f32 %v439_v45, %v391_v30  ;;  %v9439_v60 = vstv %s9432_s23  ;;  %v9440_v46 = vstv %s9433_s6  ;;  %s4618_s23 = sld [smem:[#allocation10 + $0x47]] }
 0x10d   : > { %v445_v38 = vmul.f32 %v9439_v60, %v5460_v14  ;;  %v347_v10 = vadd.f32 %v345_v26, %v9440_v46  ;;  %v9441_v28 = vmov %v9431_v55  ;;  %v9442_v61 = vmov %v9434_v24  ;;  %s4619_s6 = sld [smem:[#allocation10 + $0x48]] }
 0x10e   : > { %v490_v41 = vmul.f32 %v9441_v28, %v5483_v58  ;;  %v392_v57 = vadd.f32 %v390_v17, %v342_v54  ;;  %v396_v48 = vmul.f32 %v9442_v61, %v5452_v9  ;;  %v9443_v22 = vmov %v9435_v19 }
 0x10f   : > { %659 = vrot.lane.b32.xlu0 %v655_v16, %s9392_s7  ;;  %647 = vrot.lane.b32.xlu1 %v642_v27, %s9392_s7  ;;  %v346_v43 = vmul.f32 %v9443_v22, %v5400_v39  ;;  %v9444_v37 = vstv %s9436_s10  ;;  %v5782_v44 = vadd.f32 %v489_v3, %v441_v59  ;;  %v495_v1 = vmul.f32 %v494_v34, %v5468_v18  ;;  %s4620_s10 = sld [smem:[#allocation10 + $0x49]] }
 0x110   : > { %v669_v62 = vmul.f32 %v9444_v37, %v5444_v4  ;;  %v397_v0 = vadd.f32 %v395_v56, %v347_v10  ;;  %v656_v50 = vmul.f32 %v654_v47, %v5452_v9  ;;  %v442_v49 = vadd.f32 %v440_v7, %v392_v57 }
 0x111   : > { %v9446_v16 = vmov %v9439_v60  ;;  %v9447_v63 = vmov %v9440_v46  ;;  %v496_v47 = vmul.f32 %v494_v34, %v5483_v58  ;;  %v9448_v6 = vstv %s9445_s9  ;;  %s4622_s9 = sld [smem:[#allocation10 + $0x4b]] }
 0x112   : > { %v446_v2 = vmul.f32 %v9446_v16, %v5466_v33  ;;  %v348_v53 = vadd.f32 %v346_v43, %v9447_v63  ;;  %v447_v52 = vadd.f32 %v445_v38, %v397_v0  ;;  %v5799_v45 = vadd.f32 %v490_v41, %v442_v49 }
 0x113   : > { %673 = vrot.lane.b32.xlu0 %v669_v62, %s9392_s7  ;;  %661 = vrot.lane.b32.xlu1 %v656_v50, %s9392_s7  ;;  %v683_v55 = vmul.f32 %v9448_v6, %v5444_v4  ;;  %v9449_v17 = vmov %v9444_v37  ;;  %v696_v35 = vstv %s5753_s5  ;;  %v9451_v19 = vmov %v9448_v6  ;;  %s4621_s5 = sld [smem:[#allocation10 + $0x4a]] }
 0x114   : > { %v398_v31 = vadd.f32 %v396_v48, %v348_v53  ;;  %v5805_v3 = vadd.f32 %v495_v1, %v447_v52  ;;  %v670_v21 = vmul.f32 %v9449_v17, %v5452_v9  ;;  %v697_v56 = vmul.f32 %v696_v35, %v5444_v4 }
 0x115   : > { %v684_v26 = vmul.f32 %v9451_v19, %v5452_v9  ;;  %v710_v27 = vstv %s5788_s11  ;;  %v724_v8 = vstv %s5797_s19  ;;  %v698_v36 = vmul.f32 %v696_v35, %v5452_v9  ;;  %s4623_s11 = sld [smem:[#allocation10 + $0x4c]] }
 0x116   : > { %v448_v30 = vadd.f32 %v446_v2, %v398_v31  ;;  %v711_v7 = vmul.f32 %v710_v27, %v5444_v4  ;;  %v725_v54 = vmul.f32 %v724_v8, %v5460_v14  ;;  %v738_v34 = vstv %s4596_s20  ;;  %s4624_s19 = sld [smem:[#allocation10 + $0x4d]] }
 0x117   : > { %687 = vrot.lane.b32.xlu0 %v683_v55, %s9392_s7  ;;  %675 = vrot.lane.b32.xlu1 %v670_v21, %s9392_s7  ;;  %v712_v59 = vmul.f32 %v710_v27, %v5452_v9  ;;  %v739_v60 = vmul.f32 %v738_v34, %v5460_v14  ;;  %v726_v38 = vmul.f32 %v724_v8, %v5466_v33  ;;  %v752_v46 = vstv %s4597_s27  ;;  %s4625_s20 = sld [smem:[#allocation10 + $0x4e]] }
 0x118   : > { %v5813_v24 = vadd.f32 %v496_v47, %v448_v30  ;;  %v753_v10 = vmul.f32 %v752_v46, %v5460_v14  ;;  %v740_v28 = vmul.f32 %v738_v34, %v5466_v33  ;;  %v766_v41 = vstv %s4598_s29  ;;  %s4626_s27 = sld [smem:[#allocation10 + $0x4f]] }
 0x119   : > { %v767_v57 = vmul.f32 %v766_v41, %v5460_v14  ;;  %v754_v61 = vmul.f32 %v752_v46, %v5466_v33  ;;  %v780_v48 = vstv %s4599_s26  ;;  %v768_v43 = vmul.f32 %v766_v41, %v5466_v33  ;;  %s4627_s29 = sld [smem:[#allocation10 + $0x50]] }
 0x11a   : > { %9450 = vst [vmem:[#allocation65_spill] sm:$0xff] %v5813_v24  ;;  %v781_v22 = vmul.f32 %v780_v48, %v5460_v14  ;;  %v794_v37 = vstv %s4600_s4  ;;  %v782_v1 = vmul.f32 %v780_v48, %v5466_v33  ;;  %v808_v0 = vstv %s4601_s22  ;;  %s4628_s26 = sld [smem:[#allocation10 + $0x51]] }
 0x11b   : > { %701 = vrot.lane.b32.xlu0 %v697_v56, %s9392_s7  ;;  %689 = vrot.lane.b32.xlu1 %v684_v26, %s9392_s7  ;;  %v795_v62 = vmul.f32 %v794_v37, %v5460_v14  ;;  %v809_v50 = vmul.f32 %v808_v0, %v5460_v14  ;;  %v796_v49 = vmul.f32 %v794_v37, %v5466_v33  ;;  %v822_v16 = vstv %s4602_s18  ;;  %s4629_s4 = sld [smem:[#allocation10 + $0x52]] }
 0x11c   : > { %v836_v2 = vstv %s4603_s28  ;;  %v823_v63 = vmul.f32 %v822_v16, %v5460_v14  ;;  %v810_v53 = vmul.f32 %v808_v0, %v5466_v33  ;;  %v850_v47 = vstv %s4604_s15  ;;  %s4630_s22 = sld [smem:[#allocation10 + $0x53]] }
 0x11d   : > { %v837_v52 = vmul.f32 %v836_v2, %v5468_v18  ;;  %v824_v31 = vmul.f32 %v822_v16, %v5466_v33  ;;  %v851_v6 = vmul.f32 %v850_v47, %v5468_v18  ;;  %v838_v55 = vmul.f32 %v836_v2, %v5483_v58  ;;  %s4631_s18 = sld [smem:[#allocation10 + $0x54]] }
 0x11e   : > { %v864_v17 = vstv %s4605_s24  ;;  %v852_v35 = vmul.f32 %v850_v47, %v5483_v58  ;;  %v878_v30 = vstv %s4606_s17  ;;  %v892_v26 = vstv %s4607_s0  ;;  %s4632_s28 = sld [smem:[#allocation10 + $0x55]] }
 0x11f   : > { %715 = vrot.lane.b32.xlu0 %v711_v7, %s9392_s7  ;;  %703 = vrot.lane.b32.xlu1 %v698_v36, %s9392_s7  ;;  %v865_v21 = vmul.f32 %v864_v17, %v5468_v18  ;;  %v879_v56 = vmul.f32 %v878_v30, %v5468_v18  ;;  %v866_v19 = vmul.f32 %v864_v17, %v5483_v58  ;;  %v906_v7 = vstv %s4608_s2  ;;  %s4633_s15 = sld [smem:[#allocation10 + $0x56]] }
 0x120   : > { %v893_v27 = vmul.f32 %v892_v26, %v5468_v18  ;;  %v880_v8 = vmul.f32 %v878_v30, %v5483_v58  ;;  %v894_v34 = vmul.f32 %v892_v26, %v5483_v58  ;;  %v962_v0 = vstv %s5893_s14  ;;  %s4634_s24 = sld [smem:[#allocation10 + $0x57]] }
 0x121   : > { %v1004_v30 = vstv %s4615_s8  ;;  %s4635_s17 = sld [smem:[#allocation10 + $0x58]] }
 0x122   : > { %s4636_s0 = sld [smem:[#allocation10 + $0x59]] }
 0x123   : > { %729 = vrot.lane.b32.xlu0 %v725_v54, %s9392_s7  ;;  %717 = vrot.lane.b32.xlu1 %v712_v59, %s9392_s7  ;;  %v907_v54 = vmul.f32 %v906_v7, %v5468_v18  ;;  %v920_v59 = vstv %s4609_s13  ;;  %s4637_s2 = sld [smem:[#allocation10 + $0x5a]] }
 0x124   : > { %v922_v48 = vmul.f32 %v920_v59, %v5483_v58  ;;  %s6111_s13 = sld [smem:[#allocation10 + $0x5b]] }
 0x125   : > { %s6143_s14 = sld [smem:[#allocation10 + $0x5e]] }
 0x126   : > { %s6170_s8 = sld [smem:[#allocation10 + $0x81]] }
 0x127   : > { %743 = vrot.lane.b32.xlu0 %v739_v60, %s9392_s7  ;;  %731 = vrot.lane.b32.xlu1 %v726_v38, %s9392_s7  ;;  %v921_v38 = vmul.f32 %v920_v59, %v5468_v18  ;;  %v1006_v59 = vmul.f32 %v1004_v30, %v5400_v39 }
 0x12b   : > { %757 = vrot.lane.b32.xlu0 %v753_v10, %s9392_s7  ;;  %745 = vrot.lane.b32.xlu1 %v740_v28, %s9392_s7  ;;  %v908_v10 = vmul.f32 %v906_v7, %v5483_v58  ;;  %v934_v28 = vstv %s4610_s1  ;;  %s6121_s1 = sld [smem:[#allocation10 + $0x5c]] }
 0x12f   : > { %771 = vrot.lane.b32.xlu0 %v767_v57, %s9392_s7  ;;  %759 = vrot.lane.b32.xlu1 %v754_v61, %s9392_s7  ;;  %v935_v57 = vmul.f32 %v934_v28, %v5468_v18 }
 0x133   : > { %785 = vrot.lane.b32.xlu0 %v781_v22, %s9392_s7  ;;  %773 = vrot.lane.b32.xlu1 %v768_v43, %s9392_s7  ;;  %v948_v22 = vstv %s5883_s12  ;;  %s6132_s12 = sld [smem:[#allocation10 + $0x5d]] }
 0x134   : > { %v949_v37 = vmul.f32 %v948_v22, %v5366_v15  ;;  %v950_v2 = vmul.f32 %v948_v22, %v5400_v39  ;;  %v1046_v22 = vstv %s4618_s23  ;;  %s6204_s23 = sld [smem:[#allocation10 + $0x84]] }
 0x137   : > { %799 = vrot.lane.b32.xlu0 %v795_v62, %s9392_s7  ;;  %787 = vrot.lane.b32.xlu1 %v782_v1, %s9392_s7  ;;  %v936_v1 = vmul.f32 %v934_v28, %v5483_v58 }
 0x13b   : > { %813 = vrot.lane.b32.xlu0 %v809_v50, %s9392_s7  ;;  %801 = vrot.lane.b32.xlu1 %v796_v49, %s9392_s7  ;;  %v963_v49 = vmul.f32 %v962_v0, %v5366_v15 }
 0x13f   : > { %827 = vrot.lane.b32.xlu0 %v823_v63, %s9392_s7  ;;  %815 = vrot.lane.b32.xlu1 %v810_v53, %s9392_s7  ;;  %v976_v63 = vstv %s5904_s16  ;;  %s6152_s16 = sld [smem:[#allocation10 + $0x5f]] }
 0x143   : > { %841 = vrot.lane.b32.xlu0 %v837_v52, %s9392_s7  ;;  %829 = vrot.lane.b32.xlu1 %v824_v31, %s9392_s7  ;;  %v977_v52 = vmul.f32 %v976_v63, %v5366_v15  ;;  %v964_v31 = vmul.f32 %v962_v0, %v5400_v39 }
 0x147   : > { %855 = vrot.lane.b32.xlu0 %v851_v6, %s9392_s7  ;;  %843 = vrot.lane.b32.xlu1 %v838_v55, %s9392_s7  ;;  %v990_v6 = vstv %s5915_s21  ;;  %s6161_s21 = sld [smem:[#allocation10 + $0x80]] }
 0x148   : > { %v991_v17 = vmul.f32 %v990_v6, %v5366_v15 }
 0x14b   : > { %869 = vrot.lane.b32.xlu0 %v865_v21, %s9392_s7  ;;  %857 = vrot.lane.b32.xlu1 %v852_v35, %s9392_s7  ;;  %v978_v35 = vmul.f32 %v976_v63, %v5400_v39 }
 0x14f   : > { %883 = vrot.lane.b32.xlu0 %v879_v56, %s9392_s7  ;;  %871 = vrot.lane.b32.xlu1 %v866_v19, %s9392_s7  ;;  %v1005_v19 = vmul.f32 %v1004_v30, %v5366_v15 }
 0x153   : > { %897 = vrot.lane.b32.xlu0 %v893_v27, %s9392_s7  ;;  %885 = vrot.lane.b32.xlu1 %v880_v8, %s9392_s7  ;;  %v992_v27 = vmul.f32 %v990_v6, %v5400_v39  ;;  %v1018_v8 = vstv %s4616_s3  ;;  %v1048_v6 = vmul.f32 %v1046_v22, %v5400_v39  ;;  %s6181_s3 = sld [smem:[#allocation10 + $0x82]] }
 0x155   : > { %v5879_v36 = vpop.permute.xlu0 %505 }
 0x157   : > { %911 = vrot.lane.b32.xlu0 %v907_v54, %s9392_s7  ;;  %899 = vrot.lane.b32.xlu1 %v894_v34, %s9392_s7  ;;  %v1019_v54 = vmul.f32 %v1018_v8, %v5366_v15 }
 0x159   : > { %v5887_v60 = vpop.permute.xlu0 %519  ;;  %v5890_v46 = vpop.permute.xlu1 %507 }
 0x15b   : > { %925 = vrot.lane.b32.xlu0 %v921_v38, %s9392_s7  ;;  %913 = vrot.lane.b32.xlu1 %v908_v10, %s9392_s7  ;;  %v1032_v38 = vstv %s4617_s30  ;;  %s6191_s30 = sld [smem:[#allocation10 + $0x83]] }
 0x15c   : > { %v1033_v28 = vmul.f32 %v1032_v38, %v5366_v15 }
 0x15d   : > { %v5897_v41 = vpop.permute.xlu0 %533  ;;  %v5900_v61 = vpop.permute.xlu1 %521 }
 0x15f   : > { %939 = vrot.lane.b32.xlu0 %v935_v57, %s9392_s7  ;;  %927 = vrot.lane.b32.xlu1 %v922_v48, %s9392_s7  ;;  %v1020_v48 = vmul.f32 %v1018_v8, %v5400_v39 }
 0x161   : > { %v5908_v43 = vpop.permute.xlu0 %547  ;;  %v5911_v62 = vpop.permute.xlu1 %535 }
 0x163   : > { %953 = vrot.lane.b32.xlu0 %v949_v37, %s5085_s25  ;;  %941 = vrot.lane.b32.xlu1 %v936_v1, %s9392_s7  ;;  %v1047_v1 = vmul.f32 %v1046_v22, %v5366_v15 }
 0x165   : > { %v5919_v50 = vpop.permute.xlu0 %561  ;;  %v5922_v16 = vpop.permute.xlu1 %549 }
 0x167   : > { %967 = vrot.lane.b32.xlu0 %v963_v49, %s5085_s25  ;;  %955 = vrot.lane.b32.xlu1 %v950_v2, %s5085_s25  ;;  %v1034_v49 = vmul.f32 %v1032_v38, %v5400_v39  ;;  %v1060_v2 = vstv %s4619_s6  ;;  %v1102_v38 = vstv %s4622_s9  ;;  %s6207_s6 = sld [smem:[#allocation10 + $0x85]] }
 0x168   : > { %s6221_s9 = sld [smem:[#allocation10 + $0x88]] }
 0x169   : > { %v5928_v53 = vpop.permute.xlu0 %575  ;;  %v5931_v47 = vpop.permute.xlu1 %563 }
 0x16b   : > { %981 = vrot.lane.b32.xlu0 %v977_v52, %s5085_s25  ;;  %969 = vrot.lane.b32.xlu1 %v964_v31, %s5085_s25  ;;  %v1061_v52 = vmul.f32 %v1060_v2, %v5444_v4 }
 0x16d   : > { %v5937_v55 = vpop.permute.xlu0 %589  ;;  %v5940_v21 = vpop.permute.xlu1 %577 }
 0x16f   : > { %995 = vrot.lane.b32.xlu0 %v991_v17, %s5085_s25  ;;  %983 = vrot.lane.b32.xlu1 %v978_v35, %s5085_s25  ;;  %v1074_v17 = vstv %s4620_s10  ;;  %s6210_s10 = sld [smem:[#allocation10 + $0x86]] }
 0x170   : > { %v1075_v35 = vmul.f32 %v1074_v17, %v5444_v4 }
 0x171   : > { %v5945_v56 = vpop.permute.xlu0 %603  ;;  %v5948_v26 = vpop.permute.xlu1 %591 }
 0x173   : > { %1009 = vrot.lane.b32.xlu0 %v1005_v19, %s5085_s25  ;;  %997 = vrot.lane.b32.xlu1 %v992_v27, %s5085_s25  ;;  %v1062_v19 = vmul.f32 %v1060_v2, %v5452_v9  ;;  %v1088_v27 = vstv %s4621_s5  ;;  %s6215_s5 = sld [smem:[#allocation10 + $0x87]] }
 0x174   : > { %v1089_v8 = vmul.f32 %v1088_v27, %v5444_v4 }
 0x175   : > { %v5953_v7 = vpop.permute.xlu0 %617  ;;  %v5956_v34 = vpop.permute.xlu1 %605 }
 0x176   : > { %9452 = vst [vmem:[#allocation66_spill] sm:$0xff] %v5956_v34 }
 0x177   : > { %1023 = vrot.lane.b32.xlu0 %v1019_v54, %s5085_s25  ;;  %1011 = vrot.lane.b32.xlu1 %v1006_v59, %s5085_s25  ;;  %v1076_v59 = vmul.f32 %v1074_v17, %v5452_v9  ;;  %v1104_v17 = vmul.f32 %v1102_v38, %v5452_v9 }
 0x179   : > { %v5961_v10 = vpop.permute.xlu0 %631  ;;  %v5964_v57 = vpop.permute.xlu1 %619 }
 0x17a   : > { %9453 = vst [vmem:[#allocation67_spill] sm:$0xff] %v5961_v10  ;;  %9454 = vst [vmem:[#allocation68_spill] sm:$0xff] %v5964_v57 }
 0x17b   : > { %1037 = vrot.lane.b32.xlu0 %v1033_v28, %s5085_s25  ;;  %1025 = vrot.lane.b32.xlu1 %v1020_v48, %s5085_s25  ;;  %v1103_v48 = vmul.f32 %v1102_v38, %v5444_v4 }
 0x17d   : > { %v5969_v37 = vpop.permute.xlu0 %645  ;;  %v5972_v0 = vpop.permute.xlu1 %633 }
 0x17e   : > { %9455 = vst [vmem:[#allocation69_spill] sm:$0xff] %v5969_v37  ;;  %9456 = vst [vmem:[#allocation70_spill] sm:$0xff] %v5972_v0 }
 0x17f   : > { %1051 = vrot.lane.b32.xlu0 %v1047_v1, %s5085_s25  ;;  %1039 = vrot.lane.b32.xlu1 %v1034_v49, %s5085_s25  ;;  %v1090_v1 = vmul.f32 %v1088_v27, %v5452_v9  ;;  %v1116_v49 = vstv %s4623_s11  ;;  %s6224_s11 = sld [smem:[#allocation10 + $0x89]] }
 0x181   : > { %v5977_v63 = vpop.permute.xlu0 %659  ;;  %v5980_v31 = vpop.permute.xlu1 %647 }
 0x182   : > { %9457 = vst [vmem:[#allocation71_spill] sm:$0xff] %v5977_v63  ;;  %9458 = vst [vmem:[#allocation72_spill] sm:$0xff] %v5980_v31 }
 0x183   : > { %1065 = vrot.lane.b32.xlu0 %v1061_v52, %s5085_s25  ;;  %1053 = vrot.lane.b32.xlu1 %v1048_v6, %s5085_s25  ;;  %v1117_v52 = vmul.f32 %v1116_v49, %v5444_v4 }
 0x185   : > { %v5985_v15 = vpop.permute.xlu0 %673  ;;  %v5988_v30 = vpop.permute.xlu1 %661 }
 0x186   : > { %9459 = vst [vmem:[#allocation73_spill] sm:$0xff] %v5985_v15  ;;  %9460 = vst [vmem:[#allocation74_spill] sm:$0xff] %v5988_v30 }
 0x187   : > { %1079 = vrot.lane.b32.xlu0 %v1075_v35, %s5085_s25  ;;  %1067 = vrot.lane.b32.xlu1 %v1062_v19, %s5085_s25  ;;  %v1130_v35 = vstv %s4624_s19  ;;  %s6227_s19 = sld [smem:[#allocation10 + $0x8a]] }
 0x188   : > { %v1131_v27 = vmul.f32 %v1130_v35, %v5444_v4 }
 0x189   : > { %v5993_v39 = vpop.permute.xlu0 %687  ;;  %v5996_v54 = vpop.permute.xlu1 %675 }
 0x18a   : > { %9461 = vst [vmem:[#allocation75_spill] sm:$0xff] %v5993_v39  ;;  %9462 = vst [vmem:[#allocation76_spill] sm:$0xff] %v5996_v54 }
 0x18b   : > { %1093 = vrot.lane.b32.xlu0 %v1089_v8, %s5085_s25  ;;  %1081 = vrot.lane.b32.xlu1 %v1076_v59, %s5085_s25  ;;  %v1118_v59 = vmul.f32 %v1116_v49, %v5452_v9 }
 0x18d   : > { %v6001_v28 = vpop.permute.xlu0 %701  ;;  %v6004_v22 = vpop.permute.xlu1 %689 }
 0x18e   : > { %9463 = vst [vmem:[#allocation77_spill] sm:$0xff] %v6001_v28  ;;  %9464 = vst [vmem:[#allocation78_spill] sm:$0xff] %v6004_v22 }
 0x18f   : > { %1107 = vrot.lane.b32.xlu0 %v1103_v48, %s5085_s25  ;;  %1095 = vrot.lane.b32.xlu1 %v1090_v1, %s5085_s25  ;;  %v1144_v48 = vstv %s4625_s20  ;;  %s6232_s20 = sld [smem:[#allocation10 + $0x8b]] }
 0x190   : > { %v1145_v1 = vmul.f32 %v1144_v48, %v5444_v4 }
 0x191   : > { %v6009_v2 = vpop.permute.xlu0 %715  ;;  %v6012_v6 = vpop.permute.xlu1 %703 }
 0x192   : > { %9465 = vst [vmem:[#allocation79_spill] sm:$0xff] %v6009_v2  ;;  %9466 = vst [vmem:[#allocation80_spill] sm:$0xff] %v6012_v6  ;;  %v1158_v6 = vstv %s4626_s27  ;;  %s6238_s27 = sld [smem:[#allocation10 + $0x8c]] }
 0x193   : > { %1121 = vrot.lane.b32.xlu0 %v1117_v52, %s5085_s25  ;;  %1109 = vrot.lane.b32.xlu1 %v1104_v17, %s5085_s25  ;;  %v1132_v17 = vmul.f32 %v1130_v35, %v5452_v9 }
 0x195   : > { %v6017_v19 = vpop.permute.xlu0 %729  ;;  %v6020_v8 = vpop.permute.xlu1 %717 }
 0x196   : > { %9467 = vst [vmem:[#allocation81_spill] sm:$0xff] %v6017_v19  ;;  %9468 = vst [vmem:[#allocation82_spill] sm:$0xff] %v6020_v8 }
 0x197   : > { %1135 = vrot.lane.b32.xlu0 %v1131_v27, %s5085_s25  ;;  %1123 = vrot.lane.b32.xlu1 %v1118_v59, %s5085_s25  ;;  %v1159_v27 = vmul.f32 %v1158_v6, %v5444_v4  ;;  %v1146_v59 = vmul.f32 %v1144_v48, %v5452_v9 }
 0x199   : > { %v6025_v38 = vpop.permute.xlu0 %743  ;;  %v6028_v52 = vpop.permute.xlu1 %731 }
 0x19a   : > { %9469 = vst [vmem:[#allocation83_spill] sm:$0xff] %v6025_v38  ;;  %9470 = vst [vmem:[#allocation84_spill] sm:$0xff] %v6028_v52  ;;  %v1172_v38 = vstv %s4627_s29  ;;  %s6241_s29 = sld [smem:[#allocation10 + $0x8d]] }
 0x19b   : > { %1149 = vrot.lane.b32.xlu0 %v1145_v1, %s5085_s25  ;;  %1137 = vrot.lane.b32.xlu1 %v1132_v17, %s5085_s25  ;;  %v1173_v1 = vmul.f32 %v1172_v38, %v5460_v14  ;;  %v1160_v17 = vmul.f32 %v1158_v6, %v5452_v9 }
 0x19d   : > { %v6033_v49 = vpop.permute.xlu0 %757  ;;  %v6036_v8 = vpop.permute.xlu1 %745 }
 0x19e   : > { %9471 = vst [vmem:[#allocation85_spill] sm:$0xff] %v6033_v49  ;;  %9472 = vst [vmem:[#allocation86_spill] sm:$0xff] %v6036_v8  ;;  %v1186_v49 = vstv %s4628_s26  ;;  %s6244_s26 = sld [smem:[#allocation10 + $0x8e]] }
 0x19f   : > { %1163 = vrot.lane.b32.xlu0 %v1159_v27, %s5085_s25  ;;  %1151 = vrot.lane.b32.xlu1 %v1146_v59, %s5085_s25  ;;  %v1187_v48 = vmul.f32 %v1186_v49, %v5460_v14  ;;  %v1174_v59 = vmul.f32 %v1172_v38, %v5466_v33 }
 0x1a1   : > { %v6041_v35 = vpop.permute.xlu0 %771  ;;  %v6044_v52 = vpop.permute.xlu1 %759 }
 0x1a2   : > { %9473 = vst [vmem:[#allocation87_spill] sm:$0xff] %v6041_v35  ;;  %9474 = vst [vmem:[#allocation88_spill] sm:$0xff] %v6044_v52  ;;  %v1200_v35 = vstv %s4629_s4  ;;  %v1270_v52 = vstv %s4634_s24  ;;  %s6249_s4 = sld [smem:[#allocation10 + $0x8f]] }
 0x1a3   : > { %1177 = vrot.lane.b32.xlu0 %v1173_v1, %s5085_s25  ;;  %1165 = vrot.lane.b32.xlu1 %v1160_v17, %s5085_s25  ;;  %v1201_v6 = vmul.f32 %v1200_v35, %v5460_v14  ;;  %v1188_v17 = vmul.f32 %v1186_v49, %v5466_v33  ;;  %s6272_s24 = sld [smem:[#allocation10 + $0x62]] }
 0x1a5   : > { %v6049_v4 = vpop.permute.xlu0 %785  ;;  %v6052_v27 = vpop.permute.xlu1 %773 }
 0x1a6   : > { %9475 = vst [vmem:[#allocation89_spill] sm:$0xff] %v6049_v4  ;;  %9476 = vst [vmem:[#allocation90_spill] sm:$0xff] %v6052_v27  ;;  %v1214_v4 = vstv %s4630_s22  ;;  %s6255_s22 = sld [smem:[#allocation10 + $0x60]] }
 0x1a7   : > { %1191 = vrot.lane.b32.xlu0 %v1187_v48, %s5085_s25  ;;  %1179 = vrot.lane.b32.xlu1 %v1174_v59, %s5085_s25  ;;  %v1215_v48 = vmul.f32 %v1214_v4, %v5460_v14  ;;  %v1202_v59 = vmul.f32 %v1200_v35, %v5466_v33 }
 0x1a9   : > { %v6057_v9 = vpop.permute.xlu0 %799  ;;  %v6060_v1 = vpop.permute.xlu1 %787 }
 0x1aa   : > { %9477 = vst [vmem:[#allocation91_spill] sm:$0xff] %v6057_v9  ;;  %9478 = vst [vmem:[#allocation92_spill] sm:$0xff] %v6060_v1  ;;  %v1228_v9 = vstv %s4631_s18  ;;  %s6258_s18 = sld [smem:[#allocation10 + $0x68]] }
 0x1ab   : > { %1205 = vrot.lane.b32.xlu0 %v1201_v6, %s5085_s25  ;;  %1193 = vrot.lane.b32.xlu1 %v1188_v17, %s5085_s25  ;;  %v1229_v6 = vmul.f32 %v1228_v9, %v5460_v14  ;;  %v1216_v17 = vmul.f32 %v1214_v4, %v5466_v33 }
 0x1ac   : > { %v1398_v2 = vstv %s6255_s22  ;;  %s6478_s22 = sld [smem:[#allocation10 + $0x72]] }
 0x1ad   : > { %v6065_v38 = vpop.permute.xlu0 %813  ;;  %v6068_v27 = vpop.permute.xlu1 %801 }
 0x1ae   : > { %9479 = vst [vmem:[#allocation93_spill] sm:$0xff] %v6065_v38  ;;  %9480 = vst [vmem:[#allocation94_spill] sm:$0xff] %v6068_v27  ;;  %v1242_v38 = vstv %s4632_s28  ;;  %s6261_s28 = sld [smem:[#allocation10 + $0x61]] }
 0x1af   : > { %1219 = vrot.lane.b32.xlu0 %v1215_v48, %s5085_s25  ;;  %1207 = vrot.lane.b32.xlu1 %v1202_v59, %s5085_s25  ;;  %v1243_v48 = vmul.f32 %v1242_v38, %v5460_v14  ;;  %v1230_v59 = vmul.f32 %v1228_v9, %v5466_v33 }
 0x1b1   : > { %v6073_v49 = vpop.permute.xlu0 %827  ;;  %v6076_v1 = vpop.permute.xlu1 %815 }
 0x1b2   : > { %9481 = vst [vmem:[#allocation95_spill] sm:$0xff] %v6073_v49  ;;  %9482 = vst [vmem:[#allocation96_spill] sm:$0xff] %v6076_v1  ;;  %v1256_v49 = vstv %s4633_s15  ;;  %s6266_s15 = sld [smem:[#allocation10 + $0x69]] }
 0x1b3   : > { %1233 = vrot.lane.b32.xlu0 %v1229_v6, %s5085_s25  ;;  %1221 = vrot.lane.b32.xlu1 %v1216_v17, %s5085_s25  ;;  %v1257_v6 = vmul.f32 %v1256_v49, %v5460_v14  ;;  %v1244_v17 = vmul.f32 %v1242_v38, %v5466_v33 }
 0x1b5   : > { %v6081_v35 = vpop.permute.xlu0 %841  ;;  %v6084_v27 = vpop.permute.xlu1 %829 }
 0x1b6   : > { %9483 = vst [vmem:[#allocation97_spill] sm:$0xff] %v6081_v35  ;;  %9484 = vst [vmem:[#allocation98_spill] sm:$0xff] %v6084_v27 }
 0x1b7   : > { %1247 = vrot.lane.b32.xlu0 %v1243_v48, %s5085_s25  ;;  %1235 = vrot.lane.b32.xlu1 %v1230_v59, %s5085_s25  ;;  %v1271_v48 = vmul.f32 %v1270_v52, %v5460_v14  ;;  %v1258_v59 = vmul.f32 %v1256_v49, %v5466_v33 }
 0x1b9   : > { %v6089_v4 = vpop.permute.xlu0 %855  ;;  %v6092_v1 = vpop.permute.xlu1 %843 }
 0x1ba   : > { %9485 = vst [vmem:[#allocation99_spill] sm:$0xff] %v6089_v4  ;;  %9486 = vst [vmem:[#allocation100_spill] sm:$0xff] %v6092_v1  ;;  %v1284_v4 = vstv %s4635_s17  ;;  %s6275_s17 = sld [smem:[#allocation10 + $0x6a]] }
 0x1bb   : > { %1261 = vrot.lane.b32.xlu0 %v1257_v6, %s5085_s25  ;;  %1249 = vrot.lane.b32.xlu1 %v1244_v17, %s5085_s25  ;;  %v1285_v6 = vmul.f32 %v1284_v4, %v5468_v18  ;;  %v1272_v17 = vmul.f32 %v1270_v52, %v5466_v33 }
 0x1bd   : > { %v6097_v9 = vpop.permute.xlu0 %869  ;;  %v6100_v27 = vpop.permute.xlu1 %857 }
 0x1be   : > { %9487 = vst [vmem:[#allocation101_spill] sm:$0xff] %v6097_v9  ;;  %9488 = vst [vmem:[#allocation102_spill] sm:$0xff] %v6100_v27  ;;  %v1298_v9 = vstv %s4636_s0  ;;  %s6278_s0 = sld [smem:[#allocation10 + $0x63]] }
 0x1bf   : > { %1275 = vrot.lane.b32.xlu0 %v1271_v48, %s5085_s25  ;;  %1263 = vrot.lane.b32.xlu1 %v1258_v59, %s5085_s25  ;;  %v1299_v49 = vmul.f32 %v1298_v9, %v5468_v18  ;;  %v1286_v59 = vmul.f32 %v1284_v4, %v5483_v58 }
 0x1c1   : > { %v6105_v38 = vpop.permute.xlu0 %883  ;;  %v6108_v1 = vpop.permute.xlu1 %871 }
 0x1c2   : > { %9489 = vst [vmem:[#allocation103_spill] sm:$0xff] %v6105_v38  ;;  %9490 = vst [vmem:[#allocation104_spill] sm:$0xff] %v6108_v1  ;;  %v1312_v38 = vstv %s4637_s2  ;;  %v1354_v1 = vstv %s6132_s12  ;;  %s6283_s2 = sld [smem:[#allocation10 + $0x6b]] }
 0x1c3   : > { %1289 = vrot.lane.b32.xlu0 %v1285_v6, %s5085_s25  ;;  %1277 = vrot.lane.b32.xlu1 %v1272_v17, %s5085_s25  ;;  %v1313_v52 = vmul.f32 %v1312_v38, %v5468_v18  ;;  %v1300_v17 = vmul.f32 %v1298_v9, %v5483_v58  ;;  %s6295_s12 = sld [smem:[#allocation10 + $0x65]] }
 0x1c5   : > { %v6115_v14 = vpop.permute.xlu0 %897  ;;  %v6118_v48 = vpop.permute.xlu1 %885 }
 0x1c6   : > { %9491 = vst [vmem:[#allocation105_spill] sm:$0xff] %v6115_v14  ;;  %9492 = vst [vmem:[#allocation106_spill] sm:$0xff] %v6118_v48  ;;  %v1326_v14 = vstv %s6111_s13  ;;  %v1340_v48 = vstv %s6121_s1  ;;  %s6289_s13 = sld [smem:[#allocation10 + $0x64]] }
 0x1c7   : > { %1303 = vrot.lane.b32.xlu0 %v1299_v49, %s5085_s25  ;;  %1291 = vrot.lane.b32.xlu1 %v1286_v59, %s5085_s25  ;;  %v1327_v49 = vmul.f32 %v1326_v14, %v5468_v18  ;;  %s6292_s1 = sld [smem:[#allocation10 + $0x6c]] }
 0x1c9   : > { %v6125_v33 = vpop.permute.xlu0 %911  ;;  %v6128_v6 = vpop.permute.xlu1 %899 }
 0x1ca   : > { %9493 = vst [vmem:[#allocation107_spill] sm:$0xff] %v6125_v33  ;;  %9494 = vst [vmem:[#allocation108_spill] sm:$0xff] %v6128_v6  ;;  %v1314_v33 = vmul.f32 %v1312_v38, %v5483_v58 }
 0x1cb   : > { %1317 = vrot.lane.b32.xlu0 %v1313_v52, %s5085_s25  ;;  %1305 = vrot.lane.b32.xlu1 %v1300_v17, %s5085_s25  ;;  %v4929_v52 = vld [vmem:[#allocation2 + $0x48] sm:$0xff] }
 0x1cc   : > { %v1341_v17 = vmul.f32 %v4929_v52, %v1340_v48  ;;  %v1355_v38 = vmul.f32 %v4929_v52, %v1354_v1 }
 0x1cd   : > { %v6136_v4 = vpop.permute.xlu0 %925  ;;  %v6139_v59 = vpop.permute.xlu1 %913 }
 0x1ce   : > { %9495 = vst [vmem:[#allocation109_spill] sm:$0xff] %v6136_v4  ;;  %9496 = vst [vmem:[#allocation110_spill] sm:$0xff] %v6139_v59  ;;  %v4930_v4 = vld [vmem:[#allocation2 + $0x50] sm:$0xff]  ;;  %v1382_v59 = vstv %s6152_s16  ;;  %s6308_s16 = sld [smem:[#allocation10 + $0x90]] }
 0x1cf   : > { %1331 = vrot.lane.b32.xlu0 %v1327_v49, %s5085_s25  ;;  %1319 = vrot.lane.b32.xlu1 %v1314_v33, %s5085_s25  ;;  %v1328_v18 = vmul.f32 %v4930_v4, %v1326_v14  ;;  %v1342_v49 = vmul.f32 %v4930_v4, %v1340_v48 }
 0x1d1   : > { %v6147_v9 = vpop.permute.xlu0 %939  ;;  %v6149_v6 = vpop.permute.xlu1 %927 }
 0x1d2   : > { %9497 = vst [vmem:[#allocation111_spill] sm:$0xff] %v6147_v9  ;;  %9498 = vst [vmem:[#allocation112_spill] sm:$0xff] %v6149_v6  ;;  %v1368_v9 = vstv %s6143_s14  ;;  %s6300_s14 = sld [smem:[#allocation10 + $0x6d]] }
 0x1d3   : > { %1345 = vrot.lane.b32.xlu0 %v1341_v17, %s5085_s25  ;;  %1333 = vrot.lane.b32.xlu1 %v1328_v18, %s5085_s25  ;;  %v1369_v6 = vmul.f32 %v4929_v52, %v1368_v9  ;;  %v1356_v18 = vmul.f32 %v4930_v4, %v1354_v1  ;;  %v1370_v27 = vmul.f32 %v4930_v4, %v1368_v9 }
 0x1d5   : > { %v6156_v58 = vpop.permute.xlu0 %953  ;;  %v6158_v33 = vpop.permute.xlu1 %941 }
 0x1d6   : > { %9499 = vst [vmem:[#allocation113_spill] sm:$0xff] %v6156_v58  ;;  %9500 = vst [vmem:[#allocation114_spill] sm:$0xff] %v6158_v33  ;;  %v1383_v33 = vmul.f32 %v4929_v52, %v1382_v59  ;;  %v1384_v52 = vmul.f32 %v4930_v4, %v1382_v59 }
 0x1d7   : > { %1359 = vrot.lane.b32.xlu0 %v1355_v38, %s5085_s25  ;;  %1347 = vrot.lane.b32.xlu1 %v1342_v49, %s5085_s25  ;;  %v6176_v38 = vld [vmem:[#allocation2 + $0x1] sm:$0xff] }
 0x1d9   : > { %v6165_v14 = vpop.permute.xlu0 %967  ;;  %v6167_v17 = vpop.permute.xlu1 %955 }
 0x1da   : > { %9501 = vst [vmem:[#allocation115_spill] sm:$0xff] %v6165_v14  ;;  %9502 = vst [vmem:[#allocation116_spill] sm:$0xff] %v6167_v17  ;;  %v1596_v14 = vstv %s6161_s21  ;;  %s6311_s21 = sld [smem:[#allocation10 + $0x91]]  ;;  %v1764_v17 = vstv %s6238_s27 }
 0x1db   : > { %1373 = vrot.lane.b32.xlu0 %v1369_v6, %s5085_s25  ;;  %1361 = vrot.lane.b32.xlu1 %v1356_v18, %s5085_s25  ;;  %v1597_v6 = vmul.f32 %v1596_v14, %v6176_v38  ;;  %s6420_s27 = sld [smem:[#allocation10 + $0x70]] }
 0x1dd   : > { %v6174_v48 = vpop.permute.xlu0 %981  ;;  %v6178_v49 = vpop.permute.xlu1 %969 }
 0x1de   : > { %9503 = vst [vmem:[#allocation117_spill] sm:$0xff] %v6174_v48  ;;  %9504 = vst [vmem:[#allocation118_spill] sm:$0xff] %v6178_v49  ;;  %v1610_v48 = vstv %s6170_s8  ;;  %v6193_v49 = vld [vmem:[#allocation2 + $0x9] sm:$0xff]  ;;  %s6314_s8 = sld [smem:[#allocation10 + $0x92]] }
 0x1df   : > { %1387 = vrot.lane.b32.xlu0 %v1383_v33, %s5085_s25  ;;  %1375 = vrot.lane.b32.xlu1 %v1370_v27, %s5085_s25  ;;  %v1611_v27 = vmul.f32 %v1610_v48, %v6176_v38 }
 0x1e0   : > { %v1834_v63 = vstv %s6311_s21  ;;  %s6665_s21 = sld [smem:[#allocation10 + $0x7d]] }
 0x1e1   : > { %v6185_v1 = vpop.permute.xlu0 %995  ;;  %v6188_v18 = vpop.permute.xlu1 %983 }
 0x1e2   : > { %9505 = vst [vmem:[#allocation119_spill] sm:$0xff] %v6185_v1  ;;  %9506 = vst [vmem:[#allocation120_spill] sm:$0xff] %v6188_v18  ;;  %v1598_v1 = vmul.f32 %v1596_v14, %v6193_v49  ;;  %v1624_v18 = vstv %s6181_s3  ;;  %v1612_v14 = vmul.f32 %v1610_v48, %v6193_v49  ;;  %s6319_s3 = sld [smem:[#allocation10 + $0x93]] }
 0x1e3   : > { %1601 = vrot.lane.b32.xlu0 %v1597_v6, %s9392_s7  ;;  %1389 = vrot.lane.b32.xlu1 %v1384_v52, %s5085_s25  ;;  %v1625_v59 = vmul.f32 %v1624_v18, %v6176_v38  ;;  %v1638_v52 = vstv %s6191_s30  ;;  %v1626_v48 = vmul.f32 %v1624_v18, %v6193_v49  ;;  %s6325_s30 = sld [smem:[#allocation10 + $0x94]] }
 0x1e4   : > { %v1640_v18 = vmul.f32 %v1638_v52, %v6193_v49  ;;  %v1848_v31 = vstv %s6314_s8  ;;  %s7011_s8 = sld [smem:[#allocation10 + $0x7e]] }
 0x1e5   : > { %v6197_v9 = vpop.permute.xlu0 %1009  ;;  %v6200_v33 = vpop.permute.xlu1 %997 }
 0x1e6   : > { %9507 = vst [vmem:[#allocation121_spill] sm:$0xff] %v6197_v9  ;;  %9508 = vst [vmem:[#allocation122_spill] sm:$0xff] %v6200_v33  ;;  %v1694_v33 = vstv %s6215_s5  ;;  %v6302_v9 = vld [vmem:[#allocation2 + $0x19] sm:$0xff]  ;;  %s6355_s5 = sld [smem:[#allocation10 + $0x67]] }
 0x1e7   : > { %1615 = vrot.lane.b32.xlu0 %v1611_v27, %s9392_s7  ;;  %1603 = vrot.lane.b32.xlu1 %v1598_v1, %s9392_s7  ;;  %v1639_v27 = vmul.f32 %v1638_v52, %v6176_v38 }
 0x1e9   : > { %v6212_v4 = vpop.permute.xlu0 %1023  ;;  %v6217_v6 = vpop.permute.xlu1 %1011  ;;  %v1876_v19 = vstv %s6325_s30  ;;  %s7044_s30 = sld [smem:[#allocation10 + $0x7f]] }
 0x1ea   : > { %9509 = vst [vmem:[#allocation123_spill] sm:$0xff] %v6212_v4  ;;  %9510 = vst [vmem:[#allocation124_spill] sm:$0xff] %v6217_v6  ;;  %v1652_v4 = vstv %s6204_s23  ;;  %s6333_s23 = sld [smem:[#allocation10 + $0x66]] }
 0x1eb   : > { %1629 = vrot.lane.b32.xlu0 %v1625_v59, %s9392_s7  ;;  %1617 = vrot.lane.b32.xlu1 %v1612_v14, %s9392_s7  ;;  %v1653_v14 = vmul.f32 %v1652_v4, %v6176_v38  ;;  %v1654_v52 = vmul.f32 %v1652_v4, %v6193_v49 }
 0x1ed   : > { %v6229_v1 = vpop.permute.xlu0 %1037  ;;  %v6234_v6 = vpop.permute.xlu1 %1025 }
 0x1ee   : > { %9511 = vst [vmem:[#allocation125_spill] sm:$0xff] %v6229_v1  ;;  %9512 = vst [vmem:[#allocation126_spill] sm:$0xff] %v6234_v6  ;;  %v1666_v1 = vstv %s6207_s6  ;;  %s6339_s6 = sld [smem:[#allocation10 + $0x95]] }
 0x1ef   : > { %1643 = vrot.lane.b32.xlu0 %v1639_v27, %s9392_s7  ;;  %1631 = vrot.lane.b32.xlu1 %v1626_v48, %s9392_s7  ;;  %v1667_v48 = vmul.f32 %v1666_v1, %v6176_v38  ;;  %v1668_v4 = vmul.f32 %v1666_v1, %v6193_v49 }
 0x1f1   : > { %v6246_v59 = vpop.permute.xlu0 %1051  ;;  %v6251_v6 = vpop.permute.xlu1 %1039 }
 0x1f2   : > { %9513 = vst [vmem:[#allocation127_spill] sm:$0xff] %v6246_v59  ;;  %9514 = vst [vmem:[#allocation128_spill] sm:$0xff] %v6251_v6  ;;  %v1680_v59 = vstv %s6210_s10  ;;  %s6347_s10 = sld [smem:[#allocation10 + $0x6e]] }
 0x1f3   : > { %1657 = vrot.lane.b32.xlu0 %v1653_v14, %s9392_s7  ;;  %1645 = vrot.lane.b32.xlu1 %v1640_v18, %s9392_s7  ;;  %v1681_v18 = vmul.f32 %v1680_v59, %v6176_v38 }
 0x1f4   : > { %v1890_v34 = vstv %s6339_s6  ;;  %s7072_s6 = sld [smem:[#allocation10 + $0x9f]] }
 0x1f5   : > { %v6263_v27 = vpop.permute.xlu0 %1065  ;;  %v6268_v6 = vpop.permute.xlu1 %1053 }
 0x1f6   : > { %9515 = vst [vmem:[#allocation129_spill] sm:$0xff] %v6263_v27  ;;  %9516 = vst [vmem:[#allocation130_spill] sm:$0xff] %v6268_v6  ;;  %v1806_v27 = vstv %s6249_s4  ;;  %s6465_s4 = sld [smem:[#allocation10 + $0x9a]] }
 0x1f7   : > { %1671 = vrot.lane.b32.xlu0 %v1667_v48, %s9392_s7  ;;  %1659 = vrot.lane.b32.xlu1 %v1654_v52, %s9392_s7  ;;  %v1695_v52 = vmul.f32 %v1694_v33, %v6176_v38  ;;  %v6401_v0 = vmul.f32 %v1806_v27, %v6302_v9 }
 0x1f9   : > { %v6280_v14 = vpop.permute.xlu0 %1079  ;;  %v6285_v6 = vpop.permute.xlu1 %1067 }
 0x1fa   : > { %9517 = vst [vmem:[#allocation131_spill] sm:$0xff] %v6280_v14  ;;  %9518 = vst [vmem:[#allocation132_spill] sm:$0xff] %v6285_v6  ;;  %v1682_v6 = vmul.f32 %v1680_v59, %v6193_v49  ;;  %v1750_v14 = vstv %s6232_s20  ;;  %s6405_s20 = sld [smem:[#allocation10 + $0x98]] }
 0x1fb   : > { %1685 = vrot.lane.b32.xlu0 %v1681_v18, %s9392_s7  ;;  %1673 = vrot.lane.b32.xlu1 %v1668_v4, %s9392_s7  ;;  %v1708_v18 = vstv %s6221_s9  ;;  %v1751_v15 = vmul.f32 %v1750_v14, %v6302_v9  ;;  %s6364_s9 = sld [smem:[#allocation10 + $0x96]] }
 0x1fc   : > { %v1709_v59 = vmul.f32 %v1708_v18, %v6302_v9 }
 0x1fd   : > { %v6297_v48 = vpop.permute.xlu0 %1093  ;;  %v6304_v1 = vpop.permute.xlu1 %1081 }
 0x1fe   : > { %9519 = vst [vmem:[#allocation133_spill] sm:$0xff] %v6297_v48  ;;  %9520 = vst [vmem:[#allocation134_spill] sm:$0xff] %v6304_v1  ;;  %v1696_v48 = vmul.f32 %v1694_v33, %v6193_v49  ;;  %v1778_v33 = vstv %s6241_s29  ;;  %s6433_s29 = sld [smem:[#allocation10 + $0x71]] }
 0x1ff   : > { %1699 = vrot.lane.b32.xlu0 %v1695_v52, %s9392_s7  ;;  %1687 = vrot.lane.b32.xlu1 %v1682_v6, %s9392_s7  ;;  %v1722_v52 = vstv %s6224_s11  ;;  %v6327_v6 = vld [vmem:[#allocation2 + $0x21] sm:$0xff]  ;;  %v6378_v39 = vmul.f32 %v1778_v33, %v6302_v9  ;;  %s6381_s11 = sld [smem:[#allocation10 + $0x97]] }
 0x200   : > { %9523 = vst [vmem:[#allocation137_spill] sm:$0xff] %v6327_v6  ;;  %v1723_v58 = vmul.f32 %v1722_v52, %v6302_v9  ;;  %v1710_v54 = vmul.f32 %v1708_v18, %v6327_v6  ;;  %v6366_v18 = vld [vmem:[#allocation2 + $0x39] sm:$0xff]  ;;  %v6386_v30 = vmul.f32 %v1778_v33, %v6327_v6  ;;  %v6409_v33 = vmul.f32 %v1806_v27, %v6327_v6 }
 0x201   : > { %v6316_v4 = vpop.permute.xlu0 %1107  ;;  %v6321_v1 = vpop.permute.xlu1 %1095  ;;  %9526 = vst [vmem:[#allocation140_spill] sm:$0xff] %v6366_v18 }
 0x202   : > { %9521 = vst [vmem:[#allocation135_spill] sm:$0xff] %v6316_v4  ;;  %9522 = vst [vmem:[#allocation136_spill] sm:$0xff] %v6321_v1  ;;  %v1736_v4 = vstv %s6227_s19  ;;  %v1792_v1 = vstv %s6244_s26  ;;  %s6393_s19 = sld [smem:[#allocation10 + $0x6f]] }
 0x203   : > { %1713 = vrot.lane.b32.xlu0 %v1709_v59, %s9392_s7  ;;  %1701 = vrot.lane.b32.xlu1 %v1696_v48, %s9392_s7  ;;  %v1448_v59 = vstv %s6258_s18  ;;  %v1724_v48 = vmul.f32 %v1722_v52, %v6327_v6  ;;  %v1738_v28 = vmul.f32 %v1736_v4, %v6327_v6  ;;  %v6368_v52 = vld [vmem:[#allocation2 + $0x31] sm:$0xff]  ;;  %v6398_v37 = vmul.f32 %v1792_v1, %v6327_v6  ;;  %s6449_s26 = sld [smem:[#allocation10 + $0x99]] }
 0x204   : > { %9527 = vst [vmem:[#allocation141_spill] sm:$0xff] %v6368_v52  ;;  %v6424_v57 = vmul.f32 %v1834_v63, %v6368_v52  ;;  %v6430_v27 = vmul.f32 %v1848_v31, %v6368_v52  ;;  %s6495_s18 = sld [smem:[#allocation10 + $0x73]] }
 0x205   : > { %v6341_v8 = vpop.permute.xlu0 %1121  ;;  %v6349_v22 = vpop.permute.xlu1 %1109 }
 0x206   : > { %9524 = vst [vmem:[#allocation138_spill] sm:$0xff] %v6341_v8  ;;  %9525 = vst [vmem:[#allocation139_spill] sm:$0xff] %v6349_v22  ;;  %v1737_v8 = vmul.f32 %v1736_v4, %v6302_v9  ;;  %v6362_v22 = vmul.f32 %v1750_v14, %v6327_v6  ;;  %v6375_v4 = vmul.f32 %v1764_v17, %v6327_v6  ;;  %v1820_v14 = vstv %s6308_s16  ;;  %s6651_s16 = sld [smem:[#allocation10 + $0x7c]] }
 0x207   : > { %1727 = vrot.lane.b32.xlu0 %v1723_v58, %s9392_s7  ;;  %1715 = vrot.lane.b32.xlu1 %v1710_v54, %s9392_s7  ;;  %v6372_v58 = vmul.f32 %v1764_v17, %v6302_v9  ;;  %v6389_v54 = vmul.f32 %v1792_v1, %v6302_v9  ;;  %v6412_v10 = vmul.f32 %v1820_v14, %v6368_v52 }
 0x208   : > { %v6418_v1 = vmul.f32 %v1398_v2, %v6176_v38 }
 0x209   : > { %v6383_v35 = vpop.permute.xlu0 %1135  ;;  %v6395_v17 = vpop.permute.xlu1 %1123 }
 0x20a   : > { %9528 = vst [vmem:[#allocation142_spill] sm:$0xff] %v6383_v35  ;;  %9529 = vst [vmem:[#allocation143_spill] sm:$0xff] %v6395_v17  ;;  %v1862_v35 = vstv %s6319_s3  ;;  %v6415_v17 = vmul.f32 %v1820_v14, %v6366_v18  ;;  %s7023_s3 = sld [smem:[#allocation10 + $0x77]] }
 0x20b   : > { %1741 = vrot.lane.b32.xlu0 %v1737_v8, %s9392_s7  ;;  %9530 = vst [vmem:[#allocation144_spill] sm:$0xff] %v6418_v1  ;;  %1729 = vrot.lane.b32.xlu1 %v1724_v48, %s9392_s7  ;;  %v6427_v8 = vmul.f32 %v1834_v63, %v6366_v18  ;;  %v6438_v1 = vmul.f32 %v1848_v31, %v6366_v18 }
 0x20c   : > { %v6441_v48 = vmul.f32 %v1862_v35, %v6368_v52  ;;  %v6444_v63 = vmul.f32 %v1862_v35, %v6366_v18  ;;  %v6457_v31 = vmul.f32 %v1876_v19, %v6366_v18  ;;  %v6463_v35 = vmul.f32 %v1448_v59, %v6327_v6 }
 0x20d   : > { %9531 = vst [vmem:[#allocation145_spill] sm:$0xff] %v6427_v8  ;;  %v6435_v14 = vpop.permute.xlu0 %1149  ;;  %9533 = vst [vmem:[#allocation147_spill] sm:$0xff] %v6438_v1  ;;  %v6447_v8 = vmul.f32 %v1876_v19, %v6368_v52  ;;  %v6451_v24 = vpop.permute.xlu1 %1137  ;;  %v6460_v1 = vmul.f32 %v1398_v2, %v6193_v49  ;;  %v9543_v19 = vstv %s6261_s28  ;;  %v1904_v2 = vstv %s6364_s9  ;;  %s6527_s28 = sld [smem:[#allocation10 + $0x74]] }
 0x20e   : > { %9532 = vst [vmem:[#allocation146_spill] sm:$0xff] %v6435_v14  ;;  %9534 = vst [vmem:[#allocation148_spill] sm:$0xff] %v6441_v48  ;;  %v6454_v14 = vmul.f32 %v1448_v59, %v6302_v9  ;;  %v9545_v59 = vstv %s6266_s15  ;;  %s6547_s15 = sld [smem:[#allocation10 + $0x9c]]  ;;  %v1960_v48 = vstv %s6465_s4 }
 0x20f   : > { %9535 = vst [vmem:[#allocation149_spill] sm:$0xff] %v6444_v63  ;;  %9536 = vst [vmem:[#allocation150_spill] sm:$0xff] %v6447_v8  ;;  %1755 = vrot.lane.b32.xlu0 %v1751_v15, %s9392_s7  ;;  %1743 = vrot.lane.b32.xlu1 %v1738_v28, %s9392_s7  ;;  %v6487_v15 = vmul.f32 %v1890_v34, %v6366_v18  ;;  %v9551_v63 = vmov %v9545_v59  ;;  %s7148_s9 = sld [smem:[#allocation10 + $0xa2]] }
 0x210   : > { %9537 = vst [vmem:[#allocation151_spill] sm:$0xff] %v6451_v24  ;;  %9538 = vst [vmem:[#allocation152_spill] sm:$0xff] %v6454_v14  ;;  %v6469_v24 = vmul.f32 %v1890_v34, %v6368_v52  ;;  %v6474_v14 = vmul.f32 %v9543_v19, %v6176_v38  ;;  %v6502_v28 = vmul.f32 %v9551_v63, %v6327_v6  ;;  %v1416_v34 = vstv %s6278_s0  ;;  %s6571_s0 = sld [smem:[#allocation10 + $0x9d]] }
 0x211   : > { %9539 = vst [vmem:[#allocation153_spill] sm:$0xff] %v6457_v31  ;;  %9540 = vst [vmem:[#allocation154_spill] sm:$0xff] %v6460_v1  ;;  %v1460_v1 = vstv %s6275_s17  ;;  %v9548_v31 = vmov %v9543_v19  ;;  %v1918_v19 = vstv %s6381_s11  ;;  %s6511_s17 = sld [smem:[#allocation10 + $0x9b]] }
 0x212   : > { %9541 = vst [vmem:[#allocation155_spill] sm:$0xff] %v6463_v35  ;;  %9542 = vst [vmem:[#allocation156_spill] sm:$0xff] %v6469_v24  ;;  %v6484_v35 = vmul.f32 %v9545_v59, %v6302_v9  ;;  %v6492_v24 = vmul.f32 %v9548_v31, %v6193_v49  ;;  %v9553_v59 = vstv %s6272_s24  ;;  %v6513_v31 = vld [vmem:[#allocation2 + $0x49] sm:$0xff]  ;;  %v6521_v63 = vmul.f32 %v1460_v1, %v6302_v9  ;;  %s7160_s11 = sld [smem:[#allocation10 + $0xa3]] }
 0x213   : > { %9544 = vst [vmem:[#allocation157_spill] sm:$0xff] %v6474_v14  ;;  %9547 = vst [vmem:[#allocation159_spill] sm:$0xff] %v6487_v15  ;;  %v6497_v14 = vpop.permute.xlu0 %1163  ;;  %v1466_v15 = vstv %s6283_s2  ;;  %1769 = vrot.lane.b32.xlu0 %v6372_v58, %s9392_s7  ;;  %1757 = vrot.lane.b32.xlu1 %v6362_v22, %s9392_s7  ;;  %v6552_v58 = vmul.f32 %v1416_v34, %v6176_v38  ;;  %v1946_v22 = vstv %s6449_s26  ;;  %s6583_s2 = sld [smem:[#allocation10 + $0x79]] }
 0x214   : > { %9546 = vst [vmem:[#allocation158_spill] sm:$0xff] %v6484_v35  ;;  %9549 = vst [vmem:[#allocation160_spill] sm:$0xff] %v6492_v24  ;;  %v6507_v35 = vmul.f32 %v9553_v59, %v6176_v38  ;;  %v6515_v24 = vpop.permute.xlu1 %1151  ;;  %v1932_v59 = vstv %s6405_s20  ;;  %s4712_s20 = sld [smem:[#allocation10 + $0xa5]] }
 0x215   : > { %9550 = vst [vmem:[#allocation161_spill] sm:$0xff] %v6497_v14  ;;  %9552 = vst [vmem:[#allocation162_spill] sm:$0xff] %v6502_v28  ;;  %v6518_v14 = vmul.f32 %v1904_v2, %v6368_v52  ;;  %v6524_v28 = vmul.f32 %v1904_v2, %v6366_v18  ;;  %v6542_v2 = vmul.f32 %v1460_v1, %v6327_v6  ;;  %s7196_s26 = sld [smem:[#allocation10 + $0xa8]] }
 0x216   : > { %9554 = vst [vmem:[#allocation163_spill] sm:$0xff] %v6507_v35  ;;  %9555 = vst [vmem:[#allocation164_spill] sm:$0xff] %v6515_v24  ;;  %v6529_v35 = vld [vmem:[#allocation2 + $0x51] sm:$0xff]  ;;  %v6534_v24 = vmul.f32 %v1918_v19, %v6368_v52  ;;  %s7205_s4 = sld [smem:[#allocation10 + $0xa9]] }
 0x217   : > { %9556 = vst [vmem:[#allocation165_spill] sm:$0xff] %v6518_v14  ;;  %9557 = vst [vmem:[#allocation166_spill] sm:$0xff] %v6521_v63  ;;  %v9561_v14 = vstv %s6272_s24  ;;  %v6545_v63 = vmul.f32 %v1918_v19, %v6366_v18  ;;  %s6559_s24 = sld [smem:[#allocation10 + $0x78]]  ;;  %v6561_v1 = vpop.permute.xlu0 %1177  ;;  %v6564_v19 = vmul.f32 %v1932_v59, %v6513_v31  ;;  %1783 = vrot.lane.b32.xlu0 %v6378_v39, %s9392_s7  ;;  %1771 = vrot.lane.b32.xlu1 %v6375_v4, %s9392_s7 }
 0x218   : > { %9558 = vst [vmem:[#allocation167_spill] sm:$0xff] %v6524_v28  ;;  %9559 = vst [vmem:[#allocation168_spill] sm:$0xff] %v6529_v35  ;;  %v6539_v8 = vmul.f32 %v9561_v14, %v6193_v49  ;;  %v6555_v28 = vmul.f32 %v1466_v15, %v6302_v9  ;;  %v1422_v14 = vstv %s6289_s13  ;;  %s6597_s13 = sld [smem:[#allocation10 + $0x75]]  ;;  %v6619_v4 = vmul.f32 %v1946_v22, %v6529_v35 }
 0x219   : > { %9560 = vst [vmem:[#allocation169_spill] sm:$0xff] %v6534_v24  ;;  %9563 = vst [vmem:[#allocation171_spill] sm:$0xff] %v6542_v2  ;;  %v6567_v2 = vmul.f32 %v1416_v34, %v6193_v49  ;;  %v6579_v24 = vmul.f32 %v1932_v59, %v6529_v35  ;;  %v6588_v34 = vmul.f32 %v1422_v14, %v6176_v38 }
 0x21a   : > { %9562 = vst [vmem:[#allocation170_spill] sm:$0xff] %v6539_v8  ;;  %9564 = vst [vmem:[#allocation172_spill] sm:$0xff] %v6545_v63  ;;  %v1472_v8 = vstv %s6292_s1  ;;  %v1428_v63 = vstv %s6295_s12  ;;  %v6602_v59 = vmul.f32 %v1946_v22, %v6513_v31  ;;  %s6611_s1 = sld [smem:[#allocation10 + $0x7a]]  ;;  %v1440_v22 = vstv %s6355_s5 }
 0x21b   : > { %9565 = vst [vmem:[#allocation173_spill] sm:$0xff] %v6552_v58  ;;  %9566 = vst [vmem:[#allocation174_spill] sm:$0xff] %v6555_v28  ;;  %v6573_v58 = vpop.permute.xlu1 %1165  ;;  %v6576_v28 = vmul.f32 %v1466_v15, %v6327_v6  ;;  %v6594_v15 = vmul.f32 %v1422_v14, %v6193_v49  ;;  %v6605_v39 = vmul.f32 %v1472_v8, %v6327_v6  ;;  %v6613_v14 = vpop.permute.xlu0 %1191  ;;  %s6625_s12 = sld [smem:[#allocation10 + $0x76]]  ;;  %1797 = vrot.lane.b32.xlu0 %v6389_v54, %s9392_s7 }
 0x21c   : > { %9567 = vst [vmem:[#allocation175_spill] sm:$0xff] %v6561_v1  ;;  %9568 = vst [vmem:[#allocation176_spill] sm:$0xff] %v6567_v2  ;;  %v1478_v1 = vstv %s6300_s14  ;;  %v6608_v2 = vmul.f32 %v1428_v63, %v6176_v38  ;;  %s6639_s14 = sld [smem:[#allocation10 + $0x7b]]  ;;  %1785 = vrot.lane.b32.xlu1 %v6386_v30, %s9392_s7 }
 0x21d   : > { %9569 = vst [vmem:[#allocation177_spill] sm:$0xff] %v6573_v58  ;;  %9570 = vst [vmem:[#allocation178_spill] sm:$0xff] %v6576_v28  ;;  %v6591_v58 = vmul.f32 %v1472_v8, %v6302_v9  ;;  %v1434_v28 = vstv %s6333_s23  ;;  %v1974_v8 = vstv %s6511_s17  ;;  %s7048_s23 = sld [smem:[#allocation10 + $0x9e]] }
 0x21e   : > { %9571 = vst [vmem:[#allocation179_spill] sm:$0xff] %v6579_v24  ;;  %9572 = vst [vmem:[#allocation180_spill] sm:$0xff] %v6588_v34  ;;  %v6622_v24 = vmul.f32 %v1960_v48, %v6513_v31  ;;  %v6633_v34 = vmul.f32 %v1478_v1, %v6327_v6  ;;  %v6659_v54 = vmul.f32 %v1434_v28, %v6193_v49  ;;  %s7131_s5 = sld [smem:[#allocation10 + $0xa1]] }
 0x21f   : > { %9573 = vst [vmem:[#allocation181_spill] sm:$0xff] %v6591_v58  ;;  %9574 = vst [vmem:[#allocation182_spill] sm:$0xff] %v6594_v15  ;;  %v1484_v58 = vstv %s6347_s10  ;;  %v6616_v15 = vmul.f32 %v1478_v1, %v6302_v9  ;;  %v6667_v1 = vpop.permute.xlu0 %1205  ;;  %v6673_v30 = vmul.f32 %v1974_v8, %v6529_v35  ;;  %1811 = vrot.lane.b32.xlu0 %v6401_v0, %s9392_s7  ;;  %v9596_v0 = vstv %s6571_s0  ;;  %s7101_s10 = sld [smem:[#allocation10 + $0xa0]] }
 0x220   : > { %9575 = vst [vmem:[#allocation183_spill] sm:$0xff] %v6602_v59  ;;  %9576 = vst [vmem:[#allocation184_spill] sm:$0xff] %v6605_v39  ;;  %v6627_v39 = vpop.permute.xlu1 %1179  ;;  %1799 = vrot.lane.b32.xlu1 %v6398_v37, %s9392_s7  ;;  %s4719_s17 = sld [smem:[#allocation10 + $0xac]] }
 0x221   : > { %9577 = vst [vmem:[#allocation185_spill] sm:$0xff] %v6608_v2  ;;  %9578 = vst [vmem:[#allocation186_spill] sm:$0xff] %v6616_v15  ;;  %v6630_v2 = vmul.f32 %v1428_v63, %v6193_v49  ;;  %v6636_v15 = vmul.f32 %v1434_v28, %v6176_v38  ;;  %v6647_v63 = vmul.f32 %v1960_v48, %v6529_v35  ;;  %v1498_v48 = vstv %s6420_s27  ;;  %s4713_s27 = sld [smem:[#allocation10 + $0xa6]] }
 0x222   : > { %9579 = vst [vmem:[#allocation187_spill] sm:$0xff] %v6619_v4  ;;  %9580 = vst [vmem:[#allocation188_spill] sm:$0xff] %v6622_v24  ;;  %v6644_v4 = vmul.f32 %v1484_v58, %v6302_v9  ;;  %v1554_v24 = vstv %s6583_s2  ;;  %s7268_s2 = sld [smem:[#allocation10 + $0xb1]] }
 0x223   : > { %9581 = vst [vmem:[#allocation189_spill] sm:$0xff] %v6630_v2  ;;  %9582 = vst [vmem:[#allocation190_spill] sm:$0xff] %v6633_v34  ;;  %v1988_v34 = vstv %s6547_s15  ;;  %v6656_v2 = vmul.f32 %v1974_v8, %v6513_v31  ;;  %v6695_v8 = vmul.f32 %v1498_v48, %v6368_v52  ;;  %1825 = vrot.lane.b32.xlu0 %v6412_v10, %s9392_s7  ;;  %s4721_s15 = sld [smem:[#allocation10 + $0xae]] }
 0x224   : > { %9583 = vst [vmem:[#allocation191_spill] sm:$0xff] %v6636_v15  ;;  %9584 = vst [vmem:[#allocation192_spill] sm:$0xff] %v6644_v4  ;;  %v6662_v4 = vmul.f32 %v1484_v58, %v6327_v6  ;;  %v1548_v15 = vstv %s6559_s24  ;;  %v9591_v58 = vstv %s6393_s19  ;;  %v6698_v28 = vmul.f32 %v1988_v34, %v6529_v35  ;;  %1813 = vrot.lane.b32.xlu1 %v6409_v33, %s9392_s7  ;;  %s7251_s24 = sld [smem:[#allocation10 + $0xaf]] }
 0x225   : > { %9585 = vst [vmem:[#allocation193_spill] sm:$0xff] %v6647_v63  ;;  %9586 = vst [vmem:[#allocation194_spill] sm:$0xff] %v6656_v2  ;;  %v6670_v63 = vmul.f32 %v1440_v22, %v6176_v38  ;;  %v6682_v6 = vmul.f32 %v9591_v58, %v6302_v9  ;;  %v1504_v2 = vstv %s6433_s29  ;;  %v6692_v38 = vmul.f32 %v1440_v22, %v6193_v49  ;;  %s7188_s29 = sld [smem:[#allocation10 + $0xa7]] }
 0x226   : > { %9587 = vst [vmem:[#allocation195_spill] sm:$0xff] %v6659_v54  ;;  %9588 = vst [vmem:[#allocation196_spill] sm:$0xff] %v6662_v4  ;;  %v6677_v54 = vpop.permute.xlu1 %1193  ;;  %v6685_v4 = vmul.f32 %v1988_v34, %v6513_v31  ;;  %v1510_v9 = vstv %s6478_s22  ;;  %v6704_v58 = vmul.f32 %v1548_v15, %v6513_v31  ;;  %v6712_v49 = vmul.f32 %v1498_v48, %v6366_v18  ;;  %v6715_v34 = vpop.permute.xlu0 %1219  ;;  %s7214_s22 = sld [smem:[#allocation10 + $0xaa]] }
 0x227   : > { %9589 = vst [vmem:[#allocation197_spill] sm:$0xff] %v6670_v63  ;;  %9590 = vst [vmem:[#allocation198_spill] sm:$0xff] %v6673_v30  ;;  %v1560_v22 = vstv %s6611_s1  ;;  %v6721_v37 = vmul.f32 %v1504_v2, %v6368_v52  ;;  %v1516_v30 = vstv %s6495_s18  ;;  %v1566_v63 = vstv %s6639_s14  ;;  %1839 = vrot.lane.b32.xlu0 %v6424_v57, %s9392_s7  ;;  %s7223_s18 = sld [smem:[#allocation10 + $0xab]] }
 0x228   : > { %9592 = vst [vmem:[#allocation199_spill] sm:$0xff] %v6682_v6  ;;  %9593 = vst [vmem:[#allocation200_spill] sm:$0xff] %v6685_v4  ;;  %v6709_v6 = vmul.f32 %v9596_v0, %v6513_v31  ;;  %v6727_v0 = vmul.f32 %v1504_v2, %v6366_v18  ;;  %v6742_v4 = vmul.f32 %v1560_v22, %v6513_v31  ;;  %v1522_v2 = vstv %s6527_s28  ;;  %s4720_s28 = sld [smem:[#allocation10 + $0xad]] }
 0x229   : > { %9594 = vst [vmem:[#allocation201_spill] sm:$0xff] %v6692_v38  ;;  %9595 = vst [vmem:[#allocation202_spill] sm:$0xff] %v6698_v28  ;;  %v6718_v38 = vmul.f32 %v1548_v15, %v6529_v35  ;;  %v6724_v28 = vmul.f32 %v1554_v24, %v6513_v31  ;;  %v6735_v15 = vmul.f32 %v1510_v9, %v6368_v52  ;;  %1827 = vrot.lane.b32.xlu1 %v6415_v17, %s9392_s7  ;;  %v9622_v17 = vld [vmem:[#allocation74_spill] sm:$0xff]  ;;  %s7286_s1 = sld [smem:[#allocation10 + $0xb3]] }
 0x22a   : > { %9597 = vst [vmem:[#allocation203_spill] sm:$0xff] %v6709_v6  ;;  %9599 = vst [vmem:[#allocation205_spill] sm:$0xff] %v6727_v0  ;;  %v6729_v48 = vpop.permute.xlu1 %1207  ;;  %v6732_v6 = vmul.f32 %v1554_v24, %v6529_v35  ;;  %v6745_v59 = vmul.f32 %v1510_v9, %v6366_v18  ;;  %v1572_v0 = vstv %s6651_s16  ;;  %v6752_v24 = vmul.f32 %v1560_v22, %v6529_v35  ;;  %v6757_v10 = vpop.permute.xlu0 %1233  ;;  %s4728_s14 = sld [smem:[#allocation10 + $0xb5]] }
 0x22b   : > { %9598 = vst [vmem:[#allocation204_spill] sm:$0xff] %v6718_v38  ;;  %9601 = vst [vmem:[#allocation207_spill] sm:$0xff] %v6735_v15  ;;  %v6763_v9 = vmul.f32 %v1566_v63, %v6513_v31  ;;  %v6769_v33 = vmul.f32 %v1566_v63, %v6529_v35  ;;  %v6774_v15 = vmul.f32 %v1522_v2, %v6368_v52  ;;  %1853 = vrot.lane.b32.xlu0 %v6430_v27, %s9392_s7  ;;  %s4729_s16 = sld [smem:[#allocation10 + $0xb6]] }
 0x22c   : > { %9600 = vst [vmem:[#allocation206_spill] sm:$0xff] %v6732_v6  ;;  %9602 = vst [vmem:[#allocation208_spill] sm:$0xff] %v6742_v4  ;;  %v1528_v6 = vstv %s6597_s13  ;;  %v6760_v4 = vmul.f32 %v1516_v30, %v6368_v52  ;;  %v6777_v38 = vmul.f32 %v1572_v0, %v6513_v31  ;;  %v512_v57 = vadd.f32 %v5890_v46, %v5561_v11  ;;  %s7277_s13 = sld [smem:[#allocation10 + $0xb2]] }
 0x22d   : > { %9603 = vst [vmem:[#allocation209_spill] sm:$0xff] %v6745_v59  ;;  %9604 = vst [vmem:[#allocation210_spill] sm:$0xff] %v6752_v24  ;;  %v6766_v59 = vmul.f32 %v1516_v30, %v6366_v18  ;;  %v6780_v24 = vmul.f32 %v1522_v2, %v6366_v18  ;;  %v6788_v63 = vmul.f32 %v1528_v6, %v6368_v52  ;;  %v9609_v30 = vstv %s6665_s21 }
 0x22e   : > { %9605 = vst [vmem:[#allocation211_spill] sm:$0xff] %v6760_v4  ;;  %9607 = vst [vmem:[#allocation213_spill] sm:$0xff] %v6769_v33  ;;  %v6771_v22 = vpop.permute.xlu1 %1221  ;;  %v6783_v4 = vmul.f32 %v1572_v0, %v6529_v35  ;;  %v6793_v33 = vmul.f32 %v9609_v30, %v6513_v31  ;;  %v511_v0 = vadd.f32 %v5879_v36, %v5554_v12  ;;  %v6821_v36 = vpop.permute.xlu0 %1247 }
 0x22f   : > { %9606 = vst [vmem:[#allocation212_spill] sm:$0xff] %v6766_v59  ;;  %9608 = vst [vmem:[#allocation214_spill] sm:$0xff] %v6777_v38  ;;  %v6796_v59 = vmul.f32 %v1528_v6, %v6366_v18  ;;  %v9611_v38 = vstv %s6625_s12  ;;  %v525_v35 = vadd.f32 %v5887_v60, %v5569_v5  ;;  %v539_v30 = vadd.f32 %v5897_v41, %v5606_v29  ;;  %v9653_v18 = vld [vmem:[#allocation149_spill] sm:$0xff] }
 0x230   : > { %v6801_v2 = vmul.f32 %v9611_v38, %v6368_v52  ;;  %v526_v6 = vadd.f32 %v5900_v61, %v5596_v25  ;;  %v540_v38 = vadd.f32 %v5911_v62, %v5642_v51  ;;  %v553_v12 = vadd.f32 %v5908_v43, %v5650_v40  ;;  %v9614_v61 = vld [vmem:[#allocation68_spill] sm:$0xff]  ;;  %v9615_v62 = vld [vmem:[#allocation67_spill] sm:$0xff]  ;;  %v9658_v52 = vld [vmem:[#allocation102_spill] sm:$0xff] }
 0x231   : > { %9610 = vst [vmem:[#allocation215_spill] sm:$0xff] %v6796_v59  ;;  %v567_v11 = vadd.f32 %v5919_v50, %v5699_v23  ;;  %v554_v5 = vadd.f32 %v5922_v16, %v5679_v42  ;;  %v568_v29 = vadd.f32 %v5931_v47, %v5725_v32  ;;  %v581_v25 = vadd.f32 %v5928_v53, %v5733_v13  ;;  %v9612_v32 = vld [vmem:[#allocation65_spill] sm:$0xff]  ;;  %v9613_v13 = vld [vmem:[#allocation66_spill] sm:$0xff]  ;;  %v9662_v59 = vld [vmem:[#allocation103_spill] sm:$0xff] }
 0x232   : > { %v623_v60 = vadd.f32 %v5953_v7, %v511_v0  ;;  %v6830_v51 = vpop.permute.xlu1 %1235  ;;  %v582_v40 = vadd.f32 %v5940_v21, %v5762_v20  ;;  %v595_v23 = vadd.f32 %v5937_v55, %v5782_v44  ;;  %v596_v46 = vadd.f32 %v5948_v26, %v5799_v45  ;;  %v9616_v20 = vld [vmem:[#allocation81_spill] sm:$0xff]  ;;  %v9618_v53 = vld [vmem:[#allocation70_spill] sm:$0xff]  ;;  %v6853_v7 = vpop.permute.xlu0 %1261 }
 0x233   : > { %v609_v42 = vadd.f32 %v5945_v56, %v5805_v3  ;;  %v610_v41 = vadd.f32 %v9613_v13, %v9612_v32  ;;  %v624_v43 = vadd.f32 %v9614_v61, %v512_v57  ;;  %v637_v50 = vadd.f32 %v9615_v62, %v525_v35  ;;  %v9617_v44 = vld [vmem:[#allocation145_spill] sm:$0xff]  ;;  %v9620_v3 = vld [vmem:[#allocation72_spill] sm:$0xff]  ;;  %v9621_v56 = vld [vmem:[#allocation71_spill] sm:$0xff] }
 0x234   : > { %v735_v16 = vadd.f32 %v9616_v20, %v623_v60  ;;  %1841 = vrot.lane.b32.xlu1 %v9617_v44, %s9392_s7  ;;  %v638_v45 = vadd.f32 %v9618_v53, %v526_v6  ;;  %v9619_v47 = vld [vmem:[#allocation69_spill] sm:$0xff]  ;;  %v652_v21 = vadd.f32 %v9620_v3, %v540_v38  ;;  %v665_v26 = vadd.f32 %v9621_v56, %v553_v12  ;;  %v9624_v35 = vld [vmem:[#allocation75_spill] sm:$0xff]  ;;  %v9626_v62 = vld [vmem:[#allocation76_spill] sm:$0xff] }
 0x235   : > { %v651_v55 = vadd.f32 %v9619_v47, %v539_v30  ;;  %v666_v27 = vadd.f32 %v9622_v17, %v554_v5  ;;  %v9623_v0 = vld [vmem:[#allocation73_spill] sm:$0xff]  ;;  %v693_v32 = vadd.f32 %v9624_v35, %v581_v25  ;;  %v680_v6 = vadd.f32 %v9626_v62, %v568_v29  ;;  %v9627_v20 = vld [vmem:[#allocation78_spill] sm:$0xff]  ;;  %v9629_v53 = vld [vmem:[#allocation79_spill] sm:$0xff] }
 0x236   : > { %v679_v57 = vadd.f32 %v9623_v0, %v567_v11  ;;  %v9625_v60 = vld [vmem:[#allocation97_spill] sm:$0xff]  ;;  %v6859_v61 = vpop.permute.xlu1 %1249  ;;  %v694_v30 = vadd.f32 %v9627_v20, %v582_v40  ;;  %v721_v12 = vadd.f32 %v9629_v53, %v609_v42  ;;  %v9630_v47 = vld [vmem:[#allocation148_spill] sm:$0xff]  ;;  %v9632_v11 = vld [vmem:[#allocation82_spill] sm:$0xff]  ;;  %v6877_v53 = vpop.permute.xlu0 %1275 }
 0x237   : > { %v847_v13 = vadd.f32 %v9625_v60, %v735_v16  ;;  %v9628_v44 = vld [vmem:[#allocation77_spill] sm:$0xff]  ;;  %1867 = vrot.lane.b32.xlu0 %v9630_v47, %s9392_s7  ;;  %v9631_v5 = vld [vmem:[#allocation80_spill] sm:$0xff]  ;;  %v722_v56 = vadd.f32 %v9632_v11, %v610_v41  ;;  %v9633_v25 = vld [vmem:[#allocation83_spill] sm:$0xff] }
 0x238   : > { %v707_v38 = vadd.f32 %v9628_v44, %v595_v23  ;;  %v708_v3 = vadd.f32 %v9631_v5, %v596_v46  ;;  %v749_v17 = vadd.f32 %v9633_v25, %v637_v50  ;;  %v9634_v16 = vld [vmem:[#allocation113_spill] sm:$0xff]  ;;  %v9635_v35 = vld [vmem:[#allocation147_spill] sm:$0xff]  ;;  %v9636_v29 = vld [vmem:[#allocation84_spill] sm:$0xff] }
 0x239   : > { %v959_v0 = vadd.f32 %v9634_v16, %v847_v13  ;;  %1855 = vrot.lane.b32.xlu1 %v9635_v35, %s9392_s7  ;;  %v736_v40 = vadd.f32 %v9636_v29, %v624_v43  ;;  %v9637_v60 = vld [vmem:[#allocation86_spill] sm:$0xff]  ;;  %v9638_v62 = vld [vmem:[#allocation85_spill] sm:$0xff]  ;;  %v9639_v20 = vld [vmem:[#allocation87_spill] sm:$0xff] }
 0x23a   : > { %v750_v23 = vadd.f32 %v9637_v60, %v638_v45  ;;  %v763_v42 = vadd.f32 %v9638_v62, %v651_v55  ;;  %v777_v44 = vadd.f32 %v9639_v20, %v665_v26  ;;  %v9640_v46 = vld [vmem:[#allocation88_spill] sm:$0xff]  ;;  %v9641_v41 = vld [vmem:[#allocation89_spill] sm:$0xff]  ;;  %v9642_v50 = vld [vmem:[#allocation99_spill] sm:$0xff]  ;;  %v6883_v16 = vpop.permute.xlu1 %1263 }
 0x23b   : > { %v764_v47 = vadd.f32 %v9640_v46, %v652_v21  ;;  %v791_v5 = vadd.f32 %v9641_v41, %v679_v57  ;;  %v861_v11 = vadd.f32 %v9642_v50, %v749_v17  ;;  %v9643_v13 = vld [vmem:[#allocation129_spill] sm:$0xff]  ;;  %v9644_v35 = vld [vmem:[#allocation90_spill] sm:$0xff]  ;;  %v9645_v29 = vld [vmem:[#allocation92_spill] sm:$0xff] }
 0x23c   : > { %v1071_v25 = vadd.f32 %v9643_v13, %v959_v0  ;;  %v778_v43 = vadd.f32 %v9644_v35, %v666_v27  ;;  %v792_v45 = vadd.f32 %v9645_v29, %v680_v6  ;;  %v9646_v60 = vld [vmem:[#allocation91_spill] sm:$0xff]  ;;  %v9647_v62 = vld [vmem:[#allocation100_spill] sm:$0xff]  ;;  %v9648_v20 = vld [vmem:[#allocation150_spill] sm:$0xff] }
 0x23d   : > { %v805_v55 = vadd.f32 %v9646_v60, %v693_v32  ;;  %v848_v26 = vadd.f32 %v9647_v62, %v736_v40  ;;  %1881 = vrot.lane.b32.xlu0 %v9648_v20, %s9392_s7  ;;  %v9649_v21 = vld [vmem:[#allocation94_spill] sm:$0xff]  ;;  %v9650_v57 = vld [vmem:[#allocation93_spill] sm:$0xff]  ;;  %v9651_v17 = vld [vmem:[#allocation115_spill] sm:$0xff]  ;;  %1869 = vrot.lane.b32.xlu1 %v9653_v18, %s9392_s7  ;;  %v1290_v20 = vpop.permute.xlu0 %1289 }
 0x23e   : > { %v806_v46 = vadd.f32 %v9649_v21, %v694_v30  ;;  %v819_v41 = vadd.f32 %v9650_v57, %v707_v38  ;;  %v973_v50 = vadd.f32 %v9651_v17, %v861_v11  ;;  %v9652_v0 = vld [vmem:[#allocation175_spill] sm:$0xff]  ;;  %v9654_v27 = vld [vmem:[#allocation96_spill] sm:$0xff]  ;;  %v9656_v29 = vld [vmem:[#allocation98_spill] sm:$0xff]  ;;  %v862_v30 = vadd.f32 %v9658_v52, %v750_v23  ;;  %v6904_v17 = vpop.permute.xlu1 %1277 }
 0x23f   : > { %v1183_v13 = vadd.f32 %v9652_v0, %v1071_v25  ;;  %v820_v6 = vadd.f32 %v9654_v27, %v708_v3  ;;  %v9655_v35 = vld [vmem:[#allocation95_spill] sm:$0xff]  ;;  %v834_v40 = vadd.f32 %v9656_v29, %v722_v56  ;;  %v9657_v60 = vld [vmem:[#allocation116_spill] sm:$0xff]  ;;  %v9659_v21 = vld [vmem:[#allocation101_spill] sm:$0xff]  ;;  %v889_v3 = vadd.f32 %v9662_v59, %v777_v44 }
 0x240   : > { %v833_v32 = vadd.f32 %v9655_v35, %v721_v12  ;;  %v960_v62 = vadd.f32 %v9657_v60, %v848_v26  ;;  %v875_v38 = vadd.f32 %v9659_v21, %v763_v42  ;;  %v9660_v57 = vld [vmem:[#allocation131_spill] sm:$0xff]  ;;  %v9661_v0 = vld [vmem:[#allocation104_spill] sm:$0xff]  ;;  %v9663_v27 = vld [vmem:[#allocation105_spill] sm:$0xff] }
 0x241   : > { %v1085_v11 = vadd.f32 %v9660_v57, %v973_v50  ;;  %v1295_v25 = vadd.f32 %v1290_v20, %v1183_v13  ;;  %v876_v18 = vadd.f32 %v9661_v0, %v764_v47  ;;  %v903_v12 = vadd.f32 %v9663_v27, %v791_v5  ;;  %v9664_v35 = vld [vmem:[#allocation132_spill] sm:$0xff]  ;;  %v9666_v29 = vld [vmem:[#allocation106_spill] sm:$0xff]  ;;  %v9667_v23 = vld [vmem:[#allocation117_spill] sm:$0xff]  ;;  %v1304_v0 = vpop.permute.xlu0 %1303 }
 0x242   : > { %v1072_v56 = vadd.f32 %v9664_v35, %v960_v62  ;;  %v9665_v26 = vld [vmem:[#allocation156_spill] sm:$0xff]  ;;  %v890_v52 = vadd.f32 %v9666_v29, %v778_v43  ;;  %v987_v42 = vadd.f32 %v9667_v23, %v875_v38  ;;  %v9669_v13 = vld [vmem:[#allocation153_spill] sm:$0xff]  ;;  %v9671_v44 = vld [vmem:[#allocation107_spill] sm:$0xff] }
 0x243   : > { %1895 = vrot.lane.b32.xlu0 %v9665_v26, %s9392_s7  ;;  %v1197_v50 = vadd.f32 %v6613_v14, %v1085_v11  ;;  %v9668_v60 = vld [vmem:[#allocation144_spill] sm:$0xff]  ;;  %1883 = vrot.lane.b32.xlu1 %v9669_v13, %s9392_s7  ;;  %v917_v5 = vadd.f32 %v9671_v44, %v805_v55  ;;  %v9672_v20 = vld [vmem:[#allocation118_spill] sm:$0xff]  ;;  %v9673_v27 = vld [vmem:[#allocation109_spill] sm:$0xff] }
 0x244   : > { %v1401_v21 = vadd.f32 %v9668_v60, %v1295_v25  ;;  %v9670_v47 = vld [vmem:[#allocation108_spill] sm:$0xff]  ;;  %v974_v62 = vadd.f32 %v9672_v20, %v862_v30  ;;  %v1184_v57 = vadd.f32 %v6627_v39, %v1072_v56  ;;  %v6923_v43 = vadd.f32 %v9673_v27, %v819_v41  ;;  %v9674_v38 = vld [vmem:[#allocation133_spill] sm:$0xff]  ;;  %v1292_v25 = vpop.permute.xlu1 %1291  ;;  %v9676_v29 = vld [vmem:[#allocation110_spill] sm:$0xff] }
 0x245   : > { %v904_v59 = vadd.f32 %v9670_v47, %v792_v45  ;;  %v1099_v35 = vadd.f32 %v9674_v38, %v987_v42  ;;  %v9675_v14 = vld [vmem:[#allocation152_spill] sm:$0xff]  ;;  %v1309_v26 = vadd.f32 %v1304_v0, %v1197_v50  ;;  %v6928_v23 = vadd.f32 %v9676_v29, %v806_v46  ;;  %v9677_v45 = vld [vmem:[#allocation111_spill] sm:$0xff]  ;;  %v9678_v55 = vld [vmem:[#allocation134_spill] sm:$0xff]  ;;  %v1318_v38 = vpop.permute.xlu0 %1317 }
 0x246   : > { %v1451_v11 = vadd.f32 %v9675_v14, %v1401_v21  ;;  %v6931_v60 = vadd.f32 %v9677_v45, %v833_v32  ;;  %v1086_v30 = vadd.f32 %v9678_v55, %v974_v62  ;;  %v1296_v13 = vadd.f32 %v1292_v25, %v1184_v57  ;;  %v9679_v39 = vld [vmem:[#allocation165_spill] sm:$0xff]  ;;  %v9680_v41 = vld [vmem:[#allocation119_spill] sm:$0xff]  ;;  %v9683_v44 = vld [vmem:[#allocation112_spill] sm:$0xff] }
 0x247   : > { %1909 = vrot.lane.b32.xlu0 %v9679_v39, %s9392_s7  ;;  %v1001_v56 = vadd.f32 %v9680_v41, %v889_v3  ;;  %v1211_v42 = vadd.f32 %v6667_v1, %v1099_v35  ;;  %v9681_v47 = vld [vmem:[#allocation157_spill] sm:$0xff]  ;;  %v9682_v50 = vld [vmem:[#allocation159_spill] sm:$0xff]  ;;  %v6943_v32 = vadd.f32 %v9683_v44, %v820_v6  ;;  %v9684_v20 = vld [vmem:[#allocation120_spill] sm:$0xff] }
 0x248   : > { %v1407_v21 = vadd.f32 %v9681_v47, %v1309_v26  ;;  %1897 = vrot.lane.b32.xlu1 %v9682_v50, %s9392_s7  ;;  %v1501_v46 = vadd.f32 %v6695_v8, %v1451_v11  ;;  %v988_v62 = vadd.f32 %v9684_v20, %v876_v18  ;;  %v1198_v57 = vadd.f32 %v6677_v54, %v1086_v30  ;;  %v9685_v0 = vld [vmem:[#allocation154_spill] sm:$0xff]  ;;  %v9686_v3 = vld [vmem:[#allocation135_spill] sm:$0xff]  ;;  %v1306_v25 = vpop.permute.xlu1 %1305  ;;  %v9689_v6 = vld [vmem:[#allocation136_spill] sm:$0xff] }
 0x249   : > { %v1402_v27 = vadd.f32 %v9685_v0, %v1296_v13  ;;  %v1113_v14 = vadd.f32 %v9686_v3, %v1001_v56  ;;  %v9687_v1 = vld [vmem:[#allocation158_spill] sm:$0xff]  ;;  %v1323_v26 = vadd.f32 %v1318_v38, %v1211_v42  ;;  %v9690_v18 = vld [vmem:[#allocation155_spill] sm:$0xff]  ;;  %v9691_v30 = vld [vmem:[#allocation169_spill] sm:$0xff]  ;;  %v1332_v20 = vpop.permute.xlu0 %1331 }
 0x24a   : > { %v1457_v35 = vadd.f32 %v9687_v1, %v1407_v21  ;;  %v6951_v29 = vadd.f32 %v6704_v58, %v1501_v46  ;;  %v9688_v8 = vld [vmem:[#allocation114_spill] sm:$0xff]  ;;  %v1100_v45 = vadd.f32 %v9689_v6, %v988_v62  ;;  %v1310_v54 = vadd.f32 %v1306_v25, %v1198_v57  ;;  %v9692_v13 = vld [vmem:[#allocation121_spill] sm:$0xff]  ;;  %v9693_v56 = vld [vmem:[#allocation163_spill] sm:$0xff] }
 0x24b   : > { %v6954_v11 = vadd.f32 %v9688_v8, %v834_v40  ;;  %v1452_v55 = vadd.f32 %v9690_v18, %v1402_v27  ;;  %1923 = vrot.lane.b32.xlu0 %v9691_v30, %s9392_s7  ;;  %v1015_v39 = vadd.f32 %v9692_v13, %v903_v12  ;;  %v1225_v41 = vadd.f32 %v6715_v34, %v1113_v14  ;;  %v9694_v58 = vld [vmem:[#allocation167_spill] sm:$0xff]  ;;  %v9695_v47 = vld [vmem:[#allocation122_spill] sm:$0xff]  ;;  %v9696_v46 = vld [vmem:[#allocation160_spill] sm:$0xff] }
 0x24c   : > { %v1413_v42 = vadd.f32 %v9693_v56, %v1323_v26  ;;  %1911 = vrot.lane.b32.xlu1 %v9694_v58, %s9392_s7  ;;  %v1507_v40 = vadd.f32 %v6721_v37, %v1457_v35  ;;  %v1002_v21 = vadd.f32 %v9695_v47, %v890_v52  ;;  %v1212_v50 = vadd.f32 %v6729_v48, %v1100_v45  ;;  %v9697_v57 = vld [vmem:[#allocation138_spill] sm:$0xff]  ;;  %v1320_v27 = vpop.permute.xlu1 %1319  ;;  %v9699_v14 = vld [vmem:[#allocation139_spill] sm:$0xff]  ;;  %v9701_v48 = vld [vmem:[#allocation204_spill] sm:$0xff] }
 0x24d   : > { %v1408_v44 = vadd.f32 %v9696_v46, %v1310_v54  ;;  %v1502_v62 = vadd.f32 %v6712_v49, %v1452_v55  ;;  %v1127_v12 = vadd.f32 %v9697_v57, %v1015_v39  ;;  %v9698_v0 = vld [vmem:[#allocation166_spill] sm:$0xff]  ;;  %v1337_v38 = vadd.f32 %v1332_v20, %v1225_v41  ;;  %v9702_v49 = vld [vmem:[#allocation123_spill] sm:$0xff]  ;;  %v9703_v6 = vld [vmem:[#allocation173_spill] sm:$0xff]  ;;  %v1346_v41 = vpop.permute.xlu0 %1345 }
 0x24e   : > { %v1463_v34 = vadd.f32 %v9698_v0, %v1413_v42  ;;  %v6973_v3 = vadd.f32 %v6724_v28, %v1507_v40  ;;  %v1114_v37 = vadd.f32 %v9699_v14, %v1002_v21  ;;  %v9700_v1 = vld [vmem:[#allocation162_spill] sm:$0xff]  ;;  %v1324_v35 = vadd.f32 %v1320_v27, %v1212_v50  ;;  %v9704_v28 = vld [vmem:[#allocation172_spill] sm:$0xff]  ;;  %v9705_v18 = vld [vmem:[#allocation207_spill] sm:$0xff] }
 0x24f   : > { %v1458_v52 = vadd.f32 %v9700_v1, %v1408_v44  ;;  %1937 = vrot.lane.b32.xlu0 %v6564_v19, %s9392_s7  ;;  %v6980_v25 = vadd.f32 %v9701_v48, %v1502_v62  ;;  %v1029_v26 = vadd.f32 %v9702_v49, %v917_v5  ;;  %v1239_v8 = vadd.f32 %v6757_v10, %v1127_v12  ;;  %v9706_v54 = vld [vmem:[#allocation124_spill] sm:$0xff]  ;;  %v9707_v39 = vld [vmem:[#allocation170_spill] sm:$0xff]  ;;  %v9708_v56 = vld [vmem:[#allocation205_spill] sm:$0xff] }
 0x250   : > { %v1419_v45 = vadd.f32 %v9703_v6, %v1337_v38  ;;  %1925 = vrot.lane.b32.xlu1 %v9704_v28, %s9392_s7  ;;  %v1513_v55 = vadd.f32 %v9705_v18, %v1463_v34  ;;  %v1016_v30 = vadd.f32 %v9706_v54, %v904_v59  ;;  %v1226_v13 = vadd.f32 %v6771_v22, %v1114_v37  ;;  %v9709_v58 = vld [vmem:[#allocation142_spill] sm:$0xff]  ;;  %v1334_v47 = vpop.permute.xlu1 %1333  ;;  %v9711_v50 = vld [vmem:[#allocation208_spill] sm:$0xff]  ;;  %v9712_v44 = vld [vmem:[#allocation143_spill] sm:$0xff] }
 0x251   : > { %v1414_v19 = vadd.f32 %v9707_v39, %v1324_v35  ;;  %v1508_v42 = vadd.f32 %v9708_v56, %v1458_v52  ;;  %v1141_v5 = vadd.f32 %v9709_v58, %v1029_v26  ;;  %v9710_v40 = vld [vmem:[#allocation174_spill] sm:$0xff]  ;;  %v1351_v21 = vadd.f32 %v1346_v41, %v1239_v8  ;;  %v9713_v62 = vld [vmem:[#allocation171_spill] sm:$0xff]  ;;  %v9716_v34 = vld [vmem:[#allocation125_spill] sm:$0xff] }
 0x252   : > { %v1469_v10 = vadd.f32 %v9710_v40, %v1419_v45  ;;  %v6995_v46 = vadd.f32 %v9711_v50, %v1513_v55  ;;  %v1128_v20 = vadd.f32 %v9712_v44, %v1016_v30  ;;  %v1338_v57 = vadd.f32 %v1334_v47, %v1226_v13  ;;  %v9714_v22 = vld [vmem:[#allocation183_spill] sm:$0xff]  ;;  %v9715_v12 = vld [vmem:[#allocation206_spill] sm:$0xff]  ;;  %v9717_v14 = vld [vmem:[#allocation180_spill] sm:$0xff]  ;;  %v1360_v45 = vpop.permute.xlu0 %1359 }
 0x253   : > { %v1464_v59 = vadd.f32 %v9713_v62, %v1414_v19  ;;  %1951 = vrot.lane.b32.xlu0 %v9714_v22, %s9392_s7  ;;  %v7002_v0 = vadd.f32 %v9715_v12, %v1508_v42  ;;  %v1043_v27 = vadd.f32 %v9716_v34, %v6923_v43  ;;  %v1253_v38 = vadd.f32 %v6821_v36, %v1141_v5  ;;  %v9718_v1 = vld [vmem:[#allocation179_spill] sm:$0xff]  ;;  %v9720_v48 = vld [vmem:[#allocation126_spill] sm:$0xff]  ;;  %v9721_v8 = vld [vmem:[#allocation176_spill] sm:$0xff] }
 0x254   : > { %v1425_v37 = vadd.f32 %v9717_v14, %v1351_v21  ;;  %1939 = vrot.lane.b32.xlu1 %v9718_v1, %s9392_s7  ;;  %v9719_v52 = vld [vmem:[#allocation211_spill] sm:$0xff]  ;;  %v1030_v49 = vadd.f32 %v9720_v48, %v6928_v23  ;;  %v1240_v26 = vadd.f32 %v6830_v51, %v1128_v20  ;;  %v1420_v6 = vadd.f32 %v9721_v8, %v1338_v57  ;;  %v9722_v43 = vld [vmem:[#allocation209_spill] sm:$0xff]  ;;  %v9723_v36 = vld [vmem:[#allocation146_spill] sm:$0xff]  ;;  %v1348_v30 = vpop.permute.xlu1 %1347 }
 0x255   : > { %v1519_v35 = vadd.f32 %v9719_v52, %v1469_v10  ;;  %v1514_v28 = vadd.f32 %v9722_v43, %v1464_v59  ;;  %v1155_v18 = vadd.f32 %v9723_v36, %v1043_v27  ;;  %v9724_v55 = vld [vmem:[#allocation181_spill] sm:$0xff]  ;;  %v1365_v13 = vadd.f32 %v1360_v45, %v1253_v38  ;;  %v9726_v19 = vld [vmem:[#allocation151_spill] sm:$0xff]  ;;  %v9727_v41 = vld [vmem:[#allocation178_spill] sm:$0xff] }
 0x256   : > { %v1475_v54 = vadd.f32 %v9724_v55, %v1425_v37  ;;  %v1142_v23 = vadd.f32 %v9726_v19, %v1030_v49  ;;  %v1470_v51 = vadd.f32 %v9727_v41, %v1420_v6  ;;  %v1352_v56 = vadd.f32 %v1348_v30, %v1240_v26  ;;  %v9728_v42 = vld [vmem:[#allocation188_spill] sm:$0xff]  ;;  %v9729_v58 = vld [vmem:[#allocation210_spill] sm:$0xff]  ;;  %v9730_v40 = vld [vmem:[#allocation127_spill] sm:$0xff]  ;;  %v1374_v12 = vpop.permute.xlu0 %1373 }
 0x257   : > { %v7021_v39 = vadd.f32 %v6763_v9, %v1519_v35  ;;  %1965 = vrot.lane.b32.xlu0 %v9728_v42, %s9392_s7  ;;  %v7030_v5 = vadd.f32 %v9729_v58, %v1514_v28  ;;  %v1057_v10 = vadd.f32 %v9730_v40, %v6931_v60  ;;  %v1267_v47 = vadd.f32 %v6853_v7, %v1155_v18  ;;  %v9731_v9 = vld [vmem:[#allocation185_spill] sm:$0xff]  ;;  %v9732_v50 = vld [vmem:[#allocation187_spill] sm:$0xff]  ;;  %v9733_v20 = vld [vmem:[#allocation128_spill] sm:$0xff] }
 0x258   : > { %v1431_v21 = vadd.f32 %v9731_v9, %v1365_v13  ;;  %1953 = vrot.lane.b32.xlu1 %v9732_v50, %s9392_s7  ;;  %v1525_v44 = vadd.f32 %v6774_v15, %v1475_v54  ;;  %v1044_v62 = vadd.f32 %v9733_v20, %v6943_v32  ;;  %v1254_v59 = vadd.f32 %v6859_v61, %v1142_v23  ;;  %v9734_v57 = vld [vmem:[#allocation182_spill] sm:$0xff]  ;;  %v9735_v34 = vld [vmem:[#allocation212_spill] sm:$0xff]  ;;  %v9736_v7 = vld [vmem:[#allocation161_spill] sm:$0xff]  ;;  %v1362_v37 = vpop.permute.xlu1 %1361 }
 0x259   : > { %9725 = vst [vmem:[#allocation65_spill] sm:$0xff] %v7021_v39  ;;  %v1426_v22 = vadd.f32 %v9734_v57, %v1352_v56  ;;  %v1520_v27 = vadd.f32 %v9735_v34, %v1470_v51  ;;  %v1169_v60 = vadd.f32 %v9736_v7, %v1057_v10  ;;  %v9737_v38 = vld [vmem:[#allocation186_spill] sm:$0xff]  ;;  %v1379_v1 = vadd.f32 %v1374_v12, %v1267_v47  ;;  %v9740_v61 = vld [vmem:[#allocation164_spill] sm:$0xff]  ;;  %v9743_v8 = vld [vmem:[#allocation213_spill] sm:$0xff] }
 0x25a   : > { %v1481_v14 = vadd.f32 %v9737_v38, %v1431_v21  ;;  %v9738_v15 = vld [vmem:[#allocation214_spill] sm:$0xff]  ;;  %v1156_v52 = vadd.f32 %v9740_v61, %v1044_v62  ;;  %v9741_v35 = vld [vmem:[#allocation184_spill] sm:$0xff]  ;;  %v1366_v49 = vadd.f32 %v1362_v37, %v1254_v59  ;;  %v9745_v43 = vld [vmem:[#allocation191_spill] sm:$0xff]  ;;  %v1584_v55 = vstv %s7011_s8  ;;  %v1388_v41 = vpop.permute.xlu0 %1387  ;;  %s7322_s8 = sld [smem:[#allocation10 + $0xb8]] }
 0x25b   : > { %v7051_v32 = vadd.f32 %v9738_v15, %v1525_v44  ;;  %v1476_v48 = vadd.f32 %v9741_v35, %v1426_v22  ;;  %v9742_v26 = vld [vmem:[#allocation194_spill] sm:$0xff]  ;;  %v7058_v6 = vadd.f32 %v9743_v8, %v1520_v27  ;;  %v1281_v45 = vadd.f32 %v6877_v53, %v1169_v60  ;;  %v9746_v36 = vld [vmem:[#allocation193_spill] sm:$0xff]  ;;  %v9749_v53 = vld [vmem:[#allocation192_spill] sm:$0xff] }
 0x25c   : > { %1979 = vrot.lane.b32.xlu0 %v9742_v26, %s9392_s7  ;;  %v1437_v28 = vadd.f32 %v9745_v43, %v1379_v1  ;;  %1967 = vrot.lane.b32.xlu1 %v9746_v36, %s9392_s7  ;;  %v1531_v18 = vadd.f32 %v6788_v63, %v1481_v14  ;;  %v9747_v54 = vld [vmem:[#allocation130_spill] sm:$0xff]  ;;  %v1268_v13 = vadd.f32 %v6883_v16, %v1156_v52  ;;  %v9748_v19 = vld [vmem:[#allocation189_spill] sm:$0xff]  ;;  %v1376_v42 = vpop.permute.xlu1 %1375  ;;  %v1540_v40 = vstv %s7023_s3  ;;  %v9753_v21 = vld [vmem:[#allocation200_spill] sm:$0xff]  ;;  %s7331_s3 = sld [smem:[#allocation10 + $0xb9]] }
 0x25d   : > { %9739 = vst [vmem:[#allocation66_spill] sm:$0xff] %v7051_v32  ;;  %9744 = vst [vmem:[#allocation68_spill] sm:$0xff] %v7058_v6  ;;  %v1058_v30 = vadd.f32 %v9747_v54, %v6954_v11  ;;  %v1432_v23 = vadd.f32 %v9748_v19, %v1366_v49  ;;  %v1526_v51 = vadd.f32 %v6780_v24, %v1476_v48  ;;  %v9751_v11 = vld [vmem:[#allocation177_spill] sm:$0xff]  ;;  %v9752_v16 = vld [vmem:[#allocation190_spill] sm:$0xff]  ;;  %v9758_v62 = vstv %s6665_s21  ;;  %s7314_s21 = sld [smem:[#allocation10 + $0xb7]] }
 0x25e   : > { %v1487_v56 = vadd.f32 %v9749_v53, %v1437_v28  ;;  %v1393_v58 = vadd.f32 %v1388_v41, %v1281_v45  ;;  %v7075_v63 = vadd.f32 %v6793_v33, %v1531_v18  ;;  %v1380_v9 = vadd.f32 %v1376_v42, %v1268_v13  ;;  %v9755_v50 = vld [vmem:[#allocation197_spill] sm:$0xff]  ;;  %v9756_v20 = vld [vmem:[#allocation198_spill] sm:$0xff]  ;;  %v9757_v33 = vld [vmem:[#allocation168_spill] sm:$0xff] }
 0x25f   : > { %v1170_v10 = vadd.f32 %v9751_v11, %v1058_v30  ;;  %v1482_v47 = vadd.f32 %v9752_v16, %v1432_v23  ;;  %v7083_v24 = vadd.f32 %v6783_v4, %v1526_v51  ;;  %v1580_v59 = vmul.f32 %v9758_v62, %v9757_v33  ;;  %v9759_v34 = vld [vmem:[#allocation195_spill] sm:$0xff]  ;;  %v7095_v4 = vpop.permute.xlu0 %1601  ;;  %v9764_v35 = vld [vmem:[#allocation196_spill] sm:$0xff]  ;;  %v9769_v28 = vld [vmem:[#allocation137_spill] sm:$0xff] }
 0x260   : > { %9750 = vst [vmem:[#allocation67_spill] sm:$0xff] %v7075_v63  ;;  %1993 = vrot.lane.b32.xlu0 %v9753_v21, %s9392_s7  ;;  %v1443_v44 = vadd.f32 %v9755_v50, %v1393_v58  ;;  %1981 = vrot.lane.b32.xlu1 %v9756_v20, %s9392_s7  ;;  %v1585_v57 = vmul.f32 %v1584_v55, %v6513_v31  ;;  %v9760_v7 = vld [vmem:[#allocation215_spill] sm:$0xff]  ;;  %v1590_v38 = vstv %s7044_s30  ;;  %v1390_v1 = vpop.permute.xlu1 %1389  ;;  %v2016_v15 = vstv %s7048_s23  ;;  %v9767_v8 = vld [vmem:[#allocation140_spill] sm:$0xff]  ;;  %v9771_v54 = vld [vmem:[#allocation202_spill] sm:$0xff]  ;;  %s7340_s30 = sld [smem:[#allocation10 + $0xba]] }
 0x261   : > { %9754 = vst [vmem:[#allocation81_spill] sm:$0xff] %v7083_v24  ;;  %v1537_v22 = vadd.f32 %v6801_v2, %v1487_v56  ;;  %v1282_v12 = vadd.f32 %v6904_v17, %v1170_v10  ;;  %v1438_v27 = vadd.f32 %v9759_v34, %v1380_v9  ;;  %v1532_v60 = vadd.f32 %v9760_v7, %v1482_v47  ;;  %v9761_v14 = vld [vmem:[#allocation199_spill] sm:$0xff]  ;;  %v9763_v2 = vld [vmem:[#allocation141_spill] sm:$0xff]  ;;  %s7349_s23 = sld [smem:[#allocation10 + $0xbb]] }
 0x262   : > { %v1493_v37 = vadd.f32 %v9761_v14, %v1443_v44  ;;  %v1541_v52 = vmul.f32 %v1540_v40, %v9763_v2  ;;  %v9765_v49 = vld [vmem:[#allocation203_spill] sm:$0xff]  ;;  %v9768_v45 = vstv %s6625_s12  ;;  %v9770_v36 = vstv %s6393_s19  ;;  %v9772_v19 = vld [vmem:[#allocation201_spill] sm:$0xff]  ;;  %s4711_s19 = sld [smem:[#allocation10 + $0xa4]] }
 0x263   : > { %v7103_v61 = vadd.f32 %v1585_v57, %v1537_v22  ;;  %v1488_v17 = vadd.f32 %v9764_v35, %v1438_v27  ;;  %v1394_v48 = vadd.f32 %v1390_v1, %v1282_v12  ;;  %v7109_v26 = vadd.f32 %v1580_v59, %v1532_v60  ;;  %v7121_v41 = vpop.permute.xlu0 %1615  ;;  %s4727_s12 = sld [smem:[#allocation10 + $0xb4]] }
 0x264   : > { %2007 = vrot.lane.b32.xlu0 %v9765_v49, %s9392_s7  ;;  %v1536_v43 = vmul.f32 %v9768_v45, %v9767_v8  ;;  %v1492_v18 = vmul.f32 %v9770_v36, %v9769_v28  ;;  %1995 = vrot.lane.b32.xlu1 %v9771_v54, %s9392_s7  ;;  %v1591_v30 = vmul.f32 %v1590_v38, %v6513_v31  ;;  %v7125_v42 = vpop.permute.xlu1 %1603  ;;  %v9773_v58 = vstv %s6571_s0  ;;  %s7259_s0 = sld [smem:[#allocation10 + $0xb0]] }
 0x265   : > { %9762 = vst [vmem:[#allocation145_spill] sm:$0xff] %v7103_v61  ;;  %9766 = vst [vmem:[#allocation70_spill] sm:$0xff] %v7109_v26  ;;  %v1543_v13 = vadd.f32 %v1541_v52, %v1493_v37  ;;  %v1444_v23 = vadd.f32 %v9772_v19, %v1394_v48  ;;  %v2017_v51 = vmul.f32 %v2016_v15, %v6513_v31  ;;  %v2030_v10 = vstv %s7072_s6  ;;  %v4932_v37 = vld [vmem:[#allocation2 + $0x9] sm:$0xff]  ;;  %s4735_s6 = sld [smem:[#allocation10 + $0xbc]] }
 0x266   : > { %v1586_v53 = vmul.f32 %v1584_v55, %v9757_v33  ;;  %v1538_v56 = vadd.f32 %v1536_v43, %v1488_v17  ;;  %v2004_v11 = vmul.f32 %v9773_v58, %v9757_v33  ;;  %v1542_v21 = vmul.f32 %v1540_v40, %v9767_v8 }
 0x267   : > { %v7133_v16 = vadd.f32 %v1591_v30, %v1543_v13  ;;  %v1494_v47 = vadd.f32 %v1492_v18, %v1444_v23  ;;  %v7140_v55 = vpop.permute.xlu0 %1629  ;;  %v2031_v50 = vmul.f32 %v2030_v10, %v6513_v31  ;;  %v1592_v44 = vmul.f32 %v1590_v38, %v9757_v33  ;;  %v4931_v31 = vld [vmem:[#allocation2 + $0x1] sm:$0xff] }
 0x268   : > { %2021 = vrot.lane.b32.xlu0 %v2017_v51, %s9392_s7  ;;  %v7136_v9 = vadd.f32 %v1586_v53, %v1538_v56  ;;  %2009 = vrot.lane.b32.xlu1 %v2004_v11, %s9392_s7  ;;  %v7144_v62 = vpop.permute.xlu1 %1617  ;;  %v2018_v59 = vmul.f32 %v2016_v15, %v9757_v33  ;;  %v2044_v57 = vstv %s7101_s10  ;;  %v2032_v27 = vmul.f32 %v2030_v10, %v9757_v33  ;;  %s4736_s10 = sld [smem:[#allocation10 + $0xbd]] }
 0x269   : > { %9774 = vst [vmem:[#allocation69_spill] sm:$0xff] %v7133_v16  ;;  %v1544_v20 = vadd.f32 %v1542_v21, %v1494_v47  ;;  %v2045_v12 = vmul.f32 %v4931_v31, %v2044_v57  ;;  %v2058_v7 = vstv %s7131_s5  ;;  %v2046_v1 = vmul.f32 %v4932_v37, %v2044_v57  ;;  %s7371_s5 = sld [smem:[#allocation10 + $0xbe]] }
 0x26a   : > { %9775 = vst [vmem:[#allocation72_spill] sm:$0xff] %v7136_v9  ;;  %v2059_v38 = vmul.f32 %v4931_v31, %v2058_v7  ;;  %v2072_v15 = vstv %s7148_s9  ;;  %v2060_v35 = vmul.f32 %v4932_v37, %v2058_v7  ;;  %v2086_v17 = vstv %s7160_s11  ;;  %s7379_s9 = sld [smem:[#allocation10 + $0xbf]] }
 0x26b   : > { %v7151_v40 = vadd.f32 %v1592_v44, %v1544_v20  ;;  %v7154_v22 = vpop.permute.xlu0 %1643  ;;  %v2073_v2 = vmul.f32 %v4931_v31, %v2072_v15  ;;  %v2087_v49 = vmul.f32 %v4931_v31, %v2086_v17  ;;  %v2074_v45 = vmul.f32 %v4932_v37, %v2072_v15  ;;  %s7388_s11 = sld [smem:[#allocation10 + $0xe0]] }
 0x26c   : > { %2035 = vrot.lane.b32.xlu0 %v2031_v50, %s9392_s7  ;;  %2023 = vrot.lane.b32.xlu1 %v2018_v59, %s9392_s7  ;;  %9777 = vst [vmem:[#allocation74_spill] sm:$0xff] %v7154_v22  ;;  %v7156_v34 = vpop.permute.xlu1 %1631  ;;  %v2100_v43 = vstv %s4711_s19  ;;  %v2088_v54 = vmul.f32 %v4932_v37, %v2086_v17  ;;  %v2114_v30 = vstv %s4712_s20  ;;  %s7397_s19 = sld [smem:[#allocation10 + $0xe1]] }
 0x26d   : > { %9776 = vst [vmem:[#allocation71_spill] sm:$0xff] %v7151_v40  ;;  %v2101_v36 = vmul.f32 %v4931_v31, %v2100_v43  ;;  %v2115_v19 = vmul.f32 %v4931_v31, %v2114_v30  ;;  %v2102_v51 = vmul.f32 %v4932_v37, %v2100_v43  ;;  %v2128_v53 = vstv %s4713_s27  ;;  %s7408_s20 = sld [smem:[#allocation10 + $0xe2]] }
 0x26e   : > { %v2129_v58 = vmul.f32 %v4931_v31, %v2128_v53  ;;  %v2116_v10 = vmul.f32 %v4932_v37, %v2114_v30  ;;  %v2142_v47 = vstv %s7188_s29  ;;  %v2130_v20 = vmul.f32 %v4932_v37, %v2128_v53  ;;  %s7418_s27 = sld [smem:[#allocation10 + $0xe3]] }
 0x26f   : > { %v7164_v60 = vpop.permute.xlu0 %1657  ;;  %v2143_v50 = vmul.f32 %v4931_v31, %v2142_v47  ;;  %v2156_v59 = vstv %s7196_s26  ;;  %v2324_v16 = vstv %s4727_s12  ;;  %v2338_v9 = vstv %s4728_s14  ;;  %s4775_s29 = sld [smem:[#allocation10 + $0xe4]] }
 0x270   : > { %2049 = vrot.lane.b32.xlu0 %v2045_v12, %s5085_s25  ;;  %2037 = vrot.lane.b32.xlu1 %v2032_v27, %s9392_s7  ;;  %9778 = vst [vmem:[#allocation73_spill] sm:$0xff] %v7164_v60  ;;  %v7166_v14 = vpop.permute.xlu1 %1645  ;;  %v4933_v12 = vld [vmem:[#allocation2 + $0x19] sm:$0xff]  ;;  %v2394_v61 = vstv %s7331_s3  ;;  %v2408_v26 = vstv %s7340_s30  ;;  %s4776_s26 = sld [smem:[#allocation10 + $0xe5]] }
 0x271   : > { %9779 = vst [vmem:[#allocation75_spill] sm:$0xff] %v7166_v14  ;;  %v2157_v27 = vmul.f32 %v4933_v12, %v2156_v59  ;;  %v2436_v63 = vstv %s4735_s6  ;;  %s7578_s12 = sld [smem:[#allocation10 + $0xec]] }
 0x272   : > { %s7589_s14 = sld [smem:[#allocation10 + $0xf3]] }
 0x273   : > { %v7171_v33 = vpop.permute.xlu0 %1671  ;;  %v2720_v24 = vstv %s7408_s20  ;;  %s4784_s3 = sld [smem:[#allocation10 + $0xed]] }
 0x274   : > { %2063 = vrot.lane.b32.xlu0 %v2059_v38, %s5085_s25  ;;  %2051 = vrot.lane.b32.xlu1 %v2046_v1, %s5085_s25  ;;  %9780 = vst [vmem:[#allocation97_spill] sm:$0xff] %v7171_v33  ;;  %v7173_v52 = vpop.permute.xlu1 %1659  ;;  %v2144_v38 = vmul.f32 %v4932_v37, %v2142_v47  ;;  %v2170_v1 = vstv %s7205_s4  ;;  %s7448_s4 = sld [smem:[#allocation10 + $0xe6]] }
 0x275   : > { %9781 = vst [vmem:[#allocation76_spill] sm:$0xff] %v7173_v52  ;;  %v2171_v15 = vmul.f32 %v4933_v12, %v2170_v1  ;;  %s4791_s30 = sld [smem:[#allocation10 + $0xf4]] }
 0x276   : > { %s4805_s6 = sld [smem:[#allocation10 + $0x102]] }
 0x277   : > { %v7178_v48 = vpop.permute.xlu0 %1685  ;;  %s4806_s20 = sld [smem:[#allocation10 + $0x103]] }
 0x278   : > { %2077 = vrot.lane.b32.xlu0 %v2073_v2, %s5085_s25  ;;  %2065 = vrot.lane.b32.xlu1 %v2060_v35, %s5085_s25  ;;  %9782 = vst [vmem:[#allocation78_spill] sm:$0xff] %v7178_v48  ;;  %v7180_v8 = vpop.permute.xlu1 %1673  ;;  %v4934_v35 = vld [vmem:[#allocation2 + $0x21] sm:$0xff] }
 0x279   : > { %9783 = vst [vmem:[#allocation77_spill] sm:$0xff] %v7180_v8  ;;  %v2158_v17 = vmul.f32 %v4934_v35, %v2156_v59  ;;  %v2226_v59 = vstv %s4720_s28  ;;  %s7493_s28 = sld [smem:[#allocation10 + $0xea]] }
 0x27b   : > { %v7184_v28 = vpop.permute.xlu0 %1699 }
 0x27c   : > { %2091 = vrot.lane.b32.xlu0 %v2087_v49, %s5085_s25  ;;  %2079 = vrot.lane.b32.xlu1 %v2074_v45, %s5085_s25  ;;  %9784 = vst [vmem:[#allocation79_spill] sm:$0xff] %v7184_v28  ;;  %v7186_v18 = vpop.permute.xlu1 %1687  ;;  %v2184_v49 = vstv %s7214_s22  ;;  %s7458_s22 = sld [smem:[#allocation10 + $0xe7]] }
 0x27d   : > { %9785 = vst [vmem:[#allocation148_spill] sm:$0xff] %v7186_v18  ;;  %v2185_v45 = vmul.f32 %v4933_v12, %v2184_v49  ;;  %v2186_v53 = vmul.f32 %v4934_v35, %v2184_v49 }
 0x27f   : > { %v7192_v13 = vpop.permute.xlu0 %1713 }
 0x280   : > { %2105 = vrot.lane.b32.xlu0 %v2101_v36, %s5085_s25  ;;  %2093 = vrot.lane.b32.xlu1 %v2088_v54, %s5085_s25  ;;  %v7194_v23 = vpop.permute.xlu1 %1701  ;;  %v2172_v36 = vmul.f32 %v4934_v35, %v2170_v1  ;;  %v2198_v54 = vstv %s7223_s18  ;;  %s7469_s18 = sld [smem:[#allocation10 + $0xe8]] }
 0x281   : > { %9786 = vst [vmem:[#allocation80_spill] sm:$0xff] %v7194_v23 }
 0x283   : > { %v7200_v56 = vpop.permute.xlu0 %1727 }
 0x284   : > { %2119 = vrot.lane.b32.xlu0 %v2115_v19, %s5085_s25  ;;  %2107 = vrot.lane.b32.xlu1 %v2102_v51, %s5085_s25  ;;  %v7202_v11 = vpop.permute.xlu1 %1715  ;;  %v2199_v19 = vmul.f32 %v4933_v12, %v2198_v54 }
 0x286   : > { %v2804_v32 = vstv %s7469_s18  ;;  %s7752_s18 = sld [smem:[#allocation10 + $0xf6]] }
 0x287   : > { %v7209_v21 = vpop.permute.xlu0 %1741 }
 0x288   : > { %2133 = vrot.lane.b32.xlu0 %v2129_v58, %s5085_s25  ;;  %2121 = vrot.lane.b32.xlu1 %v2116_v10, %s5085_s25  ;;  %v7211_v44 = vpop.permute.xlu1 %1729  ;;  %v2212_v58 = vstv %s4719_s17  ;;  %s7480_s17 = sld [smem:[#allocation10 + $0xe9]] }
 0x289   : > { %v2213_v47 = vmul.f32 %v4933_v12, %v2212_v58 }
 0x28b   : > { %v7218_v57 = vpop.permute.xlu0 %1755 }
 0x28c   : > { %2147 = vrot.lane.b32.xlu0 %v2143_v50, %s5085_s25  ;;  %2135 = vrot.lane.b32.xlu1 %v2130_v20, %s5085_s25  ;;  %9787 = vst [vmem:[#allocation82_spill] sm:$0xff] %v7218_v57  ;;  %v7220_v7 = vpop.permute.xlu1 %1743  ;;  %v2200_v20 = vmul.f32 %v4934_v35, %v2198_v54  ;;  %v2228_v54 = vmul.f32 %v4934_v35, %v2226_v59 }
 0x28f   : > { %v7227_v31 = vpop.permute.xlu0 %1769 }
 0x290   : > { %2161 = vrot.lane.b32.xlu0 %v2157_v27, %s5085_s25  ;;  %2149 = vrot.lane.b32.xlu1 %v2144_v38, %s5085_s25  ;;  %9788 = vst [vmem:[#allocation83_spill] sm:$0xff] %v7227_v31  ;;  %v7229_v2 = vpop.permute.xlu1 %1757  ;;  %v2227_v38 = vmul.f32 %v4933_v12, %v2226_v59  ;;  %v2790_v31 = vstv %s7458_s22  ;;  %s7739_s22 = sld [smem:[#allocation10 + $0xef]] }
 0x291   : > { %9789 = vst [vmem:[#allocation113_spill] sm:$0xff] %v7229_v2 }
 0x293   : > { %v7234_v37 = vpop.permute.xlu0 %1783 }
 0x294   : > { %2175 = vrot.lane.b32.xlu0 %v2171_v15, %s5085_s25  ;;  %2163 = vrot.lane.b32.xlu1 %v2158_v17, %s5085_s25  ;;  %9790 = vst [vmem:[#allocation147_spill] sm:$0xff] %v7234_v37  ;;  %v7236_v43 = vpop.permute.xlu1 %1771  ;;  %v2214_v15 = vmul.f32 %v4934_v35, %v2212_v58  ;;  %v2240_v17 = vstv %s4721_s15  ;;  %s7504_s15 = sld [smem:[#allocation10 + $0xf0]] }
 0x295   : > { %9791 = vst [vmem:[#allocation84_spill] sm:$0xff] %v7236_v43  ;;  %v2706_v43 = vstv %s7397_s19  ;;  %s4799_s19 = sld [smem:[#allocation10 + $0xfc]] }
 0x297   : > { %v7241_v30 = vpop.permute.xlu0 %1797 }
 0x298   : > { %2189 = vrot.lane.b32.xlu0 %v2185_v45, %s5085_s25  ;;  %2177 = vrot.lane.b32.xlu1 %v2172_v36, %s5085_s25  ;;  %9792 = vst [vmem:[#allocation86_spill] sm:$0xff] %v7241_v30  ;;  %v7243_v51 = vpop.permute.xlu1 %1785  ;;  %v2241_v45 = vmul.f32 %v4933_v12, %v2240_v17  ;;  %v2296_v30 = vstv %s7277_s13  ;;  %s7554_s13 = sld [smem:[#allocation10 + $0xf8]] }
 0x299   : > { %9793 = vst [vmem:[#allocation85_spill] sm:$0xff] %v7243_v51  ;;  %v4937_v51 = vld [vmem:[#allocation2 + $0x49] sm:$0xff] }
 0x29a   : > { %v2916_v2 = vstv %s7504_s15  ;;  %s4814_s15 = sld [smem:[#allocation10 + $0x10b]] }
 0x29b   : > { %v7247_v10 = vpop.permute.xlu0 %1811 }
 0x29c   : > { %2203 = vrot.lane.b32.xlu0 %v2199_v19, %s5085_s25  ;;  %2191 = vrot.lane.b32.xlu1 %v2186_v53, %s5085_s25  ;;  %9794 = vst [vmem:[#allocation87_spill] sm:$0xff] %v7247_v10  ;;  %v7249_v50 = vpop.permute.xlu1 %1799  ;;  %v2254_v19 = vstv %s7251_s24  ;;  %s7517_s24 = sld [smem:[#allocation10 + $0xf1]] }
 0x29d   : > { %9795 = vst [vmem:[#allocation88_spill] sm:$0xff] %v7249_v50  ;;  %v2255_v58 = vmul.f32 %v4933_v12, %v2254_v19  ;;  %v2282_v50 = vstv %s7268_s2  ;;  %s7541_s2 = sld [smem:[#allocation10 + $0xf2]] }
 0x29e   : > { %v3028_v6 = vstv %s7554_s13  ;;  %s4794_s13 = sld [smem:[#allocation10 + $0xf7]] }
 0x29f   : > { %v7255_v27 = vpop.permute.xlu0 %1825 }
 0x2a0   : > { %2217 = vrot.lane.b32.xlu0 %v2213_v47, %s5085_s25  ;;  %2205 = vrot.lane.b32.xlu1 %v2200_v20, %s5085_s25  ;;  %v7257_v1 = vpop.permute.xlu1 %1813  ;;  %v2242_v20 = vmul.f32 %v4934_v35, %v2240_v17 }
 0x2a1   : > { %9796 = vst [vmem:[#allocation89_spill] sm:$0xff] %v7257_v1 }
 0x2a3   : > { %v7263_v49 = vpop.permute.xlu0 %1839  ;;  %v2944_v14 = vstv %s7541_s2  ;;  %s4828_s2 = sld [smem:[#allocation10 + $0x119]] }
 0x2a4   : > { %2231 = vrot.lane.b32.xlu0 %v2227_v38, %s5085_s25  ;;  %2219 = vrot.lane.b32.xlu1 %v2214_v15, %s5085_s25  ;;  %v7265_v36 = vpop.permute.xlu1 %1827  ;;  %v2268_v38 = vstv %s7259_s0  ;;  %v4935_v15 = vld [vmem:[#allocation2 + $0x31] sm:$0xff]  ;;  %s7530_s0 = sld [smem:[#allocation10 + $0xeb]] }
 0x2a5   : > { %v2283_v17 = vmul.f32 %v4935_v15, %v2282_v50 }
 0x2a7   : > { %v7272_v53 = vpop.permute.xlu0 %1853 }
 0x2a8   : > { %2245 = vrot.lane.b32.xlu0 %v2241_v45, %s5085_s25  ;;  %2233 = vrot.lane.b32.xlu1 %v2228_v54, %s5085_s25  ;;  %v7274_v47 = vpop.permute.xlu1 %1841  ;;  %v2269_v45 = vmul.f32 %v4935_v15, %v2268_v38  ;;  %v2256_v54 = vmul.f32 %v4934_v35, %v2254_v19  ;;  %v2297_v19 = vmul.f32 %v4935_v15, %v2296_v30 }
 0x2ab   : > { %v7281_v59 = vpop.permute.xlu0 %1867 }
 0x2ac   : > { %2259 = vrot.lane.b32.xlu0 %v2255_v58, %s5085_s25  ;;  %2247 = vrot.lane.b32.xlu1 %v2242_v20, %s5085_s25  ;;  %9797 = vst [vmem:[#allocation99_spill] sm:$0xff] %v7281_v59  ;;  %v7283_v1 = vpop.permute.xlu1 %1855  ;;  %v4936_v20 = vld [vmem:[#allocation2 + $0x39] sm:$0xff] }
 0x2ad   : > { %9798 = vst [vmem:[#allocation129_spill] sm:$0xff] %v7283_v1  ;;  %v2270_v10 = vmul.f32 %v4936_v20, %v2268_v38 }
 0x2af   : > { %v7290_v12 = vpop.permute.xlu0 %1881 }
 0x2b0   : > { %2273 = vrot.lane.b32.xlu0 %v2269_v45, %s5085_s25  ;;  %2261 = vrot.lane.b32.xlu1 %v2256_v54, %s5085_s25  ;;  %9799 = vst [vmem:[#allocation90_spill] sm:$0xff] %v7290_v12  ;;  %v7292_v58 = vpop.permute.xlu1 %1869  ;;  %v2284_v45 = vmul.f32 %v4936_v20, %v2282_v50  ;;  %v2310_v54 = vstv %s7286_s1  ;;  %v2325_v50 = vmul.f32 %v4935_v15, %v2324_v16  ;;  %s7565_s1 = sld [smem:[#allocation10 + $0xf9]] }
 0x2b1   : > { %9800 = vst [vmem:[#allocation92_spill] sm:$0xff] %v7292_v58  ;;  %v2311_v38 = vmul.f32 %v4935_v15, %v2310_v54 }
 0x2b4   : > { %2287 = vrot.lane.b32.xlu0 %v2283_v17, %s5085_s25  ;;  %2275 = vrot.lane.b32.xlu1 %v2270_v10, %s5085_s25  ;;  %v2298_v17 = vmul.f32 %v4936_v20, %v2296_v30 }
 0x2b5   : > { %v7297_v35 = vpop.permute.xlu0 %1895  ;;  %v7299_v23 = vpop.permute.xlu1 %1883 }
 0x2b6   : > { %9801 = vst [vmem:[#allocation91_spill] sm:$0xff] %v7297_v35  ;;  %9802 = vst [vmem:[#allocation100_spill] sm:$0xff] %v7299_v23  ;;  %v2692_v23 = vstv %s7388_s11  ;;  %v3042_v57 = vstv %s7565_s1  ;;  %s4792_s11 = sld [smem:[#allocation10 + $0xf5]] }
 0x2b7   : > { %s4801_s1 = sld [smem:[#allocation10 + $0xfe]] }
 0x2b8   : > { %2301 = vrot.lane.b32.xlu0 %v2297_v19, %s5085_s25  ;;  %2289 = vrot.lane.b32.xlu1 %v2284_v45, %s5085_s25  ;;  %v2312_v19 = vmul.f32 %v4936_v20, %v2310_v54  ;;  %v2339_v45 = vmul.f32 %v4935_v15, %v2338_v9 }
 0x2b9   : > { %v7304_v40 = vpop.permute.xlu0 %1909 }
 0x2ba   : > { %9803 = vst [vmem:[#allocation150_spill] sm:$0xff] %v7304_v40  ;;  %v7306_v28 = vpop.permute.xlu1 %1897  ;;  %v2352_v40 = vstv %s4729_s16  ;;  %s4797_s16 = sld [smem:[#allocation10 + $0xfa]] }
 0x2bb   : > { %9804 = vst [vmem:[#allocation94_spill] sm:$0xff] %v7306_v28  ;;  %v2380_v28 = vstv %s7322_s8  ;;  %s4804_s8 = sld [smem:[#allocation10 + $0x101]] }
 0x2bc   : > { %2315 = vrot.lane.b32.xlu0 %v2311_v38, %s5085_s25  ;;  %2303 = vrot.lane.b32.xlu1 %v2298_v17, %s5085_s25  ;;  %v2326_v17 = vmul.f32 %v4936_v20, %v2324_v16 }
 0x2bd   : > { %v7310_v10 = vpop.permute.xlu0 %1923 }
 0x2be   : > { %9805 = vst [vmem:[#allocation93_spill] sm:$0xff] %v7310_v10  ;;  %v7312_v18 = vpop.permute.xlu1 %1911  ;;  %v2353_v10 = vmul.f32 %v4935_v15, %v2352_v40 }
 0x2bf   : > { %9806 = vst [vmem:[#allocation115_spill] sm:$0xff] %v7312_v18  ;;  %v2366_v18 = vstv %s7314_s21  ;;  %s4803_s21 = sld [smem:[#allocation10 + $0x100]] }
 0x2c0   : > { %2329 = vrot.lane.b32.xlu0 %v2325_v50, %s5085_s25  ;;  %2317 = vrot.lane.b32.xlu1 %v2312_v19, %s5085_s25  ;;  %v2340_v19 = vmul.f32 %v4936_v20, %v2338_v9 }
 0x2c1   : > { %v7318_v30 = vpop.permute.xlu0 %1937 }
 0x2c2   : > { %v7320_v38 = vpop.permute.xlu1 %1925 }
 0x2c3   : > { %9807 = vst [vmem:[#allocation175_spill] sm:$0xff] %v7320_v38  ;;  %v2367_v38 = vmul.f32 %v4935_v15, %v2366_v18  ;;  %v2395_v15 = vmul.f32 %v4937_v51, %v2394_v61 }
 0x2c4   : > { %2343 = vrot.lane.b32.xlu0 %v2339_v45, %s5085_s25  ;;  %2331 = vrot.lane.b32.xlu1 %v2326_v17, %s5085_s25  ;;  %v2354_v17 = vmul.f32 %v4936_v20, %v2352_v40 }
 0x2c5   : > { %v7326_v54 = vpop.permute.xlu0 %1951 }
 0x2c6   : > { %v7328_v50 = vpop.permute.xlu1 %1939 }
 0x2c8   : > { %2357 = vrot.lane.b32.xlu0 %v2353_v10, %s5085_s25  ;;  %2345 = vrot.lane.b32.xlu1 %v2340_v19, %s5085_s25  ;;  %v2381_v10 = vmul.f32 %v4937_v51, %v2380_v28  ;;  %v2368_v19 = vmul.f32 %v4936_v20, %v2366_v18  ;;  %v2409_v20 = vmul.f32 %v4937_v51, %v2408_v26 }
 0x2c9   : > { %v7335_v16 = vpop.permute.xlu0 %1965 }
 0x2ca   : > { %v7337_v45 = vpop.permute.xlu1 %1953 }
 0x2cc   : > { %2371 = vrot.lane.b32.xlu0 %v2367_v38, %s5085_s25  ;;  %2359 = vrot.lane.b32.xlu1 %v2354_v17, %s5085_s25  ;;  %v4938_v17 = vld [vmem:[#allocation2 + $0x51] sm:$0xff] }
 0x2cd   : > { %v2382_v8 = vmul.f32 %v4938_v17, %v2380_v28 }
 0x2ce   : > { %v7344_v9 = vpop.permute.xlu0 %1979  ;;  %v7346_v48 = vpop.permute.xlu1 %1967 }
 0x2cf   : > { %9808 = vst [vmem:[#allocation149_spill] sm:$0xff] %v7344_v9  ;;  %9809 = vst [vmem:[#allocation96_spill] sm:$0xff] %v7346_v48  ;;  %v2930_v9 = vstv %s7517_s24  ;;  %s4821_s24 = sld [smem:[#allocation10 + $0x112]] }
 0x2d0   : > { %2385 = vrot.lane.b32.xlu0 %v2381_v10, %s5085_s25  ;;  %2373 = vrot.lane.b32.xlu1 %v2368_v19, %s5085_s25  ;;  %v2396_v10 = vmul.f32 %v4938_v17, %v2394_v61  ;;  %v2422_v19 = vstv %s7349_s23  ;;  %s4798_s23 = sld [smem:[#allocation10 + $0xfb]] }
 0x2d1   : > { %v2423_v28 = vmul.f32 %v4937_v51, %v2422_v19 }
 0x2d2   : > { %v7353_v40 = vpop.permute.xlu0 %1993  ;;  %v7355_v38 = vpop.permute.xlu1 %1981 }
 0x2d3   : > { %9810 = vst [vmem:[#allocation95_spill] sm:$0xff] %v7353_v40  ;;  %9811 = vst [vmem:[#allocation98_spill] sm:$0xff] %v7355_v38  ;;  %v2818_v38 = vstv %s7480_s17  ;;  %s4800_s17 = sld [smem:[#allocation10 + $0xfd]] }
 0x2d4   : > { %2399 = vrot.lane.b32.xlu0 %v2395_v15, %s5085_s25  ;;  %2387 = vrot.lane.b32.xlu1 %v2382_v8, %s5085_s25  ;;  %v2410_v15 = vmul.f32 %v4938_v17, %v2408_v26  ;;  %v2437_v8 = vmul.f32 %v4937_v51, %v2436_v63 }
 0x2d6   : > { %v7360_v18 = vpop.permute.xlu0 %2007  ;;  %v7362_v35 = vpop.permute.xlu1 %1995  ;;  %v3070_v48 = vstv %s4798_s23  ;;  %s4823_s23 = sld [smem:[#allocation10 + $0x114]] }
 0x2d7   : > { %9812 = vst [vmem:[#allocation116_spill] sm:$0xff] %v7360_v18  ;;  %9813 = vst [vmem:[#allocation102_spill] sm:$0xff] %v7362_v35  ;;  %v2450_v18 = vstv %s4736_s10  ;;  %s4811_s10 = sld [smem:[#allocation10 + $0x108]] }
 0x2d8   : > { %2413 = vrot.lane.b32.xlu0 %v2409_v20, %s5085_s25  ;;  %2401 = vrot.lane.b32.xlu1 %v2396_v10, %s5085_s25  ;;  %v2424_v10 = vmul.f32 %v4938_v17, %v2422_v19 }
 0x2da   : > { %v7367_v37 = vpop.permute.xlu0 %2021  ;;  %v7369_v33 = vpop.permute.xlu1 %2009 }
 0x2db   : > { %9814 = vst [vmem:[#allocation101_spill] sm:$0xff] %v7367_v37  ;;  %9815 = vst [vmem:[#allocation131_spill] sm:$0xff] %v7369_v33  ;;  %v2451_v37 = vmul.f32 %v4937_v51, %v2450_v18  ;;  %v2464_v33 = vstv %s7371_s5  ;;  %s4812_s5 = sld [smem:[#allocation10 + $0x109]] }
 0x2dc   : > { %2427 = vrot.lane.b32.xlu0 %v2423_v28, %s5085_s25  ;;  %2415 = vrot.lane.b32.xlu1 %v2410_v15, %s5085_s25  ;;  %v2438_v15 = vmul.f32 %v4938_v17, %v2436_v63  ;;  %v2466_v35 = vmul.f32 %v4938_v17, %v2464_v33 }
 0x2de   : > { %v7375_v61 = vpop.permute.xlu0 %2035  ;;  %v7377_v20 = vpop.permute.xlu1 %2023 }
 0x2df   : > { %9816 = vst [vmem:[#allocation104_spill] sm:$0xff] %v7375_v61  ;;  %9817 = vst [vmem:[#allocation103_spill] sm:$0xff] %v7377_v20  ;;  %v2465_v20 = vmul.f32 %v4937_v51, %v2464_v33  ;;  %v2478_v61 = vstv %s7379_s9  ;;  %v7420_v33 = vld [vmem:[#allocation2 + $0xa] sm:$0xff]  ;;  %s4785_s9 = sld [smem:[#allocation10 + $0xee]] }
 0x2e0   : > { %2441 = vrot.lane.b32.xlu0 %v2437_v8, %s5085_s25  ;;  %2429 = vrot.lane.b32.xlu1 %v2424_v10, %s5085_s25  ;;  %v2452_v10 = vmul.f32 %v4938_v17, %v2450_v18  ;;  %v2694_v52 = vmul.f32 %v2692_v23, %v7420_v33 }
 0x2e2   : > { %v7383_v26 = vpop.permute.xlu0 %2049  ;;  %v7385_v28 = vpop.permute.xlu1 %2037 }
 0x2e3   : > { %9818 = vst [vmem:[#allocation105_spill] sm:$0xff] %v7385_v28  ;;  %v2479_v28 = vmul.f32 %v4937_v51, %v2478_v61  ;;  %v2480_v51 = vmul.f32 %v4938_v17, %v2478_v61 }
 0x2e4   : > { %2455 = vrot.lane.b32.xlu0 %v2451_v37, %s5085_s25  ;;  %2443 = vrot.lane.b32.xlu1 %v2438_v15, %s5085_s25  ;;  %v7403_v37 = vld [vmem:[#allocation2 + $0x2] sm:$0xff] }
 0x2e5   : > { %v2721_v61 = vmul.f32 %v2720_v24, %v7403_v37 }
 0x2e6   : > { %v7392_v19 = vpop.permute.xlu0 %2063  ;;  %v7394_v8 = vpop.permute.xlu1 %2051 }
 0x2e8   : > { %2469 = vrot.lane.b32.xlu0 %v2465_v20, %s5085_s25  ;;  %2457 = vrot.lane.b32.xlu1 %v2452_v10, %s5085_s25  ;;  %v2693_v20 = vmul.f32 %v2692_v23, %v7403_v37 }
 0x2ea   : > { %v7401_v63 = vpop.permute.xlu0 %2077  ;;  %v7405_v15 = vpop.permute.xlu1 %2065 }
 0x2eb   : > { %9819 = vst [vmem:[#allocation132_spill] sm:$0xff] %v7401_v63  ;;  %v3182_v63 = vstv %s4806_s20  ;;  %s7944_s20 = sld [smem:[#allocation10 + $0x116]] }
 0x2ec   : > { %2483 = vrot.lane.b32.xlu0 %v2479_v28, %s5085_s25  ;;  %2471 = vrot.lane.b32.xlu1 %v2466_v35, %s5085_s25  ;;  %v2707_v35 = vmul.f32 %v2706_v43, %v7403_v37 }
 0x2ee   : > { %v7412_v18 = vpop.permute.xlu0 %2091  ;;  %v7415_v10 = vpop.permute.xlu1 %2079 }
 0x2ef   : > { %9820 = vst [vmem:[#allocation156_spill] sm:$0xff] %v7412_v18  ;;  %9821 = vst [vmem:[#allocation106_spill] sm:$0xff] %v7415_v10  ;;  %v2832_v18 = vstv %s7493_s28  ;;  %s4807_s28 = sld [smem:[#allocation10 + $0x104]] }
 0x2f0   : > { %2697 = vrot.lane.b32.xlu0 %v2693_v20, %s9392_s7  ;;  %2485 = vrot.lane.b32.xlu1 %v2480_v51, %s5085_s25  ;;  %v2708_v51 = vmul.f32 %v2706_v43, %v7420_v33 }
 0x2f2   : > { %v7424_v28 = vpop.permute.xlu0 %2105  ;;  %v7427_v40 = vpop.permute.xlu1 %2093 }
 0x2f3   : > { %9822 = vst [vmem:[#allocation117_spill] sm:$0xff] %v7424_v28  ;;  %9823 = vst [vmem:[#allocation144_spill] sm:$0xff] %v7427_v40  ;;  %v2734_v28 = vstv %s7418_s27  ;;  %v2792_v40 = vmul.f32 %v2790_v31, %v7420_v33  ;;  %s7707_s27 = sld [smem:[#allocation10 + $0x10a]] }
 0x2f4   : > { %2711 = vrot.lane.b32.xlu0 %v2707_v35, %s9392_s7  ;;  %2699 = vrot.lane.b32.xlu1 %v2694_v52, %s9392_s7  ;;  %v2735_v35 = vmul.f32 %v2734_v28, %v7403_v37  ;;  %v2722_v52 = vmul.f32 %v2720_v24, %v7420_v33 }
 0x2f6   : > { %v7433_v17 = vpop.permute.xlu0 %2119  ;;  %v7436_v20 = vpop.permute.xlu1 %2107 }
 0x2f7   : > { %9824 = vst [vmem:[#allocation153_spill] sm:$0xff] %v7433_v17  ;;  %9825 = vst [vmem:[#allocation108_spill] sm:$0xff] %v7436_v20  ;;  %v2748_v17 = vstv %s4775_s29  ;;  %v2762_v20 = vstv %s4776_s26  ;;  %s7717_s29 = sld [smem:[#allocation10 + $0x110]] }
 0x2f8   : > { %2725 = vrot.lane.b32.xlu0 %v2721_v61, %s9392_s7  ;;  %2713 = vrot.lane.b32.xlu1 %v2708_v51, %s9392_s7  ;;  %v2749_v61 = vmul.f32 %v2748_v17, %v7403_v37  ;;  %s9870_s26 = sld [smem:[#allocation27_spill]] }
 0x2fa   : > { %v7442_v23 = vpop.permute.xlu0 %2133  ;;  %v7445_v12 = vpop.permute.xlu1 %2121 }
 0x2fb   : > { %9826 = vst [vmem:[#allocation107_spill] sm:$0xff] %v7442_v23  ;;  %9827 = vst [vmem:[#allocation118_spill] sm:$0xff] %v7445_v12  ;;  %v2736_v23 = vmul.f32 %v2734_v28, %v7420_v33  ;;  %v2776_v12 = vstv %s7448_s4  ;;  %s7728_s4 = sld [smem:[#allocation10 + $0x111]] }
 0x2fc   : > { %2739 = vrot.lane.b32.xlu0 %v2735_v35, %s9392_s7  ;;  %2727 = vrot.lane.b32.xlu1 %v2722_v52, %s9392_s7  ;;  %v2763_v35 = vmul.f32 %v2762_v20, %v7403_v37  ;;  %v2778_v60 = vmul.f32 %v2776_v12, %v7420_v33 }
 0x2fe   : > { %v7452_v43 = vpop.permute.xlu0 %2147  ;;  %v7455_v51 = vpop.permute.xlu1 %2135 }
 0x2ff   : > { %9828 = vst [vmem:[#allocation109_spill] sm:$0xff] %v7452_v43  ;;  %9829 = vst [vmem:[#allocation133_spill] sm:$0xff] %v7455_v51  ;;  %v2750_v43 = vmul.f32 %v2748_v17, %v7420_v33  ;;  %v2764_v51 = vmul.f32 %v2762_v20, %v7420_v33 }
 0x300   : > { %2753 = vrot.lane.b32.xlu0 %v2749_v61, %s9392_s7  ;;  %2741 = vrot.lane.b32.xlu1 %v2736_v23, %s9392_s7  ;;  %v2777_v23 = vmul.f32 %v2776_v12, %v7403_v37  ;;  %v7506_v12 = vld [vmem:[#allocation2 + $0x22] sm:$0xff] }
 0x301   : > { %v2806_v58 = vmul.f32 %v2804_v32, %v7506_v12 }
 0x302   : > { %v7462_v24 = vpop.permute.xlu0 %2161  ;;  %v7465_v52 = vpop.permute.xlu1 %2149 }
 0x303   : > { %9830 = vst [vmem:[#allocation152_spill] sm:$0xff] %v7465_v52 }
 0x304   : > { %2767 = vrot.lane.b32.xlu0 %v2763_v35, %s9392_s7  ;;  %2755 = vrot.lane.b32.xlu1 %v2750_v43, %s9392_s7  ;;  %v2791_v43 = vmul.f32 %v2790_v31, %v7403_v37  ;;  %v7487_v35 = vld [vmem:[#allocation2 + $0x1a] sm:$0xff] }
 0x306   : > { %v7473_v28 = vpop.permute.xlu0 %2175  ;;  %v7476_v61 = vpop.permute.xlu1 %2163 }
 0x308   : > { %2781 = vrot.lane.b32.xlu0 %v2777_v23, %s9392_s7  ;;  %2769 = vrot.lane.b32.xlu1 %v2764_v51, %s9392_s7  ;;  %v2805_v51 = vmul.f32 %v2804_v32, %v7487_v35 }
 0x30a   : > { %v7484_v17 = vpop.permute.xlu0 %2189  ;;  %v7489_v52 = vpop.permute.xlu1 %2177 }
 0x30b   : > { %9831 = vst [vmem:[#allocation110_spill] sm:$0xff] %v7484_v17 }
 0x30c   : > { %2795 = vrot.lane.b32.xlu0 %v2791_v43, %s9392_s7  ;;  %2783 = vrot.lane.b32.xlu1 %v2778_v60, %s9392_s7  ;;  %v2819_v60 = vmul.f32 %v2818_v38, %v7487_v35 }
 0x30e   : > { %v7497_v20 = vpop.permute.xlu0 %2203  ;;  %v7500_v23 = vpop.permute.xlu1 %2191 }
 0x30f   : > { %9832 = vst [vmem:[#allocation111_spill] sm:$0xff] %v7497_v20  ;;  %9833 = vst [vmem:[#allocation134_spill] sm:$0xff] %v7500_v23  ;;  %v2860_v23 = vstv %s7578_s12  ;;  %s4808_s12 = sld [smem:[#allocation10 + $0x105]] }
 0x310   : > { %2809 = vrot.lane.b32.xlu0 %v2805_v51, %s9392_s7  ;;  %2797 = vrot.lane.b32.xlu1 %v2792_v40, %s9392_s7  ;;  %v2833_v40 = vmul.f32 %v2832_v18, %v7487_v35  ;;  %v7524_v51 = vld [vmem:[#allocation2 + $0x32] sm:$0xff] }
 0x312   : > { %v7510_v43 = vpop.permute.xlu0 %2217  ;;  %v7513_v20 = vpop.permute.xlu1 %2205 }
 0x313   : > { %9834 = vst [vmem:[#allocation165_spill] sm:$0xff] %v7510_v43  ;;  %9835 = vst [vmem:[#allocation119_spill] sm:$0xff] %v7513_v20  ;;  %v2820_v20 = vmul.f32 %v2818_v38, %v7506_v12  ;;  %v7543_v38 = vld [vmem:[#allocation2 + $0x3a] sm:$0xff] }
 0x314   : > { %2823 = vrot.lane.b32.xlu0 %v2819_v60, %s9392_s7  ;;  %2811 = vrot.lane.b32.xlu1 %v2806_v58, %s9392_s7  ;;  %v2917_v58 = vmul.f32 %v2916_v2, %v7524_v51  ;;  %v2946_v59 = vmul.f32 %v2944_v14, %v7543_v38 }
 0x316   : > { %v7521_v31 = vpop.permute.xlu0 %2231  ;;  %v7526_v43 = vpop.permute.xlu1 %2219 }
 0x317   : > { %9836 = vst [vmem:[#allocation157_spill] sm:$0xff] %v7521_v31  ;;  %9837 = vst [vmem:[#allocation159_spill] sm:$0xff] %v7526_v43  ;;  %v2834_v31 = vmul.f32 %v2832_v18, %v7506_v12  ;;  %v2846_v43 = vstv %s7530_s0  ;;  %s4827_s0 = sld [smem:[#allocation10 + $0x118]] }
 0x318   : > { %2837 = vrot.lane.b32.xlu0 %v2833_v40, %s9392_s7  ;;  %2825 = vrot.lane.b32.xlu1 %v2820_v20, %s9392_s7  ;;  %v2931_v20 = vmul.f32 %v2930_v9, %v7524_v51 }
 0x31a   : > { %v7534_v32 = vpop.permute.xlu0 %2245  ;;  %v7537_v60 = vpop.permute.xlu1 %2233 }
 0x31b   : > { %9838 = vst [vmem:[#allocation112_spill] sm:$0xff] %v7534_v32  ;;  %9839 = vst [vmem:[#allocation120_spill] sm:$0xff] %v7537_v60  ;;  %v2918_v60 = vmul.f32 %v2916_v2, %v7543_v38 }
 0x31c   : > { %2921 = vrot.lane.b32.xlu0 %v2917_v58, %s9392_s7  ;;  %2839 = vrot.lane.b32.xlu1 %v2834_v31, %s9392_s7  ;;  %v2847_v31 = vmul.f32 %v2846_v43, %v7487_v35 }
 0x31e   : > { %v7547_v40 = vpop.permute.xlu0 %2259  ;;  %v7550_v32 = vpop.permute.xlu1 %2247 }
 0x31f   : > { %9840 = vst [vmem:[#allocation154_spill] sm:$0xff] %v7547_v40  ;;  %9841 = vst [vmem:[#allocation135_spill] sm:$0xff] %v7550_v32  ;;  %v2932_v40 = vmul.f32 %v2930_v9, %v7543_v38 }
 0x320   : > { %2935 = vrot.lane.b32.xlu0 %v2931_v20, %s9392_s7  ;;  %2923 = vrot.lane.b32.xlu1 %v2918_v60, %s9392_s7  ;;  %v2945_v60 = vmul.f32 %v2944_v14, %v7524_v51  ;;  %v7572_v20 = vld [vmem:[#allocation2 + $0x4a] sm:$0xff] }
 0x322   : > { %v7558_v18 = vpop.permute.xlu0 %2273  ;;  %v7561_v58 = vpop.permute.xlu1 %2261 }
 0x323   : > { %9842 = vst [vmem:[#allocation158_spill] sm:$0xff] %v7561_v58  ;;  %v2848_v58 = vmul.f32 %v2846_v43, %v7506_v12  ;;  %v7591_v43 = vld [vmem:[#allocation2 + $0x52] sm:$0xff] }
 0x324   : > { %2851 = vrot.lane.b32.xlu0 %v2847_v31, %s9392_s7  ;;  %2937 = vrot.lane.b32.xlu1 %v2932_v40, %s9392_s7  ;;  %v3029_v40 = vmul.f32 %v3028_v6, %v7572_v20  ;;  %v3030_v39 = vmul.f32 %v3028_v6, %v7591_v43 }
 0x326   : > { %v7569_v2 = vpop.permute.xlu0 %2287  ;;  %v7574_v32 = vpop.permute.xlu1 %2275 }
 0x328   : > { %2949 = vrot.lane.b32.xlu0 %v2945_v60, %s9392_s7  ;;  %2853 = vrot.lane.b32.xlu1 %v2848_v58, %s9392_s7  ;;  %v3043_v58 = vmul.f32 %v3042_v57, %v7572_v20 }
 0x32a   : > { %v7582_v9 = vpop.permute.xlu0 %2301  ;;  %v7585_v31 = vpop.permute.xlu1 %2289 }
 0x32b   : > { %9843 = vst [vmem:[#allocation114_spill] sm:$0xff] %v7582_v9  ;;  %v2972_v9 = vstv %s4791_s30  ;;  %s4816_s30 = sld [smem:[#allocation10 + $0x10d]] }
 0x32c   : > { %3033 = vrot.lane.b32.xlu0 %v3029_v40, %s9392_s7  ;;  %2951 = vrot.lane.b32.xlu1 %v2946_v59, %s9392_s7  ;;  %v2861_v40 = vmul.f32 %v2860_v23, %v7487_v35  ;;  %v3044_v59 = vmul.f32 %v3042_v57, %v7591_v43 }
 0x32e   : > { %v7595_v60 = vpop.permute.xlu0 %2315  ;;  %v7598_v22 = vpop.permute.xlu1 %2303 }
 0x32f   : > { %9844 = vst [vmem:[#allocation136_spill] sm:$0xff] %v7595_v60  ;;  %9845 = vst [vmem:[#allocation155_spill] sm:$0xff] %v7598_v22  ;;  %v2958_v60 = vstv %s7589_s14  ;;  %s4815_s14 = sld [smem:[#allocation10 + $0x10c]] }
 0x330   : > { %3047 = vrot.lane.b32.xlu0 %v3043_v58, %s9392_s7  ;;  %3035 = vrot.lane.b32.xlu1 %v3030_v39, %s9392_s7  ;;  %v2959_v58 = vmul.f32 %v2958_v60, %v7524_v51  ;;  %v2862_v39 = vmul.f32 %v2860_v23, %v7506_v12 }
 0x332   : > { %v7604_v14 = vpop.permute.xlu0 %2329  ;;  %v7607_v10 = vpop.permute.xlu1 %2317 }
 0x333   : > { %9846 = vst [vmem:[#allocation169_spill] sm:$0xff] %v7604_v14  ;;  %9847 = vst [vmem:[#allocation121_spill] sm:$0xff] %v7607_v10  ;;  %v3056_v14 = vstv %s4797_s16  ;;  %s4822_s16 = sld [smem:[#allocation10 + $0x113]] }
 0x334   : > { %2865 = vrot.lane.b32.xlu0 %v2861_v40, %s9392_s7  ;;  %3049 = vrot.lane.b32.xlu1 %v3044_v59, %s9392_s7  ;;  %v3057_v40 = vmul.f32 %v3056_v14, %v7572_v20  ;;  %v2960_v59 = vmul.f32 %v2958_v60, %v7543_v38 }
 0x336   : > { %v7613_v6 = vpop.permute.xlu0 %2343  ;;  %v7616_v22 = vpop.permute.xlu1 %2331 }
 0x337   : > { %9848 = vst [vmem:[#allocation163_spill] sm:$0xff] %v7613_v6  ;;  %9849 = vst [vmem:[#allocation167_spill] sm:$0xff] %v7616_v22  ;;  %v3140_v6 = vstv %s4803_s21  ;;  %s4829_s21 = sld [smem:[#allocation10 + $0x11a]] }
 0x338   : > { %2963 = vrot.lane.b32.xlu0 %v2959_v58, %s9392_s7  ;;  %2867 = vrot.lane.b32.xlu1 %v2862_v39, %s9392_s7  ;;  %v3141_v58 = vmul.f32 %v3140_v6, %v7403_v37  ;;  %v3058_v39 = vmul.f32 %v3056_v14, %v7591_v43 }
 0x33a   : > { %v7621_v57 = vpop.permute.xlu0 %2357  ;;  %v7624_v10 = vpop.permute.xlu1 %2345 }
 0x33b   : > { %9850 = vst [vmem:[#allocation122_spill] sm:$0xff] %v7621_v57  ;;  %9851 = vst [vmem:[#allocation160_spill] sm:$0xff] %v7624_v10  ;;  %v3154_v57 = vstv %s4804_s8  ;;  %s4802_s8 = sld [smem:[#allocation10 + $0xff]] }
 0x33c   : > { %3061 = vrot.lane.b32.xlu0 %v3057_v40, %s9392_s7  ;;  %2965 = vrot.lane.b32.xlu1 %v2960_v59, %s9392_s7  ;;  %v3155_v40 = vmul.f32 %v3154_v57, %v7403_v37  ;;  %v3142_v59 = vmul.f32 %v3140_v6, %v7420_v33 }
 0x33e   : > { %v7629_v23 = vpop.permute.xlu0 %2371  ;;  %v7632_v22 = vpop.permute.xlu1 %2359 }
 0x33f   : > { %9852 = vst [vmem:[#allocation138_spill] sm:$0xff] %v7629_v23  ;;  %9853 = vst [vmem:[#allocation166_spill] sm:$0xff] %v7632_v22  ;;  %v2874_v23 = vstv %s4784_s3  ;;  %s4809_s3 = sld [smem:[#allocation10 + $0x106]] }
 0x340   : > { %3145 = vrot.lane.b32.xlu0 %v3141_v58, %s5085_s25  ;;  %3063 = vrot.lane.b32.xlu1 %v3058_v39, %s9392_s7  ;;  %v2875_v58 = vmul.f32 %v2874_v23, %v7487_v35  ;;  %v3156_v39 = vmul.f32 %v3154_v57, %v7420_v33 }
 0x342   : > { %v7637_v60 = vpop.permute.xlu0 %2385  ;;  %v7640_v10 = vpop.permute.xlu1 %2373 }
 0x343   : > { %9854 = vst [vmem:[#allocation139_spill] sm:$0xff] %v7640_v10 }
 0x344   : > { %3159 = vrot.lane.b32.xlu0 %v3155_v40, %s5085_s25  ;;  %3147 = vrot.lane.b32.xlu1 %v3142_v59, %s5085_s25  ;;  %v2973_v40 = vmul.f32 %v2972_v9, %v7524_v51  ;;  %v2876_v59 = vmul.f32 %v2874_v23, %v7506_v12 }
 0x346   : > { %v7645_v14 = vpop.permute.xlu0 %2399  ;;  %v7648_v22 = vpop.permute.xlu1 %2387 }
 0x348   : > { %2879 = vrot.lane.b32.xlu0 %v2875_v58, %s9392_s7  ;;  %3161 = vrot.lane.b32.xlu1 %v3156_v39, %s5085_s25  ;;  %v3071_v58 = vmul.f32 %v3070_v48, %v7572_v20  ;;  %v2974_v39 = vmul.f32 %v2972_v9, %v7543_v38 }
 0x34a   : > { %v7653_v6 = vpop.permute.xlu0 %2413  ;;  %v7656_v10 = vpop.permute.xlu1 %2401 }
 0x34b   : > { %9855 = vst [vmem:[#allocation162_spill] sm:$0xff] %v7653_v6  ;;  %v3168_v6 = vstv %s4805_s6  ;;  %s4830_s6 = sld [smem:[#allocation10 + $0x11b]] }
 0x34c   : > { %2977 = vrot.lane.b32.xlu0 %v2973_v40, %s9392_s7  ;;  %2881 = vrot.lane.b32.xlu1 %v2876_v59, %s9392_s7  ;;  %v3169_v40 = vmul.f32 %v3168_v6, %v7403_v37  ;;  %v3072_v59 = vmul.f32 %v3070_v48, %v7591_v43 }
 0x34e   : > { %v7661_v57 = vpop.permute.xlu0 %2427  ;;  %v7664_v17 = vpop.permute.xlu1 %2415 }
 0x34f   : > { %9856 = vst [vmem:[#allocation204_spill] sm:$0xff] %v7661_v57  ;;  %9857 = vst [vmem:[#allocation123_spill] sm:$0xff] %v7664_v17  ;;  %v3252_v57 = vstv %s4811_s10  ;;  %s4810_s10 = sld [smem:[#allocation10 + $0x107]] }
 0x350   : > { %3075 = vrot.lane.b32.xlu0 %v3071_v58, %s9392_s7  ;;  %2979 = vrot.lane.b32.xlu1 %v2974_v39, %s9392_s7  ;;  %v3253_v58 = vmul.f32 %v3252_v57, %v7487_v35  ;;  %v3170_v39 = vmul.f32 %v3168_v6, %v7420_v33 }
 0x352   : > { %v7669_v23 = vpop.permute.xlu0 %2441  ;;  %v7672_v1 = vpop.permute.xlu1 %2429 }
 0x353   : > { %9858 = vst [vmem:[#allocation173_spill] sm:$0xff] %v7669_v23  ;;  %9859 = vst [vmem:[#allocation172_spill] sm:$0xff] %v7672_v1  ;;  %v3266_v23 = vstv %s4812_s5  ;;  %s4817_s5 = sld [smem:[#allocation10 + $0x10e]] }
 0x354   : > { %3173 = vrot.lane.b32.xlu0 %v3169_v40, %s5085_s25  ;;  %3077 = vrot.lane.b32.xlu1 %v3072_v59, %s9392_s7  ;;  %v3267_v40 = vmul.f32 %v3266_v23, %v7487_v35  ;;  %v3254_v59 = vmul.f32 %v3252_v57, %v7506_v12 }
 0x356   : > { %v7677_v9 = vpop.permute.xlu0 %2455  ;;  %v7680_v17 = vpop.permute.xlu1 %2443 }
 0x357   : > { %9860 = vst [vmem:[#allocation207_spill] sm:$0xff] %v7677_v9  ;;  %9861 = vst [vmem:[#allocation124_spill] sm:$0xff] %v7680_v17  ;;  %v2888_v9 = vstv %s4785_s9  ;;  %s4824_s9 = sld [smem:[#allocation10 + $0x115]] }
 0x358   : > { %3257 = vrot.lane.b32.xlu0 %v3253_v58, %s5085_s25  ;;  %3175 = vrot.lane.b32.xlu1 %v3170_v39, %s5085_s25  ;;  %v2889_v58 = vmul.f32 %v2888_v9, %v7487_v35  ;;  %v3268_v39 = vmul.f32 %v3266_v23, %v7506_v12 }
 0x35a   : > { %v7685_v48 = vpop.permute.xlu0 %2469  ;;  %v7688_v1 = vpop.permute.xlu1 %2457 }
 0x35b   : > { %9862 = vst [vmem:[#allocation170_spill] sm:$0xff] %v7685_v48  ;;  %9863 = vst [vmem:[#allocation205_spill] sm:$0xff] %v7688_v1  ;;  %v2986_v48 = vstv %s4792_s11  ;;  %s4831_s11 = sld [smem:[#allocation10 + $0x11c]] }
 0x35c   : > { %3271 = vrot.lane.b32.xlu0 %v3267_v40, %s5085_s25  ;;  %3259 = vrot.lane.b32.xlu1 %v3254_v59, %s5085_s25  ;;  %v2987_v40 = vmul.f32 %v2986_v48, %v7524_v51  ;;  %v2890_v59 = vmul.f32 %v2888_v9, %v7506_v12 }
 0x35e   : > { %v7693_v6 = vpop.permute.xlu0 %2483  ;;  %v7696_v17 = vpop.permute.xlu1 %2471 }
 0x35f   : > { %9864 = vst [vmem:[#allocation142_spill] sm:$0xff] %v7693_v6  ;;  %9865 = vst [vmem:[#allocation174_spill] sm:$0xff] %v7696_v17  ;;  %v3084_v6 = vstv %s4799_s19  ;;  %v2988_v17 = vmul.f32 %v2986_v48, %v7543_v38  ;;  %s7934_s19 = sld [smem:[#allocation10 + $0x10f]] }
 0x360   : > { %2893 = vrot.lane.b32.xlu0 %v2889_v58, %s9392_s7  ;;  %3273 = vrot.lane.b32.xlu1 %v3268_v39, %s5085_s25  ;;  %v3085_v58 = vmul.f32 %v3084_v6, %v7572_v20 }
 0x362   : > { %v7701_v57 = vpop.permute.xlu0 %2697  ;;  %v7704_v1 = vpop.permute.xlu1 %2485 }
 0x363   : > { %9866 = vst [vmem:[#allocation208_spill] sm:$0xff] %v7704_v1  ;;  %v3086_v1 = vmul.f32 %v3084_v6, %v7591_v43  ;;  %v3767_v6 = vld [vmem:[%s9870_s26] sm:$0xff] }
 0x364   : > { %2991 = vrot.lane.b32.xlu0 %v2987_v40, %s9392_s7  ;;  %2895 = vrot.lane.b32.xlu1 %v2890_v59, %s9392_s7  ;;  %v3183_v40 = vmul.f32 %v3182_v63, %v7403_v37  ;;  %3769 = vst.msk [vmem:[#allocation4] sm:$0xff] %vm3662_vm3, %v3767_v6 }
 0x366   : > { %v7711_v23 = vpop.permute.xlu0 %2711  ;;  %v7714_v39 = vpop.permute.xlu1 %2699 }
 0x367   : > { %9867 = vst [vmem:[#allocation143_spill] sm:$0xff] %v7711_v23  ;;  %9868 = vst [vmem:[#allocation171_spill] sm:$0xff] %v7714_v39  ;;  %v3280_v39 = vstv %s7707_s27  ;;  %s7955_s27 = sld [smem:[#allocation10 + $0x11d]] }
 0x368   : > { %3089 = vrot.lane.b32.xlu0 %v3085_v58, %s9392_s7  ;;  %2993 = vrot.lane.b32.xlu1 %v2988_v17, %s9392_s7  ;;  %v3281_v17 = vmul.f32 %v3280_v39, %v7487_v35 }
 0x36a   : > { %v7721_v9 = vpop.permute.xlu0 %2725  ;;  %v7724_v59 = vpop.permute.xlu1 %2713 }
 0x36b   : > { %9869 = vst [vmem:[#allocation183_spill] sm:$0xff] %v7721_v9  ;;  %9871 = vst [vmem:[#allocation206_spill] sm:$0xff] %v7724_v59  ;;  %v3184_v9 = vmul.f32 %v3182_v63, %v7420_v33  ;;  %v3364_v59 = vstv %s7717_s29  ;;  %v3282_v63 = vmul.f32 %v3280_v39, %v7506_v12  ;;  %v2902_v39 = vstv %s7739_s22  ;;  %s7966_s29 = sld [smem:[#allocation10 + $0x117]] }
 0x36c   : > { %3187 = vrot.lane.b32.xlu0 %v3183_v40, %s5085_s25  ;;  %3091 = vrot.lane.b32.xlu1 %v3086_v1, %s9392_s7  ;;  %v3365_v40 = vmul.f32 %v3364_v59, %v7524_v51  ;;  %s7999_s22 = sld [smem:[#allocation10 + $0xc0]] }
 0x36e   : > { %v7732_v48 = vpop.permute.xlu0 %2739  ;;  %v7735_v58 = vpop.permute.xlu1 %2727 }
 0x36f   : > { %9872 = vst [vmem:[#allocation125_spill] sm:$0xff] %v7732_v48  ;;  %9873 = vst [vmem:[#allocation180_spill] sm:$0xff] %v7735_v58  ;;  %v3378_v58 = vstv %s7728_s4  ;;  %s7995_s4 = sld [smem:[#allocation10 + $0x11f]] }
 0x370   : > { %3285 = vrot.lane.b32.xlu0 %v3281_v17, %s5085_s25  ;;  %3189 = vrot.lane.b32.xlu1 %v3184_v9, %s5085_s25  ;;  %v3768_v9 = vld [vmem:[%s9870_s26 + $0x8] sm:$0xff]  ;;  %s7979_s26 = sld [smem:[#allocation10 + $0x11e]] }
 0x371   : > { %3770 = vst.msk [vmem:[#allocation4 + $0x8] sm:$0xff] %vm3662_vm3, %v3768_v9  ;;  %v3380_v9 = vmul.f32 %v3378_v58, %v7543_v38 }
 0x372   : > { %v7744_v1 = vpop.permute.xlu0 %2753  ;;  %v7748_v48 = vpop.permute.xlu1 %2741 }
 0x373   : > { %9874 = vst [vmem:[#allocation179_spill] sm:$0xff] %v7744_v1  ;;  %9875 = vst [vmem:[#allocation211_spill] sm:$0xff] %v7748_v48  ;;  %v3379_v1 = vmul.f32 %v3378_v58, %v7524_v51  ;;  %v3366_v48 = vmul.f32 %v3364_v59, %v7543_v38 }
 0x374   : > { %3369 = vrot.lane.b32.xlu0 %v3365_v40, %s5085_s25  ;;  %3287 = vrot.lane.b32.xlu1 %v3282_v63, %s5085_s25  ;;  %v2903_v63 = vmul.f32 %v2902_v39, %v7487_v35 }
 0x376   : > { %v7758_v17 = vpop.permute.xlu0 %2767  ;;  %v7761_v6 = vpop.permute.xlu1 %2755 }
 0x377   : > { %9876 = vst [vmem:[#allocation126_spill] sm:$0xff] %v7758_v17  ;;  %9877 = vst [vmem:[#allocation176_spill] sm:$0xff] %v7761_v6  ;;  %v3000_v17 = vstv %s7752_s18  ;;  %s8008_s18 = sld [smem:[#allocation10 + $0xc1]] }
 0x378   : > { %3383 = vrot.lane.b32.xlu0 %v3379_v1, %s5085_s25  ;;  %3371 = vrot.lane.b32.xlu1 %v3366_v48, %s5085_s25  ;;  %v3001_v1 = vmul.f32 %v3000_v17, %v7524_v51  ;;  %v2904_v48 = vmul.f32 %v2902_v39, %v7506_v12 }
 0x37a   : > { %v7767_v40 = vpop.permute.xlu0 %2781  ;;  %v7770_v23 = vpop.permute.xlu1 %2769 }
 0x37b   : > { %9878 = vst [vmem:[#allocation209_spill] sm:$0xff] %v7767_v40  ;;  %9879 = vst [vmem:[#allocation146_spill] sm:$0xff] %v7770_v23  ;;  %v3098_v40 = vstv %s4800_s17  ;;  %s8021_s17 = sld [smem:[#allocation10 + $0xc8]] }
 0x37c   : > { %2907 = vrot.lane.b32.xlu0 %v2903_v63, %s9392_s7  ;;  %3385 = vrot.lane.b32.xlu1 %v3380_v9, %s5085_s25  ;;  %v3099_v63 = vmul.f32 %v3098_v40, %v7572_v20  ;;  %v3002_v9 = vmul.f32 %v3000_v17, %v7543_v38 }
 0x37e   : > { %v7776_v59 = vpop.permute.xlu0 %2795  ;;  %v7779_v6 = vpop.permute.xlu1 %2783 }
 0x37f   : > { %9880 = vst [vmem:[#allocation181_spill] sm:$0xff] %v7776_v59  ;;  %9881 = vst [vmem:[#allocation151_spill] sm:$0xff] %v7779_v6  ;;  %v3196_v59 = vstv %s4807_s28  ;;  %s8029_s28 = sld [smem:[#allocation10 + $0xc9]] }
 0x380   : > { %3005 = vrot.lane.b32.xlu0 %v3001_v1, %s9392_s7  ;;  %2909 = vrot.lane.b32.xlu1 %v2904_v48, %s9392_s7  ;;  %v3197_v1 = vmul.f32 %v3196_v59, %v7403_v37  ;;  %v3100_v48 = vmul.f32 %v3098_v40, %v7591_v43 }
 0x382   : > { %v7784_v58 = vpop.permute.xlu0 %2809  ;;  %v7787_v23 = vpop.permute.xlu1 %2797 }
 0x383   : > { %9882 = vst [vmem:[#allocation178_spill] sm:$0xff] %v7784_v58  ;;  %9883 = vst [vmem:[#allocation188_spill] sm:$0xff] %v7787_v23  ;;  %v3294_v58 = vstv %s4814_s15  ;;  %s8043_s15 = sld [smem:[#allocation10 + $0xd0]] }
 0x384   : > { %3103 = vrot.lane.b32.xlu0 %v3099_v63, %s9392_s7  ;;  %3007 = vrot.lane.b32.xlu1 %v3002_v9, %s9392_s7  ;;  %v3295_v63 = vmul.f32 %v3294_v58, %v7487_v35  ;;  %v3198_v9 = vmul.f32 %v3196_v59, %v7420_v33 }
 0x386   : > { %v7792_v39 = vpop.permute.xlu0 %2823  ;;  %v7795_v6 = vpop.permute.xlu1 %2811 }
 0x387   : > { %9884 = vst [vmem:[#allocation210_spill] sm:$0xff] %v7792_v39  ;;  %9885 = vst [vmem:[#allocation127_spill] sm:$0xff] %v7795_v6  ;;  %v3392_v39 = vstv %s4821_s24  ;;  %s8052_s24 = sld [smem:[#allocation10 + $0xd1]] }
 0x388   : > { %3201 = vrot.lane.b32.xlu0 %v3197_v1, %s5085_s25  ;;  %3105 = vrot.lane.b32.xlu1 %v3100_v48, %s9392_s7  ;;  %v3393_v1 = vmul.f32 %v3392_v39, %v7524_v51  ;;  %v3296_v48 = vmul.f32 %v3294_v58, %v7506_v12 }
 0x38a   : > { %v7800_v17 = vpop.permute.xlu0 %2837  ;;  %v7803_v23 = vpop.permute.xlu1 %2825 }
 0x38b   : > { %9886 = vst [vmem:[#allocation185_spill] sm:$0xff] %v7800_v17  ;;  %9887 = vst [vmem:[#allocation187_spill] sm:$0xff] %v7803_v23  ;;  %v3476_v17 = vstv %s4827_s0  ;;  %s8067_s0 = sld [smem:[#allocation10 + $0xd8]] }
 0x38c   : > { %3299 = vrot.lane.b32.xlu0 %v3295_v63, %s5085_s25  ;;  %3203 = vrot.lane.b32.xlu1 %v3198_v9, %s5085_s25  ;;  %v3477_v63 = vmul.f32 %v3476_v17, %v7572_v20  ;;  %v3394_v9 = vmul.f32 %v3392_v39, %v7543_v38 }
 0x38e   : > { %v7808_v40 = vpop.permute.xlu0 %2921  ;;  %v7811_v6 = vpop.permute.xlu1 %2839 }
 0x38f   : > { %9888 = vst [vmem:[#allocation128_spill] sm:$0xff] %v7808_v40  ;;  %9889 = vst [vmem:[#allocation182_spill] sm:$0xff] %v7811_v6  ;;  %v3490_v40 = vstv %s4828_s2  ;;  %s8071_s2 = sld [smem:[#allocation10 + $0xd9]] }
 0x390   : > { %3397 = vrot.lane.b32.xlu0 %v3393_v1, %s5085_s25  ;;  %3301 = vrot.lane.b32.xlu1 %v3296_v48, %s5085_s25  ;;  %v3491_v1 = vmul.f32 %v3490_v40, %v7572_v20  ;;  %v3478_v48 = vmul.f32 %v3476_v17, %v7591_v43 }
 0x392   : > { %v7816_v59 = vpop.permute.xlu0 %2935  ;;  %v7819_v23 = vpop.permute.xlu1 %2923 }
 0x393   : > { %9890 = vst [vmem:[#allocation212_spill] sm:$0xff] %v7816_v59  ;;  %9891 = vst [vmem:[#allocation161_spill] sm:$0xff] %v7819_v23  ;;  %v3014_v59 = vstv %s4794_s13  ;;  %s5086_s13 = smov 113  }
 0x394   : > { %3481 = vrot.lane.b32.xlu0 %v3477_v63, %s5085_s25  ;;  %3399 = vrot.lane.b32.xlu1 %v3394_v9, %s5085_s25  ;;  %v3015_v63 = vmul.f32 %v3014_v59, %v7524_v51  ;;  %v3492_v9 = vmul.f32 %v3490_v40, %v7591_v43 }
 0x396   : > { %v7824_v58 = vpop.permute.xlu0 %2851  ;;  %v7827_v6 = vpop.permute.xlu1 %2937 }
 0x397   : > { %9892 = vst [vmem:[#allocation186_spill] sm:$0xff] %v7824_v58  ;;  %9893 = vst [vmem:[#allocation214_spill] sm:$0xff] %v7827_v6  ;;  %v3112_v58 = vstv %s4801_s1  ;;  %s8129_s1 = sld [smem:[#allocation10 + $0xc2]] }
 0x398   : > { %3495 = vrot.lane.b32.xlu0 %v3491_v1, %s5085_s25  ;;  %3483 = vrot.lane.b32.xlu1 %v3478_v48, %s5085_s25  ;;  %v3113_v1 = vmul.f32 %v3112_v58, %v7572_v20  ;;  %v3016_v48 = vmul.f32 %v3014_v59, %v7543_v38 }
 0x39a   : > { %v7832_v39 = vpop.permute.xlu0 %2949  ;;  %v7835_v23 = vpop.permute.xlu1 %2853 }
 0x39b   : > { %9894 = vst [vmem:[#allocation164_spill] sm:$0xff] %v7832_v39  ;;  %9895 = vst [vmem:[#allocation184_spill] sm:$0xff] %v7835_v23  ;;  %v3210_v39 = vstv %s4808_s12  ;;  %s8143_s12 = sld [smem:[#allocation10 + $0xca]] }
 0x39c   : > { %3019 = vrot.lane.b32.xlu0 %v3015_v63, %s9392_s7  ;;  %3497 = vrot.lane.b32.xlu1 %v3492_v9, %s5085_s25  ;;  %v3211_v63 = vmul.f32 %v3210_v39, %v7403_v37  ;;  %v3114_v9 = vmul.f32 %v3112_v58, %v7591_v43 }
 0x39e   : > { %v7840_v17 = vpop.permute.xlu0 %3033  ;;  %v7843_v6 = vpop.permute.xlu1 %2951 }
 0x39f   : > { %9896 = vst [vmem:[#allocation194_spill] sm:$0xff] %v7840_v17  ;;  %9897 = vst [vmem:[#allocation213_spill] sm:$0xff] %v7843_v6  ;;  %v3308_v17 = vstv %s4815_s14  ;;  %s5087_s14 = smov 15  }
 0x3a0   : > { %3117 = vrot.lane.b32.xlu0 %v3113_v1, %s9392_s7  ;;  %3021 = vrot.lane.b32.xlu1 %v3016_v48, %s9392_s7  ;;  %v3309_v1 = vmul.f32 %v3308_v17, %v7487_v35  ;;  %v3212_v48 = vmul.f32 %v3210_v39, %v7420_v33 }
 0x3a2   : > { %v7848_v40 = vpop.permute.xlu0 %3047  ;;  %v7851_v23 = vpop.permute.xlu1 %3035 }
 0x3a3   : > { %9898 = vst [vmem:[#allocation191_spill] sm:$0xff] %v7848_v40  ;;  %9899 = vst [vmem:[#allocation193_spill] sm:$0xff] %v7851_v23  ;;  %v3406_v40 = vstv %s4822_s16  ;;  %s8165_s16 = sld [smem:[#allocation10 + $0xd2]] }
 0x3a4   : > { %3215 = vrot.lane.b32.xlu0 %v3211_v63, %s5085_s25  ;;  %3119 = vrot.lane.b32.xlu1 %v3114_v9, %s9392_s7  ;;  %v3407_v63 = vmul.f32 %v3406_v40, %v7524_v51  ;;  %v3310_v9 = vmul.f32 %v3308_v17, %v7506_v12 }
 0x3a6   : > { %v7856_v59 = vpop.permute.xlu0 %2865  ;;  %v7859_v6 = vpop.permute.xlu1 %3049 }
 0x3a7   : > { %9900 = vst [vmem:[#allocation130_spill] sm:$0xff] %v7856_v59  ;;  %9901 = vst [vmem:[#allocation189_spill] sm:$0xff] %v7859_v6  ;;  %v3504_v59 = vstv %s4829_s21  ;;  %s8207_s21 = sld [smem:[#allocation10 + $0xda]] }
 0x3a8   : > { %3313 = vrot.lane.b32.xlu0 %v3309_v1, %s5085_s25  ;;  %3217 = vrot.lane.b32.xlu1 %v3212_v48, %s5085_s25  ;;  %v3505_v1 = vmul.f32 %v3504_v59, %v7572_v20  ;;  %v3408_v48 = vmul.f32 %v3406_v40, %v7543_v38 }
 0x3aa   : > { %v7864_v58 = vpop.permute.xlu0 %2963  ;;  %v7867_v23 = vpop.permute.xlu1 %2867 }
 0x3ab   : > { %9902 = vst [vmem:[#allocation192_spill] sm:$0xff] %v7864_v58  ;;  %9903 = vst [vmem:[#allocation177_spill] sm:$0xff] %v7867_v23  ;;  %v3126_v58 = vstv %s4802_s8  ;;  %s8219_s8 = sld [smem:[#allocation10 + $0xc3]] }
 0x3ac   : > { %3411 = vrot.lane.b32.xlu0 %v3407_v63, %s5085_s25  ;;  %3315 = vrot.lane.b32.xlu1 %v3310_v9, %s5085_s25  ;;  %v3127_v63 = vmul.f32 %v3126_v58, %v7572_v20  ;;  %v3506_v9 = vmul.f32 %v3504_v59, %v7591_v43 }
 0x3ae   : > { %v7872_v39 = vpop.permute.xlu0 %3061  ;;  %v7875_v6 = vpop.permute.xlu1 %2965 }
 0x3af   : > { %9904 = vst [vmem:[#allocation190_spill] sm:$0xff] %v7872_v39  ;;  %9905 = vst [vmem:[#allocation200_spill] sm:$0xff] %v7875_v6  ;;  %v3224_v39 = vstv %s4809_s3  ;;  %s8225_s3 = sld [smem:[#allocation10 + $0xcb]] }
 0x3b0   : > { %3509 = vrot.lane.b32.xlu0 %v3505_v1, %s5085_s25  ;;  %3413 = vrot.lane.b32.xlu1 %v3408_v48, %s5085_s25  ;;  %v3225_v1 = vmul.f32 %v3224_v39, %v7403_v37  ;;  %v3128_v48 = vmul.f32 %v3126_v58, %v7591_v43 }
 0x3b2   : > { %v7880_v17 = vpop.permute.xlu0 %3145  ;;  %v7883_v23 = vpop.permute.xlu1 %3063 }
 0x3b3   : > { %9906 = vst [vmem:[#allocation197_spill] sm:$0xff] %v7880_v17  ;;  %9907 = vst [vmem:[#allocation198_spill] sm:$0xff] %v7883_v23  ;;  %v3322_v17 = vstv %s4816_s30  ;;  %s8241_s30 = sld [smem:[#allocation10 + $0xc4]] }
 0x3b4   : > { %3131 = vrot.lane.b32.xlu0 %v3127_v63, %s9392_s7  ;;  %3511 = vrot.lane.b32.xlu1 %v3506_v9, %s5085_s25  ;;  %v3323_v63 = vmul.f32 %v3322_v17, %v7487_v35  ;;  %v3226_v9 = vmul.f32 %v3224_v39, %v7420_v33 }
 0x3b6   : > { %v7888_v40 = vpop.permute.xlu0 %3159  ;;  %v7891_v6 = vpop.permute.xlu1 %3147 }
 0x3b7   : > { %9908 = vst [vmem:[#allocation168_spill] sm:$0xff] %v7888_v40  ;;  %9909 = vst [vmem:[#allocation195_spill] sm:$0xff] %v7891_v6  ;;  %v3420_v40 = vstv %s4823_s23  ;;  %s8251_s23 = sld [smem:[#allocation10 + $0xcc]] }
 0x3b8   : > { %3229 = vrot.lane.b32.xlu0 %v3225_v1, %s5085_s25  ;;  %3133 = vrot.lane.b32.xlu1 %v3128_v48, %s9392_s7  ;;  %v3421_v1 = vmul.f32 %v3420_v40, %v7524_v51  ;;  %v3324_v48 = vmul.f32 %v3322_v17, %v7506_v12 }
 0x3ba   : > { %v7896_v59 = vpop.permute.xlu0 %2879  ;;  %v7899_v23 = vpop.permute.xlu1 %3161 }
 0x3bb   : > { %9910 = vst [vmem:[#allocation215_spill] sm:$0xff] %v7896_v59  ;;  %9911 = vst [vmem:[#allocation199_spill] sm:$0xff] %v7899_v23  ;;  %v3518_v59 = vstv %s4830_s6  ;;  %s8269_s6 = sld [smem:[#allocation10 + $0xc5]] }
 0x3bc   : > { %3327 = vrot.lane.b32.xlu0 %v3323_v63, %s5085_s25  ;;  %3231 = vrot.lane.b32.xlu1 %v3226_v9, %s5085_s25  ;;  %v3519_v63 = vmul.f32 %v3518_v59, %v7572_v20  ;;  %v3422_v9 = vmul.f32 %v3420_v40, %v7543_v38 }
 0x3be   : > { %v7904_v58 = vpop.permute.xlu0 %2977  ;;  %v7907_v6 = vpop.permute.xlu1 %2881 }
 0x3bf   : > { %9912 = vst [vmem:[#allocation141_spill] sm:$0xff] %v7904_v58  ;;  %9913 = vst [vmem:[#allocation196_spill] sm:$0xff] %v7907_v6  ;;  %v3238_v58 = vstv %s4810_s10  ;;  %s8281_s10 = sld [smem:[#allocation10 + $0xcd]] }
 0x3c0   : > { %3425 = vrot.lane.b32.xlu0 %v3421_v1, %s5085_s25  ;;  %3329 = vrot.lane.b32.xlu1 %v3324_v48, %s5085_s25  ;;  %v3239_v1 = vmul.f32 %v3238_v58, %v7403_v37  ;;  %v3520_v48 = vmul.f32 %v3518_v59, %v7591_v43 }
 0x3c2   : > { %v7912_v39 = vpop.permute.xlu0 %3075  ;;  %v7915_v23 = vpop.permute.xlu1 %2979 }
 0x3c3   : > { %9914 = vst [vmem:[#allocation203_spill] sm:$0xff] %v7912_v39  ;;  %9915 = vst [vmem:[#allocation140_spill] sm:$0xff] %v7915_v23  ;;  %v3336_v39 = vstv %s4817_s5  ;;  %s8290_s5 = sld [smem:[#allocation10 + $0xc6]] }
 0x3c4   : > { %3523 = vrot.lane.b32.xlu0 %v3519_v63, %s5085_s25  ;;  %3427 = vrot.lane.b32.xlu1 %v3422_v9, %s5085_s25  ;;  %v3337_v63 = vmul.f32 %v3336_v39, %v7487_v35  ;;  %v3240_v9 = vmul.f32 %v3238_v58, %v7420_v33 }
 0x3c6   : > { %v7920_v17 = vpop.permute.xlu0 %3173  ;;  %v7923_v6 = vpop.permute.xlu1 %3077 }
 0x3c7   : > { %9916 = vst [vmem:[#allocation137_spill] sm:$0xff] %v7920_v17  ;;  %9917 = vst [vmem:[#allocation202_spill] sm:$0xff] %v7923_v6  ;;  %v3434_v17 = vstv %s4824_s9  ;;  %v3532_v6 = vstv %s4831_s11  ;;  %s8301_s9 = sld [smem:[#allocation10 + $0xce]] }
 0x3c8   : > { %3243 = vrot.lane.b32.xlu0 %v3239_v1, %s5085_s25  ;;  %3525 = vrot.lane.b32.xlu1 %v3520_v48, %s5085_s25  ;;  %v3435_v59 = vmul.f32 %v3434_v17, %v7524_v51  ;;  %v3338_v48 = vmul.f32 %v3336_v39, %v7506_v12  ;;  %v3533_v58 = vmul.f32 %v3532_v6, %v7572_v20  ;;  %s8325_s11 = sld [smem:[#allocation10 + $0xd3]] }
 0x3ca   : > { %v7928_v40 = vpop.permute.xlu0 %3257  ;;  %v7931_v23 = vpop.permute.xlu1 %3175 }
 0x3cb   : > { %9918 = vst [vmem:[#allocation201_spill] sm:$0xff] %v7931_v23  ;;  %v3350_v23 = vstv %s7934_s19  ;;  %s8344_s19 = sld [smem:[#allocation10 + $0xc7]] }
 0x3cc   : > { %3341 = vrot.lane.b32.xlu0 %v3337_v63, %s5085_s25  ;;  %3245 = vrot.lane.b32.xlu1 %v3240_v9, %s5085_s25  ;;  %v3436_v9 = vmul.f32 %v3434_v17, %v7543_v38 }
 0x3ce   : > { %v7938_v37 = vpop.permute.xlu0 %3271  ;;  %v7941_v1 = vpop.permute.xlu1 %3259 }
 0x3cf   : > { %9919 = vst [vmem:[#allocation216_spill] sm:$0xff] %v7941_v1  ;;  %v3448_v1 = vstv %s7944_s20  ;;  %s8354_s20 = sld [smem:[#allocation10 + $0xdb]] }
 0x3d0   : > { %3439 = vrot.lane.b32.xlu0 %v3435_v59, %s5085_s25  ;;  %3343 = vrot.lane.b32.xlu1 %v3338_v48, %s5085_s25  ;;  %v3351_v59 = vmul.f32 %v3350_v23, %v7487_v35 }
 0x3d2   : > { %v7948_v33 = vpop.permute.xlu0 %2893  ;;  %v7951_v63 = vpop.permute.xlu1 %3273 }
 0x3d3   : > { %9920 = vst [vmem:[#allocation217_spill] sm:$0xff] %v7948_v33  ;;  %v3534_v33 = vmul.f32 %v3532_v6, %v7591_v43  ;;  %v3546_v6 = vstv %s7955_s27  ;;  %s8364_s27 = sld [smem:[#allocation10 + $0xcf]] }
 0x3d4   : > { %3537 = vrot.lane.b32.xlu0 %v3533_v58, %s5085_s25  ;;  %3441 = vrot.lane.b32.xlu1 %v3436_v9, %s5085_s25  ;;  %v3449_v58 = vmul.f32 %v3448_v1, %v7524_v51  ;;  %v1607_v9 = vadd.f32 %v7095_v4, %v6951_v29  ;;  %v3547_v29 = vmul.f32 %v3546_v6, %v7572_v20 }
 0x3d6   : > { %v7959_v39 = vpop.permute.xlu0 %2991  ;;  %v7962_v48 = vpop.permute.xlu1 %2895 }
 0x3d7   : > { %9921 = vst [vmem:[#allocation218_spill] sm:$0xff] %v7959_v39  ;;  %9922 = vst [vmem:[#allocation219_spill] sm:$0xff] %v7962_v48  ;;  %v3352_v48 = vmul.f32 %v3350_v23, %v7506_v12 }
 0x3d8   : > { %3355 = vrot.lane.b32.xlu0 %v3351_v59, %s5085_s25  ;;  %3539 = vrot.lane.b32.xlu1 %v3534_v33, %s5085_s25  ;;  %v1621_v33 = vadd.f32 %v7121_v41, %v6973_v3  ;;  %v1719_v59 = vadd.f32 %v7192_v13, %v1607_v9  ;;  %v1608_v3 = vadd.f32 %v7125_v42, %v6980_v25 }
 0x3da   : > { %v7970_v17 = vpop.permute.xlu0 %3089  ;;  %v7975_v39 = vpop.permute.xlu1 %2993  ;;  %v1733_v4 = vadd.f32 %v7200_v56, %v1621_v33  ;;  %v1831_v12 = vadd.f32 %v7255_v27, %v1719_v59  ;;  %v1622_v56 = vadd.f32 %v7144_v62, %v7002_v0  ;;  %v1720_v27 = vadd.f32 %v7202_v11, %v1608_v3  ;;  %v8057_v3 = vld [vmem:[#allocation2 + $0x2] sm:$0xff] }
 0x3db   : > { %9923 = vst [vmem:[#allocation220_spill] sm:$0xff] %v7970_v17  ;;  %9924 = vst [vmem:[#allocation221_spill] sm:$0xff] %v7975_v39  ;;  %v3450_v39 = vmul.f32 %v3448_v1, %v7543_v38  ;;  %v3574_v59 = vstv %s7995_s4  ;;  %s8518_s4 = sld [smem:[#allocation10 + $0xd5]] }
 0x3dc   : > { %3453 = vrot.lane.b32.xlu0 %v3449_v58, %s5085_s25  ;;  %3357 = vrot.lane.b32.xlu1 %v3352_v48, %s5085_s25  ;;  %v3462_v58 = vstv %s7966_s29  ;;  %v1845_v41 = vadd.f32 %v7263_v49, %v1733_v4  ;;  %v1943_v13 = vadd.f32 %v7318_v30, %v1831_v12  ;;  %v3548_v30 = vmul.f32 %v3546_v6, %v7591_v43  ;;  %s8391_s29 = sld [smem:[#allocation10 + $0xd4]] }
 0x3dd   : > { %v3463_v25 = vmul.f32 %v3462_v58, %v7524_v51  ;;  %v1734_v9 = vadd.f32 %v7211_v44, %v1622_v56  ;;  %v1832_v0 = vadd.f32 %v7265_v36, %v1720_v27  ;;  %v2544_v56 = vstv %s8021_s17  ;;  %s8584_s17 = sld [smem:[#allocation10 + $0xd7]] }
 0x3de   : > { %v7986_v17 = vpop.permute.xlu0 %3187  ;;  %v7991_v23 = vpop.permute.xlu1 %3091  ;;  %v1957_v42 = vadd.f32 %v7326_v54, %v1845_v41  ;;  %v2055_v48 = vadd.f32 %v7383_v26, %v1943_v13 }
 0x3df   : > { %v1846_v54 = vadd.f32 %v7274_v47, %v1734_v9  ;;  %v1944_v26 = vadd.f32 %v7328_v50, %v1832_v0  ;;  %v3576_v0 = vmul.f32 %v3574_v59, %v7591_v43 }
 0x3e0   : > { %3551 = vrot.lane.b32.xlu0 %v3547_v29, %s5085_s25  ;;  %3455 = vrot.lane.b32.xlu1 %v3450_v39, %s5085_s25  ;;  %v3560_v39 = vstv %s7979_s26  ;;  %v2069_v62 = vadd.f32 %v7392_v19, %v1957_v42  ;;  %v2167_v11 = vadd.f32 %v7462_v24, %v2055_v48  ;;  %v3464_v24 = vmul.f32 %v3462_v58, %v7543_v38  ;;  %s8402_s26 = sld [smem:[#allocation10 + $0xdc]] }
 0x3e1   : > { %v3561_v36 = vmul.f32 %v3560_v39, %v7572_v20  ;;  %v1958_v47 = vadd.f32 %v7337_v45, %v1846_v54  ;;  %v2056_v50 = vadd.f32 %v7394_v8, %v1944_v26  ;;  %v2494_v29 = vstv %s7999_s22  ;;  %s8541_s22 = sld [smem:[#allocation10 + $0xdd]] }
 0x3e2   : > { %v8010_v1 = vpop.permute.xlu0 %3285  ;;  %v8015_v49 = vpop.permute.xlu1 %3189  ;;  %v2181_v6 = vadd.f32 %v7473_v28, %v2069_v62  ;;  %v2279_v33 = vadd.f32 %v7558_v18, %v2167_v11  ;;  %v2500_v58 = vstv %s8008_s18  ;;  %v3575_v8 = vmul.f32 %v3574_v59, %v7572_v20  ;;  %v8085_v62 = vld [vmem:[#allocation2 + $0xa] sm:$0xff]  ;;  %s8566_s18 = sld [smem:[#allocation10 + $0xd6]] }
 0x3e3   : > { %v2070_v18 = vadd.f32 %v7405_v15, %v1958_v47  ;;  %v2168_v12 = vadd.f32 %v7476_v61, %v2056_v50  ;;  %v3562_v15 = vmul.f32 %v3560_v39, %v7591_v43  ;;  %v2496_v11 = vmul.f32 %v8085_v62, %v2494_v29 }
 0x3e4   : > { %3467 = vrot.lane.b32.xlu0 %v3463_v25, %s5085_s25  ;;  %3553 = vrot.lane.b32.xlu1 %v3548_v30, %s5085_s25  ;;  %v2293_v4 = vadd.f32 %v7569_v2, %v2181_v6  ;;  %v2391_v28 = vadd.f32 %v7637_v60, %v2279_v33  ;;  %v2495_v2 = vmul.f32 %v8057_v3, %v2494_v29  ;;  %v2600_v33 = vstv %s8052_s24  ;;  %v8105_v29 = vld [vmem:[#allocation2 + $0x22] sm:$0xff]  ;;  %s10155_s24 = sld [smem:[#allocation21_spill]] }
 0x3e5   : > { %v2182_v61 = vadd.f32 %v7489_v52, %v2070_v18  ;;  %v2280_v13 = vadd.f32 %v7574_v32, %v2168_v12  ;;  %v2501_v25 = vmul.f32 %v8057_v3, %v2500_v58  ;;  %v2550_v32 = vstv %s8029_s28  ;;  %s8590_s28 = sld [smem:[#allocation10 + $0xde]] }
 0x3e6   : > { %v8031_v44 = vpop.permute.xlu0 %3369  ;;  %v8036_v19 = vpop.permute.xlu1 %3287  ;;  %v2405_v60 = vadd.f32 %v7645_v14, %v2293_v4  ;;  %v2497_v27 = vadd.f32 %v2495_v2, %v2391_v28  ;;  %v8074_v14 = vld [vmem:[#allocation4] sm:$0xff]  ;;  %v2545_v30 = vmul.f32 %v2544_v56, %v7487_v35  ;;  %v8092_v35 = vld [vmem:[#allocation2 + $0x1a] sm:$0xff]  ;;  %v2502_v6 = vmul.f32 %v8085_v62, %v2500_v58 }
 0x3e7   : > { %v2294_v42 = vadd.f32 %v7585_v31, %v2182_v61  ;;  %v2392_v52 = vadd.f32 %v7648_v22, %v2280_v13  ;;  %v2594_v31 = vstv %s8043_s15  ;;  %v2551_v26 = vmul.f32 %v8092_v35, %v2550_v32  ;;  %s8617_s15 = sld [smem:[#allocation10 + $0xdf]] }
 0x3e8   : > { %3565 = vrot.lane.b32.xlu0 %v3561_v36, %s5085_s25  ;;  %3469 = vrot.lane.b32.xlu1 %v3464_v24, %s5085_s25  ;;  %v2503_v39 = vadd.f32 %v2501_v25, %v2405_v60  ;;  %v2547_v22 = vadd.f32 %v2545_v30, %v2497_v27  ;;  %v2595_v47 = vmul.f32 %v2594_v31, %v7524_v51  ;;  %v2644_v18 = vstv %s8067_s0  ;;  %s10156_s0 = sld [smem:[#allocation24_spill]] }
 0x3e9   : > { %v2406_v54 = vadd.f32 %v7656_v10, %v2294_v42  ;;  %v2498_v36 = vadd.f32 %v2496_v11, %v2392_v52  ;;  %v8100_v10 = vld [vmem:[#allocation4 + $0x8] sm:$0xff]  ;;  %v2546_v4 = vmul.f32 %v8105_v29, %v2544_v56  ;;  %v1635_v12 = vadd.f32 %v7140_v55, %v6995_v46 }
 0x3ea   : > { %v8054_v45 = vpop.permute.xlu0 %3383  ;;  %v8061_v41 = vpop.permute.xlu1 %3371  ;;  %v2553_v59 = vadd.f32 %v2551_v26, %v2503_v39  ;;  %v2597_v58 = vadd.f32 %v2595_v47, %v2547_v22  ;;  %v2650_v2 = vstv %s8071_s2  ;;  %v2645_v56 = vmul.f32 %v2644_v18, %v7572_v20  ;;  %v9932_v26 = vld [vmem:[#allocation132_spill] sm:$0xff] }
 0x3eb   : > { %v2504_v28 = vadd.f32 %v2502_v6, %v2406_v54  ;;  %v2548_v60 = vadd.f32 %v2546_v4, %v2498_v36  ;;  %v1747_v13 = vadd.f32 %v7209_v21, %v1635_v12  ;;  %v2596_v55 = vmul.f32 %v2594_v31, %v7543_v38  ;;  %v9933_v6 = vld [vmem:[#allocation143_spill] sm:$0xff]  ;;  %v9937_v12 = vld [vmem:[#allocation110_spill] sm:$0xff] }
 0x3ec   : > { %3579 = vrot.lane.b32.xlu0 %v3575_v8, %s5085_s25  ;;  %3567 = vrot.lane.b32.xlu1 %v3562_v15, %s5085_s25  ;;  %v2601_v8 = vmul.f32 %v2600_v33, %v7524_v51  ;;  %v2552_v15 = vmul.f32 %v8105_v29, %v2550_v32  ;;  %v2651_v51 = vmul.f32 %v2650_v2, %v7572_v20  ;;  %v3823_v21 = vrot.slane %v8100_v10, 7  ;;  %v8137_v20 = vld [vmem:[#allocation2 + $0x3a] sm:$0xff] }
 0x3ed   : > { %v1859_v42 = vadd.f32 %v7272_v53, %v1747_v13  ;;  %v2647_v52 = vadd.f32 %v2645_v56, %v2597_v58  ;;  %v3826_v32 = vrot.slane %v8074_v14, 7  ;;  %v1636_v38 = vadd.f32 %v7156_v34, %v7030_v5 }
 0x3ee   : > { %v8079_v48 = vpop.permute.xlu0 %2907  ;;  %v8082_v9 = vpop.permute.xlu1 %3385  ;;  %v2603_v27 = vadd.f32 %v2601_v8, %v2553_v59  ;;  %v2554_v46 = vadd.f32 %v2552_v15, %v2504_v28  ;;  %v2598_v30 = vadd.f32 %v2596_v55, %v2548_v60  ;;  %v2602_v39 = vmul.f32 %v8137_v20, %v2600_v33  ;;  %v9934_v33 = vld [vmem:[#allocation178_spill] sm:$0xff]  ;;  %v9939_v15 = vld [vmem:[#allocation128_spill] sm:$0xff]  ;;  %v9941_v55 = vld [vmem:[#allocation171_spill] sm:$0xff]  ;;  %p10158_p10 = scmp.ne.s32.totalorder %s10156_s0, 0 }
 0x3ef   : > { %9925 = vst [vmem:[#allocation222_spill] sm:$0xff] %v8079_v48  ;;  %v1971_v53 = vadd.f32 %v7335_v16, %v1859_v42  ;;  %v2703_v11 = vadd.f32 %v7701_v57, %v2647_v52  ;;  %v1748_v22 = vadd.f32 %v7220_v7, %v1636_v38  ;;  %v2646_v5 = vmul.f32 %v2644_v18, %v7591_v43  ;;  %v9936_v7 = vld [vmem:[#allocation129_spill] sm:$0xff]  ;;  %v9938_v8 = vld [vmem:[#allocation210_spill] sm:$0xff]  ;;  %v9943_v38 = vld [vmem:[#allocation212_spill] sm:$0xff] }
 0x3f0   : > { %3781 = vrot.lane.b32.xlu0 %v8074_v14, %s5086_s13  ;;  %3581 = vrot.lane.b32.xlu1 %v3576_v0, %s5085_s25  ;;  %s9928_s25 = smov 1   ;;  %v2653_v54 = vadd.f32 %v2651_v51, %v2603_v27  ;;  %v2604_v34 = vadd.f32 %v2602_v39, %v2554_v46  ;;  %v8158_v57 = vsel %vm3825_vm4, %v3823_v21, %v3826_v32  ;;  %v9940_v27 = vld [vmem:[#allocation96_spill] sm:$0xff]  ;;  %v2506_v52 = vstv %s8129_s1  ;;  %v9944_v39 = vld [vmem:[#allocation194_spill] sm:$0xff] }
 0x3f1   : > { %v2083_v36 = vadd.f32 %v9932_v26, %v1971_v53  ;;  %v2815_v59 = vadd.f32 %v9934_v33, %v2703_v11  ;;  %9935 = vst [vmem:[#allocation132_spill] sm:$0xff] %v8158_v57  ;;  %v1860_v47 = vadd.f32 %v9936_v7, %v1748_v22  ;;  %v2648_v4 = vadd.f32 %v2646_v5, %v2598_v30  ;;  %v9945_v11 = vld [vmem:[#allocation106_spill] sm:$0xff]  ;;  %v9947_v26 = vld [vmem:[#allocation127_spill] sm:$0xff] }
 0x3f2   : > { %v8098_v24 = vpop.permute.xlu0 %3005  ;;  %v8103_v50 = vpop.permute.xlu1 %2909  ;;  %v2717_v16 = vadd.f32 %v9933_v6, %v2653_v54  ;;  %v2652_v28 = vmul.f32 %v2650_v2, %v7591_v43  ;;  %v9942_v43 = vld [vmem:[#allocation114_spill] sm:$0xff]  ;;  %v8187_v6 = vsel %vm3825_vm4, %v3826_v32, %v3823_v21  ;;  %v9950_v7 = vld [vmem:[#allocation191_spill] sm:$0xff]  ;;  %v2507_v21 = vmul.f32 %v8057_v3, %v2506_v52  ;;  %v9955_v32 = vld [vmem:[#allocation168_spill] sm:$0xff] }
 0x3f3   : > { %9926 = vst [vmem:[#allocation223_spill] sm:$0xff] %v8098_v24  ;;  %9927 = vst [vmem:[#allocation224_spill] sm:$0xff] %v8103_v50  ;;  %v2195_v58 = vadd.f32 %v9937_v12, %v2083_v36  ;;  %v2927_v13 = vadd.f32 %v9939_v15, %v2815_v59  ;;  %v1972_v46 = vadd.f32 %v9940_v27, %v1860_v47  ;;  %v9946_v22 = vld [vmem:[#allocation206_spill] sm:$0xff]  ;;  %v10009_v50 = vld [vmem:[#allocation84_spill] sm:$0xff] }
 0x3f4   : > { %3787 = vrot.lane.b32.xlu0 %v8074_v14, %s9928_s25  ;;  %3783 = vrot.lane.b32.xlu1 %v8100_v10, %s5086_s13  ;;  %v2829_v60 = vadd.f32 %v9938_v8, %v2717_v16  ;;  %v2704_v51 = vadd.f32 %v9941_v55, %v2648_v4  ;;  %v2654_v42 = vadd.f32 %v2652_v28, %v2604_v34  ;;  %v2556_v16 = vstv %s8143_s12  ;;  %v9949_v33 = vld [vmem:[#allocation162_spill] sm:$0xff]  ;;  %v9951_v4 = vld [vmem:[#allocation197_spill] sm:$0xff]  ;;  %v10041_v24 = vld [vmem:[#allocation148_spill] sm:$0xff] }
 0x3f5   : > { %v2307_v2 = vadd.f32 %v9942_v43, %v2195_v58  ;;  %v3039_v53 = vadd.f32 %v9944_v39, %v2927_v13  ;;  %v2084_v54 = vadd.f32 %v9945_v11, %v1972_v46  ;;  %9948 = vst [vmem:[#allocation143_spill] sm:$0xff] %v8187_v6  ;;  %v9952_v58 = vld [vmem:[#allocation134_spill] sm:$0xff]  ;;  %v9954_v13 = vld [vmem:[#allocation161_spill] sm:$0xff]  ;;  %v2557_v43 = vmul.f32 %v8092_v35, %v2556_v16 }
 0x3f6   : > { %v8118_v61 = vpop.permute.xlu0 %3103  ;;  %v8122_v25 = vpop.permute.xlu1 %3007  ;;  %v2941_v30 = vadd.f32 %v9943_v38, %v2829_v60  ;;  %v2718_v5 = vadd.f32 %v9946_v22, %v2654_v42  ;;  %v2816_v36 = vadd.f32 %v9947_v26, %v2704_v51  ;;  %v9953_v60 = vld [vmem:[#allocation187_spill] sm:$0xff]  ;;  %v9959_v26 = vld [vmem:[#allocation65_spill] sm:$0xff]  ;;  %v10010_v48 = vld [vmem:[#allocation198_spill] sm:$0xff] }
 0x3f7   : > { %9929 = vst [vmem:[#allocation225_spill] sm:$0xff] %v8118_v61  ;;  %9930 = vst [vmem:[#allocation226_spill] sm:$0xff] %v8122_v25  ;;  %v2419_v59 = vadd.f32 %v9949_v33, %v2307_v2  ;;  %v3151_v28 = vadd.f32 %v9951_v4, %v3039_v53  ;;  %v2196_v8 = vadd.f32 %v9952_v58, %v2084_v54  ;;  %v9956_v51 = vld [vmem:[#allocation155_spill] sm:$0xff]  ;;  %v9957_v2 = vld [vmem:[#allocation214_spill] sm:$0xff]  ;;  %v2606_v54 = vstv %s8165_s16  ;;  %s10157_s16 = sld [smem:[#allocation231_spill]] }
 0x3f8   : > { %3802 = vrot.lane.b32.xlu0 %v8074_v14, %s9392_s7  ;;  %3789 = vrot.lane.b32.xlu1 %v8100_v10, %s9928_s25  ;;  %v3053_v47 = vadd.f32 %v9950_v7, %v2941_v30  ;;  %v2830_v15 = vadd.f32 %v9953_v60, %v2718_v5  ;;  %v2928_v27 = vadd.f32 %v9954_v13, %v2816_v36  ;;  %v9958_v30 = vld [vmem:[#allocation193_spill] sm:$0xff]  ;;  %v9960_v36 = vld [vmem:[#allocation74_spill] sm:$0xff]  ;;  %v9961_v7 = vld [vmem:[#allocation123_spill] sm:$0xff]  ;;  %v3880_v60 = vrot.slane %v8100_v10, 1 }
 0x3f9   : > { %v3263_v55 = vadd.f32 %v7928_v40, %v3151_v28  ;;  %v2308_v42 = vadd.f32 %v9956_v51, %v2196_v8  ;;  %v2509_v11 = vadd.f32 %v2507_v21, %v2419_v59  ;;  %v1649_v33 = vadd.f32 %v9960_v36, %v9959_v26  ;;  %v9962_v4 = vld [vmem:[#allocation189_spill] sm:$0xff]  ;;  %v9963_v58 = vld [vmem:[#allocation195_spill] sm:$0xff]  ;;  %v9966_v21 = vld [vmem:[#allocation216_spill] sm:$0xff] }
 0x3fa   : > { %v8140_v0 = vpop.permute.xlu0 %3201  ;;  %v8146_v31 = vpop.permute.xlu1 %3105  ;;  %v3165_v46 = vadd.f32 %v9955_v32, %v3053_v47  ;;  %v2942_v38 = vadd.f32 %v9957_v2, %v2830_v15  ;;  %v3040_v39 = vadd.f32 %v9958_v30, %v2928_v27  ;;  %v3879_v59 = vrot.slane %v8074_v14, 1  ;;  %v9965_v13 = vld [vmem:[#allocation199_spill] sm:$0xff] }
 0x3fb   : > { %9931 = vst [vmem:[#allocation227_spill] sm:$0xff] %v8146_v31  ;;  %v3375_v40 = vadd.f32 %v8031_v44, %v3263_v55  ;;  %v2420_v47 = vadd.f32 %v9961_v7, %v2308_v42  ;;  %v2508_v15 = vmul.f32 %v8085_v62, %v2506_v52  ;;  %v9967_v55 = vld [vmem:[#allocation82_spill] sm:$0xff]  ;;  %v2558_v42 = vmul.f32 %v8105_v29, %v2556_v16 }
 0x3fc   : > { %3808 = vrot.lane.b32.xlu0 %v8074_v14, %s5087_s14  ;;  %3804 = vrot.lane.b32.xlu1 %v8100_v10, %s9392_s7  ;;  %v3277_v22 = vadd.f32 %v7938_v37, %v3165_v46  ;;  %v3054_v28 = vadd.f32 %v9962_v4, %v2942_v38  ;;  %v3152_v8 = vadd.f32 %v9963_v58, %v3040_v39  ;;  %v2656_v26 = vstv %s8207_s21 }
 0x3fd   : > { %v1761_v51 = vadd.f32 %v9967_v55, %v1649_v33  ;;  %v2510_v14 = vadd.f32 %v2508_v15, %v2420_v47  ;;  %v9975_v47 = vld [vmem:[#allocation149_spill] sm:$0xff]  ;;  %v8283_v55 = vld [vmem:[#allocation2 + $0x4a] sm:$0xff] }
 0x3fe   : > { %v8162_v18 = vpop.permute.xlu0 %3299  ;;  %v8169_v56 = vpop.permute.xlu1 %3203  ;;  %v3389_v37 = vadd.f32 %v8054_v45, %v3277_v22  ;;  %v3166_v27 = vadd.f32 %v9965_v13, %v3054_v28  ;;  %v3264_v32 = vadd.f32 %v9966_v21, %v3152_v8  ;;  %v2559_v45 = vadd.f32 %v2557_v43, %v2509_v11  ;;  %v9969_v43 = vld [vmem:[#allocation99_spill] sm:$0xff] }
 0x3ff   : > { %v1873_v16 = vadd.f32 %v9969_v43, %v1761_v51  ;;  %v8258_v22 = vsel %vm3878_vm5, %v3879_v59, %v3880_v60  ;;  %v2560_v13 = vadd.f32 %v2558_v42, %v2510_v14  ;;  %v2657_v51 = vmul.f32 %v8283_v55, %v2656_v26  ;;  %v9979_v42 = vld [vmem:[#allocation92_spill] sm:$0xff]  ;;  %v9982_v43 = vld [vmem:[#allocation111_spill] sm:$0xff] }
 0x400   : > { %3838 = vrot.lane.b32.xlu0 %v8158_v57, %s5086_s13  ;;  %3810 = vrot.lane.b32.xlu1 %v8100_v10, %s5087_s14  ;;  %v8243_v10 = vld [vmem:[#allocation2 + $0x32] sm:$0xff]  ;;  %v3278_v30 = vadd.f32 %v7951_v63, %v3166_v27  ;;  %v3376_v39 = vadd.f32 %v8061_v41, %v3264_v32  ;;  %9970 = vst [vmem:[#allocation110_spill] sm:$0xff] %v8258_v22  ;;  %v2512_v27 = vstv %s8219_s8 }
 0x401   : > { %v2607_v52 = vmul.f32 %v8243_v10, %v2606_v54  ;;  %v9971_v63 = vld [vmem:[#allocation68_spill] sm:$0xff]  ;;  %v9972_v41 = vld [vmem:[#allocation75_spill] sm:$0xff]  ;;  %v1985_v4 = vadd.f32 %v9975_v47, %v1873_v16 }
 0x402   : > { %v8184_v34 = vpop.permute.xlu0 %3397  ;;  %v8193_v12 = vpop.permute.xlu1 %3301  ;;  %v3390_v36 = vadd.f32 %v8082_v9, %v3278_v30  ;;  %v9978_v9 = vld [vmem:[#allocation156_spill] sm:$0xff] }
 0x403   : > { %v2609_v28 = vadd.f32 %v2607_v52, %v2559_v45  ;;  %v2097_v32 = vadd.f32 %v9978_v9, %v1985_v4  ;;  %v2608_v45 = vmul.f32 %v8137_v20, %v2606_v54  ;;  %v2513_v54 = vmul.f32 %v8057_v3, %v2512_v27 }
 0x404   : > { %3844 = vrot.lane.b32.xlu0 %v8158_v57, %s9928_s25  ;;  %3840 = vrot.lane.b32.xlu1 %v8187_v6, %s5086_s13 }
 0x405   : > { %v2209_v16 = vadd.f32 %v9982_v43, %v2097_v32  ;;  %v2524_v43 = vstv %s8269_s6 }
 0x406   : > { %v3482_v53 = vpop.permute.xlu0 %3481  ;;  %v8214_v5 = vpop.permute.xlu1 %3399 }
 0x407   : > { %v8228_v44 = vadd.f32 %v3482_v53, %v3375_v40  ;;  %v1650_v40 = vadd.f32 %v9972_v41, %v9971_v63  ;;  %v9984_v63 = vld [vmem:[#allocation98_spill] sm:$0xff] }
 0x408   : > { %3858 = vrot.lane.b32.xlu0 %v8158_v57, %s9392_s7  ;;  %3846 = vrot.lane.b32.xlu1 %v8187_v6, %s9928_s25 }
 0x409   : > { %9964 = vst [vmem:[#allocation178_spill] sm:$0xff] %v8228_v44  ;;  %v3587_v53 = vand.u32 2147483647, %v8228_v44 }
 0x40a   : > { %v3496_v46 = vpop.permute.xlu0 %3495  ;;  %v3484_v2 = vpop.permute.xlu1 %3483 }
 0x40b   : > { %v8239_v38 = vadd.f32 %v3496_v46, %v3389_v37  ;;  %v8264_v33 = vadd.f32 %v3484_v2, %v3376_v39  ;;  %v9976_v37 = vld [vmem:[#allocation113_spill] sm:$0xff]  ;;  %v2562_v46 = vstv %s8225_s3  ;;  %v8297_v39 = vsel %vm3878_vm5, %v3880_v60, %v3879_v59  ;;  %v9985_v59 = vld [vmem:[#allocation136_spill] sm:$0xff] }
 0x40c   : > { %3864 = vrot.lane.b32.xlu0 %v8158_v57, %s5087_s14  ;;  %3860 = vrot.lane.b32.xlu1 %v8187_v6, %s9392_s7  ;;  %v1762_v15 = vadd.f32 %v9976_v37, %v1650_v40  ;;  %9981 = vst [vmem:[#allocation114_spill] sm:$0xff] %v8297_v39  ;;  %v2518_v40 = vstv %s8241_s30  ;;  %v2321_v60 = vadd.f32 %v9985_v59, %v2209_v16  ;;  %v9986_v37 = vld [vmem:[#allocation183_spill] sm:$0xff]  ;;  %v9990_v16 = vld [vmem:[#allocation185_spill] sm:$0xff]  ;;  %s5088_s30 = smov [#allocation12]  }
 0x40d   : > { %9968 = vst [vmem:[#allocation129_spill] sm:$0xff] %v8239_v38  ;;  %v3589_v11 = vand.u32 2147483647, %v8239_v38  ;;  %9973 = vst [vmem:[#allocation210_spill] sm:$0xff] %v8264_v33  ;;  %v3588_v14 = vand.u32 2147483647, %v8264_v33  ;;  %v2563_v4 = vmul.f32 %v8092_v35, %v2562_v46  ;;  %v8320_v32 = vmul.f32 %v8105_v29, %v2562_v46 }
 0x40e   : > { %v8266_v7 = vpop.permute.xlu0 %3019  ;;  %v3498_v8 = vpop.permute.xlu1 %3497  ;;  %v1874_v2 = vadd.f32 %v9979_v42, %v1762_v15  ;;  %v2580_v33 = vstv %s8301_s9 }
 0x40f   : > { %9974 = vst [vmem:[#allocation128_spill] sm:$0xff] %v8266_v7  ;;  %v8271_v58 = vadd.f32 %v3589_v11, %v3587_v53  ;;  %v8275_v21 = vadd.f32 %v3498_v8, %v3390_v36  ;;  %v2659_v53 = vadd.f32 %v2657_v51, %v2609_v28  ;;  %v2610_v36 = vadd.f32 %v2608_v45, %v2560_v13  ;;  %v9987_v28 = vld [vmem:[#allocation144_spill] sm:$0xff] }
 0x410   : > { %3893 = vrot.lane.b32.xlu0 %v8258_v22, %s5086_s13  ;;  %3866 = vrot.lane.b32.xlu1 %v8187_v6, %s5087_s14  ;;  %v1986_v41 = vadd.f32 %v9984_v63, %v1874_v2  ;;  %v2568_v8 = vstv %s8251_s23  ;;  %v2514_v13 = vmul.f32 %v8085_v62, %v2512_v27  ;;  %v8322_v51 = vld [vmem:[#allocation2 + $0x52] sm:$0xff]  ;;  %s5007_s23 = sshll.u32 %s5088_s30, 4  ;;  %s5008_s23 = int_to_ptr.vmem [resolvable:$false] %s5007_s23 }
 0x411   : > { %9977 = vst [vmem:[#allocation96_spill] sm:$0xff] %v8275_v21  ;;  %v3590_v52 = vand.u32 2147483647, %v8275_v21  ;;  %v2731_v15 = vadd.f32 %v9986_v37, %v2659_v53  ;;  %v2658_v45 = vmul.f32 %v8322_v51, %v2656_v26  ;;  %v9989_v2 = vld [vmem:[#allocation204_spill] sm:$0xff]  ;;  %v9992_v53 = vld [vmem:[#allocation119_spill] sm:$0xff]  ;;  %v8339_v26 = vmul.f32 %v8092_v35, %v2568_v8  ;;  %v9994_v37 = vld [vmem:[#allocation73_spill] sm:$0xff] }
 0x412   : > { %v8294_v30 = vpop.permute.xlu0 %3117  ;;  %v8303_v11 = vpop.permute.xlu1 %3021  ;;  %v2098_v9 = vadd.f32 %v9987_v28, %v1986_v41  ;;  %v8342_v41 = vmul.f32 %v8085_v62, %v2518_v40  ;;  %v8351_v28 = vmul.f32 %v8105_v29, %v2568_v8  ;;  %v9998_v6 = vld [vmem:[#allocation83_spill] sm:$0xff]  ;;  %s5009_s6 = scalar_lea.vmem %s5008_s23, 512 }
 0x413   : > { %9980 = vst [vmem:[#allocation171_spill] sm:$0xff] %v8294_v30  ;;  %9983 = vst [vmem:[#allocation212_spill] sm:$0xff] %v8303_v11  ;;  %v8307_v47 = vadd.f32 %v3590_v52, %v3588_v14  ;;  %v2433_v14 = vadd.f32 %v9989_v2, %v2321_v60  ;;  %v8331_v52 = vmul.f32 %v8057_v3, %v2518_v40  ;;  %v9993_v60 = vld [vmem:[#allocation66_spill] sm:$0xff]  ;;  %v9995_v2 = vld [vmem:[#allocation164_spill] sm:$0xff]  ;;  %v9307_v30 = vstv %s8344_s19 }
 0x414   : > { %3899 = vrot.lane.b32.xlu0 %v8258_v22, %s9928_s25  ;;  %3895 = vrot.lane.b32.xlu1 %v8297_v39, %s5086_s13  ;;  %v2843_v27 = vadd.f32 %v9990_v16, %v2731_v15  ;;  %v2210_v63 = vadd.f32 %v9992_v53, %v2098_v9  ;;  %v2660_v59 = vadd.f32 %v2658_v45, %v2610_v36  ;;  %v2574_v9 = vstv %s8281_s10  ;;  %v9996_v40 = vld [vmem:[#allocation121_spill] sm:$0xff] }
 0x415   : > { %v1663_v15 = vadd.f32 %v9994_v37, %v9993_v60  ;;  %v8361_v45 = vmul.f32 %v8057_v3, %v2524_v43  ;;  %v2530_v53 = vstv %s8290_s5  ;;  %v9997_v60 = vld [vmem:[#allocation180_spill] sm:$0xff]  ;;  %v2515_v21 = vadd.f32 %v2513_v54, %v2433_v14 }
 0x416   : > { %v8327_v42 = vpop.permute.xlu0 %3215  ;;  %v8335_v46 = vpop.permute.xlu1 %3119  ;;  %v2955_v16 = vadd.f32 %v9995_v2, %v2843_v27  ;;  %v2322_v36 = vadd.f32 %v9996_v40, %v2210_v63  ;;  %v2732_v37 = vadd.f32 %v9997_v60, %v2660_v59  ;;  %v9999_v27 = vld [vmem:[#allocation190_spill] sm:$0xff]  ;;  %v10001_v63 = vld [vmem:[#allocation172_spill] sm:$0xff]  ;;  %v8376_v44 = vmul.f32 %v8092_v35, %v2574_v9 }
 0x417   : > { %9988 = vst [vmem:[#allocation194_spill] sm:$0xff] %v8327_v42  ;;  %9991 = vst [vmem:[#allocation106_spill] sm:$0xff] %v8335_v46  ;;  %v1775_v57 = vadd.f32 %v9998_v6, %v1663_v15  ;;  %v8379_v11 = vmul.f32 %v8085_v62, %v2524_v43  ;;  %v10002_v59 = vld [vmem:[#allocation182_spill] sm:$0xff]  ;;  %v8386_v14 = vmul.f32 %v8105_v29, %v2574_v9  ;;  %v10005_v43 = vld [vmem:[#allocation81_spill] sm:$0xff] }
 0x418   : > { %3913 = vrot.lane.b32.xlu0 %v8258_v22, %s9392_s7  ;;  %3901 = vrot.lane.b32.xlu1 %v8297_v39, %s9928_s25  ;;  %v3067_v2 = vadd.f32 %v9999_v27, %v2955_v16  ;;  %v2434_v40 = vadd.f32 %v10001_v63, %v2322_v36  ;;  %v2844_v60 = vadd.f32 %v10002_v59, %v2732_v37  ;;  %v10003_v6 = vld [vmem:[#allocation90_spill] sm:$0xff]  ;;  %v10004_v16 = vld [vmem:[#allocation137_spill] sm:$0xff]  ;;  %v10006_v37 = vld [vmem:[#allocation76_spill] sm:$0xff] }
 0x419   : > { %v1887_v54 = vadd.f32 %v10003_v6, %v1775_v57  ;;  %v8389_v15 = vmul.f32 %v8057_v3, %v2530_v53  ;;  %v1664_v27 = vadd.f32 %v10006_v37, %v10005_v43  ;;  %v8399_v63 = vmul.f32 %v8092_v35, %v2580_v33  ;;  %v10007_v9 = vld [vmem:[#allocation213_spill] sm:$0xff] }
 0x41a   : > { %v8367_v8 = vpop.permute.xlu0 %3313  ;;  %v8372_v38 = vpop.permute.xlu1 %3217  ;;  %v3179_v36 = vadd.f32 %v10004_v16, %v3067_v2  ;;  %v2612_v57 = vstv %s8325_s11  ;;  %v2956_v59 = vadd.f32 %v10007_v9, %v2844_v60  ;;  %v2565_v2 = vadd.f32 %v2563_v4, %v2515_v21  ;;  %v10011_v9 = vld [vmem:[#allocation117_spill] sm:$0xff] }
 0x41b   : > { %10000 = vst [vmem:[#allocation206_spill] sm:$0xff] %v8372_v38  ;;  %v8409_v16 = vmul.f32 %v8085_v62, %v2530_v53  ;;  %v1776_v25 = vadd.f32 %v10009_v50, %v1664_v27  ;;  %v2516_v7 = vadd.f32 %v2514_v13, %v2434_v40  ;;  %v8425_v53 = vmul.f32 %v8105_v29, %v2580_v33  ;;  %v10013_v13 = vld [vmem:[#allocation201_spill] sm:$0xff] }
 0x41c   : > { %3919 = vrot.lane.b32.xlu0 %v8258_v22, %s5087_s14  ;;  %3915 = vrot.lane.b32.xlu1 %v8297_v39, %s9392_s7  ;;  %v10008_v22 = vld [vmem:[#allocation95_spill] sm:$0xff]  ;;  %v3291_v43 = vadd.f32 %v8010_v1, %v3179_v36  ;;  %v3068_v60 = vadd.f32 %v10010_v48, %v2956_v59  ;;  %v10012_v1 = vld [vmem:[#allocation100_spill] sm:$0xff]  ;;  %v10014_v36 = vld [vmem:[#allocation165_spill] sm:$0xff]  ;;  %v8433_v27 = vmul.f32 %v8057_v3, %v9307_v30 }
 0x41d   : > { %v1999_v46 = vadd.f32 %v10008_v22, %v1887_v54  ;;  %v2613_v22 = vmul.f32 %v8243_v10, %v2612_v57  ;;  %v2662_v54 = vstv %s8354_s20  ;;  %v1888_v4 = vadd.f32 %v10012_v1, %v1776_v25  ;;  %v10016_v25 = vld [vmem:[#allocation102_spill] sm:$0xff]  ;;  %v10018_v50 = vld [vmem:[#allocation97_spill] sm:$0xff] }
 0x41e   : > { %v8405_v6 = vpop.permute.xlu0 %3411  ;;  %v8412_v37 = vpop.permute.xlu1 %3315  ;;  %v3403_v21 = vadd.f32 %v8184_v34, %v3291_v43  ;;  %v3180_v40 = vadd.f32 %v10013_v13, %v3068_v60  ;;  %v2663_v60 = vmul.f32 %v8283_v55, %v2662_v54  ;;  %v10017_v13 = vld [vmem:[#allocation67_spill] sm:$0xff]  ;;  %v2614_v3 = vmul.f32 %v8137_v20, %v2612_v57 }
 0x41f   : > { %v2111_v38 = vadd.f32 %v10011_v9, %v1999_v46  ;;  %v2615_v34 = vadd.f32 %v2613_v22, %v2565_v2  ;;  %v2000_v33 = vadd.f32 %v10016_v25, %v1888_v4  ;;  %v2566_v9 = vadd.f32 %v8320_v32, %v2516_v7  ;;  %v10020_v22 = vld [vmem:[#allocation108_spill] sm:$0xff]  ;;  %v10022_v25 = vld [vmem:[#allocation147_spill] sm:$0xff] }
 0x420   : > { %3921 = vrot.lane.b32.xlu1 %v8297_v39, %s5087_s14  ;;  %v3292_v1 = vadd.f32 %v8036_v19, %v3180_v40  ;;  %v10023_v40 = vld [vmem:[#allocation173_spill] sm:$0xff]  ;;  %v10026_v4 = vld [vmem:[#allocation91_spill] sm:$0xff] }
 0x421   : > { %v2223_v46 = vadd.f32 %v10014_v36, %v2111_v38  ;;  %v1677_v38 = vadd.f32 %v10018_v50, %v10017_v13  ;;  %v10019_v36 = vld [vmem:[#allocation169_spill] sm:$0xff]  ;;  %v2665_v50 = vadd.f32 %v2663_v60, %v2615_v34  ;;  %v10024_v13 = vld [vmem:[#allocation159_spill] sm:$0xff] }
 0x422   : > { %v3510_v48 = vpop.permute.xlu0 %3509  ;;  %v8435_v59 = vpop.permute.xlu1 %3413  ;;  %v3404_v7 = vadd.f32 %v8214_v5, %v3292_v1  ;;  %v10027_v1 = vld [vmem:[#allocation125_spill] sm:$0xff] }
 0x423   : > { %v8437_v43 = vadd.f32 %v3510_v48, %v3403_v21  ;;  %v2335_v39 = vadd.f32 %v10019_v36, %v2223_v46  ;;  %v2112_v21 = vadd.f32 %v10020_v22, %v2000_v33  ;;  %v2618_v48 = vstv %s8391_s29  ;;  %v10030_v34 = vld [vmem:[#allocation77_spill] sm:$0xff] }
 0x424   : > { %v1789_v19 = vadd.f32 %v10022_v25, %v1677_v38  ;;  %v2664_v33 = vmul.f32 %v8322_v51, %v2662_v54  ;;  %v2616_v22 = vadd.f32 %v2614_v3, %v2566_v9  ;;  %v2619_v38 = vmul.f32 %v8243_v10, %v2618_v48 }
 0x425   : > { %10015 = vst [vmem:[#allocation127_spill] sm:$0xff] %v8437_v43  ;;  %v3593_v2 = vand.u32 2147483647, %v8437_v43  ;;  %v2447_v30 = vadd.f32 %v10023_v40, %v2335_v39  ;;  %v2224_v36 = vadd.f32 %v10024_v13, %v2112_v21  ;;  %v10028_v25 = vstv %s8402_s26  ;;  %v10035_v40 = vld [vmem:[#allocation116_spill] sm:$0xff]  ;;  %v10036_v13 = vld [vmem:[#allocation186_spill] sm:$0xff] }
 0x426   : > { %v8452_v32 = vpop.permute.xlu0 %3131  ;;  %v3512_v57 = vpop.permute.xlu1 %3511  ;;  %v1901_v5 = vadd.f32 %v10026_v4, %v1789_v19  ;;  %v8469_v39 = vmul.f32 %v8283_v55, %v10028_v25  ;;  %v8475_v54 = vmul.f32 %v8137_v20, %v2618_v48  ;;  %v10033_v4 = vld [vmem:[#allocation145_spill] sm:$0xff] }
 0x427   : > { %10021 = vst [vmem:[#allocation162_spill] sm:$0xff] %v8452_v32  ;;  %v8457_v46 = vadd.f32 %v3593_v2, %v8271_v58  ;;  %v8461_v43 = vadd.f32 %v3512_v57, %v3404_v7  ;;  %v2745_v32 = vadd.f32 %v10027_v1, %v2665_v50  ;;  %v10029_v58 = vld [vmem:[#allocation70_spill] sm:$0xff]  ;;  %v10031_v2 = vld [vmem:[#allocation167_spill] sm:$0xff]  ;;  %v2521_v57 = vadd.f32 %v8331_v52, %v2447_v30  ;;  %v10045_v52 = vld [vmem:[#allocation192_spill] sm:$0xff] }
 0x428   : > { %v1678_v60 = vadd.f32 %v10030_v34, %v10029_v58  ;;  %v2336_v21 = vadd.f32 %v10031_v2, %v2224_v36  ;;  %v10034_v7 = vld [vmem:[#allocation78_spill] sm:$0xff]  ;;  %v2013_v50 = vadd.f32 %v10035_v40, %v1901_v5  ;;  %v10038_v58 = vld [vmem:[#allocation85_spill] sm:$0xff]  ;;  %v10039_v34 = vld [vmem:[#allocation124_spill] sm:$0xff]  ;;  %v2666_v2 = vadd.f32 %v2664_v33, %v2616_v22 }
 0x429   : > { %10025 = vst [vmem:[#allocation191_spill] sm:$0xff] %v8461_v43  ;;  %v3594_v9 = vand.u32 2147483647, %v8461_v43  ;;  %v1691_v19 = vadd.f32 %v10034_v7, %v10033_v4  ;;  %v2857_v1 = vadd.f32 %v10036_v13, %v2745_v32  ;;  %v10042_v4 = vld [vmem:[#allocation69_spill] sm:$0xff]  ;;  %v10043_v7 = vld [vmem:[#allocation79_spill] sm:$0xff] }
 0x42a   : > { %v8478_v3 = vpop.permute.xlu0 %3229  ;;  %v8485_v25 = vpop.permute.xlu1 %3133  ;;  %v1790_v36 = vadd.f32 %v10038_v58, %v1678_v60  ;;  %v2448_v48 = vadd.f32 %v10039_v34, %v2336_v21  ;;  %v1705_v5 = vadd.f32 %v10043_v7, %v10042_v4  ;;  %v10044_v40 = vld [vmem:[#allocation153_spill] sm:$0xff]  ;;  %v10046_v13 = vld [vmem:[#allocation71_spill] sm:$0xff]  ;;  %v10048_v60 = vld [vmem:[#allocation86_spill] sm:$0xff]  ;;  %v2571_v4 = vadd.f32 %v8339_v26, %v2521_v57 }
 0x42b   : > { %10032 = vst [vmem:[#allocation197_spill] sm:$0xff] %v8478_v3  ;;  %10037 = vst [vmem:[#allocation134_spill] sm:$0xff] %v8485_v25  ;;  %v8490_v43 = vadd.f32 %v3594_v9, %v8307_v47  ;;  %v10040_v3 = vld [vmem:[#allocation72_spill] sm:$0xff]  ;;  %v2125_v30 = vadd.f32 %v10044_v40, %v2013_v50  ;;  %v2969_v32 = vadd.f32 %v10045_v52, %v2857_v1  ;;  %v10049_v21 = vld [vmem:[#allocation94_spill] sm:$0xff] }
 0x42c   : > { %v1692_v31 = vadd.f32 %v10041_v24, %v10040_v3  ;;  %v10047_v25 = vld [vmem:[#allocation80_spill] sm:$0xff]  ;;  %v1803_v58 = vadd.f32 %v10048_v60, %v1691_v19  ;;  %v1902_v33 = vadd.f32 %v10049_v21, %v1790_v36  ;;  %v10050_v22 = vld [vmem:[#allocation211_spill] sm:$0xff]  ;;  %v10052_v3 = vld [vmem:[#allocation157_spill] sm:$0xff]  ;;  %v2522_v36 = vadd.f32 %v8342_v41, %v2448_v48 }
 0x42d   : > { %v1706_v42 = vadd.f32 %v10047_v25, %v10046_v13  ;;  %v2746_v47 = vadd.f32 %v10050_v22, %v2666_v2  ;;  %v10051_v34 = vld [vmem:[#allocation87_spill] sm:$0xff]  ;;  %v2237_v61 = vadd.f32 %v10052_v3, %v2125_v30  ;;  %v10054_v40 = vld [vmem:[#allocation88_spill] sm:$0xff]  ;;  %v10057_v60 = vld [vmem:[#allocation89_spill] sm:$0xff] }
 0x42e   : > { %v8503_v9 = vpop.permute.xlu0 %3327  ;;  %v1817_v24 = vadd.f32 %v10051_v34, %v1705_v5  ;;  %v10053_v50 = vld [vmem:[#allocation203_spill] sm:$0xff]  ;;  %v8509_v1 = vpop.permute.xlu1 %3231  ;;  %v1804_v25 = vadd.f32 %v10054_v40, %v1692_v31  ;;  %v10056_v13 = vld [vmem:[#allocation184_spill] sm:$0xff]  ;;  %v10058_v22 = vld [vmem:[#allocation150_spill] sm:$0xff] }
 0x42f   : > { %v3081_v7 = vadd.f32 %v10053_v50, %v2969_v32  ;;  %v10055_v52 = vld [vmem:[#allocation131_spill] sm:$0xff]  ;;  %v2858_v2 = vadd.f32 %v10056_v13, %v2746_v47  ;;  %v1818_v21 = vadd.f32 %v10057_v60, %v1706_v42  ;;  %v1915_v5 = vadd.f32 %v10058_v22, %v1803_v58  ;;  %v10061_v3 = vld [vmem:[#allocation93_spill] sm:$0xff]  ;;  %v10063_v41 = vld [vmem:[#allocation200_spill] sm:$0xff] }
 0x430   : > { %v2014_v19 = vadd.f32 %v10055_v52, %v1902_v33  ;;  %v10059_v34 = vld [vmem:[#allocation163_spill] sm:$0xff]  ;;  %v1929_v31 = vadd.f32 %v10061_v3, %v1817_v24  ;;  %v10062_v33 = vld [vmem:[#allocation118_spill] sm:$0xff]  ;;  %v10064_v42 = vld [vmem:[#allocation101_spill] sm:$0xff]  ;;  %v2572_v24 = vadd.f32 %v8351_v28, %v2522_v36 }
 0x431   : > { %v2349_v30 = vadd.f32 %v10059_v34, %v2237_v61  ;;  %v3193_v26 = vadd.f32 %v7986_v17, %v3081_v7  ;;  %v10060_v57 = vld [vmem:[#allocation115_spill] sm:$0xff]  ;;  %v2970_v48 = vadd.f32 %v10063_v41, %v2858_v2  ;;  %v2027_v40 = vadd.f32 %v10064_v42, %v1915_v5  ;;  %v10069_v2 = vld [vmem:[#allocation104_spill] sm:$0xff] }
 0x432   : > { %v1916_v32 = vadd.f32 %v10060_v57, %v1804_v25  ;;  %v2126_v50 = vadd.f32 %v10062_v33, %v2014_v19  ;;  %v8525_v47 = vpop.permute.xlu0 %3425  ;;  %v10065_v58 = vld [vmem:[#allocation207_spill] sm:$0xff]  ;;  %v2621_v61 = vadd.f32 %v2619_v38, %v2571_v4  ;;  %v8530_v60 = vpop.permute.xlu1 %3329  ;;  %v10067_v25 = vld [vmem:[#allocation120_spill] sm:$0xff]  ;;  %v10068_v19 = vld [vmem:[#allocation202_spill] sm:$0xff]  ;;  %v2041_v57 = vadd.f32 %v10069_v2, %v1929_v31 }
 0x433   : > { %v2461_v52 = vadd.f32 %v10065_v58, %v2349_v30  ;;  %v3305_v13 = vadd.f32 %v8162_v18, %v3193_v26  ;;  %v10066_v17 = vld [vmem:[#allocation175_spill] sm:$0xff]  ;;  %v3082_v34 = vadd.f32 %v10068_v19, %v2970_v48  ;;  %v10071_v5 = vstv %s8402_s26  ;;  %v10075_v31 = vld [vmem:[#allocation112_spill] sm:$0xff] }
 0x434   : > { %v1930_v7 = vadd.f32 %v10066_v17, %v1818_v21  ;;  %v2238_v22 = vadd.f32 %v10067_v25, %v2126_v50  ;;  %v10070_v3 = vld [vmem:[#allocation107_spill] sm:$0xff]  ;;  %v2670_v30 = vmul.f32 %v8322_v51, %v10071_v5  ;;  %v10073_v21 = vld [vmem:[#allocation105_spill] sm:$0xff]  ;;  %v10074_v50 = vld [vmem:[#allocation160_spill] sm:$0xff] }
 0x435   : > { %v2139_v33 = vadd.f32 %v10070_v3, %v2027_v40  ;;  %v3417_v18 = vadd.f32 %v8405_v6, %v3305_v13  ;;  %v10072_v38 = vld [vmem:[#allocation103_spill] sm:$0xff]  ;;  %v3194_v36 = vadd.f32 %v8015_v49, %v3082_v34  ;;  %v2527_v42 = vadd.f32 %v8361_v45, %v2461_v52  ;;  %v10076_v6 = vld [vmem:[#allocation109_spill] sm:$0xff]  ;;  %v10078_v49 = vld [vmem:[#allocation122_spill] sm:$0xff] }
 0x436   : > { %v2028_v4 = vadd.f32 %v10072_v38, %v1916_v32  ;;  %v2042_v26 = vadd.f32 %v10073_v21, %v1930_v7  ;;  %v2350_v28 = vadd.f32 %v10074_v50, %v2238_v22  ;;  %v3524_v41 = vpop.permute.xlu0 %3523  ;;  %v2671_v40 = vadd.f32 %v8469_v39, %v2621_v61  ;;  %v8551_v58 = vpop.permute.xlu1 %3427  ;;  %v10077_v13 = vld [vmem:[#allocation205_spill] sm:$0xff]  ;;  %v10079_v34 = vld [vmem:[#allocation179_spill] sm:$0xff]  ;;  %v10081_v61 = vld [vmem:[#allocation152_spill] sm:$0xff] }
 0x437   : > { %v2251_v48 = vadd.f32 %v10075_v31, %v2139_v33  ;;  %v8553_v17 = vadd.f32 %v3524_v41, %v3417_v18  ;;  %v2153_v32 = vadd.f32 %v10076_v6, %v2041_v57  ;;  %v2622_v7 = vadd.f32 %v8475_v54, %v2572_v24  ;;  %v10080_v39 = vld [vmem:[#allocation133_spill] sm:$0xff]  ;;  %v10082_v5 = vld [vmem:[#allocation154_spill] sm:$0xff] }
 0x438   : > { %v2462_v25 = vadd.f32 %v10077_v13, %v2350_v28  ;;  %v3306_v22 = vadd.f32 %v8193_v12, %v3194_v36  ;;  %v2759_v2 = vadd.f32 %v10079_v34, %v2671_v40  ;;  %v2624_v3 = vstv %s8518_s4  ;;  %v10083_v18 = vld [vmem:[#allocation170_spill] sm:$0xff] }
 0x439   : > { %v2363_v19 = vadd.f32 %v10078_v49, %v2251_v48  ;;  %v3597_v45 = vand.u32 2147483647, %v8553_v17  ;;  %v2140_v52 = vadd.f32 %v10080_v39, %v2028_v4  ;;  %v2154_v33 = vadd.f32 %v10081_v61, %v2042_v26  ;;  %v10084_v21 = vld [vmem:[#allocation130_spill] sm:$0xff]  ;;  %v10085_v26 = vld [vmem:[#allocation135_spill] sm:$0xff]  ;;  %v10092_v39 = vld [vmem:[#allocation220_spill] sm:$0xff] }
 0x43a   : > { %v2265_v57 = vadd.f32 %v10082_v5, %v2153_v32  ;;  %v3418_v54 = vadd.f32 %v8435_v59, %v3306_v22  ;;  %v8569_v24 = vpop.permute.xlu0 %3243  ;;  %v2577_v12 = vadd.f32 %v8376_v44, %v2527_v42  ;;  %v2871_v50 = vadd.f32 %v10084_v21, %v2759_v2  ;;  %v3526_v4 = vpop.permute.xlu1 %3525  ;;  %v10086_v59 = vld [vmem:[#allocation138_spill] sm:$0xff]  ;;  %v10087_v42 = vld [vmem:[#allocation141_spill] sm:$0xff] }
 0x43b   : > { %v2475_v38 = vadd.f32 %v10083_v18, %v2363_v19  ;;  %v8575_v28 = vadd.f32 %v3597_v45, %v8457_v46  ;;  %v2252_v36 = vadd.f32 %v10085_v26, %v2140_v52  ;;  %v2528_v41 = vadd.f32 %v8379_v11, %v2462_v25  ;;  %v10088_v13 = vld [vmem:[#allocation158_spill] sm:$0xff]  ;;  %v10090_v19 = vld [vmem:[#allocation176_spill] sm:$0xff] }
 0x43c   : > { %v2672_v31 = vadd.f32 %v2670_v30, %v2622_v7  ;;  %v8579_v48 = vadd.f32 %v3526_v4, %v3418_v54  ;;  %v2377_v40 = vadd.f32 %v10086_v59, %v2265_v57  ;;  %v2625_v6 = vmul.f32 %v8243_v10, %v2624_v3  ;;  %v10089_v22 = vld [vmem:[#allocation166_spill] sm:$0xff]  ;;  %v10094_v54 = vld [vmem:[#allocation177_spill] sm:$0xff] }
 0x43d   : > { %v2674_v44 = vstv %s8541_s22  ;;  %v2983_v32 = vadd.f32 %v10087_v42, %v2871_v50  ;;  %v2266_v46 = vadd.f32 %v10088_v13, %v2154_v33  ;;  %v2364_v49 = vadd.f32 %v10089_v22, %v2252_v36  ;;  %v10091_v34 = vld [vmem:[#allocation142_spill] sm:$0xff]  ;;  %v10097_v36 = vld [vmem:[#allocation139_spill] sm:$0xff] }
 0x43e   : > { %v2760_v11 = vadd.f32 %v10090_v19, %v2672_v31  ;;  %v3598_v30 = vand.u32 2147483647, %v8579_v48  ;;  %v8593_v25 = vpop.permute.xlu0 %3341  ;;  %v2533_v7 = vadd.f32 %v8389_v15, %v2475_v38  ;;  %v2489_v2 = vadd.f32 %v10091_v34, %v2377_v40  ;;  %v8598_v61 = vpop.permute.xlu1 %3245  ;;  %v10093_v5 = vld [vmem:[#allocation174_spill] sm:$0xff] }
 0x43f   : > { %v2627_v45 = vadd.f32 %v2625_v6, %v2577_v12  ;;  %v3095_v52 = vadd.f32 %v10092_v39, %v2983_v32  ;;  %v2578_v33 = vadd.f32 %v8386_v14, %v2528_v41  ;;  %v2476_v57 = vadd.f32 %v10093_v5, %v2364_v49  ;;  %v10099_v32 = vld [vmem:[#allocation208_spill] sm:$0xff] }
 0x440   : > { %v2872_v18 = vadd.f32 %v10094_v54, %v2760_v11  ;;  %v8604_v21 = vadd.f32 %v3598_v30, %v8490_v43  ;;  %v10095_v50 = vstv %s8364_s27  ;;  %v10096_v15 = vstv %s8344_s19  ;;  %v10098_v43 = vld [vmem:[#allocation140_spill] sm:$0xff]  ;;  %v10101_v11 = vld [vmem:[#allocation126_spill] sm:$0xff] }
 0x441   : > { %v2587_v4 = vmul.f32 %v8092_v35, %v10095_v50  ;;  %v2538_v38 = vmul.f32 %v8085_v62, %v10096_v15  ;;  %v2675_v12 = vmul.f32 %v8283_v55, %v2674_v44  ;;  %v3207_v26 = vadd.f32 %v8140_v0, %v3095_v52  ;;  %v10104_v15 = vld [vmem:[#allocation146_spill] sm:$0xff] }
 0x442   : > { %v2378_v14 = vadd.f32 %v10097_v36, %v2266_v46  ;;  %v2626_v41 = vmul.f32 %v8137_v20, %v2624_v3  ;;  %v2630_v31 = vstv %s8566_s18  ;;  %v2984_v59 = vadd.f32 %v10098_v43, %v2872_v18  ;;  %v8620_v40 = vpop.permute.xlu0 %3439  ;;  %v8625_v42 = vpop.permute.xlu1 %3343  ;;  %v10105_v43 = vld [vmem:[#allocation225_spill] sm:$0xff] }
 0x443   : > { %v2583_v62 = vadd.f32 %v8399_v63, %v2533_v7  ;;  %v2539_v35 = vadd.f32 %v8433_v27, %v2489_v2  ;;  %v2677_v6 = vadd.f32 %v2675_v12, %v2627_v45  ;;  %v3319_v0 = vadd.f32 %v8367_v8, %v3207_v26 }
 0x444   : > { %v2534_v3 = vadd.f32 %v8409_v16, %v2476_v57  ;;  %v2490_v13 = vadd.f32 %v10099_v32, %v2378_v14  ;;  %v2628_v46 = vadd.f32 %v2626_v41, %v2578_v33  ;;  %v3096_v22 = vadd.f32 %v7991_v23, %v2984_v59  ;;  %v10102_v23 = vld [vmem:[#allocation215_spill] sm:$0xff]  ;;  %v10107_v32 = vld [vmem:[#allocation209_spill] sm:$0xff] }
 0x445   : > { %v10100_v49 = vmov %v10095_v50  ;;  %v2773_v30 = vadd.f32 %v10101_v11, %v2677_v6  ;;  %v2631_v63 = vmul.f32 %v8243_v10, %v2630_v31  ;;  %v3431_v27 = vadd.f32 %v8525_v47, %v3319_v0  ;;  %v10106_v6 = vld [vmem:[#allocation196_spill] sm:$0xff]  ;;  %v10109_v11 = vld [vmem:[#allocation221_spill] sm:$0xff] }
 0x446   : > { %v2588_v19 = vmul.f32 %v8105_v29, %v10100_v49  ;;  %v2676_v8 = vmul.f32 %v8322_v51, %v2674_v44  ;;  %v2680_v7 = vstv %s8590_s28  ;;  %v2636_v34 = vstv %s8584_s17  ;;  %v3538_v2 = vpop.permute.xlu0 %3537  ;;  %v3442_v33 = vpop.permute.xlu1 %3441 }
 0x447   : > { %v3208_v16 = vadd.f32 %v8169_v56, %v3096_v22  ;;  %v2589_v45 = vadd.f32 %v2587_v4, %v2539_v35  ;;  %v2633_v39 = vadd.f32 %v2631_v63, %v2583_v62  ;;  %v2885_v52 = vadd.f32 %v10102_v23, %v2773_v30  ;;  %v10103_v56 = vld [vmem:[#allocation218_spill] sm:$0xff] }
 0x448   : > { %v8641_v29 = vadd.f32 %v3538_v2, %v3431_v27  ;;  %v2584_v5 = vadd.f32 %v8425_v53, %v2534_v3  ;;  %v2540_v57 = vadd.f32 %v2538_v38, %v2490_v13  ;;  %v2678_v54 = vadd.f32 %v2676_v8, %v2628_v46  ;;  %v10108_v46 = vld [vmem:[#allocation194_spill] sm:$0xff]  ;;  %v10110_v27 = vld [vmem:[#allocation217_spill] sm:$0xff] }
 0x449   : > { %v3320_v47 = vadd.f32 %v8412_v37, %v3208_v16  ;;  %v2681_v44 = vmul.f32 %v8283_v55, %v2680_v7  ;;  %v2637_v18 = vmul.f32 %v8243_v10, %v2636_v34  ;;  %v2997_v50 = vadd.f32 %v10103_v56, %v2885_v52 }
 0x44a   : > { %v3601_v4 = vand.u32 2147483647, %v8641_v29  ;;  %v2774_v12 = vadd.f32 %v10104_v15, %v2678_v54  ;;  %v2632_v26 = vmul.f32 %v8137_v20, %v2630_v31  ;;  %v2686_v36 = vstv %s8617_s15  ;;  %v3356_v53 = vpop.permute.xlu0 %3355  ;;  %v3540_v62 = vpop.permute.xlu1 %3539  ;;  %v10114_v54 = vld [vmem:[#allocation151_spill] sm:$0xff] }
 0x44b   : > { %v3432_v14 = vadd.f32 %v8551_v58, %v3320_v47  ;;  %v2683_v38 = vadd.f32 %v2681_v44, %v2633_v39  ;;  %v2639_v41 = vadd.f32 %v2637_v18, %v2589_v45  ;;  %v3109_v37 = vadd.f32 %v10105_v43, %v2997_v50  ;;  %v10115_v18 = vld [vmem:[#allocation206_spill] sm:$0xff]  ;;  %v10117_v15 = vld [vmem:[#allocation171_spill] sm:$0xff] }
 0x44c   : > { %v3603_v59 = vadd.f32 %v3601_v4, %v8575_v28  ;;  %v2590_v10 = vadd.f32 %v2588_v19, %v2540_v57  ;;  %v2634_v35 = vadd.f32 %v2632_v26, %v2584_v5  ;;  %v2886_v0 = vadd.f32 %v10106_v6, %v2774_v12  ;;  %v10116_v50 = vld [vmem:[#allocation222_spill] sm:$0xff] }
 0x44d   : > { %v8656_v3 = vadd.f32 %v3540_v62, %v3432_v14  ;;  %v2787_v13 = vadd.f32 %v10107_v32, %v2683_v38  ;;  %v2687_v31 = vmul.f32 %v8283_v55, %v2686_v36  ;;  %v3221_v58 = vadd.f32 %v10108_v46, %v3109_v37  ;;  %v10111_v55 = vld [vmem:[#allocation227_spill] sm:$0xff]  ;;  %v10120_v62 = vld [vmem:[#allocation197_spill] sm:$0xff]  ;;  %v10122_v6 = vld [vmem:[#allocation226_spill] sm:$0xff] }
 0x44e   : > { %v2682_v22 = vmul.f32 %v8322_v51, %v2680_v7  ;;  %v2638_v49 = vmul.f32 %v8137_v20, %v2636_v34  ;;  %v2998_v30 = vadd.f32 %v10109_v11, %v2886_v0  ;;  %v3454_v19 = vpop.permute.xlu0 %3453  ;;  %v3358_v2 = vpop.permute.xlu1 %3357  ;;  %v10112_v7 = vld [vmem:[#allocation181_spill] sm:$0xff]  ;;  %v10113_v20 = vld [vmem:[#allocation223_spill] sm:$0xff]  ;;  %v2688_v44 = vmul.f32 %v8322_v51, %v2686_v36  ;;  %v10121_v36 = vld [vmem:[#allocation188_spill] sm:$0xff] }
 0x44f   : > { %v3602_v28 = vand.u32 2147483647, %v8656_v3  ;;  %v2689_v63 = vadd.f32 %v2687_v31, %v2639_v41  ;;  %v2899_v8 = vadd.f32 %v10110_v27, %v2787_v13  ;;  %v3333_v16 = vadd.f32 %v8503_v9, %v3221_v58  ;;  %v10118_v38 = vld [vmem:[#allocation219_spill] sm:$0xff]  ;;  %v10123_v31 = vld [vmem:[#allocation162_spill] sm:$0xff]  ;;  %v10124_v11 = vld [vmem:[#allocation224_spill] sm:$0xff] }
 0x450   : > { %v2684_v45 = vadd.f32 %v2682_v22, %v2634_v35  ;;  %v2640_v39 = vadd.f32 %v2638_v49, %v2590_v10  ;;  %v3110_v23 = vadd.f32 %v10111_v55, %v2998_v30  ;;  %v10125_v30 = vld [vmem:[#allocation106_spill] sm:$0xff] }
 0x451   : > { %v3604_v52 = vadd.f32 %v3602_v28, %v8604_v21  ;;  %v2801_v5 = vadd.f32 %v10112_v7, %v2689_v63  ;;  %v3011_v34 = vadd.f32 %v10113_v20, %v2899_v8  ;;  %v3445_v57 = vadd.f32 %v8620_v40, %v3333_v16  ;;  %v10119_v40 = vld [vmem:[#allocation128_spill] sm:$0xff]  ;;  %v10127_v7 = vld [vmem:[#allocation134_spill] sm:$0xff] }
 0x452   : > { %v2788_v47 = vadd.f32 %v10114_v54, %v2684_v45  ;;  %v3222_v56 = vadd.f32 %v10115_v18, %v3110_v23  ;;  %v3552_v9 = vpop.permute.xlu0 %3551  ;;  %v3456_v26 = vpop.permute.xlu1 %3455  ;;  %v2690_v21 = vadd.f32 %v2688_v44, %v2640_v39  ;;  %v10126_v16 = vld [vmem:[#allocation212_spill] sm:$0xff] }
 0x453   : > { %v2913_v4 = vadd.f32 %v10116_v50, %v2801_v5  ;;  %v3123_v12 = vadd.f32 %v10117_v15, %v3011_v34  ;;  %v8677_v14 = vadd.f32 %v3552_v9, %v3445_v57 }
 0x454   : > { %v2900_v41 = vadd.f32 %v10118_v38, %v2788_v47  ;;  %v3334_v43 = vadd.f32 %v8530_v60, %v3222_v56  ;;  %v2802_v35 = vadd.f32 %v10121_v36, %v2690_v21 }
 0x455   : > { %v3025_v37 = vadd.f32 %v10119_v40, %v2913_v4  ;;  %v3235_v10 = vadd.f32 %v10120_v62, %v3123_v12  ;;  %v3605_v51 = vand.u32 2147483647, %v8677_v14 }
 0x456   : > { %v3012_v0 = vadd.f32 %v10122_v6, %v2900_v41  ;;  %v3446_v32 = vadd.f32 %v3442_v33, %v3334_v43  ;;  %v3468_v13 = vpop.permute.xlu0 %3467  ;;  %v3554_v49 = vpop.permute.xlu1 %3553  ;;  %v2914_v60 = vadd.f32 %v10124_v11, %v2802_v35 }
 0x457   : > { %v3137_v46 = vadd.f32 %v10123_v31, %v3025_v37  ;;  %v3347_v58 = vadd.f32 %v8593_v25, %v3235_v10  ;;  %v3607_v22 = vadd.f32 %v3605_v51, %v3603_v59 }
 0x458   : > { %v3124_v28 = vadd.f32 %v10125_v30, %v3012_v0  ;;  %v8690_v63 = vadd.f32 %v3554_v49, %v3446_v32  ;;  %v3026_v45 = vadd.f32 %v10126_v16, %v2914_v60  ;;  %v10132_v60 = vld [vmem:[#allocation178_spill] sm:$0xff] }
 0x459   : > { %v3249_v27 = vadd.f32 %v8569_v24, %v3137_v46  ;;  %v3459_v8 = vadd.f32 %v3454_v19, %v3347_v58 }
 0x45a   : > { %v3236_v33 = vadd.f32 %v8509_v1, %v3124_v28  ;;  %v3606_v39 = vand.u32 2147483647, %v8690_v63  ;;  %v3566_v55 = vpop.permute.xlu0 %3565  ;;  %v3470_v25 = vpop.permute.xlu1 %3469  ;;  %v3138_v5 = vadd.f32 %v10127_v7, %v3026_v45  ;;  %v10133_v28 = vld [vmem:[#allocation129_spill] sm:$0xff] }
 0x45b   : > { %v3361_v23 = vadd.f32 %v3356_v53, %v3249_v27  ;;  %v8696_v59 = vadd.f32 %v3566_v55, %v3459_v8  ;;  %v10134_v8 = vld [vmem:[#allocation127_spill] sm:$0xff] }
 0x45c   : > { %v3348_v20 = vadd.f32 %v8625_v42, %v3236_v33  ;;  %v3608_v34 = vadd.f32 %v3606_v39, %v3604_v52  ;;  %v3250_v19 = vadd.f32 %v8598_v61, %v3138_v5  ;;  %v3657_v42 = vlaneseq }
 0x45d   : > { %v3473_v57 = vadd.f32 %v3468_v13, %v3361_v23  ;;  %v3609_v24 = vand.u32 2147483647, %v8696_v59 }
 0x45e   : > { %v3460_v54 = vadd.f32 %v3456_v26, %v3348_v20  ;;  %v3580_v47 = vpop.permute.xlu0 %3579  ;;  %v3568_v44 = vpop.permute.xlu1 %3567  ;;  %v3362_v56 = vadd.f32 %v3358_v2, %v3250_v19  ;;  %v8712_v2 = vand.u32 127, %v3657_v42  ;;  %v3658_v43 = vshrl.u32 %v3657_v42, 7 }
 0x45f   : > { %v3611_v1 = vadd.f32 %v3609_v24, %v3607_v22  ;;  %v3585_v18 = vadd.f32 %v3580_v47, %v3473_v57 }
 0x460   : > { %v8702_v53 = vadd.f32 %v3568_v44, %v3460_v54  ;;  %v3474_v50 = vadd.f32 %v3470_v25, %v3362_v56  ;;  %v4835_v10 = vadd.s32 4294967295, %v8712_v2  ;;  %v4837_v51 = vadd.s32 4294967295, %v3658_v43 }
 0x461   : > { %v3613_v9 = vand.u32 2147483647, %v3585_v18  ;;  %v3659_v6 = vadd.s32 8, %v3658_v43  ;;  %v8724_v32 = vadd.s32 1, %v8712_v2  ;;  %vm3706_vm11 = vcmp.lt.s32.totalorder %v8712_v2, 16 }
 0x462   : > { %v3610_v4 = vand.u32 2147483647, %v8702_v53  ;;  %v8705_v15 = vpop.permute.xlu0 %3781  ;;  %v3582_v12 = vpop.permute.xlu1 %3581  ;;  %vm3672_vm8 = vcmp.ge.s32.totalorder %v4835_v10, 0  ;;  %vm3697_vm9 = vcmp.ge.s32.totalorder %v4837_v51, 0  ;;  %vm3675_vm10 = vcmp.lt.s32.totalorder %v4835_v10, 16 }
 0x463   : > { %v3615_v52 = vadd.f32 %v3613_v9, %v3611_v1  ;;  %v8707_v38 = vadd.f32 %v3582_v12, %v3474_v50  ;;  %v4840_v31 = vadd.s32 1, %v3659_v6  ;;  %vm3714_vm12 = vmand %vm3697_vm9, %vm3672_vm8  ;;  %vm3687_vm14 = vcmp.lt.s32.totalorder %v8724_v32, 16  ;;  %v10145_v9 = vld [vmem:[#allocation210_spill] sm:$0xff] }
 0x464   : > { %v3612_v21 = vadd.f32 %v3610_v4, %v3608_v34  ;;  %vm8735_vm13 = vmand %vm3672_vm8, %vm3675_vm10  ;;  %v10146_v4 = vld [vmem:[#allocation96_spill] sm:$0xff] }
 0x465   : > { %vm3617_vm6 = vcmp.gt.f32.partialorder %v3615_v52, 0.0  ;;  %v3614_v26 = vand.u32 2147483647, %v8707_v38  ;;  %vm8745_vm15 = vmand %vm3697_vm9, %vm3706_vm11  ;;  %vm3737_vm0 = vcmp.lt.s32.totalorder %v4840_v31, 16 }
 0x466   : > { %v3619_v61 = vsel %vm3617_vm6, %v3615_v52, 1.0  ;;  %v8710_v41 = vpop.permute.xlu0 %3787  ;;  %v8714_v40 = vpop.permute.xlu1 %3783  ;;  %vm8754_vm1 = vmand %vm3714_vm12, %vm3675_vm10  ;;  %v10147_v52 = vld [vmem:[#allocation191_spill] sm:$0xff] }
 0x467   : > { %4925 = vrcp.f32 %v3619_v61  ;;  %v3616_v37 = vadd.f32 %v3614_v26, %v3612_v21  ;;  %vm8772_vm2 = vmand %vm3697_vm9, %vm3687_vm14 }
 0x468   : > { %vm8784_vm6 = vmand %vm3737_vm0, %vm3672_vm8 }
 0x469   : > { %vm3618_vm7 = vcmp.gt.f32.partialorder %v3616_v37, 0.0  ;;  %vm8823_vm8 = vmand %vm8784_vm6, %vm3675_vm10  ;;  %vm3793_vm10 = vcmask 7168  }
 0x46a   : > { %v8716_v62 = vpop.permute.xlu0 %3802  ;;  %v3620_v36 = vsel %vm3618_vm7, %v3616_v37, 1.0  ;;  %v8719_v35 = vpop.permute.xlu1 %3789  ;;  %vm8812_vm7 = vmand %vm3737_vm0, %vm3706_vm11 }
 0x46b   : > { %4927 = vrcp.f32 %v3620_v36  ;;  %vm8837_vm9 = vmand %vm3737_vm0, %vm3687_vm14 }
 0x46e   : > { %v8721_v0 = vpop.permute.xlu0 %3808  ;;  %v8726_v13 = vpop.permute.xlu1 %3804 }
 0x472   : > { %v8731_v46 = vpop.permute.xlu0 %3838  ;;  %v8740_v22 = vpop.permute.xlu1 %3810 }
 0x474   : > { %v4926_v49 = vpop.eup %4925 }
 0x475   : > { %v3625_v30 = vmul.f32 %v4926_v49, %v10132_v60  ;;  %v3627_v27 = vmul.f32 %v4926_v49, %v10133_v28  ;;  %v3629_v16 = vmul.f32 %v4926_v49, %v10134_v8  ;;  %v3631_v45 = vmul.f32 %v4926_v49, %v8553_v17 }
 0x476   : > { %v8759_v39 = vmul.f32 %v4926_v49, %v8641_v29  ;;  %v8762_v55 = vmul.f32 %v4926_v49, %v8677_v14  ;;  %v8765_v23 = vmul.f32 %v4926_v49, %v8696_v59  ;;  %v8767_v25 = vmul.f32 %v4926_v49, %v3585_v18  ;;  %v8776_v7 = vpop.permute.xlu0 %3844  ;;  %v8790_v34 = vpop.permute.xlu1 %3840 }
 0x477   : > { %v3641_v5 = vsub.f32 1.0, %v3625_v30  ;;  %v3678_v29 = vsel %vm8735_vm13, %v3625_v30, 0.0  ;;  %v3690_v14 = vsel %vm3687_vm14, %v3627_v27, 0.0  ;;  %v3709_v20 = vsel %vm8745_vm15, %v3629_v16, 0.0 }
 0x478   : > { %3681 = vst.msk [vmem:[#allocation3 + $0x10] sm:$0xff] %vm3662_vm3, %v3678_v29  ;;  %3693 = vst.msk [vmem:[#allocation3 + $0x20] sm:$0xff] %vm3662_vm3, %v3690_v14  ;;  %v3744_v57 = vsel %vm3706_vm11, %v8762_v55, 0.0  ;;  %v3753_v24 = vsel %vm8735_vm13, %v8765_v23, 0.0  ;;  %v3762_v19 = vsel %vm3687_vm14, %v8767_v25, 0.0  ;;  %v3718_v54 = vsel %vm8754_vm1, %v3631_v45, 0.0  ;;  %v4928_v47 = vpop.eup %4927 }
 0x479   : > { %3712 = vst.msk [vmem:[#allocation3 + $0x30] sm:$0xff] %vm3662_vm3, %v3709_v20  ;;  %v3643_v1 = vsub.f32 %v3641_v5, %v3627_v27  ;;  %3747 = vst.msk [vmem:[#allocation3 + $0x60] sm:$0xff] %vm3662_vm3, %v3744_v57  ;;  %v3727_v18 = vsel %vm8772_vm2, %v8759_v39, 0.0  ;;  %v3626_v50 = vmul.f32 %v4928_v47, %v10145_v9  ;;  %v3628_v42 = vmul.f32 %v4928_v47, %v10146_v4 }
 0x47a   : > { %3756 = vst.msk [vmem:[#allocation3 + $0x70] sm:$0xff] %vm3662_vm3, %v3753_v24  ;;  %3765 = vst.msk [vmem:[#allocation3 + $0x80] sm:$0xff] %vm3662_vm3, %v3762_v19  ;;  %v3630_v12 = vmul.f32 %v4928_v47, %v10147_v52  ;;  %v3632_v21 = vmul.f32 %v4928_v47, %v8579_v48  ;;  %v8832_v61 = vpop.permute.xlu0 %3858  ;;  %v3634_v37 = vmul.f32 %v4928_v47, %v8656_v3  ;;  %v8844_v36 = vpop.permute.xlu1 %3846  ;;  %v4947_v19 = vld [vmem:[#allocation4] sm:$0xff] }
 0x47b   : > { %3721 = vst.msk [vmem:[#allocation3 + $0x40] sm:$0xff] %vm3662_vm3, %v3718_v54  ;;  %3730 = vst.msk [vmem:[#allocation3 + $0x50] sm:$0xff] %vm3662_vm3, %v3727_v18  ;;  %v3645_v26 = vsub.f32 %v3643_v1, %v3629_v16  ;;  %v3636_v10 = vmul.f32 %v4928_v47, %v8690_v63  ;;  %v3638_v51 = vmul.f32 %v4928_v47, %v8702_v53  ;;  %v3642_v6 = vsub.f32 1.0, %v3626_v50 }
 0x47c   : > { %v3640_v48 = vmul.f32 %v4928_v47, %v8707_v38  ;;  %v3679_v49 = vsel %vm8735_vm13, %v3626_v50, 0.0  ;;  %v3691_v31 = vsel %vm3687_vm14, %v3628_v42, 0.0  ;;  %v3710_v3 = vsel %vm3706_vm11, %v3630_v12, 0.0 }
 0x47d   : > { %v3647_v11 = vsub.f32 %v3645_v26, %v3631_v45  ;;  %3682 = vst.msk [vmem:[#allocation3 + $0x18] sm:$0xff] %vm3662_vm3, %v3679_v49  ;;  %3694 = vst.msk [vmem:[#allocation3 + $0x28] sm:$0xff] %vm3662_vm3, %v3691_v31  ;;  %v3719_v63 = vsel %vm8735_vm13, %v3632_v21, 0.0  ;;  %v3728_v53 = vsel %vm3687_vm14, %v3634_v37, 0.0  ;;  %v3644_v38 = vsub.f32 %v3642_v6, %v3628_v42  ;;  %v4948_v26 = vld [vmem:[#allocation4 + $0x8] sm:$0xff] }
 0x47e   : > { %3713 = vst.msk [vmem:[#allocation3 + $0x38] sm:$0xff] %vm3662_vm3, %v3710_v3  ;;  %3722 = vst.msk [vmem:[#allocation3 + $0x48] sm:$0xff] %vm3662_vm3, %v3719_v63  ;;  %v3745_v60 = vsel %vm8812_vm7, %v3636_v10, 0.0  ;;  %v3754_v2 = vsel %vm8823_vm8, %v3638_v51, 0.0  ;;  %v3763_v58 = vsel %vm8837_vm9, %v3640_v48, 0.0  ;;  %v8872_v32 = vpop.permute.xlu1 %3860  ;;  %v3865_v28 = vpop.permute.xlu0 %3864  ;;  %vm3814_vm11 = vcmask 121856  }
 0x47f   : > { %3731 = vst.msk [vmem:[#allocation3 + $0x58] sm:$0xff] %vm3662_vm3, %v3728_v53  ;;  %v3649_v30 = vsub.f32 %v3647_v11, %v8759_v39  ;;  %3748 = vst.msk [vmem:[#allocation3 + $0x68] sm:$0xff] %vm3662_vm3, %v3745_v60  ;;  %v3646_v27 = vsub.f32 %v3644_v38, %v3630_v12  ;;  %v8888_v24 = vld [vmem:[#allocation3 + $0x20] sm:$0xff]  ;;  %v3815_v1 = vsel %vm3814_vm11, %v8716_v62, %v8721_v0  ;;  %v10150_v12 = vld [vmem:[#allocation132_spill] sm:$0xff] }
 0x480   : > { %3757 = vst.msk [vmem:[#allocation3 + $0x78] sm:$0xff] %vm3662_vm3, %v3754_v2  ;;  %3766 = vst.msk [vmem:[#allocation3 + $0x88] sm:$0xff] %vm3662_vm3, %v3763_v58  ;;  %v8895_v44 = vld [vmem:[#allocation3 + $0x30] sm:$0xff]  ;;  %v3817_v50 = vmul.f32 %v3815_v1, %v8888_v24  ;;  %v3850_v4 = vsel %vm3793_vm10, %v8731_v46, %v8776_v7  ;;  %v3795_v62 = vsel %vm3793_vm10, %v8714_v40, %v8719_v35  ;;  %v8927_v49 = vld [vmem:[#allocation3 + $0x60] sm:$0xff] }
 0x481   : > { %v3651_v8 = vsub.f32 %v3649_v30, %v8762_v55  ;;  %v3648_v16 = vsub.f32 %v3646_v27, %v3632_v21  ;;  %v8881_v55 = vld [vmem:[#allocation3 + $0x10] sm:$0xff]  ;;  %v3831_v21 = vmul.f32 %v10150_v12, %v8895_v44  ;;  %v3870_v46 = vsel %vm3814_vm11, %v8832_v61, %v3865_v28  ;;  %v10152_v28 = vld [vmem:[#allocation110_spill] sm:$0xff] }
 0x482   : > { %v3867_v17 = vpop.permute.xlu1 %3866  ;;  %v3894_v39 = vpop.permute.xlu0 %3893  ;;  %v3816_v40 = vsel %vm3814_vm11, %v8726_v13, %v8740_v22  ;;  %v3851_v61 = vsel %vm3793_vm10, %v8790_v34, %v8844_v36  ;;  %v10151_v53 = vld [vmem:[#allocation143_spill] sm:$0xff]  ;;  %v3886_v27 = vmul.f32 %v10152_v28, %v8927_v49 }
 0x483   : > { %v3653_v45 = vsub.f32 %v3651_v8, %v8765_v23  ;;  %v3650_v33 = vsub.f32 %v3648_v16, %v3634_v37  ;;  %v3871_v30 = vsel %vm3814_vm11, %v8872_v32, %v3867_v17  ;;  %v8945_v36 = vld [vmem:[#allocation3 + $0x70] sm:$0xff] }
 0x484   : > { %v8897_v9 = vld [vmem:[#allocation3 + $0x18] sm:$0xff]  ;;  %v8910_v52 = vld [vmem:[#allocation3 + $0x28] sm:$0xff] }
 0x485   : > { %v3655_v5 = vsub.f32 %v3653_v45, %v8767_v25  ;;  %v3652_v29 = vsub.f32 %v3650_v33, %v3636_v10  ;;  %v3794_v25 = vsel %vm3793_vm10, %v8705_v15, %v8710_v41  ;;  %v8900_v41 = vld [vmem:[#allocation3 + $0x40] sm:$0xff]  ;;  %v3797_v37 = vmul.f32 %v3795_v62, %v8897_v9  ;;  %v8916_v10 = vld [vmem:[#allocation3 + $0x50] sm:$0xff]  ;;  %v8929_v3 = vld [vmem:[#allocation3 + $0x48] sm:$0xff] }
 0x486   : > { %v8878_v20 = vpop.permute.xlu1 %3895  ;;  %v3900_v57 = vpop.permute.xlu0 %3899  ;;  %v3796_v47 = vmul.f32 %v3794_v25, %v8881_v55  ;;  %v3852_v7 = vmul.f32 %v3850_v4, %v8900_v41  ;;  %v3818_v6 = vmul.f32 %v3816_v40, %v8910_v52  ;;  %v3872_v13 = vmul.f32 %v3870_v46, %v8916_v10  ;;  %v8938_v58 = vld [vmem:[#allocation3 + $0x58] sm:$0xff] }
 0x487   : > { %3663 = vst.msk [vmem:[#allocation3] sm:$0xff] %vm3662_vm3, %v3655_v5  ;;  %v3654_v14 = vsub.f32 %v3652_v29, %v3638_v51  ;;  %v8924_v51 = vld [vmem:[#allocation3 + $0x38] sm:$0xff]  ;;  %v3905_v60 = vsel %vm3793_vm10, %v3894_v39, %v3900_v57  ;;  %v3853_v34 = vmul.f32 %v3851_v61, %v8929_v3  ;;  %v8949_v5 = vld [vmem:[#allocation3 + $0x68] sm:$0xff]  ;;  %v3873_v29 = vmul.f32 %v3871_v30, %v8938_v58 }
 0x488   : > { %v3832_v38 = vmul.f32 %v10151_v53, %v8924_v51  ;;  %v3907_v33 = vmul.f32 %v3905_v60, %v8945_v36  ;;  %v8964_v4 = vld [vmem:[#allocation3 + $0x88] sm:$0xff] }
 0x489   : > { %v3656_v59 = vsub.f32 %v3654_v14, %v3640_v48  ;;  %v8952_v14 = vld [vmem:[#allocation3 + $0x80] sm:$0xff] }
 0x48a   : > { %v3902_v18 = vpop.permute.xlu1 %3901  ;;  %v3914_v15 = vpop.permute.xlu0 %3913 }
 0x48b   : > { %3664 = vst.msk [vmem:[#allocation3 + $0x8] sm:$0xff] %vm3662_vm3, %v3656_v59  ;;  %v3906_v59 = vsel %vm3793_vm10, %v8878_v20, %v3902_v18 }
 0x48e   : > { %v8883_v23 = vld [vmem:[#allocation3] sm:$0xff]  ;;  %v3916_v31 = vpop.permute.xlu1 %3915  ;;  %v3920_v22 = vpop.permute.xlu0 %3919 }
 0x48f   : > { %v3775_v54 = vmul.f32 %v4947_v19, %v8883_v23  ;;  %v3925_v16 = vsel %vm3814_vm11, %v3914_v15, %v3920_v22  ;;  %v10153_v19 = vld [vmem:[#allocation114_spill] sm:$0xff] }
 0x490   : > { %v3927_v57 = vmul.f32 %v3925_v16, %v8952_v14 }
 0x491   : > { %v3798_v56 = vadd.f32 %v3796_v47, %v3775_v54  ;;  %v3887_v54 = vmul.f32 %v10153_v19, %v8949_v5  ;;  %v8959_v47 = vld [vmem:[#allocation3 + $0x78] sm:$0xff] }
 0x492   : > { %v8905_v42 = vld [vmem:[#allocation3 + $0x8] sm:$0xff]  ;;  %v3922_v32 = vpop.permute.xlu1 %3921  ;;  %v3908_v15 = vmul.f32 %v3906_v59, %v8959_v47 }
 0x493   : > { %v3819_v0 = vadd.f32 %v3817_v50, %v3798_v56  ;;  %v3776_v43 = vmul.f32 %v4948_v26, %v8905_v42  ;;  %v3926_v56 = vsel %vm3814_vm11, %v3916_v31, %v3922_v32 }
 0x494   : > { %v3928_v20 = vmul.f32 %v3926_v56, %v8964_v4 }
 0x495   : > { %v3833_v35 = vadd.f32 %v3831_v21, %v3819_v0  ;;  %v3799_v48 = vadd.f32 %v3797_v37, %v3776_v43 }
 0x497   : > { %v3854_v11 = vadd.f32 %v3852_v7, %v3833_v35  ;;  %v3820_v63 = vadd.f32 %v3818_v6, %v3799_v48 }
 0x499   : > { %v3874_v2 = vadd.f32 %v3872_v13, %v3854_v11  ;;  %v3834_v8 = vadd.f32 %v3832_v38, %v3820_v63 }
 0x49b   : > { %v3888_v45 = vadd.f32 %v3886_v27, %v3874_v2  ;;  %v3855_v39 = vadd.f32 %v3853_v34, %v3834_v8 }
 0x49d   : > { %v3909_v17 = vadd.f32 %v3907_v33, %v3888_v45  ;;  %v3875_v25 = vadd.f32 %v3873_v29, %v3855_v39 }
 0x49f   : > { %v3929_v1 = vadd.f32 %v3927_v57, %v3909_v17  ;;  %v3889_v50 = vadd.f32 %v3887_v54, %v3875_v25 }
 0x4a1   : > { %3931 = vst.msk [vmem:[#allocation4] sm:$0xff] %vm3662_vm3, %v3929_v1  ;;  %v3910_v62 = vadd.f32 %v3908_v15, %v3889_v50 }
 0x4a3   : > { %v3930_v18 = vadd.f32 %v3928_v20, %v3910_v62 }
 0x4a5   : > { %3932 = vst.msk [vmem:[#allocation4 + $0x8] sm:$0xff] %vm3662_vm3, %v3930_v18 }
 0x4a8   : > { %v3933_v0 = vld [vmem:[#allocation4] sm:$0xff] }
 0x4a9   : > { %3943 = vrot.lane.b32.xlu0 %v3933_v0, %s5086_s13  ;;  %v3985_v26 = vrot.slane %v3933_v0, 7  ;;  %v4037_v40 = vrot.slane %v3933_v0, 1  ;;  %v3937_v30 = vmul.f32 %v3933_v0, %v8883_v23 }
 0x4ac   : > { %v3934_v12 = vld [vmem:[#allocation4 + $0x8] sm:$0xff] }
 0x4ad   : > { %3949 = vrot.lane.b32.xlu0 %v3933_v0, %s9928_s25  ;;  %3945 = vrot.lane.b32.xlu1 %v3934_v12, %s5086_s13  ;;  %v3983_v21 = vrot.slane %v3934_v12, 7  ;;  %v4038_v46 = vrot.slane %v3934_v12, 1  ;;  %v3938_v17 = vmul.f32 %v3934_v12, %v8905_v42 }
 0x4af   : > { %v3989_v43 = vsel %vm3825_vm4, %v3983_v21, %v3985_v26  ;;  %v3986_v37 = vsel %vm3825_vm4, %v3985_v26, %v3983_v21  ;;  %v4039_v35 = vsel %vm3878_vm5, %v4037_v40, %v4038_v46  ;;  %v4043_v7 = vsel %vm3878_vm5, %v4038_v46, %v4037_v40 }
 0x4b0   : > { %v3990_v25 = vmul.f32 %v3989_v43, %v8895_v44  ;;  %v4044_v46 = vmul.f32 %v4039_v35, %v8927_v49 }
 0x4b1   : > { %3963 = vrot.lane.b32.xlu0 %v3933_v0, %s9392_s7  ;;  %3951 = vrot.lane.b32.xlu1 %v3934_v12, %s9928_s25 }
 0x4b5   : > { %3969 = vrot.lane.b32.xlu0 %v3933_v0, %s5087_s14  ;;  %3965 = vrot.lane.b32.xlu1 %v3934_v12, %s9392_s7 }
 0x4b9   : > { %3997 = vrot.lane.b32.xlu0 %v3989_v43, %s5086_s13  ;;  %3971 = vrot.lane.b32.xlu1 %v3934_v12, %s5087_s14  ;;  %v3991_v12 = vmul.f32 %v3986_v37, %v8924_v51 }
 0x4bd   : > { %4003 = vrot.lane.b32.xlu0 %v3989_v43, %s9928_s25  ;;  %3999 = vrot.lane.b32.xlu1 %v3986_v37, %s5086_s13 }
 0x4c1   : > { %4017 = vrot.lane.b32.xlu0 %v3989_v43, %s9392_s7  ;;  %4005 = vrot.lane.b32.xlu1 %v3986_v37, %s9928_s25 }
 0x4c5   : > { %4023 = vrot.lane.b32.xlu0 %v3989_v43, %s5087_s14  ;;  %4019 = vrot.lane.b32.xlu1 %v3986_v37, %s9392_s7 }
 0x4c9   : > { %4051 = vrot.lane.b32.xlu0 %v4039_v35, %s5086_s13  ;;  %4025 = vrot.lane.b32.xlu1 %v3986_v37, %s5087_s14 }
 0x4cd   : > { %4057 = vrot.lane.b32.xlu0 %v4039_v35, %s9928_s25  ;;  %4053 = vrot.lane.b32.xlu1 %v4043_v7, %s5086_s13 }
 0x4d1   : > { %4071 = vrot.lane.b32.xlu0 %v4039_v35, %s9392_s7  ;;  %4059 = vrot.lane.b32.xlu1 %v4043_v7, %s9928_s25 }
 0x4d5   : > { %4077 = vrot.lane.b32.xlu0 %v4039_v35, %s5087_s14  ;;  %4073 = vrot.lane.b32.xlu1 %v4043_v7, %s9392_s7 }
 0x4d9   : > { %4079 = vrot.lane.b32.xlu1 %v4043_v7, %s5087_s14 }
 0x51b   : > { %v3944_v48 = vpop.permute.xlu0 %3943 }
 0x51f   : > { %v3950_v6 = vpop.permute.xlu0 %3949  ;;  %v3946_v31 = vpop.permute.xlu1 %3945 }
 0x520   : > { %v3955_v63 = vsel %vm3793_vm10, %v3944_v48, %v3950_v6 }
 0x521   : > { %v3957_v2 = vmul.f32 %v3955_v63, %v8881_v55 }
 0x523   : > { %v3964_v11 = vpop.permute.xlu0 %3963  ;;  %v3952_v61 = vpop.permute.xlu1 %3951  ;;  %v3959_v16 = vadd.f32 %v3957_v2, %v3937_v30 }
 0x524   : > { %v3956_v28 = vsel %vm3793_vm10, %v3946_v31, %v3952_v61 }
 0x525   : > { %v3958_v33 = vmul.f32 %v3956_v28, %v8897_v9 }
 0x527   : > { %v3970_v13 = vpop.permute.xlu0 %3969  ;;  %v3966_v22 = vpop.permute.xlu1 %3965  ;;  %v3960_v54 = vadd.f32 %v3958_v33, %v3938_v17 }
 0x528   : > { %v3975_v38 = vsel %vm3814_vm11, %v3964_v11, %v3970_v13 }
 0x529   : > { %v3977_v27 = vmul.f32 %v3975_v38, %v8888_v24 }
 0x52b   : > { %v3998_v53 = vpop.permute.xlu0 %3997  ;;  %v3972_v60 = vpop.permute.xlu1 %3971  ;;  %v3979_v29 = vadd.f32 %v3977_v27, %v3959_v16 }
 0x52c   : > { %v3976_v45 = vsel %vm3814_vm11, %v3966_v22, %v3972_v60 }
 0x52d   : > { %v3978_v59 = vmul.f32 %v3976_v45, %v8910_v52  ;;  %v3992_v1 = vadd.f32 %v3990_v25, %v3979_v29 }
 0x52f   : > { %v4004_v8 = vpop.permute.xlu0 %4003  ;;  %v4000_v34 = vpop.permute.xlu1 %3999  ;;  %v3980_v15 = vadd.f32 %v3978_v59, %v3960_v54 }
 0x530   : > { %v4009_v39 = vsel %vm3793_vm10, %v3998_v53, %v4004_v8  ;;  %v4045_v53 = vmul.f32 %v4043_v7, %v8949_v5 }
 0x531   : > { %v4011_v19 = vmul.f32 %v4009_v39, %v8900_v41  ;;  %v3993_v40 = vadd.f32 %v3991_v12, %v3980_v15 }
 0x533   : > { %v4018_v32 = vpop.permute.xlu0 %4017  ;;  %v4006_v57 = vpop.permute.xlu1 %4005  ;;  %v4013_v18 = vadd.f32 %v4011_v19, %v3992_v1 }
 0x534   : > { %v4010_v56 = vsel %vm3793_vm10, %v4000_v34, %v4006_v57 }
 0x535   : > { %v4012_v21 = vmul.f32 %v4010_v56, %v8929_v3 }
 0x537   : > { %v4024_v50 = vpop.permute.xlu0 %4023  ;;  %v4020_v20 = vpop.permute.xlu1 %4019  ;;  %v4014_v11 = vadd.f32 %v4012_v21, %v3993_v40 }
 0x538   : > { %v4029_v62 = vsel %vm3814_vm11, %v4018_v32, %v4024_v50 }
 0x539   : > { %v4031_v0 = vmul.f32 %v4029_v62, %v8916_v10 }
 0x53b   : > { %v4033_v26 = vadd.f32 %v4031_v0, %v4013_v18  ;;  %v4052_v43 = vpop.permute.xlu0 %4051  ;;  %v4026_v48 = vpop.permute.xlu1 %4025 }
 0x53c   : > { %v4030_v6 = vsel %vm3814_vm11, %v4020_v20, %v4026_v48 }
 0x53d   : > { %v4046_v31 = vadd.f32 %v4044_v46, %v4033_v26  ;;  %v4032_v61 = vmul.f32 %v4030_v6, %v8938_v58 }
 0x53f   : > { %v4058_v13 = vpop.permute.xlu0 %4057  ;;  %v4034_v22 = vadd.f32 %v4032_v61, %v4014_v11  ;;  %v4054_v63 = vpop.permute.xlu1 %4053 }
 0x540   : > { %v4063_v37 = vsel %vm3793_vm10, %v4052_v43, %v4058_v13 }
 0x541   : > { %v4047_v38 = vadd.f32 %v4045_v53, %v4034_v22  ;;  %v4065_v35 = vmul.f32 %v4063_v37, %v8945_v36 }
 0x543   : > { %v4072_v60 = vpop.permute.xlu0 %4071  ;;  %v4060_v2 = vpop.permute.xlu1 %4059  ;;  %v4067_v34 = vadd.f32 %v4065_v35, %v4046_v31 }
 0x544   : > { %v4064_v30 = vsel %vm3793_vm10, %v4054_v63, %v4060_v2 }
 0x545   : > { %v4066_v45 = vmul.f32 %v4064_v30, %v8959_v47 }
 0x547   : > { %v4078_v28 = vpop.permute.xlu0 %4077  ;;  %v4074_v8 = vpop.permute.xlu1 %4073  ;;  %v4068_v29 = vadd.f32 %v4066_v45, %v4047_v38 }
 0x548   : > { %v4083_v27 = vsel %vm3814_vm11, %v4072_v60, %v4078_v28 }
 0x549   : > { %v4085_v16 = vmul.f32 %v4083_v27, %v8952_v14 }
 0x54b   : > { %v4087_v33 = vadd.f32 %v4085_v16, %v4067_v34  ;;  %v4080_v7 = vpop.permute.xlu1 %4079 }
 0x54c   : > { %v4084_v39 = vsel %vm3814_vm11, %v4074_v8, %v4080_v7 }
 0x54d   : > { %4089 = vst.msk [vmem:[#allocation4] sm:$0xff] %vm3662_vm3, %v4087_v33  ;;  %v4086_v32 = vmul.f32 %v4084_v39, %v8964_v4 }
 0x54f   : > { %v4088_v17 = vadd.f32 %v4086_v32, %v4068_v29 }
 0x551   : > { %4090 = vst.msk [vmem:[#allocation4 + $0x8] sm:$0xff] %vm3662_vm3, %v4088_v17 }
 0x554   : > { %v4091_v59 = vld [vmem:[#allocation4] sm:$0xff] }
 0x555   : > { %4101 = vrot.lane.b32.xlu0 %v4091_v59, %s5086_s13  ;;  %v4143_v19 = vrot.slane %v4091_v59, 7  ;;  %v4195_v50 = vrot.slane %v4091_v59, 1  ;;  %v4095_v11 = vmul.f32 %v4091_v59, %v8883_v23 }
 0x558   : > { %v4092_v57 = vld [vmem:[#allocation4 + $0x8] sm:$0xff] }
 0x559   : > { %4107 = vrot.lane.b32.xlu0 %v4091_v59, %s9928_s25  ;;  %4103 = vrot.lane.b32.xlu1 %v4092_v57, %s5086_s13  ;;  %v4141_v25 = vrot.slane %v4092_v57, 7  ;;  %v4196_v56 = vrot.slane %v4092_v57, 1  ;;  %v4096_v30 = vmul.f32 %v4092_v57, %v8905_v42 }
 0x55b   : > { %v4147_v54 = vsel %vm3825_vm4, %v4141_v25, %v4143_v19  ;;  %v4144_v1 = vsel %vm3825_vm4, %v4143_v19, %v4141_v25  ;;  %v4197_v15 = vsel %vm3878_vm5, %v4195_v50, %v4196_v56  ;;  %v4201_v62 = vsel %vm3878_vm5, %v4196_v56, %v4195_v50 }
 0x55c   : > { %v4148_v8 = vmul.f32 %v4147_v54, %v8895_v44  ;;  %v4202_v56 = vmul.f32 %v4197_v15, %v8927_v49 }
 0x55d   : > { %4121 = vrot.lane.b32.xlu0 %v4091_v59, %s9392_s7  ;;  %4109 = vrot.lane.b32.xlu1 %v4092_v57, %s9928_s25 }
 0x561   : > { %4127 = vrot.lane.b32.xlu0 %v4091_v59, %s5087_s14  ;;  %4123 = vrot.lane.b32.xlu1 %v4092_v57, %s9392_s7 }
 0x565   : > { %4155 = vrot.lane.b32.xlu0 %v4147_v54, %s5086_s13  ;;  %4129 = vrot.lane.b32.xlu1 %v4092_v57, %s5087_s14  ;;  %v4149_v57 = vmul.f32 %v4144_v1, %v8924_v51 }
 0x569   : > { %4161 = vrot.lane.b32.xlu0 %v4147_v54, %s9928_s25  ;;  %4157 = vrot.lane.b32.xlu1 %v4144_v1, %s5086_s13 }
 0x56d   : > { %4175 = vrot.lane.b32.xlu0 %v4147_v54, %s9392_s7  ;;  %4163 = vrot.lane.b32.xlu1 %v4144_v1, %s9928_s25 }
 0x571   : > { %4181 = vrot.lane.b32.xlu0 %v4147_v54, %s5087_s14  ;;  %4177 = vrot.lane.b32.xlu1 %v4144_v1, %s9392_s7 }
 0x575   : > { %4209 = vrot.lane.b32.xlu0 %v4197_v15, %s5086_s13  ;;  %4183 = vrot.lane.b32.xlu1 %v4144_v1, %s5087_s14 }
 0x579   : > { %4215 = vrot.lane.b32.xlu0 %v4197_v15, %s9928_s25  ;;  %4211 = vrot.lane.b32.xlu1 %v4201_v62, %s5086_s13 }
 0x57d   : > { %4229 = vrot.lane.b32.xlu0 %v4197_v15, %s9392_s7  ;;  %4217 = vrot.lane.b32.xlu1 %v4201_v62, %s9928_s25 }
 0x581   : > { %4235 = vrot.lane.b32.xlu0 %v4197_v15, %s5087_s14  ;;  %4231 = vrot.lane.b32.xlu1 %v4201_v62, %s9392_s7 }
 0x585   : > { %4237 = vrot.lane.b32.xlu1 %v4201_v62, %s5087_s14 }
 0x5c7   : > { %v4102_v20 = vpop.permute.xlu0 %4101 }
 0x5cb   : > { %v4108_v18 = vpop.permute.xlu0 %4107  ;;  %v4104_v0 = vpop.permute.xlu1 %4103 }
 0x5cc   : > { %v4113_v46 = vsel %vm3793_vm10, %v4102_v20, %v4108_v18 }
 0x5cd   : > { %v4115_v31 = vmul.f32 %v4113_v46, %v8881_v55 }
 0x5cf   : > { %v4122_v12 = vpop.permute.xlu0 %4121  ;;  %v4110_v21 = vpop.permute.xlu1 %4109  ;;  %v4117_v53 = vadd.f32 %v4115_v31, %v4095_v11 }
 0x5d0   : > { %v4114_v61 = vsel %vm3793_vm10, %v4104_v0, %v4110_v21 }
 0x5d1   : > { %v4116_v38 = vmul.f32 %v4114_v61, %v8897_v9 }
 0x5d3   : > { %v4128_v26 = vpop.permute.xlu0 %4127  ;;  %v4124_v43 = vpop.permute.xlu1 %4123  ;;  %v4118_v16 = vadd.f32 %v4116_v38, %v4096_v30 }
 0x5d4   : > { %v4133_v48 = vsel %vm3814_vm11, %v4122_v12, %v4128_v26 }
 0x5d5   : > { %v4135_v13 = vmul.f32 %v4133_v48, %v8888_v24 }
 0x5d7   : > { %v4156_v40 = vpop.permute.xlu0 %4155  ;;  %v4130_v6 = vpop.permute.xlu1 %4129  ;;  %v4137_v2 = vadd.f32 %v4135_v13, %v4117_v53 }
 0x5d8   : > { %v4134_v37 = vsel %vm3814_vm11, %v4124_v43, %v4130_v6 }
 0x5d9   : > { %v4136_v28 = vmul.f32 %v4134_v37, %v8910_v52  ;;  %v4150_v45 = vadd.f32 %v4148_v8, %v4137_v2 }
 0x5db   : > { %v4162_v22 = vpop.permute.xlu0 %4161  ;;  %v4158_v63 = vpop.permute.xlu1 %4157  ;;  %v4138_v39 = vadd.f32 %v4136_v28, %v4118_v16 }
 0x5dc   : > { %v4167_v60 = vsel %vm3793_vm10, %v4156_v40, %v4162_v22  ;;  %v4203_v40 = vmul.f32 %v4201_v62, %v8949_v5 }
 0x5dd   : > { %v4169_v34 = vmul.f32 %v4167_v60, %v8900_v41  ;;  %v4151_v50 = vadd.f32 %v4149_v57, %v4138_v39 }
 0x5df   : > { %v4176_v35 = vpop.permute.xlu0 %4175  ;;  %v4164_v27 = vpop.permute.xlu1 %4163  ;;  %v4171_v17 = vadd.f32 %v4169_v34, %v4150_v45 }
 0x5e0   : > { %v4168_v33 = vsel %vm3793_vm10, %v4158_v63, %v4164_v27 }
 0x5e1   : > { %v4170_v25 = vmul.f32 %v4168_v33, %v8929_v3 }
 0x5e3   : > { %v4182_v7 = vpop.permute.xlu0 %4181  ;;  %v4178_v32 = vpop.permute.xlu1 %4177  ;;  %v4172_v12 = vadd.f32 %v4170_v25, %v4151_v50 }
 0x5e4   : > { %v4187_v29 = vsel %vm3814_vm11, %v4176_v35, %v4182_v7 }
 0x5e5   : > { %v4189_v59 = vmul.f32 %v4187_v29, %v8916_v10 }
 0x5e7   : > { %v4191_v19 = vadd.f32 %v4189_v59, %v4171_v17  ;;  %v4210_v54 = vpop.permute.xlu0 %4209  ;;  %v4184_v20 = vpop.permute.xlu1 %4183 }
 0x5e8   : > { %v4188_v18 = vsel %vm3814_vm11, %v4178_v32, %v4184_v20 }
 0x5e9   : > { %v4204_v0 = vadd.f32 %v4202_v56, %v4191_v19  ;;  %v4190_v21 = vmul.f32 %v4188_v18, %v8938_v58 }
 0x5eb   : > { %v4216_v26 = vpop.permute.xlu0 %4215  ;;  %v4192_v43 = vadd.f32 %v4190_v21, %v4172_v12  ;;  %v4212_v46 = vpop.permute.xlu1 %4211 }
 0x5ec   : > { %v4221_v1 = vsel %vm3793_vm10, %v4210_v54, %v4216_v26 }
 0x5ed   : > { %v4205_v48 = vadd.f32 %v4203_v40, %v4192_v43  ;;  %v4223_v15 = vmul.f32 %v4221_v1, %v8945_v36 }
 0x5ef   : > { %v4230_v6 = vpop.permute.xlu0 %4229  ;;  %v4218_v31 = vpop.permute.xlu1 %4217  ;;  %v4225_v63 = vadd.f32 %v4223_v15, %v4204_v0 }
 0x5f0   : > { %v4222_v11 = vsel %vm3793_vm10, %v4212_v46, %v4218_v31 }
 0x5f1   : > { %v4224_v37 = vmul.f32 %v4222_v11, %v8959_v47 }
 0x5f3   : > { %v4236_v61 = vpop.permute.xlu0 %4235  ;;  %v4232_v22 = vpop.permute.xlu1 %4231  ;;  %v4226_v2 = vadd.f32 %v4224_v37, %v4205_v48 }
 0x5f4   : > { %v4241_v13 = vsel %vm3814_vm11, %v4230_v6, %v4236_v61 }
 0x5f5   : > { %v4243_v53 = vmul.f32 %v4241_v13, %v8952_v14 }
 0x5f7   : > { %v4245_v38 = vadd.f32 %v4243_v53, %v4225_v63  ;;  %v4238_v62 = vpop.permute.xlu1 %4237 }
 0x5f8   : > { %v4242_v60 = vsel %vm3814_vm11, %v4232_v22, %v4238_v62 }
 0x5f9   : > { %4247 = vst.msk [vmem:[#allocation4] sm:$0xff] %vm3662_vm3, %v4245_v38  ;;  %v4244_v35 = vmul.f32 %v4242_v60, %v8964_v4 }
 0x5fb   : > { %v4246_v30 = vadd.f32 %v4244_v35, %v4226_v2 }
 0x5fd   : > { %4248 = vst.msk [vmem:[#allocation4 + $0x8] sm:$0xff] %vm3662_vm3, %v4246_v30 }
 0x600   : > { %v4249_v28 = vld [vmem:[#allocation4] sm:$0xff] }
 0x601   : > { %4259 = vrot.lane.b32.xlu0 %v4249_v28, %s5086_s13  ;;  %v4301_v34 = vrot.slane %v4249_v28, 7  ;;  %v4353_v7 = vrot.slane %v4249_v28, 1  ;;  %v4253_v12 = vmul.f32 %v4249_v28, %v8883_v23 }
 0x604   : > { %v4250_v27 = vld [vmem:[#allocation4 + $0x8] sm:$0xff] }
 0x605   : > { %4265 = vrot.lane.b32.xlu0 %v4249_v28, %s9928_s25  ;;  %4261 = vrot.lane.b32.xlu1 %v4250_v27, %s5086_s13  ;;  %v4299_v8 = vrot.slane %v4250_v27, 7  ;;  %v4354_v33 = vrot.slane %v4250_v27, 1  ;;  %v4254_v11 = vmul.f32 %v4250_v27, %v8905_v42 }
 0x607   : > { %v4305_v16 = vsel %vm3825_vm4, %v4299_v8, %v4301_v34  ;;  %v4302_v45 = vsel %vm3825_vm4, %v4301_v34, %v4299_v8  ;;  %v4355_v39 = vsel %vm3878_vm5, %v4353_v7, %v4354_v33  ;;  %v4359_v29 = vsel %vm3878_vm5, %v4354_v33, %v4353_v7 }
 0x608   : > { %v4306_v61 = vmul.f32 %v4305_v16, %v8895_v44  ;;  %v4307_v42 = vmul.f32 %v4302_v45, %v8924_v51 }
 0x609   : > { %4279 = vrot.lane.b32.xlu0 %v4249_v28, %s9392_s7  ;;  %4267 = vrot.lane.b32.xlu1 %v4250_v27, %s9928_s25 }
 0x60d   : > { %4285 = vrot.lane.b32.xlu0 %v4249_v28, %s5087_s14  ;;  %4281 = vrot.lane.b32.xlu1 %v4250_v27, %s9392_s7 }
 0x611   : > { %4313 = vrot.lane.b32.xlu0 %v4305_v16, %s5086_s13  ;;  %4287 = vrot.lane.b32.xlu1 %v4250_v27, %s5087_s14 }
 0x615   : > { %4319 = vrot.lane.b32.xlu0 %v4305_v16, %s9928_s25  ;;  %4315 = vrot.lane.b32.xlu1 %v4302_v45, %s5086_s13 }
 0x619   : > { %4333 = vrot.lane.b32.xlu0 %v4305_v16, %s9392_s7  ;;  %4321 = vrot.lane.b32.xlu1 %v4302_v45, %s9928_s25 }
 0x61d   : > { %4339 = vrot.lane.b32.xlu0 %v4305_v16, %s5087_s14  ;;  %4335 = vrot.lane.b32.xlu1 %v4302_v45, %s9392_s7 }
 0x621   : > { %4367 = vrot.lane.b32.xlu0 %v4355_v39, %s5086_s13  ;;  %4341 = vrot.lane.b32.xlu1 %v4302_v45, %s5087_s14 }
 0x625   : > { %4373 = vrot.lane.b32.xlu0 %v4355_v39, %s9928_s25  ;;  %4369 = vrot.lane.b32.xlu1 %v4359_v29, %s5086_s13  ;;  %s4847_s13 = sshll.u32 %s10155_s24, 8 }
 0x626   : > { %s9154_s21 = scalar_lea.hbm %s10157_s16, %s4847_s13 }
 0x629   : > { %4387 = vrot.lane.b32.xlu0 %v4355_v39, %s9392_s7  ;;  %4375 = vrot.lane.b32.xlu1 %v4359_v29, %s9928_s25 }
 0x62d   : > { %4393 = vrot.lane.b32.xlu0 %v4355_v39, %s5087_s14  ;;  %4389 = vrot.lane.b32.xlu1 %v4359_v29, %s9392_s7  ;;  %s10154_s7 = sld [smem:[#allocation26_spill]] }
 0x631   : > { %4395 = vrot.lane.b32.xlu1 %v4359_v29, %s5087_s14 }
 0x633   : > { %s4534_s2 = sshll.u32 %s10154_s7, 4  ;;  %s4412_s8 = scalar_lea.sflag [#allocation7], %s10154_s7 }
 0x634   : > { %s213_s25 = scalar_lea.vmem [#allocation12], %s4534_s2 }
 0x635   : > { %s4425_s1 = sshll.u32 %s213_s25, 4  ;;  %s9156_s1 = int_to_ptr.vmem [resolvable:$true] %s4425_s1 }
 0x636   : > { %s5003_s3 = scalar_lea.vmem %s9156_s1, 256  ;;  %p5010_p4 = scmp.lt.s32.totalorder %s9156_s1, %s5008_s23 }
 0x637   : > { %p5004_p9 = scmp.ne.s32.totalorder %s9156_s1, %s5003_s3  ;;  %p5011_p5 = scmp.lt.s32.totalorder %s5009_s6, %s5003_s3 }
 0x639   : > { %p5005_p2 = pnand %p5004_p9, %p10158_p10  ;;  %p5012_p1 = por %p5011_p5, %p5010_p4 }
 0x63b   : > { %p5006_p0 = pneg %p5005_p2 }
 0x63d   : > { %p5013_p8 = pnand %p5012_p1, %p5006_p0 }
 0x673   : > { %v4260_v32 = vpop.permute.xlu0 %4259 }
 0x677   : > { %v4266_v17 = vpop.permute.xlu0 %4265  ;;  %v4262_v59 = vpop.permute.xlu1 %4261 }
 0x678   : > { %v4271_v56 = vsel %vm3793_vm10, %v4260_v32, %v4266_v17 }
 0x679   : > { %v4273_v0 = vmul.f32 %v4271_v56, %v8881_v55 }
 0x67b   : > { %v4280_v57 = vpop.permute.xlu0 %4279  ;;  %v4268_v25 = vpop.permute.xlu1 %4267  ;;  %v4275_v40 = vadd.f32 %v4273_v0, %v4253_v12 }
 0x67c   : > { %v4272_v21 = vsel %vm3793_vm10, %v4262_v59, %v4268_v25 }
 0x67d   : > { %v4274_v48 = vmul.f32 %v4272_v21, %v8897_v9 }
 0x67f   : > { %v4286_v19 = vpop.permute.xlu0 %4285  ;;  %v4282_v54 = vpop.permute.xlu1 %4281  ;;  %v4276_v13 = vadd.f32 %v4274_v48, %v4254_v11 }
 0x680   : > { %v4291_v20 = vsel %vm3814_vm11, %v4280_v57, %v4286_v19 }
 0x681   : > { %v4293_v26 = vmul.f32 %v4291_v20, %v8888_v24 }
 0x683   : > { %v4314_v50 = vpop.permute.xlu0 %4313  ;;  %v4288_v18 = vpop.permute.xlu1 %4287  ;;  %v4295_v31 = vadd.f32 %v4293_v26, %v4275_v40 }
 0x684   : > { %v4292_v1 = vsel %vm3814_vm11, %v4282_v54, %v4288_v18 }
 0x685   : > { %v4294_v55 = vmul.f32 %v4292_v1, %v8910_v52  ;;  %v4308_v22 = vadd.f32 %v4306_v61, %v4295_v31 }
 0x687   : > { %v4320_v43 = vpop.permute.xlu0 %4319  ;;  %v4316_v46 = vpop.permute.xlu1 %4315  ;;  %v4296_v37 = vadd.f32 %v4294_v55, %v4276_v13 }
 0x688   : > { %v4325_v6 = vsel %vm3793_vm10, %v4314_v50, %v4320_v43 }
 0x689   : > { %v4327_v24 = vmul.f32 %v4325_v6, %v8900_v41  ;;  %v4360_v41 = vmul.f32 %v4355_v39, %v8927_v49  ;;  %v4309_v35 = vadd.f32 %v4307_v42, %v4296_v37 }
 0x68b   : > { %v4334_v15 = vpop.permute.xlu0 %4333  ;;  %v4322_v23 = vpop.permute.xlu1 %4321  ;;  %v4329_v62 = vadd.f32 %v4327_v24, %v4308_v22 }
 0x68c   : > { %v4326_v63 = vsel %vm3793_vm10, %v4316_v46, %v4322_v23 }
 0x68d   : > { %v4328_v52 = vmul.f32 %v4326_v63, %v8929_v3 }
 0x68f   : > { %v4340_v53 = vpop.permute.xlu0 %4339  ;;  %v4336_v38 = vpop.permute.xlu1 %4335  ;;  %v4330_v8 = vadd.f32 %v4328_v52, %v4309_v35 }
 0x690   : > { %v4345_v9 = vsel %vm3814_vm11, %v4334_v15, %v4340_v53 }
 0x691   : > { %v4347_v60 = vmul.f32 %v4345_v9, %v8916_v10  ;;  %v4361_v10 = vmul.f32 %v4359_v29, %v8949_v5 }
 0x693   : > { %v4349_v2 = vadd.f32 %v4347_v60, %v4329_v62  ;;  %v4368_v44 = vpop.permute.xlu0 %4367  ;;  %v4342_v30 = vpop.permute.xlu1 %4341 }
 0x694   : > { %v4346_v28 = vsel %vm3814_vm11, %v4336_v38, %v4342_v30 }
 0x695   : > { %v4362_v27 = vadd.f32 %v4360_v41, %v4349_v2  ;;  %v4348_v34 = vmul.f32 %v4346_v28, %v8938_v58 }
 0x697   : > { %v4374_v16 = vpop.permute.xlu0 %4373  ;;  %v4350_v33 = vadd.f32 %v4348_v34, %v4330_v8  ;;  %v4370_v7 = vpop.permute.xlu1 %4369 }
 0x698   : > { %v4379_v51 = vsel %vm3793_vm10, %v4368_v44, %v4374_v16 }
 0x699   : > { %v4363_v3 = vadd.f32 %v4361_v10, %v4350_v33  ;;  %v4381_v49 = vmul.f32 %v4379_v51, %v8945_v36 }
 0x69b   : > { %v4388_v45 = vpop.permute.xlu0 %4387  ;;  %v4376_v32 = vpop.permute.xlu1 %4375  ;;  %v4383_v57 = vadd.f32 %v4381_v49, %v4362_v27 }
 0x69c   : > { %v4380_v39 = vsel %vm3793_vm10, %v4370_v7, %v4376_v32 }
 0x69d   : > { %v4382_v5 = vmul.f32 %v4380_v39, %v8959_v47 }
 0x69f   : > { %v4394_v17 = vpop.permute.xlu0 %4393  ;;  %v4390_v58 = vpop.permute.xlu1 %4389  ;;  %v4384_v36 = vadd.f32 %v4382_v5, %v4363_v3 }
 0x6a0   : > { %v4399_v59 = vsel %vm3814_vm11, %v4388_v45, %v4394_v17 }
 0x6a1   : > { %v4401_v25 = vmul.f32 %v4399_v59, %v8952_v14 }
 0x6a3   : > { %v4403_v29 = vadd.f32 %v4401_v25, %v4383_v57  ;;  %v4396_v19 = vpop.permute.xlu1 %4395 }
 0x6a4   : > { %v4400_v54 = vsel %vm3814_vm11, %v4390_v58, %v4396_v19 }
 0x6a5   : > { %4405 = vst.msk [vmem:[#allocation4] sm:$0xff] %vm3662_vm3, %v4403_v29  ;;  %v4402_v56 = vmul.f32 %v4400_v54, %v8964_v4 }
 0x6a7   : > { %v4404_v50 = vadd.f32 %v4402_v56, %v4384_v36 }
 0x6a9   : > { %4406 = vst.msk [vmem:[#allocation4 + $0x8] sm:$0xff] %vm3662_vm3, %v4404_v50 }
 0x6ac   : > { %v4407_v20 = vld [vmem:[#allocation4] sm:$0xff] }
 0x6ad   : > { %4409 = vst.msk [vmem:[%s213_s25] sm:$0xff] %vm3662_vm3, %v4407_v20 }
 0x6b0   : > { %v4408_v14 = vld [vmem:[#allocation4 + $0x8] sm:$0xff] }
 0x6b1   : > { %4410 = vst.msk [vmem:[%s213_s25 + $0x8] sm:$0xff] %vm3662_vm3, %v4408_v14 }
 0x6b2   : > { %5016 = shalt.err (!%p5013_p8)
}
 0x6b3   : > { %s5017_s10 = scalar_lea.hbm %s9154_s21, 256  ;;  %s5021_s11 = scalar_lea.hbm %s10157_s16, 512 }
 0x6b4   : > { %p5018_p7 = scmp.ne.s32.totalorder %s9154_s21, %s5017_s10  ;;  %p5022_p12 = scmp.lt.s32.totalorder %s9154_s21, %s10157_s16 }
 0x6b5   : > { %p5023_p13 = scmp.lt.s32.totalorder %s5021_s11, %s5017_s10 }
 0x6b6   : > { %p5019_p6 = pnand %p5018_p7, %p10158_p10 }
 0x6b7   : > { %p5024_p3 = por %p5023_p13, %p5022_p12 }
 0x6b8   : > { %p5020_p11 = pneg %p5019_p6 }
 0x6ba   : > { %p5025_p9 = pnand %p5024_p3, %p5020_p11 }
 0x6bc   : > { %5028 = shalt.err (!%p5025_p9)
}
 0x6bd   : > { %s5089_s27 = smov 128   ;;  %s5090_s29 = smov 8  }
 0x6be   : > { %4858 = dma.vmem_to_hbm [thread:$0]  (%p10158_p10), %s9156_s1, 256, %s9154_s21, %s4412_s8, %s5089_s27, %s5089_s27, %s5090_s29  }
 0x6bf PF: > { %s10159_s26 = sld [smem:[#allocation17_spill]] }
 0x6c0   : > { %s10160_s4 = sld [smem:[#allocation25_spill]] }
 0x6c1   : > { %s10161_s22 = sld [smem:[#allocation20_spill]] }
 0x6c5   : > { %s4440_s18 = sand.u32 1, %s10159_s26  }
 0x6c6   : > { %p10162_p2 = scmp.ne.s32.totalorder %s10160_s4, 0  ;;  %s4441_s17 = scalar_lea.sflag [#allocation7], %s4440_s18 }
 0x6c7   : > { %p10163_p0 = scmp.ge.s32.totalorder %s10161_s22, 2 }
 0x6c9   : > { %p4872_p4 = pnand %p10163_p0, %p10162_p2 }
 0x6cb   : > { %p4873_p5 = pneg %p4872_p4 }
 0x6cd   : > { %5058 = dma.done.wait (%p4873_p5), %s4441_s17, 256  }
 0x6ce   : > { %5060 = vsyncadd (%p4873_p5), %s4441_s17, 4294967040  ;;  %s10164_s15 = sld [smem:[#allocation22_spill]] }
 0x6cf   : > { %s10165_s12 = sld [smem:[#allocation18_spill]] }
 0x6d0   : > { %s10166_s13 = sld [smem:[#allocation19_spill]] }
 0x6d1   : > { %s10167_s14 = sld [smem:[#allocation23_spill]] }
 0x6d4   : > { %p18_p1 = scmp.ge.s32.totalorder %s10164_s15, 4  }
 0x6d6   :  { %20 = sbr.rel (!%p18_p1) target bundleno = 12 (0xc), region = 101 }
 0x6db   :  { %4446 = vsyncpa [#allocation6], 1 }
 0x6dc   :  { %4448 = vsyncpa [#allocation6 + $0x1], 1 }
 0x6dd   :  { %4449 = vsyncpa [#allocation7], 1 }
 0x6de   :  { %4451 = vsyncpa [#allocation7 + $0x1], 1 }
 0x6df   :  { %4452 = vsyncpa [#allocation8], 1 }
 0x6e0   :  { %4454 = vsyncpa [#allocation8 + $0x1], 1 }
 0x6e1   :  { %4455 = vsyncpa [#allocation9], 1 }
 0x6e2   :  { %4457 = vsyncpa [#allocation9 + $0x1], 1 }

</bundles_post_ra>
